<compile_context>
chip_gen: v6e
topology: v6e:2x2x1
jax: 0.10.0
libtpu: 0.0.40
codegen_flags: <defaults>
</compile_context>

<pallas_src>
import math
from functools import partial

import jax
import jax.numpy as jnp
from jax.experimental import pallas as pl
from jax.experimental.pallas import tpu as pltpu


# ----------------------------------------------------------------------------
# Config
# ----------------------------------------------------------------------------
HIDDEN = 128
NUM_HEADS = 4
HEAD_DIM = HIDDEN // NUM_HEADS          # 32 (even -> RoPE ok)
HALF_DIM = HEAD_DIM // 2                # 16
HALF_HEADS = NUM_HEADS // 2             # 2
HALF_WIDTH = HALF_HEADS * HEAD_DIM      # 64
INTERMEDIATE = 256
DECODER_LAYERS = 2
RMS_EPS = 1e-6
HN_EPS = 1e-5
ROPE_THETA = 500000.0
VOCAB = 256

BATCH = 2
SEQ = 16        # byte sequence length
CTX = 8         # global/patch sequence length


# ----------------------------------------------------------------------------
# In-kernel helpers (pure functions traced inside the Pallas kernel body)
# ----------------------------------------------------------------------------
def _rmsnorm(x, g):
    # Matches the (quirky) PyTorch RMSNorm: x <- x + eps; norm over (x + eps);
    # norm <- norm + eps; out = x / norm * g.
    xp = x + RMS_EPS
    nrm = (jnp.sqrt(jnp.sum((xp + RMS_EPS) ** 2, axis=-1, keepdims=True))
           * (float(x.shape[-1]) ** 0.5) + RMS_EPS)
    return xp * pl.reciprocal(nrm, approx=True) * g


def _softmax_rows(s):
    m = jnp.max(s, axis=-1, keepdims=True)
    p = jnp.exp(s - m)
    return p * pl.reciprocal(jnp.sum(p, axis=-1, keepdims=True), approx=True)


def _attend(q, k, v, scale, mask=None):
    # q: (Sq, Dh), k/v: (Sk, Dh) -> (Sq, Dh); f32 throughout (tiny matmuls).
    s = jax.lax.dot_general(q, k, (((1,), (1,)), ((), ())),
                            preferred_element_type=jnp.float32) * scale
    if mask is not None:
        s = jnp.where(mask, s, -1e30)
    p = _softmax_rows(s)
    return jnp.dot(p, v, preferred_element_type=jnp.float32)


# ----------------------------------------------------------------------------
# Single fused kernel: L decoder layers + byte predictor, NB batch elems/step
# ----------------------------------------------------------------------------
def _make_decoder_kernel(nb, seq, ctx_len, n_layers):
    D, Dh, H, Hh = HIDDEN, HEAD_DIM, NUM_HEADS, HALF_HEADS
    F = INTERMEDIATE
    NB, S, C, L = nb, seq, ctx_len, n_layers
    scale = 1.0 / math.sqrt(Dh)
    BF = jnp.bfloat16

    def kernel(x_ref, ctx_ref, cos_ref, sin_ref,
               cg_ref, cqkvw_ref, cqkvb_ref, cow_ref, cob_ref,
               sg_ref, sqkvw_ref, sqkvb_ref, sweff_ref, sbeff_ref, lam_ref,
               fg_ref, w13w_ref, w13b_ref, w2w_ref, w2b_ref,
               bpw_ref, bpb_ref,
               o_ref):
        h = x_ref[...].astype(jnp.float32)          # (NB*S, D)
        ctx = ctx_ref[...].astype(jnp.float32)      # (NB*C, D)
        cos = cos_ref[...]                          # (NB*S, D) full-width cos
        sin_s = sin_ref[...]                        # (NB*S, D) sign-folded sin

        # Masks / iotas computed once and reused across layers + heads.
        lane = jax.lax.broadcasted_iota(jnp.int32, (NB * S, D), 1)
        first_half = (lane % Dh) < HALF_DIM
        row = jax.lax.broadcasted_iota(jnp.int32, (S, S), 0)
        col = jax.lax.broadcasted_iota(jnp.int32, (S, S), 1)
        causal = col <= row

        def rope(x):
            # Full-width RoPE: partner lane = other half of the same head,
            # fetched with two lane rolls + a select; sign folded into sin_s.
            partner = jnp.where(first_half,
                                pltpu.roll(x, D - HALF_DIM, 1),   # x[l + 16]
                                pltpu.roll(x, HALF_DIM, 1))       # x[l - 16]
            return x * cos + partner * sin_s

        for l in range(L):
            # ---------------- cross attention (non-causal) ------------------
            xn = _rmsnorm(h, cg_ref[l])
            # merged q / kv projection: one MXU dispatch over (NB*(S+C)) rows
            lhs = jnp.concatenate([xn, ctx], axis=0).astype(BF)
            qkv = (jnp.dot(lhs, cqkvw_ref[l], preferred_element_type=jnp.float32)
                   + cqkvb_ref[l])
            q = qkv[:NB * S, :D]            # q from norm(x) rows
            k = qkv[NB * S:, D:2 * D]       # k,v from raw context rows
            v = qkv[NB * S:, 2 * D:]
            c_o_w = cow_ref[l]              # (D, D) bf16
            outs = []
            for b in range(NB):
                qb = q[b * S:(b + 1) * S]
                kb = k[b * C:(b + 1) * C]
                vb = v[b * C:(b + 1) * C]
                acc = None
                for hd in range(H):
                    sl = slice(hd * Dh, (hd + 1) * Dh)
                    a = _attend(qb[:, sl], kb[:, sl], vb[:, sl], scale)
                    # fold head directly into the O-projection (lane-dense acc)
                    t = jnp.dot(a.astype(BF), c_o_w[sl, :],
                                preferred_element_type=jnp.float32)
                    acc = t if acc is None else acc + t
                outs.append(acc)
            cross = (jnp.concatenate(outs, axis=0) if NB > 1 else outs[0]) + cob_ref[l]
            h = h + cross

            # ---------- differential self attention (causal + RoPE) ---------
            xn = _rmsnorm(h, sg_ref[l])
            qkv = (jnp.dot(xn.astype(BF), sqkvw_ref[l],
                           preferred_element_type=jnp.float32) + sqkvb_ref[l])
            q = rope(qkv[:, :D])
            k = rope(qkv[:, D:2 * D])
            v = qkv[:, 2 * D:]
            lam = lam_ref[l]                 # (1, HALF_WIDTH) broadcast lambda
            w_eff = sweff_ref[l]             # (HALF_WIDTH, D) bf16 folded O-proj
            outs = []
            for b in range(NB):
                rows = slice(b * S, (b + 1) * S)
                qb, kb, vb = q[rows], k[rows], v[rows]
                acc = None
                for hh in range(Hh):
                    sl1 = slice(hh * Dh, (hh + 1) * Dh)              # chunk-1 head
                    sl2 = slice((hh + Hh) * Dh, (hh + Hh + 1) * Dh)  # chunk-2 head
                    a1 = _attend(qb[:, sl1], kb[:, sl1], vb[:, sl1], scale, causal)
                    a2 = _attend(qb[:, sl2], kb[:, sl2], vb[:, sl2], scale, causal)
                    d = a1 - lam[:, sl1] * a2
                    # HeadwiseNorm (unbiased=False); gamma/beta of duplicated
                    # heads already folded into w_eff / b_eff.
                    mean = jnp.mean(d, axis=-1, keepdims=True)
                    var = jnp.mean((d - mean) ** 2, axis=-1, keepdims=True)
                    z = (d - mean) * jax.lax.rsqrt(var + HN_EPS)
                    t = jnp.dot(z.astype(BF), w_eff[sl1, :],
                                preferred_element_type=jnp.float32)
                    acc = t if acc is None else acc + t
                outs.append(acc)
            self_out = (jnp.concatenate(outs, axis=0) if NB > 1 else outs[0]) + sbeff_ref[l]
            h = h + self_out

            # ------------------------- SwiGLU FFN ---------------------------
            xn = _rmsnorm(h, fg_ref[l])
            h13 = (jnp.dot(xn.astype(BF), w13w_ref[l],
                           preferred_element_type=jnp.float32) + w13b_ref[l])
            h1v = h13[:, :F]
            h3v = h13[:, F:]
            act = h1v * jax.nn.sigmoid(h1v) * h3v
            y = (jnp.dot(act.astype(BF), w2w_ref[l],
                         preferred_element_type=jnp.float32) + w2b_ref[l])
            h = h + y

        # --------------------------- byte predictor -------------------------
        logits = (jnp.dot(h.astype(BF), bpw_ref[...],
                          preferred_element_type=jnp.float32) + bpb_ref[...])
        o_ref[...] = logits.astype(o_ref.dtype)

    return kernel


def _const_spec(shape):
    nd = len(shape)
    return pl.BlockSpec(shape, lambda b, _nd=nd: (0,) * _nd)


def _num_grid_steps(batch):
    """Split the batch over the grid only on chips that expose >1 TensorCore
    behind one device (v4 megacore, v7x); v5e/v6e collapse to a single step."""
    try:
        kind = jax.devices()[0].device_kind.lower()
    except Exception:
        kind = ""
    multi_tc = ("v7" in kind) or ("v4" in kind)
    return 2 if (multi_tc and batch % 2 == 0) else 1


def local_decoder_forward(kp, encoded_bytes, global_output, grid_steps=1):
    # byte_mask is never applied in the reference MultiHeadAttention (only fed
    # through dropout), so it is omitted here.
    # TODO(synk): boolean cross-attention mask (patch_mask==0) not implemented;
    #             the module is driven with cross_mask=None as the reference allows.
    B, S, D = encoded_bytes.shape
    C = global_output.shape[1]
    G = grid_steps
    NB = B // G
    L, F, HW = DECODER_LAYERS, INTERMEDIATE, HALF_WIDTH

    x2 = encoded_bytes.reshape(B * S, D)
    ctx2 = global_output.reshape(B * C, D)

    kernel = _make_decoder_kernel(NB, S, C, L)

    in_specs = [
        pl.BlockSpec((NB * S, D), lambda b: (b, 0)),      # x rows
        pl.BlockSpec((NB * C, D), lambda b: (b, 0)),      # context rows
        pl.BlockSpec((NB * S, D), lambda b: (b, 0)),      # cos (full width)
        pl.BlockSpec((NB * S, D), lambda b: (b, 0)),      # sin (sign folded)
        _const_spec((L, 1, D)),            # cross rmsnorm g
        _const_spec((L, D, 3 * D)),        # cross fused qkv (bf16)
        _const_spec((L, 1, 3 * D)),        # cross qkv bias
        _const_spec((L, D, D)),            # cross o_proj (bf16)
        _const_spec((L, 1, D)),            # cross o bias
        _const_spec((L, 1, D)),            # self rmsnorm g
        _const_spec((L, D, 3 * D)),        # self fused qkv (bf16)
        _const_spec((L, 1, 3 * D)),        # self qkv bias
        _const_spec((L, HW, D)),           # folded headnorm*o_proj (bf16)
        _const_spec((L, 1, D)),            # folded headnorm beta @ o_proj + o_b
        _const_spec((L, 1, HW)),           # lambda (broadcast per half-head)
        _const_spec((L, 1, D)),            # ffn rmsnorm g
        _const_spec((L, D, 2 * F)),        # fused w1/w3 (bf16)
        _const_spec((L, 1, 2 * F)),        # w1/w3 bias
        _const_spec((L, F, D)),            # w2 (bf16)
        _const_spec((L, 1, D)),            # w2 bias
        _const_spec((D, VOCAB)),           # byte predictor w (bf16)
        _const_spec((1, VOCAB)),           # byte predictor b
    ]
    logits = pl.pallas_call(
        kernel,
        out_shape=jax.ShapeDtypeStruct((B * S, VOCAB), jnp.float32),
        grid=(G,),
        in_specs=in_specs,
        out_specs=pl.BlockSpec((NB * S, VOCAB), lambda b: (b, 0)),
        compiler_params=pltpu.CompilerParams(
            dimension_semantics=("parallel",)),
    )(x2, ctx2, kp['cos'], kp['sin'],
      kp['c_g'], kp['c_qkv_w'], kp['c_qkv_b'], kp['c_o_w'], kp['c_o_b'],
      kp['s_g'], kp['s_qkv_w'], kp['s_qkv_b'], kp['s_weff'], kp['s_beff'], kp['lam'],
      kp['f_g'], kp['w13_w'], kp['w13_b'], kp['w2_w'], kp['w2_b'],
      kp['bp_w'], kp['bp_b'])
    return logits.reshape(B, S, VOCAB)


# ----------------------------------------------------------------------------
# One-time parameter preparation (hoisted out of the forward path)
# ----------------------------------------------------------------------------
def compute_lambda(sp):
    qk1 = jnp.sum(sp['lambda_q1'] * sp['lambda_k1'], axis=-1)   # (1, H)
    qk2 = jnp.sum(sp['lambda_q2'] * sp['lambda_k2'], axis=-1)
    lam = jnp.exp(qk1) - jnp.exp(qk2) + sp['lambda_init']
    return jnp.clip(lam, 0.0, 1.0)


def rope_tables(batch, seq_len):
    inv_freq = 1.0 / (ROPE_THETA ** (jnp.arange(0, HEAD_DIM, 2, dtype=jnp.float32)
                                     / HEAD_DIM))
    pos = jnp.arange(seq_len, dtype=jnp.float32)
    freqs = pos[:, None] * inv_freq[None, :]                     # (S, HALF_DIM)
    cos = jnp.cos(freqs)
    sin = jnp.sin(freqs)
    cos_head = jnp.concatenate([cos, cos], axis=-1)              # (S, HEAD_DIM)
    sin_head = jnp.concatenate([-sin, sin], axis=-1)             # sign folded
    cos_full = jnp.tile(cos_head, (batch, NUM_HEADS))            # (B*S, D)
    sin_full = jnp.tile(sin_head, (batch, NUM_HEADS))
    return cos_full, sin_full


def prepare_params(params, batch, seq):
    """Stacks per-layer weights along L, casts MXU operands to bf16, folds the
    duplicated-head HeadwiseNorm into the self-attn O-projection, broadcasts
    lambda, and precomputes full-width RoPE tables.  Run once per param set."""
    Dh, Hh, HW = HEAD_DIM, HALF_HEADS, HALF_WIDTH
    BF = jnp.bfloat16
    layers = params['layers']

    def stack(fn, dtype=None):
        arr = jnp.stack([fn(lp) for lp in layers], axis=0)
        return arr.astype(dtype) if dtype is not None else arr

    def weff(lp):
        sp = lp['self']
        g_full = jnp.repeat(sp['hn_gamma'], Dh)                  # (D,)
        gw = sp['o_w'] * g_full[:, None]                         # (D, D)
        return gw[:HW] + gw[HW:]                                 # (HW, D)

    def beff(lp):
        sp = lp['self']
        b_full = jnp.repeat(sp['hn_beta'], Dh)[None, :]          # (1, D)
        return b_full @ sp['o_w'] + sp['o_b']                    # (1, D)

    def lam_fn(lp):
        lam = compute_lambda(lp['self'])[:, :Hh]                 # (1, Hh)
        return jnp.repeat(lam, Dh, axis=1)                       # (1, HW)

    kp = {
        'c_g': stack(lambda lp: lp['cross']['norm_g']),
        'c_qkv_w': stack(lambda lp: lp['cross']['qkv_w'], BF),
        'c_qkv_b': stack(lambda lp: lp['cross']['qkv_b']),
        'c_o_w': stack(lambda lp: lp['cross']['o_w'], BF),
        'c_o_b': stack(lambda lp: lp['cross']['o_b']),
        's_g': stack(lambda lp: lp['self']['norm_g']),
        's_qkv_w': stack(lambda lp: lp['self']['qkv_w'], BF),
        's_qkv_b': stack(lambda lp: lp['self']['qkv_b']),
        's_weff': stack(weff, BF),
        's_beff': stack(beff),
        'lam': stack(lam_fn),
        'f_g': stack(lambda lp: lp['ffn']['norm_g']),
        'w13_w': stack(lambda lp: lp['ffn']['w13_w'], BF),
        'w13_b': stack(lambda lp: lp['ffn']['w13_b']),
        'w2_w': stack(lambda lp: lp['ffn']['w2_w'], BF),
        'w2_b': stack(lambda lp: lp['ffn']['w2_b']),
        'bp_w': params['byte_predictor']['w'].astype(BF),
        'bp_b': params['byte_predictor']['b'].reshape(1, VOCAB),
    }
    cos_full, sin_full = rope_tables(batch, seq)
    kp['cos'] = cos_full
    kp['sin'] = sin_full
    return kp


# ----------------------------------------------------------------------------
# Deterministic parameter init (shapes follow the PyTorch __init__; q/k/v and
# w1/w3 weights are stored pre-concatenated for the fused matmuls)
# ----------------------------------------------------------------------------
def init_linear(key, d_in, d_out):
    kw, kb = jax.random.split(key)
    bound = 1.0 / math.sqrt(d_in)
    w = jax.random.uniform(kw, (d_in, d_out), jnp.float32, -bound, bound)
    b = jax.random.uniform(kb, (d_out,), jnp.float32, -bound, bound)
    return w, b


def fused_linear(keys, d_in, d_outs):
    ws, bs = [], []
    for k, d_out in zip(keys, d_outs):
        w, b = init_linear(k, d_in, d_out)
        ws.append(w)
        bs.append(b)
    return jnp.concatenate(ws, axis=1), jnp.concatenate(bs).reshape(1, -1)


def init_layer_params(key):
    ks = jax.random.split(key, 16)
    D, H, Dh, F = HIDDEN, NUM_HEADS, HEAD_DIM, INTERMEDIATE
    g_init = (jnp.ones((D,), jnp.float32) + RMS_EPS).reshape(1, D)  # RMSNorm g=1+eps

    # cross attention
    c_qkv_w, c_qkv_b = fused_linear(ks[0:3], D, [D, D, D])
    c_o_w, c_o_b = init_linear(ks[3], D, D)
    cross = {'norm_g': g_init, 'qkv_w': c_qkv_w, 'qkv_b': c_qkv_b,
             'o_w': c_o_w, 'o_b': c_o_b.reshape(1, D)}

    # differential self attention
    s_qkv_w, s_qkv_b = fused_linear(ks[4:7], D, [D, D, D])
    s_o_w, s_o_b = init_linear(ks[7], D, D)
    dim_scale = 0.01 / math.sqrt(D)
    self_p = {'norm_g': g_init, 'qkv_w': s_qkv_w, 'qkv_b': s_qkv_b,
              'o_w': s_o_w, 'o_b': s_o_b.reshape(1, D),
              'hn_gamma': jnp.ones((H,), jnp.float32),
              'hn_beta': jnp.zeros((H,), jnp.float32),
              # layer_idx defaults to 1 -> base_lambda = 0.8 - 0.6*exp(0) = 0.2
              'lambda_init': jnp.full((1, H), 0.2, jnp.float32),
              'lambda_q1': jax.random.normal(ks[8], (1, H, Dh)) * dim_scale,
              'lambda_k1': jax.random.normal(ks[9], (1, H, Dh)) * dim_scale,
              'lambda_q2': jax.random.normal(ks[10], (1, H, Dh)) * dim_scale,
              'lambda_k2': jax.random.normal(ks[11], (1, H, Dh)) * dim_scale}

    # feed-forward (w1 and w3 fused)
    w13_w, w13_b = fused_linear([ks[12], ks[14]], D, [F, F])
    w2_w, w2_b = init_linear(ks[13], F, D)
    ffn = {'norm_g': g_init, 'w13_w': w13_w, 'w13_b': w13_b,
           'w2_w': w2_w, 'w2_b': w2_b.reshape(1, D)}

    return {'cross': cross, 'self': self_p, 'ffn': ffn}


def init_params(key):
    keys = jax.random.split(key, DECODER_LAYERS + 1)
    layers = [init_layer_params(keys[i]) for i in range(DECODER_LAYERS)]
    bp_w, bp_b = init_linear(keys[-1], HIDDEN, VOCAB)
    return {'layers': layers, 'byte_predictor': {'w': bp_w, 'b': bp_b}}


# ----------------------------------------------------------------------------
# Main
# ----------------------------------------------------------------------------
if __name__ == "__main__":
    root = jax.random.PRNGKey(0)
    k_params, k_x, k_ctx = jax.random.split(root, 3)

    params = init_params(k_params)
    encoded_bytes = jax.random.normal(k_x, (BATCH, SEQ, HIDDEN), jnp.float32)
    global_output = jax.random.normal(k_ctx, (BATCH, CTX, HIDDEN), jnp.float32)

    # Parameter prep happens once per parameter set (not in the forward path).
    kp = prepare_params(params, BATCH, SEQ)
    kp = jax.tree_util.tree_map(jnp.asarray, kp)

    G = _num_grid_steps(BATCH)          # 2 on v4/v7x (2 TCs), 1 on v5e/v6e
    fwd = jax.jit(partial(local_decoder_forward, grid_steps=G))
    logits = jax.block_until_ready(fwd(kp, encoded_bytes, global_output))

    assert logits.shape == (BATCH, SEQ, VOCAB), logits.shape
    assert bool(jnp.all(jnp.isfinite(logits)))
    print("KERNEL_OK")
</pallas_src>

<mosaic_0001>
module attributes {stable_mosaic.version = 11 : i64} {
  func.func @kernel(%arg0: i32, %arg1: memref<32x128xf32, #tpu.memory_space<vmem>>, %arg2: memref<16x128xf32, #tpu.memory_space<vmem>>, %arg3: memref<32x128xf32, #tpu.memory_space<vmem>>, %arg4: memref<32x128xf32, #tpu.memory_space<vmem>>, %arg5: memref<2x1x128xf32, #tpu.memory_space<vmem>>, %arg6: memref<2x128x384xbf16, #tpu.memory_space<vmem>>, %arg7: memref<2x1x384xf32, #tpu.memory_space<vmem>>, %arg8: memref<2x128x128xbf16, #tpu.memory_space<vmem>>, %arg9: memref<2x1x128xf32, #tpu.memory_space<vmem>>, %arg10: memref<2x1x128xf32, #tpu.memory_space<vmem>>, %arg11: memref<2x128x384xbf16, #tpu.memory_space<vmem>>, %arg12: memref<2x1x384xf32, #tpu.memory_space<vmem>>, %arg13: memref<2x64x128xbf16, #tpu.memory_space<vmem>>, %arg14: memref<2x1x128xf32, #tpu.memory_space<vmem>>, %arg15: memref<2x1x64xf32, #tpu.memory_space<vmem>>, %arg16: memref<2x1x128xf32, #tpu.memory_space<vmem>>, %arg17: memref<2x128x512xbf16, #tpu.memory_space<vmem>>, %arg18: memref<2x1x512xf32, #tpu.memory_space<vmem>>, %arg19: memref<2x256x128xbf16, #tpu.memory_space<vmem>>, %arg20: memref<2x1x128xf32, #tpu.memory_space<vmem>>, %arg21: memref<128x256xbf16, #tpu.memory_space<vmem>>, %arg22: memref<1x256xf32, #tpu.memory_space<vmem>>, %arg23: memref<32x256xf32, #tpu.memory_space<vmem>>) attributes {dimension_semantics = [#tpu.dimension_semantics<parallel>], iteration_bounds = array<i64: 1>, scalar_prefetch = 0 : i64, scratch_operands = 0 : i64, tpu.core_type = #tpu.core_type<tc>, window_params = [{transform_indices = @transform_0, window_bounds = array<i64: 32, 128>}, {transform_indices = @transform_1, window_bounds = array<i64: 16, 128>}, {transform_indices = @transform_2, window_bounds = array<i64: 32, 128>}, {transform_indices = @transform_3, window_bounds = array<i64: 32, 128>}, {pipeline_mode = #tpu.pipeline_mode<synchronous>, transform_indices = @transform_4, window_bounds = array<i64: 2, 1, 128>}, {pipeline_mode = #tpu.pipeline_mode<synchronous>, transform_indices = @transform_5, window_bounds = array<i64: 2, 128, 384>}, {pipeline_mode = #tpu.pipeline_mode<synchronous>, transform_indices = @transform_6, window_bounds = array<i64: 2, 1, 384>}, {pipeline_mode = #tpu.pipeline_mode<synchronous>, transform_indices = @transform_7, window_bounds = array<i64: 2, 128, 128>}, {pipeline_mode = #tpu.pipeline_mode<synchronous>, transform_indices = @transform_8, window_bounds = array<i64: 2, 1, 128>}, {pipeline_mode = #tpu.pipeline_mode<synchronous>, transform_indices = @transform_9, window_bounds = array<i64: 2, 1, 128>}, {pipeline_mode = #tpu.pipeline_mode<synchronous>, transform_indices = @transform_10, window_bounds = array<i64: 2, 128, 384>}, {pipeline_mode = #tpu.pipeline_mode<synchronous>, transform_indices = @transform_11, window_bounds = array<i64: 2, 1, 384>}, {pipeline_mode = #tpu.pipeline_mode<synchronous>, transform_indices = @transform_12, window_bounds = array<i64: 2, 64, 128>}, {pipeline_mode = #tpu.pipeline_mode<synchronous>, transform_indices = @transform_13, window_bounds = array<i64: 2, 1, 128>}, {pipeline_mode = #tpu.pipeline_mode<synchronous>, transform_indices = @transform_14, window_bounds = array<i64: 2, 1, 64>}, {pipeline_mode = #tpu.pipeline_mode<synchronous>, transform_indices = @transform_15, window_bounds = array<i64: 2, 1, 128>}, {pipeline_mode = #tpu.pipeline_mode<synchronous>, transform_indices = @transform_16, window_bounds = array<i64: 2, 128, 512>}, {pipeline_mode = #tpu.pipeline_mode<synchronous>, transform_indices = @transform_17, window_bounds = array<i64: 2, 1, 512>}, {pipeline_mode = #tpu.pipeline_mode<synchronous>, transform_indices = @transform_18, window_bounds = array<i64: 2, 256, 128>}, {pipeline_mode = #tpu.pipeline_mode<synchronous>, transform_indices = @transform_19, window_bounds = array<i64: 2, 1, 128>}, {pipeline_mode = #tpu.pipeline_mode<synchronous>, transform_indices = @transform_20, window_bounds = array<i64: 128, 256>}, {pipeline_mode = #tpu.pipeline_mode<synchronous>, transform_indices = @transform_21, window_bounds = array<i64: 1, 256>}, {transform_indices = @transform_22, window_bounds = array<i64: 32, 256>}]} {
    %c0 = arith.constant 0 : index
    %c0_0 = arith.constant 0 : index
    %0 = vector.load %arg1[%c0, %c0_0] : memref<32x128xf32, #tpu.memory_space<vmem>>, vector<32x128xf32>
    %c0_1 = arith.constant 0 : index
    %c0_2 = arith.constant 0 : index
    %1 = vector.load %arg2[%c0_1, %c0_2] : memref<16x128xf32, #tpu.memory_space<vmem>>, vector<16x128xf32>
    %c0_3 = arith.constant 0 : index
    %c0_4 = arith.constant 0 : index
    %2 = vector.load %arg3[%c0_3, %c0_4] : memref<32x128xf32, #tpu.memory_space<vmem>>, vector<32x128xf32>
    %c0_5 = arith.constant 0 : index
    %c0_6 = arith.constant 0 : index
    %3 = vector.load %arg4[%c0_5, %c0_6] : memref<32x128xf32, #tpu.memory_space<vmem>>, vector<32x128xf32>
    %4 = tpu.iota {dimensions = array<i32: 1>} : vector<32x128xi32>
    %c32_i32 = arith.constant 32 : i32
    %c0_i32 = arith.constant 0 : i32
    %5 = arith.cmpi eq, %c32_i32, %c0_i32 : i32
    %c1_i32 = arith.constant 1 : i32
    %6 = arith.select %5, %c1_i32, %c32_i32 : i32
    %7 = vector.broadcast %6 : i32 to vector<32x128xi32>
    %8 = arith.remsi %4, %7 : vector<32x128xi32>
    %c0_i32_7 = arith.constant 0 : i32
    %9 = vector.broadcast %c0_i32_7 : i32 to vector<32x128xi32>
    %10 = arith.cmpi ne, %8, %9 : vector<32x128xi32>
    %c0_i32_8 = arith.constant 0 : i32
    %11 = vector.broadcast %c0_i32_8 : i32 to vector<32x128xi32>
    %12 = arith.cmpi slt, %8, %11 : vector<32x128xi32>
    %c0_i32_9 = arith.constant 0 : i32
    %13 = arith.cmpi slt, %6, %c0_i32_9 : i32
    %14 = vector.broadcast %13 : i1 to vector<32x128xi1>
    %15 = vector.broadcast %14 : vector<32x128xi1> to vector<32x128xi1>
    %16 = arith.xori %12, %15 : vector<32x128xi1>
    %17 = arith.andi %16, %10 : vector<32x128xi1>
    %18 = vector.broadcast %6 : i32 to vector<32x128xi32>
    %19 = arith.addi %8, %18 : vector<32x128xi32>
    %20 = arith.select %17, %19, %8 : vector<32x128xi1>, vector<32x128xi32>
    %c16_i32 = arith.constant 16 : i32
    %21 = vector.broadcast %c16_i32 : i32 to vector<32x128xi32>
    %22 = arith.cmpi slt, %20, %21 : vector<32x128xi32>
    %23 = tpu.iota {dimensions = array<i32: 0>} : vector<16x16xi32>
    %24 = tpu.iota {dimensions = array<i32: 1>} : vector<16x16xi32>
    %25 = arith.cmpi sle, %24, %23 : vector<16x16xi32>
    %c0_10 = arith.constant 0 : index
    %c0_11 = arith.constant 0 : index
    %c0_12 = arith.constant 0 : index
    %26 = vector.load %arg5[%c0_10, %c0_11, %c0_12] : memref<2x1x128xf32, #tpu.memory_space<vmem>>, vector<1x1x128xf32>
    %27 = vector.shape_cast %26 : vector<1x1x128xf32> to vector<1x128xf32>
    %cst = arith.constant 9.99999997E-7 : f32
    %28 = vector.broadcast %cst : f32 to vector<32x128xf32>
    %29 = arith.addf %0, %28 : vector<32x128xf32>
    %cst_13 = arith.constant 9.99999997E-7 : f32
    %30 = vector.broadcast %cst_13 : f32 to vector<32x128xf32>
    %31 = arith.addf %29, %30 : vector<32x128xf32>
    %32 = arith.mulf %31, %31 : vector<32x128xf32>
    %cst_14 = arith.constant dense<0.000000e+00> : vector<32xf32>
    %33 = vector.multi_reduction <add>, %32, %cst_14 [1] : vector<32x128xf32> to vector<32xf32>
    %34 = vector.shape_cast %33 : vector<32xf32> to vector<32x1xf32>
    %35 = math.sqrt %34 : vector<32x1xf32>
    %cst_15 = arith.constant 11.3137083 : f32
    %36 = vector.broadcast %cst_15 : f32 to vector<32x1xf32>
    %37 = arith.mulf %35, %36 : vector<32x1xf32>
    %cst_16 = arith.constant 9.99999997E-7 : f32
    %38 = vector.broadcast %cst_16 : f32 to vector<32x1xf32>
    %39 = arith.addf %37, %38 : vector<32x1xf32>
    %40 = tpu.reciprocal %39 {approx = true} : vector<32x1xf32> -> vector<32x1xf32>
    %41 = vector.broadcast %40 : vector<32x1xf32> to vector<32x128xf32>
    %42 = arith.mulf %29, %41 : vector<32x128xf32>
    %43 = vector.broadcast %27 : vector<1x128xf32> to vector<32x128xf32>
    %44 = arith.mulf %42, %43 : vector<32x128xf32>
    %45 = tpu.concatenate %44, %1 in 0 : vector<32x128xf32>, vector<16x128xf32> -> vector<48x128xf32>
    %46 = arith.truncf %45 : vector<48x128xf32> to vector<48x128xbf16>
    %c0_17 = arith.constant 0 : index
    %c0_18 = arith.constant 0 : index
    %c0_19 = arith.constant 0 : index
    %47 = vector.load %arg6[%c0_17, %c0_18, %c0_19] : memref<2x128x384xbf16, #tpu.memory_space<vmem>>, vector<1x128x384xbf16>
    %48 = vector.shape_cast %47 : vector<1x128x384xbf16> to vector<128x384xbf16>
    %cst_20 = arith.constant dense<0.000000e+00> : vector<48x384xf32>
    %49 = tpu.matmul %46, %48, %cst_20 {dimension_numbers = #tpu.dot_dimension_numbers<[1], [0], [0], [1], [0, 0, 1, 1], [], []>} : vector<48x128xbf16>, vector<128x384xbf16>, vector<48x384xf32> -> vector<48x384xf32>
    %c0_21 = arith.constant 0 : index
    %c0_22 = arith.constant 0 : index
    %c0_23 = arith.constant 0 : index
    %50 = vector.load %arg7[%c0_21, %c0_22, %c0_23] : memref<2x1x384xf32, #tpu.memory_space<vmem>>, vector<1x1x384xf32>
    %51 = vector.shape_cast %50 : vector<1x1x384xf32> to vector<1x384xf32>
    %52 = vector.broadcast %51 : vector<1x384xf32> to vector<48x384xf32>
    %53 = arith.addf %49, %52 : vector<48x384xf32>
    %54 = vector.extract_strided_slice %53 {offsets = [0, 0], sizes = [32, 128], strides = [1, 1]} : vector<48x384xf32> to vector<32x128xf32>
    %55 = vector.extract_strided_slice %53 {offsets = [32, 128], sizes = [16, 128], strides = [1, 1]} : vector<48x384xf32> to vector<16x128xf32>
    %56 = vector.extract_strided_slice %53 {offsets = [32, 256], sizes = [16, 128], strides = [1, 1]} : vector<48x384xf32> to vector<16x128xf32>
    %c0_24 = arith.constant 0 : index
    %c0_25 = arith.constant 0 : index
    %c0_26 = arith.constant 0 : index
    %57 = vector.load %arg8[%c0_24, %c0_25, %c0_26] : memref<2x128x128xbf16, #tpu.memory_space<vmem>>, vector<1x128x128xbf16>
    %58 = vector.shape_cast %57 : vector<1x128x128xbf16> to vector<128x128xbf16>
    %59 = vector.extract_strided_slice %54 {offsets = [0, 0], sizes = [16, 128], strides = [1, 1]} : vector<32x128xf32> to vector<16x128xf32>
    %60 = vector.extract_strided_slice %55 {offsets = [0, 0], sizes = [8, 128], strides = [1, 1]} : vector<16x128xf32> to vector<8x128xf32>
    %61 = vector.extract_strided_slice %56 {offsets = [0, 0], sizes = [8, 128], strides = [1, 1]} : vector<16x128xf32> to vector<8x128xf32>
    %62 = vector.extract_strided_slice %59 {offsets = [0, 0], sizes = [16, 32], strides = [1, 1]} : vector<16x128xf32> to vector<16x32xf32>
    %63 = vector.extract_strided_slice %60 {offsets = [0, 0], sizes = [8, 32], strides = [1, 1]} : vector<8x128xf32> to vector<8x32xf32>
    %64 = vector.extract_strided_slice %61 {offsets = [0, 0], sizes = [8, 32], strides = [1, 1]} : vector<8x128xf32> to vector<8x32xf32>
    %cst_27 = arith.constant dense<0.000000e+00> : vector<16x8xf32>
    %65 = tpu.matmul %62, %63, %cst_27 {dimension_numbers = #tpu.dot_dimension_numbers<[1], [1], [0], [0], [0, 0, 1, 0], [], []>} : vector<16x32xf32>, vector<8x32xf32>, vector<16x8xf32> -> vector<16x8xf32>
    %cst_28 = arith.constant 0.176776692 : f32
    %66 = vector.broadcast %cst_28 : f32 to vector<16x8xf32>
    %67 = arith.mulf %65, %66 : vector<16x8xf32>
    %cst_29 = arith.constant dense<0xFF800000> : vector<16xf32>
    %68 = vector.multi_reduction <maximumf>, %67, %cst_29 [1] : vector<16x8xf32> to vector<16xf32>
    %69 = vector.shape_cast %68 : vector<16xf32> to vector<16x1xf32>
    %70 = vector.broadcast %69 : vector<16x1xf32> to vector<16x8xf32>
    %71 = arith.subf %67, %70 : vector<16x8xf32>
    %72 = math.exp %71 : vector<16x8xf32>
    %cst_30 = arith.constant dense<0.000000e+00> : vector<16xf32>
    %73 = vector.multi_reduction <add>, %72, %cst_30 [1] : vector<16x8xf32> to vector<16xf32>
    %74 = vector.shape_cast %73 : vector<16xf32> to vector<16x1xf32>
    %75 = tpu.reciprocal %74 {approx = true} : vector<16x1xf32> -> vector<16x1xf32>
    %76 = vector.broadcast %75 : vector<16x1xf32> to vector<16x8xf32>
    %77 = arith.mulf %72, %76 : vector<16x8xf32>
    %cst_31 = arith.constant dense<0.000000e+00> : vector<16x32xf32>
    %78 = tpu.matmul %77, %64, %cst_31 {dimension_numbers = #tpu.dot_dimension_numbers<[1], [0], [0], [1], [0, 0, 1, 1], [], []>} : vector<16x8xf32>, vector<8x32xf32>, vector<16x32xf32> -> vector<16x32xf32>
    %79 = arith.truncf %78 : vector<16x32xf32> to vector<16x32xbf16>
    %80 = vector.extract_strided_slice %58 {offsets = [0, 0], sizes = [32, 128], strides = [1, 1]} : vector<128x128xbf16> to vector<32x128xbf16>
    %cst_32 = arith.constant dense<0.000000e+00> : vector<16x128xf32>
    %81 = tpu.matmul %79, %80, %cst_32 {dimension_numbers = #tpu.dot_dimension_numbers<[1], [0], [0], [1], [0, 0, 1, 1], [], []>} : vector<16x32xbf16>, vector<32x128xbf16>, vector<16x128xf32> -> vector<16x128xf32>
    %82 = vector.extract_strided_slice %59 {offsets = [0, 32], sizes = [16, 32], strides = [1, 1]} : vector<16x128xf32> to vector<16x32xf32>
    %83 = vector.extract_strided_slice %60 {offsets = [0, 32], sizes = [8, 32], strides = [1, 1]} : vector<8x128xf32> to vector<8x32xf32>
    %84 = vector.extract_strided_slice %61 {offsets = [0, 32], sizes = [8, 32], strides = [1, 1]} : vector<8x128xf32> to vector<8x32xf32>
    %cst_33 = arith.constant dense<0.000000e+00> : vector<16x8xf32>
    %85 = tpu.matmul %82, %83, %cst_33 {dimension_numbers = #tpu.dot_dimension_numbers<[1], [1], [0], [0], [0, 0, 1, 0], [], []>} : vector<16x32xf32>, vector<8x32xf32>, vector<16x8xf32> -> vector<16x8xf32>
    %cst_34 = arith.constant 0.176776692 : f32
    %86 = vector.broadcast %cst_34 : f32 to vector<16x8xf32>
    %87 = arith.mulf %85, %86 : vector<16x8xf32>
    %cst_35 = arith.constant dense<0xFF800000> : vector<16xf32>
    %88 = vector.multi_reduction <maximumf>, %87, %cst_35 [1] : vector<16x8xf32> to vector<16xf32>
    %89 = vector.shape_cast %88 : vector<16xf32> to vector<16x1xf32>
    %90 = vector.broadcast %89 : vector<16x1xf32> to vector<16x8xf32>
    %91 = arith.subf %87, %90 : vector<16x8xf32>
    %92 = math.exp %91 : vector<16x8xf32>
    %cst_36 = arith.constant dense<0.000000e+00> : vector<16xf32>
    %93 = vector.multi_reduction <add>, %92, %cst_36 [1] : vector<16x8xf32> to vector<16xf32>
    %94 = vector.shape_cast %93 : vector<16xf32> to vector<16x1xf32>
    %95 = tpu.reciprocal %94 {approx = true} : vector<16x1xf32> -> vector<16x1xf32>
    %96 = vector.broadcast %95 : vector<16x1xf32> to vector<16x8xf32>
    %97 = arith.mulf %92, %96 : vector<16x8xf32>
    %cst_37 = arith.constant dense<0.000000e+00> : vector<16x32xf32>
    %98 = tpu.matmul %97, %84, %cst_37 {dimension_numbers = #tpu.dot_dimension_numbers<[1], [0], [0], [1], [0, 0, 1, 1], [], []>} : vector<16x8xf32>, vector<8x32xf32>, vector<16x32xf32> -> vector<16x32xf32>
    %99 = arith.truncf %98 : vector<16x32xf32> to vector<16x32xbf16>
    %100 = vector.extract_strided_slice %58 {offsets = [32, 0], sizes = [32, 128], strides = [1, 1]} : vector<128x128xbf16> to vector<32x128xbf16>
    %cst_38 = arith.constant dense<0.000000e+00> : vector<16x128xf32>
    %101 = tpu.matmul %99, %100, %cst_38 {dimension_numbers = #tpu.dot_dimension_numbers<[1], [0], [0], [1], [0, 0, 1, 1], [], []>} : vector<16x32xbf16>, vector<32x128xbf16>, vector<16x128xf32> -> vector<16x128xf32>
    %102 = arith.addf %81, %101 : vector<16x128xf32>
    %103 = vector.extract_strided_slice %59 {offsets = [0, 64], sizes = [16, 32], strides = [1, 1]} : vector<16x128xf32> to vector<16x32xf32>
    %104 = vector.extract_strided_slice %60 {offsets = [0, 64], sizes = [8, 32], strides = [1, 1]} : vector<8x128xf32> to vector<8x32xf32>
    %105 = vector.extract_strided_slice %61 {offsets = [0, 64], sizes = [8, 32], strides = [1, 1]} : vector<8x128xf32> to vector<8x32xf32>
    %cst_39 = arith.constant dense<0.000000e+00> : vector<16x8xf32>
    %106 = tpu.matmul %103, %104, %cst_39 {dimension_numbers = #tpu.dot_dimension_numbers<[1], [1], [0], [0], [0, 0, 1, 0], [], []>} : vector<16x32xf32>, vector<8x32xf32>, vector<16x8xf32> -> vector<16x8xf32>
    %cst_40 = arith.constant 0.176776692 : f32
    %107 = vector.broadcast %cst_40 : f32 to vector<16x8xf32>
    %108 = arith.mulf %106, %107 : vector<16x8xf32>
    %cst_41 = arith.constant dense<0xFF800000> : vector<16xf32>
    %109 = vector.multi_reduction <maximumf>, %108, %cst_41 [1] : vector<16x8xf32> to vector<16xf32>
    %110 = vector.shape_cast %109 : vector<16xf32> to vector<16x1xf32>
    %111 = vector.broadcast %110 : vector<16x1xf32> to vector<16x8xf32>
    %112 = arith.subf %108, %111 : vector<16x8xf32>
    %113 = math.exp %112 : vector<16x8xf32>
    %cst_42 = arith.constant dense<0.000000e+00> : vector<16xf32>
    %114 = vector.multi_reduction <add>, %113, %cst_42 [1] : vector<16x8xf32> to vector<16xf32>
    %115 = vector.shape_cast %114 : vector<16xf32> to vector<16x1xf32>
    %116 = tpu.reciprocal %115 {approx = true} : vector<16x1xf32> -> vector<16x1xf32>
    %117 = vector.broadcast %116 : vector<16x1xf32> to vector<16x8xf32>
    %118 = arith.mulf %113, %117 : vector<16x8xf32>
    %cst_43 = arith.constant dense<0.000000e+00> : vector<16x32xf32>
    %119 = tpu.matmul %118, %105, %cst_43 {dimension_numbers = #tpu.dot_dimension_numbers<[1], [0], [0], [1], [0, 0, 1, 1], [], []>} : vector<16x8xf32>, vector<8x32xf32>, vector<16x32xf32> -> vector<16x32xf32>
    %120 = arith.truncf %119 : vector<16x32xf32> to vector<16x32xbf16>
    %121 = vector.extract_strided_slice %58 {offsets = [64, 0], sizes = [32, 128], strides = [1, 1]} : vector<128x128xbf16> to vector<32x128xbf16>
    %cst_44 = arith.constant dense<0.000000e+00> : vector<16x128xf32>
    %122 = tpu.matmul %120, %121, %cst_44 {dimension_numbers = #tpu.dot_dimension_numbers<[1], [0], [0], [1], [0, 0, 1, 1], [], []>} : vector<16x32xbf16>, vector<32x128xbf16>, vector<16x128xf32> -> vector<16x128xf32>
    %123 = arith.addf %102, %122 : vector<16x128xf32>
    %124 = vector.extract_strided_slice %59 {offsets = [0, 96], sizes = [16, 32], strides = [1, 1]} : vector<16x128xf32> to vector<16x32xf32>
    %125 = vector.extract_strided_slice %60 {offsets = [0, 96], sizes = [8, 32], strides = [1, 1]} : vector<8x128xf32> to vector<8x32xf32>
    %126 = vector.extract_strided_slice %61 {offsets = [0, 96], sizes = [8, 32], strides = [1, 1]} : vector<8x128xf32> to vector<8x32xf32>
    %cst_45 = arith.constant dense<0.000000e+00> : vector<16x8xf32>
    %127 = tpu.matmul %124, %125, %cst_45 {dimension_numbers = #tpu.dot_dimension_numbers<[1], [1], [0], [0], [0, 0, 1, 0], [], []>} : vector<16x32xf32>, vector<8x32xf32>, vector<16x8xf32> -> vector<16x8xf32>
    %cst_46 = arith.constant 0.176776692 : f32
    %128 = vector.broadcast %cst_46 : f32 to vector<16x8xf32>
    %129 = arith.mulf %127, %128 : vector<16x8xf32>
    %cst_47 = arith.constant dense<0xFF800000> : vector<16xf32>
    %130 = vector.multi_reduction <maximumf>, %129, %cst_47 [1] : vector<16x8xf32> to vector<16xf32>
    %131 = vector.shape_cast %130 : vector<16xf32> to vector<16x1xf32>
    %132 = vector.broadcast %131 : vector<16x1xf32> to vector<16x8xf32>
    %133 = arith.subf %129, %132 : vector<16x8xf32>
    %134 = math.exp %133 : vector<16x8xf32>
    %cst_48 = arith.constant dense<0.000000e+00> : vector<16xf32>
    %135 = vector.multi_reduction <add>, %134, %cst_48 [1] : vector<16x8xf32> to vector<16xf32>
    %136 = vector.shape_cast %135 : vector<16xf32> to vector<16x1xf32>
    %137 = tpu.reciprocal %136 {approx = true} : vector<16x1xf32> -> vector<16x1xf32>
    %138 = vector.broadcast %137 : vector<16x1xf32> to vector<16x8xf32>
    %139 = arith.mulf %134, %138 : vector<16x8xf32>
    %cst_49 = arith.constant dense<0.000000e+00> : vector<16x32xf32>
    %140 = tpu.matmul %139, %126, %cst_49 {dimension_numbers = #tpu.dot_dimension_numbers<[1], [0], [0], [1], [0, 0, 1, 1], [], []>} : vector<16x8xf32>, vector<8x32xf32>, vector<16x32xf32> -> vector<16x32xf32>
    %141 = arith.truncf %140 : vector<16x32xf32> to vector<16x32xbf16>
    %142 = vector.extract_strided_slice %58 {offsets = [96, 0], sizes = [32, 128], strides = [1, 1]} : vector<128x128xbf16> to vector<32x128xbf16>
    %cst_50 = arith.constant dense<0.000000e+00> : vector<16x128xf32>
    %143 = tpu.matmul %141, %142, %cst_50 {dimension_numbers = #tpu.dot_dimension_numbers<[1], [0], [0], [1], [0, 0, 1, 1], [], []>} : vector<16x32xbf16>, vector<32x128xbf16>, vector<16x128xf32> -> vector<16x128xf32>
    %144 = arith.addf %123, %143 : vector<16x128xf32>
    %145 = vector.extract_strided_slice %54 {offsets = [16, 0], sizes = [16, 128], strides = [1, 1]} : vector<32x128xf32> to vector<16x128xf32>
    %146 = vector.extract_strided_slice %55 {offsets = [8, 0], sizes = [8, 128], strides = [1, 1]} : vector<16x128xf32> to vector<8x128xf32>
    %147 = vector.extract_strided_slice %56 {offsets = [8, 0], sizes = [8, 128], strides = [1, 1]} : vector<16x128xf32> to vector<8x128xf32>
    %148 = vector.extract_strided_slice %145 {offsets = [0, 0], sizes = [16, 32], strides = [1, 1]} : vector<16x128xf32> to vector<16x32xf32>
    %149 = vector.extract_strided_slice %146 {offsets = [0, 0], sizes = [8, 32], strides = [1, 1]} : vector<8x128xf32> to vector<8x32xf32>
    %150 = vector.extract_strided_slice %147 {offsets = [0, 0], sizes = [8, 32], strides = [1, 1]} : vector<8x128xf32> to vector<8x32xf32>
    %cst_51 = arith.constant dense<0.000000e+00> : vector<16x8xf32>
    %151 = tpu.matmul %148, %149, %cst_51 {dimension_numbers = #tpu.dot_dimension_numbers<[1], [1], [0], [0], [0, 0, 1, 0], [], []>} : vector<16x32xf32>, vector<8x32xf32>, vector<16x8xf32> -> vector<16x8xf32>
    %cst_52 = arith.constant 0.176776692 : f32
    %152 = vector.broadcast %cst_52 : f32 to vector<16x8xf32>
    %153 = arith.mulf %151, %152 : vector<16x8xf32>
    %cst_53 = arith.constant dense<0xFF800000> : vector<16xf32>
    %154 = vector.multi_reduction <maximumf>, %153, %cst_53 [1] : vector<16x8xf32> to vector<16xf32>
    %155 = vector.shape_cast %154 : vector<16xf32> to vector<16x1xf32>
    %156 = vector.broadcast %155 : vector<16x1xf32> to vector<16x8xf32>
    %157 = arith.subf %153, %156 : vector<16x8xf32>
    %158 = math.exp %157 : vector<16x8xf32>
    %cst_54 = arith.constant dense<0.000000e+00> : vector<16xf32>
    %159 = vector.multi_reduction <add>, %158, %cst_54 [1] : vector<16x8xf32> to vector<16xf32>
    %160 = vector.shape_cast %159 : vector<16xf32> to vector<16x1xf32>
    %161 = tpu.reciprocal %160 {approx = true} : vector<16x1xf32> -> vector<16x1xf32>
    %162 = vector.broadcast %161 : vector<16x1xf32> to vector<16x8xf32>
    %163 = arith.mulf %158, %162 : vector<16x8xf32>
    %cst_55 = arith.constant dense<0.000000e+00> : vector<16x32xf32>
    %164 = tpu.matmul %163, %150, %cst_55 {dimension_numbers = #tpu.dot_dimension_numbers<[1], [0], [0], [1], [0, 0, 1, 1], [], []>} : vector<16x8xf32>, vector<8x32xf32>, vector<16x32xf32> -> vector<16x32xf32>
    %165 = arith.truncf %164 : vector<16x32xf32> to vector<16x32xbf16>
    %166 = vector.extract_strided_slice %58 {offsets = [0, 0], sizes = [32, 128], strides = [1, 1]} : vector<128x128xbf16> to vector<32x128xbf16>
    %cst_56 = arith.constant dense<0.000000e+00> : vector<16x128xf32>
    %167 = tpu.matmul %165, %166, %cst_56 {dimension_numbers = #tpu.dot_dimension_numbers<[1], [0], [0], [1], [0, 0, 1, 1], [], []>} : vector<16x32xbf16>, vector<32x128xbf16>, vector<16x128xf32> -> vector<16x128xf32>
    %168 = vector.extract_strided_slice %145 {offsets = [0, 32], sizes = [16, 32], strides = [1, 1]} : vector<16x128xf32> to vector<16x32xf32>
    %169 = vector.extract_strided_slice %146 {offsets = [0, 32], sizes = [8, 32], strides = [1, 1]} : vector<8x128xf32> to vector<8x32xf32>
    %170 = vector.extract_strided_slice %147 {offsets = [0, 32], sizes = [8, 32], strides = [1, 1]} : vector<8x128xf32> to vector<8x32xf32>
    %cst_57 = arith.constant dense<0.000000e+00> : vector<16x8xf32>
    %171 = tpu.matmul %168, %169, %cst_57 {dimension_numbers = #tpu.dot_dimension_numbers<[1], [1], [0], [0], [0, 0, 1, 0], [], []>} : vector<16x32xf32>, vector<8x32xf32>, vector<16x8xf32> -> vector<16x8xf32>
    %cst_58 = arith.constant 0.176776692 : f32
    %172 = vector.broadcast %cst_58 : f32 to vector<16x8xf32>
    %173 = arith.mulf %171, %172 : vector<16x8xf32>
    %cst_59 = arith.constant dense<0xFF800000> : vector<16xf32>
    %174 = vector.multi_reduction <maximumf>, %173, %cst_59 [1] : vector<16x8xf32> to vector<16xf32>
    %175 = vector.shape_cast %174 : vector<16xf32> to vector<16x1xf32>
    %176 = vector.broadcast %175 : vector<16x1xf32> to vector<16x8xf32>
    %177 = arith.subf %173, %176 : vector<16x8xf32>
    %178 = math.exp %177 : vector<16x8xf32>
    %cst_60 = arith.constant dense<0.000000e+00> : vector<16xf32>
    %179 = vector.multi_reduction <add>, %178, %cst_60 [1] : vector<16x8xf32> to vector<16xf32>
    %180 = vector.shape_cast %179 : vector<16xf32> to vector<16x1xf32>
    %181 = tpu.reciprocal %180 {approx = true} : vector<16x1xf32> -> vector<16x1xf32>
    %182 = vector.broadcast %181 : vector<16x1xf32> to vector<16x8xf32>
    %183 = arith.mulf %178, %182 : vector<16x8xf32>
    %cst_61 = arith.constant dense<0.000000e+00> : vector<16x32xf32>
    %184 = tpu.matmul %183, %170, %cst_61 {dimension_numbers = #tpu.dot_dimension_numbers<[1], [0], [0], [1], [0, 0, 1, 1], [], []>} : vector<16x8xf32>, vector<8x32xf32>, vector<16x32xf32> -> vector<16x32xf32>
    %185 = arith.truncf %184 : vector<16x32xf32> to vector<16x32xbf16>
    %186 = vector.extract_strided_slice %58 {offsets = [32, 0], sizes = [32, 128], strides = [1, 1]} : vector<128x128xbf16> to vector<32x128xbf16>
    %cst_62 = arith.constant dense<0.000000e+00> : vector<16x128xf32>
    %187 = tpu.matmul %185, %186, %cst_62 {dimension_numbers = #tpu.dot_dimension_numbers<[1], [0], [0], [1], [0, 0, 1, 1], [], []>} : vector<16x32xbf16>, vector<32x128xbf16>, vector<16x128xf32> -> vector<16x128xf32>
    %188 = arith.addf %167, %187 : vector<16x128xf32>
    %189 = vector.extract_strided_slice %145 {offsets = [0, 64], sizes = [16, 32], strides = [1, 1]} : vector<16x128xf32> to vector<16x32xf32>
    %190 = vector.extract_strided_slice %146 {offsets = [0, 64], sizes = [8, 32], strides = [1, 1]} : vector<8x128xf32> to vector<8x32xf32>
    %191 = vector.extract_strided_slice %147 {offsets = [0, 64], sizes = [8, 32], strides = [1, 1]} : vector<8x128xf32> to vector<8x32xf32>
    %cst_63 = arith.constant dense<0.000000e+00> : vector<16x8xf32>
    %192 = tpu.matmul %189, %190, %cst_63 {dimension_numbers = #tpu.dot_dimension_numbers<[1], [1], [0], [0], [0, 0, 1, 0], [], []>} : vector<16x32xf32>, vector<8x32xf32>, vector<16x8xf32> -> vector<16x8xf32>
    %cst_64 = arith.constant 0.176776692 : f32
    %193 = vector.broadcast %cst_64 : f32 to vector<16x8xf32>
    %194 = arith.mulf %192, %193 : vector<16x8xf32>
    %cst_65 = arith.constant dense<0xFF800000> : vector<16xf32>
    %195 = vector.multi_reduction <maximumf>, %194, %cst_65 [1] : vector<16x8xf32> to vector<16xf32>
    %196 = vector.shape_cast %195 : vector<16xf32> to vector<16x1xf32>
    %197 = vector.broadcast %196 : vector<16x1xf32> to vector<16x8xf32>
    %198 = arith.subf %194, %197 : vector<16x8xf32>
    %199 = math.exp %198 : vector<16x8xf32>
    %cst_66 = arith.constant dense<0.000000e+00> : vector<16xf32>
    %200 = vector.multi_reduction <add>, %199, %cst_66 [1] : vector<16x8xf32> to vector<16xf32>
    %201 = vector.shape_cast %200 : vector<16xf32> to vector<16x1xf32>
    %202 = tpu.reciprocal %201 {approx = true} : vector<16x1xf32> -> vector<16x1xf32>
    %203 = vector.broadcast %202 : vector<16x1xf32> to vector<16x8xf32>
    %204 = arith.mulf %199, %203 : vector<16x8xf32>
    %cst_67 = arith.constant dense<0.000000e+00> : vector<16x32xf32>
    %205 = tpu.matmul %204, %191, %cst_67 {dimension_numbers = #tpu.dot_dimension_numbers<[1], [0], [0], [1], [0, 0, 1, 1], [], []>} : vector<16x8xf32>, vector<8x32xf32>, vector<16x32xf32> -> vector<16x32xf32>
    %206 = arith.truncf %205 : vector<16x32xf32> to vector<16x32xbf16>
    %207 = vector.extract_strided_slice %58 {offsets = [64, 0], sizes = [32, 128], strides = [1, 1]} : vector<128x128xbf16> to vector<32x128xbf16>
    %cst_68 = arith.constant dense<0.000000e+00> : vector<16x128xf32>
    %208 = tpu.matmul %206, %207, %cst_68 {dimension_numbers = #tpu.dot_dimension_numbers<[1], [0], [0], [1], [0, 0, 1, 1], [], []>} : vector<16x32xbf16>, vector<32x128xbf16>, vector<16x128xf32> -> vector<16x128xf32>
    %209 = arith.addf %188, %208 : vector<16x128xf32>
    %210 = vector.extract_strided_slice %145 {offsets = [0, 96], sizes = [16, 32], strides = [1, 1]} : vector<16x128xf32> to vector<16x32xf32>
    %211 = vector.extract_strided_slice %146 {offsets = [0, 96], sizes = [8, 32], strides = [1, 1]} : vector<8x128xf32> to vector<8x32xf32>
    %212 = vector.extract_strided_slice %147 {offsets = [0, 96], sizes = [8, 32], strides = [1, 1]} : vector<8x128xf32> to vector<8x32xf32>
    %cst_69 = arith.constant dense<0.000000e+00> : vector<16x8xf32>
    %213 = tpu.matmul %210, %211, %cst_69 {dimension_numbers = #tpu.dot_dimension_numbers<[1], [1], [0], [0], [0, 0, 1, 0], [], []>} : vector<16x32xf32>, vector<8x32xf32>, vector<16x8xf32> -> vector<16x8xf32>
    %cst_70 = arith.constant 0.176776692 : f32
    %214 = vector.broadcast %cst_70 : f32 to vector<16x8xf32>
    %215 = arith.mulf %213, %214 : vector<16x8xf32>
    %cst_71 = arith.constant dense<0xFF800000> : vector<16xf32>
    %216 = vector.multi_reduction <maximumf>, %215, %cst_71 [1] : vector<16x8xf32> to vector<16xf32>
    %217 = vector.shape_cast %216 : vector<16xf32> to vector<16x1xf32>
    %218 = vector.broadcast %217 : vector<16x1xf32> to vector<16x8xf32>
    %219 = arith.subf %215, %218 : vector<16x8xf32>
    %220 = math.exp %219 : vector<16x8xf32>
    %cst_72 = arith.constant dense<0.000000e+00> : vector<16xf32>
    %221 = vector.multi_reduction <add>, %220, %cst_72 [1] : vector<16x8xf32> to vector<16xf32>
    %222 = vector.shape_cast %221 : vector<16xf32> to vector<16x1xf32>
    %223 = tpu.reciprocal %222 {approx = true} : vector<16x1xf32> -> vector<16x1xf32>
    %224 = vector.broadcast %223 : vector<16x1xf32> to vector<16x8xf32>
    %225 = arith.mulf %220, %224 : vector<16x8xf32>
    %cst_73 = arith.constant dense<0.000000e+00> : vector<16x32xf32>
    %226 = tpu.matmul %225, %212, %cst_73 {dimension_numbers = #tpu.dot_dimension_numbers<[1], [0], [0], [1], [0, 0, 1, 1], [], []>} : vector<16x8xf32>, vector<8x32xf32>, vector<16x32xf32> -> vector<16x32xf32>
    %227 = arith.truncf %226 : vector<16x32xf32> to vector<16x32xbf16>
    %228 = vector.extract_strided_slice %58 {offsets = [96, 0], sizes = [32, 128], strides = [1, 1]} : vector<128x128xbf16> to vector<32x128xbf16>
    %cst_74 = arith.constant dense<0.000000e+00> : vector<16x128xf32>
    %229 = tpu.matmul %227, %228, %cst_74 {dimension_numbers = #tpu.dot_dimension_numbers<[1], [0], [0], [1], [0, 0, 1, 1], [], []>} : vector<16x32xbf16>, vector<32x128xbf16>, vector<16x128xf32> -> vector<16x128xf32>
    %230 = arith.addf %209, %229 : vector<16x128xf32>
    %231 = tpu.concatenate %144, %230 in 0 : vector<16x128xf32>, vector<16x128xf32> -> vector<32x128xf32>
    %c0_75 = arith.constant 0 : index
    %c0_76 = arith.constant 0 : index
    %c0_77 = arith.constant 0 : index
    %232 = vector.load %arg9[%c0_75, %c0_76, %c0_77] : memref<2x1x128xf32, #tpu.memory_space<vmem>>, vector<1x1x128xf32>
    %233 = vector.shape_cast %232 : vector<1x1x128xf32> to vector<1x128xf32>
    %234 = vector.broadcast %233 : vector<1x128xf32> to vector<32x128xf32>
    %235 = arith.addf %231, %234 : vector<32x128xf32>
    %236 = arith.addf %0, %235 : vector<32x128xf32>
    %c0_78 = arith.constant 0 : index
    %c0_79 = arith.constant 0 : index
    %c0_80 = arith.constant 0 : index
    %237 = vector.load %arg10[%c0_78, %c0_79, %c0_80] : memref<2x1x128xf32, #tpu.memory_space<vmem>>, vector<1x1x128xf32>
    %238 = vector.shape_cast %237 : vector<1x1x128xf32> to vector<1x128xf32>
    %cst_81 = arith.constant 9.99999997E-7 : f32
    %239 = vector.broadcast %cst_81 : f32 to vector<32x128xf32>
    %240 = arith.addf %236, %239 : vector<32x128xf32>
    %cst_82 = arith.constant 9.99999997E-7 : f32
    %241 = vector.broadcast %cst_82 : f32 to vector<32x128xf32>
    %242 = arith.addf %240, %241 : vector<32x128xf32>
    %243 = arith.mulf %242, %242 : vector<32x128xf32>
    %cst_83 = arith.constant dense<0.000000e+00> : vector<32xf32>
    %244 = vector.multi_reduction <add>, %243, %cst_83 [1] : vector<32x128xf32> to vector<32xf32>
    %245 = vector.shape_cast %244 : vector<32xf32> to vector<32x1xf32>
    %246 = math.sqrt %245 : vector<32x1xf32>
    %cst_84 = arith.constant 11.3137083 : f32
    %247 = vector.broadcast %cst_84 : f32 to vector<32x1xf32>
    %248 = arith.mulf %246, %247 : vector<32x1xf32>
    %cst_85 = arith.constant 9.99999997E-7 : f32
    %249 = vector.broadcast %cst_85 : f32 to vector<32x1xf32>
    %250 = arith.addf %248, %249 : vector<32x1xf32>
    %251 = tpu.reciprocal %250 {approx = true} : vector<32x1xf32> -> vector<32x1xf32>
    %252 = vector.broadcast %251 : vector<32x1xf32> to vector<32x128xf32>
    %253 = arith.mulf %240, %252 : vector<32x128xf32>
    %254 = vector.broadcast %238 : vector<1x128xf32> to vector<32x128xf32>
    %255 = arith.mulf %253, %254 : vector<32x128xf32>
    %256 = arith.truncf %255 : vector<32x128xf32> to vector<32x128xbf16>
    %c0_86 = arith.constant 0 : index
    %c0_87 = arith.constant 0 : index
    %c0_88 = arith.constant 0 : index
    %257 = vector.load %arg11[%c0_86, %c0_87, %c0_88] : memref<2x128x384xbf16, #tpu.memory_space<vmem>>, vector<1x128x384xbf16>
    %258 = vector.shape_cast %257 : vector<1x128x384xbf16> to vector<128x384xbf16>
    %cst_89 = arith.constant dense<0.000000e+00> : vector<32x384xf32>
    %259 = tpu.matmul %256, %258, %cst_89 {dimension_numbers = #tpu.dot_dimension_numbers<[1], [0], [0], [1], [0, 0, 1, 1], [], []>} : vector<32x128xbf16>, vector<128x384xbf16>, vector<32x384xf32> -> vector<32x384xf32>
    %c0_90 = arith.constant 0 : index
    %c0_91 = arith.constant 0 : index
    %c0_92 = arith.constant 0 : index
    %260 = vector.load %arg12[%c0_90, %c0_91, %c0_92] : memref<2x1x384xf32, #tpu.memory_space<vmem>>, vector<1x1x384xf32>
    %261 = vector.shape_cast %260 : vector<1x1x384xf32> to vector<1x384xf32>
    %262 = vector.broadcast %261 : vector<1x384xf32> to vector<32x384xf32>
    %263 = arith.addf %259, %262 : vector<32x384xf32>
    %264 = vector.extract_strided_slice %263 {offsets = [0, 0], sizes = [32, 128], strides = [1, 1]} : vector<32x384xf32> to vector<32x128xf32>
    %c112_i32 = arith.constant 112 : i32
    %265 = tpu.dynamic_rotate %264 by %c112_i32 dim 1 : vector<32x128xf32>, i32 -> vector<32x128xf32>
    %c16_i32_93 = arith.constant 16 : i32
    %266 = tpu.dynamic_rotate %264 by %c16_i32_93 dim 1 : vector<32x128xf32>, i32 -> vector<32x128xf32>
    %267 = arith.select %22, %265, %266 : vector<32x128xi1>, vector<32x128xf32>
    %268 = arith.mulf %264, %2 : vector<32x128xf32>
    %269 = arith.mulf %267, %3 : vector<32x128xf32>
    %270 = arith.addf %268, %269 : vector<32x128xf32>
    %271 = vector.extract_strided_slice %263 {offsets = [0, 128], sizes = [32, 128], strides = [1, 1]} : vector<32x384xf32> to vector<32x128xf32>
    %c112_i32_94 = arith.constant 112 : i32
    %272 = tpu.dynamic_rotate %271 by %c112_i32_94 dim 1 : vector<32x128xf32>, i32 -> vector<32x128xf32>
    %c16_i32_95 = arith.constant 16 : i32
    %273 = tpu.dynamic_rotate %271 by %c16_i32_95 dim 1 : vector<32x128xf32>, i32 -> vector<32x128xf32>
    %274 = arith.select %22, %272, %273 : vector<32x128xi1>, vector<32x128xf32>
    %275 = arith.mulf %271, %2 : vector<32x128xf32>
    %276 = arith.mulf %274, %3 : vector<32x128xf32>
    %277 = arith.addf %275, %276 : vector<32x128xf32>
    %278 = vector.extract_strided_slice %263 {offsets = [0, 256], sizes = [32, 128], strides = [1, 1]} : vector<32x384xf32> to vector<32x128xf32>
    %c0_96 = arith.constant 0 : index
    %c0_97 = arith.constant 0 : index
    %c0_98 = arith.constant 0 : index
    %279 = vector.load %arg15[%c0_96, %c0_97, %c0_98] : memref<2x1x64xf32, #tpu.memory_space<vmem>>, vector<1x1x64xf32>
    %280 = vector.shape_cast %279 : vector<1x1x64xf32> to vector<1x64xf32>
    %c0_99 = arith.constant 0 : index
    %c0_100 = arith.constant 0 : index
    %c0_101 = arith.constant 0 : index
    %281 = vector.load %arg13[%c0_99, %c0_100, %c0_101] : memref<2x64x128xbf16, #tpu.memory_space<vmem>>, vector<1x64x128xbf16>
    %282 = vector.shape_cast %281 : vector<1x64x128xbf16> to vector<64x128xbf16>
    %283 = vector.extract_strided_slice %270 {offsets = [0, 0], sizes = [16, 128], strides = [1, 1]} : vector<32x128xf32> to vector<16x128xf32>
    %284 = vector.extract_strided_slice %277 {offsets = [0, 0], sizes = [16, 128], strides = [1, 1]} : vector<32x128xf32> to vector<16x128xf32>
    %285 = vector.extract_strided_slice %278 {offsets = [0, 0], sizes = [16, 128], strides = [1, 1]} : vector<32x128xf32> to vector<16x128xf32>
    %286 = vector.extract_strided_slice %283 {offsets = [0, 0], sizes = [16, 32], strides = [1, 1]} : vector<16x128xf32> to vector<16x32xf32>
    %287 = vector.extract_strided_slice %284 {offsets = [0, 0], sizes = [16, 32], strides = [1, 1]} : vector<16x128xf32> to vector<16x32xf32>
    %288 = vector.extract_strided_slice %285 {offsets = [0, 0], sizes = [16, 32], strides = [1, 1]} : vector<16x128xf32> to vector<16x32xf32>
    %cst_102 = arith.constant dense<0.000000e+00> : vector<16x16xf32>
    %289 = tpu.matmul %286, %287, %cst_102 {dimension_numbers = #tpu.dot_dimension_numbers<[1], [1], [0], [0], [0, 0, 1, 0], [], []>} : vector<16x32xf32>, vector<16x32xf32>, vector<16x16xf32> -> vector<16x16xf32>
    %cst_103 = arith.constant 0.176776692 : f32
    %290 = vector.broadcast %cst_103 : f32 to vector<16x16xf32>
    %291 = arith.mulf %289, %290 : vector<16x16xf32>
    %cst_104 = arith.constant -1.000000e+30 : f32
    %292 = vector.broadcast %cst_104 : f32 to vector<16x16xf32>
    %293 = arith.select %25, %291, %292 : vector<16x16xi1>, vector<16x16xf32>
    %cst_105 = arith.constant dense<0xFF800000> : vector<16xf32>
    %294 = vector.multi_reduction <maximumf>, %293, %cst_105 [1] : vector<16x16xf32> to vector<16xf32>
    %295 = vector.shape_cast %294 : vector<16xf32> to vector<16x1xf32>
    %296 = vector.broadcast %295 : vector<16x1xf32> to vector<16x16xf32>
    %297 = arith.subf %293, %296 : vector<16x16xf32>
    %298 = math.exp %297 : vector<16x16xf32>
    %cst_106 = arith.constant dense<0.000000e+00> : vector<16xf32>
    %299 = vector.multi_reduction <add>, %298, %cst_106 [1] : vector<16x16xf32> to vector<16xf32>
    %300 = vector.shape_cast %299 : vector<16xf32> to vector<16x1xf32>
    %301 = tpu.reciprocal %300 {approx = true} : vector<16x1xf32> -> vector<16x1xf32>
    %302 = vector.broadcast %301 : vector<16x1xf32> to vector<16x16xf32>
    %303 = arith.mulf %298, %302 : vector<16x16xf32>
    %cst_107 = arith.constant dense<0.000000e+00> : vector<16x32xf32>
    %304 = tpu.matmul %303, %288, %cst_107 {dimension_numbers = #tpu.dot_dimension_numbers<[1], [0], [0], [1], [0, 0, 1, 1], [], []>} : vector<16x16xf32>, vector<16x32xf32>, vector<16x32xf32> -> vector<16x32xf32>
    %305 = vector.extract_strided_slice %283 {offsets = [0, 64], sizes = [16, 32], strides = [1, 1]} : vector<16x128xf32> to vector<16x32xf32>
    %306 = vector.extract_strided_slice %284 {offsets = [0, 64], sizes = [16, 32], strides = [1, 1]} : vector<16x128xf32> to vector<16x32xf32>
    %307 = vector.extract_strided_slice %285 {offsets = [0, 64], sizes = [16, 32], strides = [1, 1]} : vector<16x128xf32> to vector<16x32xf32>
    %cst_108 = arith.constant dense<0.000000e+00> : vector<16x16xf32>
    %308 = tpu.matmul %305, %306, %cst_108 {dimension_numbers = #tpu.dot_dimension_numbers<[1], [1], [0], [0], [0, 0, 1, 0], [], []>} : vector<16x32xf32>, vector<16x32xf32>, vector<16x16xf32> -> vector<16x16xf32>
    %cst_109 = arith.constant 0.176776692 : f32
    %309 = vector.broadcast %cst_109 : f32 to vector<16x16xf32>
    %310 = arith.mulf %308, %309 : vector<16x16xf32>
    %cst_110 = arith.constant -1.000000e+30 : f32
    %311 = vector.broadcast %cst_110 : f32 to vector<16x16xf32>
    %312 = arith.select %25, %310, %311 : vector<16x16xi1>, vector<16x16xf32>
    %cst_111 = arith.constant dense<0xFF800000> : vector<16xf32>
    %313 = vector.multi_reduction <maximumf>, %312, %cst_111 [1] : vector<16x16xf32> to vector<16xf32>
    %314 = vector.shape_cast %313 : vector<16xf32> to vector<16x1xf32>
    %315 = vector.broadcast %314 : vector<16x1xf32> to vector<16x16xf32>
    %316 = arith.subf %312, %315 : vector<16x16xf32>
    %317 = math.exp %316 : vector<16x16xf32>
    %cst_112 = arith.constant dense<0.000000e+00> : vector<16xf32>
    %318 = vector.multi_reduction <add>, %317, %cst_112 [1] : vector<16x16xf32> to vector<16xf32>
    %319 = vector.shape_cast %318 : vector<16xf32> to vector<16x1xf32>
    %320 = tpu.reciprocal %319 {approx = true} : vector<16x1xf32> -> vector<16x1xf32>
    %321 = vector.broadcast %320 : vector<16x1xf32> to vector<16x16xf32>
    %322 = arith.mulf %317, %321 : vector<16x16xf32>
    %cst_113 = arith.constant dense<0.000000e+00> : vector<16x32xf32>
    %323 = tpu.matmul %322, %307, %cst_113 {dimension_numbers = #tpu.dot_dimension_numbers<[1], [0], [0], [1], [0, 0, 1, 1], [], []>} : vector<16x16xf32>, vector<16x32xf32>, vector<16x32xf32> -> vector<16x32xf32>
    %324 = vector.extract_strided_slice %280 {offsets = [0, 0], sizes = [1, 32], strides = [1, 1]} : vector<1x64xf32> to vector<1x32xf32>
    %325 = vector.broadcast %324 : vector<1x32xf32> to vector<16x32xf32>
    %326 = arith.mulf %325, %323 : vector<16x32xf32>
    %327 = arith.subf %304, %326 : vector<16x32xf32>
    %cst_114 = arith.constant dense<0.000000e+00> : vector<16xf32>
    %328 = vector.multi_reduction <add>, %327, %cst_114 [1] : vector<16x32xf32> to vector<16xf32>
    %329 = vector.shape_cast %328 : vector<16xf32> to vector<16x1xf32>
    %cst_115 = arith.constant 3.200000e+01 : f32
    %330 = vector.broadcast %cst_115 : f32 to vector<16x1xf32>
    %331 = arith.divf %329, %330 : vector<16x1xf32>
    %332 = vector.broadcast %331 : vector<16x1xf32> to vector<16x32xf32>
    %333 = arith.subf %327, %332 : vector<16x32xf32>
    %334 = arith.mulf %333, %333 : vector<16x32xf32>
    %cst_116 = arith.constant dense<0.000000e+00> : vector<16xf32>
    %335 = vector.multi_reduction <add>, %334, %cst_116 [1] : vector<16x32xf32> to vector<16xf32>
    %336 = vector.shape_cast %335 : vector<16xf32> to vector<16x1xf32>
    %cst_117 = arith.constant 3.200000e+01 : f32
    %337 = vector.broadcast %cst_117 : f32 to vector<16x1xf32>
    %338 = arith.divf %336, %337 : vector<16x1xf32>
    %339 = vector.broadcast %331 : vector<16x1xf32> to vector<16x32xf32>
    %340 = arith.subf %327, %339 : vector<16x32xf32>
    %cst_118 = arith.constant 9.99999974E-6 : f32
    %341 = vector.broadcast %cst_118 : f32 to vector<16x1xf32>
    %342 = arith.addf %338, %341 : vector<16x1xf32>
    %343 = math.rsqrt %342 : vector<16x1xf32>
    %344 = vector.broadcast %343 : vector<16x1xf32> to vector<16x32xf32>
    %345 = arith.mulf %340, %344 : vector<16x32xf32>
    %346 = arith.truncf %345 : vector<16x32xf32> to vector<16x32xbf16>
    %347 = vector.extract_strided_slice %282 {offsets = [0, 0], sizes = [32, 128], strides = [1, 1]} : vector<64x128xbf16> to vector<32x128xbf16>
    %cst_119 = arith.constant dense<0.000000e+00> : vector<16x128xf32>
    %348 = tpu.matmul %346, %347, %cst_119 {dimension_numbers = #tpu.dot_dimension_numbers<[1], [0], [0], [1], [0, 0, 1, 1], [], []>} : vector<16x32xbf16>, vector<32x128xbf16>, vector<16x128xf32> -> vector<16x128xf32>
    %349 = vector.extract_strided_slice %283 {offsets = [0, 32], sizes = [16, 32], strides = [1, 1]} : vector<16x128xf32> to vector<16x32xf32>
    %350 = vector.extract_strided_slice %284 {offsets = [0, 32], sizes = [16, 32], strides = [1, 1]} : vector<16x128xf32> to vector<16x32xf32>
    %351 = vector.extract_strided_slice %285 {offsets = [0, 32], sizes = [16, 32], strides = [1, 1]} : vector<16x128xf32> to vector<16x32xf32>
    %cst_120 = arith.constant dense<0.000000e+00> : vector<16x16xf32>
    %352 = tpu.matmul %349, %350, %cst_120 {dimension_numbers = #tpu.dot_dimension_numbers<[1], [1], [0], [0], [0, 0, 1, 0], [], []>} : vector<16x32xf32>, vector<16x32xf32>, vector<16x16xf32> -> vector<16x16xf32>
    %cst_121 = arith.constant 0.176776692 : f32
    %353 = vector.broadcast %cst_121 : f32 to vector<16x16xf32>
    %354 = arith.mulf %352, %353 : vector<16x16xf32>
    %cst_122 = arith.constant -1.000000e+30 : f32
    %355 = vector.broadcast %cst_122 : f32 to vector<16x16xf32>
    %356 = arith.select %25, %354, %355 : vector<16x16xi1>, vector<16x16xf32>
    %cst_123 = arith.constant dense<0xFF800000> : vector<16xf32>
    %357 = vector.multi_reduction <maximumf>, %356, %cst_123 [1] : vector<16x16xf32> to vector<16xf32>
    %358 = vector.shape_cast %357 : vector<16xf32> to vector<16x1xf32>
    %359 = vector.broadcast %358 : vector<16x1xf32> to vector<16x16xf32>
    %360 = arith.subf %356, %359 : vector<16x16xf32>
    %361 = math.exp %360 : vector<16x16xf32>
    %cst_124 = arith.constant dense<0.000000e+00> : vector<16xf32>
    %362 = vector.multi_reduction <add>, %361, %cst_124 [1] : vector<16x16xf32> to vector<16xf32>
    %363 = vector.shape_cast %362 : vector<16xf32> to vector<16x1xf32>
    %364 = tpu.reciprocal %363 {approx = true} : vector<16x1xf32> -> vector<16x1xf32>
    %365 = vector.broadcast %364 : vector<16x1xf32> to vector<16x16xf32>
    %366 = arith.mulf %361, %365 : vector<16x16xf32>
    %cst_125 = arith.constant dense<0.000000e+00> : vector<16x32xf32>
    %367 = tpu.matmul %366, %351, %cst_125 {dimension_numbers = #tpu.dot_dimension_numbers<[1], [0], [0], [1], [0, 0, 1, 1], [], []>} : vector<16x16xf32>, vector<16x32xf32>, vector<16x32xf32> -> vector<16x32xf32>
    %368 = vector.extract_strided_slice %283 {offsets = [0, 96], sizes = [16, 32], strides = [1, 1]} : vector<16x128xf32> to vector<16x32xf32>
    %369 = vector.extract_strided_slice %284 {offsets = [0, 96], sizes = [16, 32], strides = [1, 1]} : vector<16x128xf32> to vector<16x32xf32>
    %370 = vector.extract_strided_slice %285 {offsets = [0, 96], sizes = [16, 32], strides = [1, 1]} : vector<16x128xf32> to vector<16x32xf32>
    %cst_126 = arith.constant dense<0.000000e+00> : vector<16x16xf32>
    %371 = tpu.matmul %368, %369, %cst_126 {dimension_numbers = #tpu.dot_dimension_numbers<[1], [1], [0], [0], [0, 0, 1, 0], [], []>} : vector<16x32xf32>, vector<16x32xf32>, vector<16x16xf32> -> vector<16x16xf32>
    %cst_127 = arith.constant 0.176776692 : f32
    %372 = vector.broadcast %cst_127 : f32 to vector<16x16xf32>
    %373 = arith.mulf %371, %372 : vector<16x16xf32>
    %cst_128 = arith.constant -1.000000e+30 : f32
    %374 = vector.broadcast %cst_128 : f32 to vector<16x16xf32>
    %375 = arith.select %25, %373, %374 : vector<16x16xi1>, vector<16x16xf32>
    %cst_129 = arith.constant dense<0xFF800000> : vector<16xf32>
    %376 = vector.multi_reduction <maximumf>, %375, %cst_129 [1] : vector<16x16xf32> to vector<16xf32>
    %377 = vector.shape_cast %376 : vector<16xf32> to vector<16x1xf32>
    %378 = vector.broadcast %377 : vector<16x1xf32> to vector<16x16xf32>
    %379 = arith.subf %375, %378 : vector<16x16xf32>
    %380 = math.exp %379 : vector<16x16xf32>
    %cst_130 = arith.constant dense<0.000000e+00> : vector<16xf32>
    %381 = vector.multi_reduction <add>, %380, %cst_130 [1] : vector<16x16xf32> to vector<16xf32>
    %382 = vector.shape_cast %381 : vector<16xf32> to vector<16x1xf32>
    %383 = tpu.reciprocal %382 {approx = true} : vector<16x1xf32> -> vector<16x1xf32>
    %384 = vector.broadcast %383 : vector<16x1xf32> to vector<16x16xf32>
    %385 = arith.mulf %380, %384 : vector<16x16xf32>
    %cst_131 = arith.constant dense<0.000000e+00> : vector<16x32xf32>
    %386 = tpu.matmul %385, %370, %cst_131 {dimension_numbers = #tpu.dot_dimension_numbers<[1], [0], [0], [1], [0, 0, 1, 1], [], []>} : vector<16x16xf32>, vector<16x32xf32>, vector<16x32xf32> -> vector<16x32xf32>
    %387 = vector.extract_strided_slice %280 {offsets = [0, 32], sizes = [1, 32], strides = [1, 1]} : vector<1x64xf32> to vector<1x32xf32>
    %388 = vector.broadcast %387 : vector<1x32xf32> to vector<16x32xf32>
    %389 = arith.mulf %388, %386 : vector<16x32xf32>
    %390 = arith.subf %367, %389 : vector<16x32xf32>
    %cst_132 = arith.constant dense<0.000000e+00> : vector<16xf32>
    %391 = vector.multi_reduction <add>, %390, %cst_132 [1] : vector<16x32xf32> to vector<16xf32>
    %392 = vector.shape_cast %391 : vector<16xf32> to vector<16x1xf32>
    %cst_133 = arith.constant 3.200000e+01 : f32
    %393 = vector.broadcast %cst_133 : f32 to vector<16x1xf32>
    %394 = arith.divf %392, %393 : vector<16x1xf32>
    %395 = vector.broadcast %394 : vector<16x1xf32> to vector<16x32xf32>
    %396 = arith.subf %390, %395 : vector<16x32xf32>
    %397 = arith.mulf %396, %396 : vector<16x32xf32>
    %cst_134 = arith.constant dense<0.000000e+00> : vector<16xf32>
    %398 = vector.multi_reduction <add>, %397, %cst_134 [1] : vector<16x32xf32> to vector<16xf32>
    %399 = vector.shape_cast %398 : vector<16xf32> to vector<16x1xf32>
    %cst_135 = arith.constant 3.200000e+01 : f32
    %400 = vector.broadcast %cst_135 : f32 to vector<16x1xf32>
    %401 = arith.divf %399, %400 : vector<16x1xf32>
    %402 = vector.broadcast %394 : vector<16x1xf32> to vector<16x32xf32>
    %403 = arith.subf %390, %402 : vector<16x32xf32>
    %cst_136 = arith.constant 9.99999974E-6 : f32
    %404 = vector.broadcast %cst_136 : f32 to vector<16x1xf32>
    %405 = arith.addf %401, %404 : vector<16x1xf32>
    %406 = math.rsqrt %405 : vector<16x1xf32>
    %407 = vector.broadcast %406 : vector<16x1xf32> to vector<16x32xf32>
    %408 = arith.mulf %403, %407 : vector<16x32xf32>
    %409 = arith.truncf %408 : vector<16x32xf32> to vector<16x32xbf16>
    %410 = vector.extract_strided_slice %282 {offsets = [32, 0], sizes = [32, 128], strides = [1, 1]} : vector<64x128xbf16> to vector<32x128xbf16>
    %cst_137 = arith.constant dense<0.000000e+00> : vector<16x128xf32>
    %411 = tpu.matmul %409, %410, %cst_137 {dimension_numbers = #tpu.dot_dimension_numbers<[1], [0], [0], [1], [0, 0, 1, 1], [], []>} : vector<16x32xbf16>, vector<32x128xbf16>, vector<16x128xf32> -> vector<16x128xf32>
    %412 = arith.addf %348, %411 : vector<16x128xf32>
    %413 = vector.extract_strided_slice %270 {offsets = [16, 0], sizes = [16, 128], strides = [1, 1]} : vector<32x128xf32> to vector<16x128xf32>
    %414 = vector.extract_strided_slice %277 {offsets = [16, 0], sizes = [16, 128], strides = [1, 1]} : vector<32x128xf32> to vector<16x128xf32>
    %415 = vector.extract_strided_slice %278 {offsets = [16, 0], sizes = [16, 128], strides = [1, 1]} : vector<32x128xf32> to vector<16x128xf32>
    %416 = vector.extract_strided_slice %413 {offsets = [0, 0], sizes = [16, 32], strides = [1, 1]} : vector<16x128xf32> to vector<16x32xf32>
    %417 = vector.extract_strided_slice %414 {offsets = [0, 0], sizes = [16, 32], strides = [1, 1]} : vector<16x128xf32> to vector<16x32xf32>
    %418 = vector.extract_strided_slice %415 {offsets = [0, 0], sizes = [16, 32], strides = [1, 1]} : vector<16x128xf32> to vector<16x32xf32>
    %cst_138 = arith.constant dense<0.000000e+00> : vector<16x16xf32>
    %419 = tpu.matmul %416, %417, %cst_138 {dimension_numbers = #tpu.dot_dimension_numbers<[1], [1], [0], [0], [0, 0, 1, 0], [], []>} : vector<16x32xf32>, vector<16x32xf32>, vector<16x16xf32> -> vector<16x16xf32>
    %cst_139 = arith.constant 0.176776692 : f32
    %420 = vector.broadcast %cst_139 : f32 to vector<16x16xf32>
    %421 = arith.mulf %419, %420 : vector<16x16xf32>
    %cst_140 = arith.constant -1.000000e+30 : f32
    %422 = vector.broadcast %cst_140 : f32 to vector<16x16xf32>
    %423 = arith.select %25, %421, %422 : vector<16x16xi1>, vector<16x16xf32>
    %cst_141 = arith.constant dense<0xFF800000> : vector<16xf32>
    %424 = vector.multi_reduction <maximumf>, %423, %cst_141 [1] : vector<16x16xf32> to vector<16xf32>
    %425 = vector.shape_cast %424 : vector<16xf32> to vector<16x1xf32>
    %426 = vector.broadcast %425 : vector<16x1xf32> to vector<16x16xf32>
    %427 = arith.subf %423, %426 : vector<16x16xf32>
    %428 = math.exp %427 : vector<16x16xf32>
    %cst_142 = arith.constant dense<0.000000e+00> : vector<16xf32>
    %429 = vector.multi_reduction <add>, %428, %cst_142 [1] : vector<16x16xf32> to vector<16xf32>
    %430 = vector.shape_cast %429 : vector<16xf32> to vector<16x1xf32>
    %431 = tpu.reciprocal %430 {approx = true} : vector<16x1xf32> -> vector<16x1xf32>
    %432 = vector.broadcast %431 : vector<16x1xf32> to vector<16x16xf32>
    %433 = arith.mulf %428, %432 : vector<16x16xf32>
    %cst_143 = arith.constant dense<0.000000e+00> : vector<16x32xf32>
    %434 = tpu.matmul %433, %418, %cst_143 {dimension_numbers = #tpu.dot_dimension_numbers<[1], [0], [0], [1], [0, 0, 1, 1], [], []>} : vector<16x16xf32>, vector<16x32xf32>, vector<16x32xf32> -> vector<16x32xf32>
    %435 = vector.extract_strided_slice %413 {offsets = [0, 64], sizes = [16, 32], strides = [1, 1]} : vector<16x128xf32> to vector<16x32xf32>
    %436 = vector.extract_strided_slice %414 {offsets = [0, 64], sizes = [16, 32], strides = [1, 1]} : vector<16x128xf32> to vector<16x32xf32>
    %437 = vector.extract_strided_slice %415 {offsets = [0, 64], sizes = [16, 32], strides = [1, 1]} : vector<16x128xf32> to vector<16x32xf32>
    %cst_144 = arith.constant dense<0.000000e+00> : vector<16x16xf32>
    %438 = tpu.matmul %435, %436, %cst_144 {dimension_numbers = #tpu.dot_dimension_numbers<[1], [1], [0], [0], [0, 0, 1, 0], [], []>} : vector<16x32xf32>, vector<16x32xf32>, vector<16x16xf32> -> vector<16x16xf32>
    %cst_145 = arith.constant 0.176776692 : f32
    %439 = vector.broadcast %cst_145 : f32 to vector<16x16xf32>
    %440 = arith.mulf %438, %439 : vector<16x16xf32>
    %cst_146 = arith.constant -1.000000e+30 : f32
    %441 = vector.broadcast %cst_146 : f32 to vector<16x16xf32>
    %442 = arith.select %25, %440, %441 : vector<16x16xi1>, vector<16x16xf32>
    %cst_147 = arith.constant dense<0xFF800000> : vector<16xf32>
    %443 = vector.multi_reduction <maximumf>, %442, %cst_147 [1] : vector<16x16xf32> to vector<16xf32>
    %444 = vector.shape_cast %443 : vector<16xf32> to vector<16x1xf32>
    %445 = vector.broadcast %444 : vector<16x1xf32> to vector<16x16xf32>
    %446 = arith.subf %442, %445 : vector<16x16xf32>
    %447 = math.exp %446 : vector<16x16xf32>
    %cst_148 = arith.constant dense<0.000000e+00> : vector<16xf32>
    %448 = vector.multi_reduction <add>, %447, %cst_148 [1] : vector<16x16xf32> to vector<16xf32>
    %449 = vector.shape_cast %448 : vector<16xf32> to vector<16x1xf32>
    %450 = tpu.reciprocal %449 {approx = true} : vector<16x1xf32> -> vector<16x1xf32>
    %451 = vector.broadcast %450 : vector<16x1xf32> to vector<16x16xf32>
    %452 = arith.mulf %447, %451 : vector<16x16xf32>
    %cst_149 = arith.constant dense<0.000000e+00> : vector<16x32xf32>
    %453 = tpu.matmul %452, %437, %cst_149 {dimension_numbers = #tpu.dot_dimension_numbers<[1], [0], [0], [1], [0, 0, 1, 1], [], []>} : vector<16x16xf32>, vector<16x32xf32>, vector<16x32xf32> -> vector<16x32xf32>
    %454 = vector.extract_strided_slice %280 {offsets = [0, 0], sizes = [1, 32], strides = [1, 1]} : vector<1x64xf32> to vector<1x32xf32>
    %455 = vector.broadcast %454 : vector<1x32xf32> to vector<16x32xf32>
    %456 = arith.mulf %455, %453 : vector<16x32xf32>
    %457 = arith.subf %434, %456 : vector<16x32xf32>
    %cst_150 = arith.constant dense<0.000000e+00> : vector<16xf32>
    %458 = vector.multi_reduction <add>, %457, %cst_150 [1] : vector<16x32xf32> to vector<16xf32>
    %459 = vector.shape_cast %458 : vector<16xf32> to vector<16x1xf32>
    %cst_151 = arith.constant 3.200000e+01 : f32
    %460 = vector.broadcast %cst_151 : f32 to vector<16x1xf32>
    %461 = arith.divf %459, %460 : vector<16x1xf32>
    %462 = vector.broadcast %461 : vector<16x1xf32> to vector<16x32xf32>
    %463 = arith.subf %457, %462 : vector<16x32xf32>
    %464 = arith.mulf %463, %463 : vector<16x32xf32>
    %cst_152 = arith.constant dense<0.000000e+00> : vector<16xf32>
    %465 = vector.multi_reduction <add>, %464, %cst_152 [1] : vector<16x32xf32> to vector<16xf32>
    %466 = vector.shape_cast %465 : vector<16xf32> to vector<16x1xf32>
    %cst_153 = arith.constant 3.200000e+01 : f32
    %467 = vector.broadcast %cst_153 : f32 to vector<16x1xf32>
    %468 = arith.divf %466, %467 : vector<16x1xf32>
    %469 = vector.broadcast %461 : vector<16x1xf32> to vector<16x32xf32>
    %470 = arith.subf %457, %469 : vector<16x32xf32>
    %cst_154 = arith.constant 9.99999974E-6 : f32
    %471 = vector.broadcast %cst_154 : f32 to vector<16x1xf32>
    %472 = arith.addf %468, %471 : vector<16x1xf32>
    %473 = math.rsqrt %472 : vector<16x1xf32>
    %474 = vector.broadcast %473 : vector<16x1xf32> to vector<16x32xf32>
    %475 = arith.mulf %470, %474 : vector<16x32xf32>
    %476 = arith.truncf %475 : vector<16x32xf32> to vector<16x32xbf16>
    %477 = vector.extract_strided_slice %282 {offsets = [0, 0], sizes = [32, 128], strides = [1, 1]} : vector<64x128xbf16> to vector<32x128xbf16>
    %cst_155 = arith.constant dense<0.000000e+00> : vector<16x128xf32>
    %478 = tpu.matmul %476, %477, %cst_155 {dimension_numbers = #tpu.dot_dimension_numbers<[1], [0], [0], [1], [0, 0, 1, 1], [], []>} : vector<16x32xbf16>, vector<32x128xbf16>, vector<16x128xf32> -> vector<16x128xf32>
    %479 = vector.extract_strided_slice %413 {offsets = [0, 32], sizes = [16, 32], strides = [1, 1]} : vector<16x128xf32> to vector<16x32xf32>
    %480 = vector.extract_strided_slice %414 {offsets = [0, 32], sizes = [16, 32], strides = [1, 1]} : vector<16x128xf32> to vector<16x32xf32>
    %481 = vector.extract_strided_slice %415 {offsets = [0, 32], sizes = [16, 32], strides = [1, 1]} : vector<16x128xf32> to vector<16x32xf32>
    %cst_156 = arith.constant dense<0.000000e+00> : vector<16x16xf32>
    %482 = tpu.matmul %479, %480, %cst_156 {dimension_numbers = #tpu.dot_dimension_numbers<[1], [1], [0], [0], [0, 0, 1, 0], [], []>} : vector<16x32xf32>, vector<16x32xf32>, vector<16x16xf32> -> vector<16x16xf32>
    %cst_157 = arith.constant 0.176776692 : f32
    %483 = vector.broadcast %cst_157 : f32 to vector<16x16xf32>
    %484 = arith.mulf %482, %483 : vector<16x16xf32>
    %cst_158 = arith.constant -1.000000e+30 : f32
    %485 = vector.broadcast %cst_158 : f32 to vector<16x16xf32>
    %486 = arith.select %25, %484, %485 : vector<16x16xi1>, vector<16x16xf32>
    %cst_159 = arith.constant dense<0xFF800000> : vector<16xf32>
    %487 = vector.multi_reduction <maximumf>, %486, %cst_159 [1] : vector<16x16xf32> to vector<16xf32>
    %488 = vector.shape_cast %487 : vector<16xf32> to vector<16x1xf32>
    %489 = vector.broadcast %488 : vector<16x1xf32> to vector<16x16xf32>
    %490 = arith.subf %486, %489 : vector<16x16xf32>
    %491 = math.exp %490 : vector<16x16xf32>
    %cst_160 = arith.constant dense<0.000000e+00> : vector<16xf32>
    %492 = vector.multi_reduction <add>, %491, %cst_160 [1] : vector<16x16xf32> to vector<16xf32>
    %493 = vector.shape_cast %492 : vector<16xf32> to vector<16x1xf32>
    %494 = tpu.reciprocal %493 {approx = true} : vector<16x1xf32> -> vector<16x1xf32>
    %495 = vector.broadcast %494 : vector<16x1xf32> to vector<16x16xf32>
    %496 = arith.mulf %491, %495 : vector<16x16xf32>
    %cst_161 = arith.constant dense<0.000000e+00> : vector<16x32xf32>
    %497 = tpu.matmul %496, %481, %cst_161 {dimension_numbers = #tpu.dot_dimension_numbers<[1], [0], [0], [1], [0, 0, 1, 1], [], []>} : vector<16x16xf32>, vector<16x32xf32>, vector<16x32xf32> -> vector<16x32xf32>
    %498 = vector.extract_strided_slice %413 {offsets = [0, 96], sizes = [16, 32], strides = [1, 1]} : vector<16x128xf32> to vector<16x32xf32>
    %499 = vector.extract_strided_slice %414 {offsets = [0, 96], sizes = [16, 32], strides = [1, 1]} : vector<16x128xf32> to vector<16x32xf32>
    %500 = vector.extract_strided_slice %415 {offsets = [0, 96], sizes = [16, 32], strides = [1, 1]} : vector<16x128xf32> to vector<16x32xf32>
    %cst_162 = arith.constant dense<0.000000e+00> : vector<16x16xf32>
    %501 = tpu.matmul %498, %499, %cst_162 {dimension_numbers = #tpu.dot_dimension_numbers<[1], [1], [0], [0], [0, 0, 1, 0], [], []>} : vector<16x32xf32>, vector<16x32xf32>, vector<16x16xf32> -> vector<16x16xf32>
    %cst_163 = arith.constant 0.176776692 : f32
    %502 = vector.broadcast %cst_163 : f32 to vector<16x16xf32>
    %503 = arith.mulf %501, %502 : vector<16x16xf32>
    %cst_164 = arith.constant -1.000000e+30 : f32
    %504 = vector.broadcast %cst_164 : f32 to vector<16x16xf32>
    %505 = arith.select %25, %503, %504 : vector<16x16xi1>, vector<16x16xf32>
    %cst_165 = arith.constant dense<0xFF800000> : vector<16xf32>
    %506 = vector.multi_reduction <maximumf>, %505, %cst_165 [1] : vector<16x16xf32> to vector<16xf32>
    %507 = vector.shape_cast %506 : vector<16xf32> to vector<16x1xf32>
    %508 = vector.broadcast %507 : vector<16x1xf32> to vector<16x16xf32>
    %509 = arith.subf %505, %508 : vector<16x16xf32>
    %510 = math.exp %509 : vector<16x16xf32>
    %cst_166 = arith.constant dense<0.000000e+00> : vector<16xf32>
    %511 = vector.multi_reduction <add>, %510, %cst_166 [1] : vector<16x16xf32> to vector<16xf32>
    %512 = vector.shape_cast %511 : vector<16xf32> to vector<16x1xf32>
    %513 = tpu.reciprocal %512 {approx = true} : vector<16x1xf32> -> vector<16x1xf32>
    %514 = vector.broadcast %513 : vector<16x1xf32> to vector<16x16xf32>
    %515 = arith.mulf %510, %514 : vector<16x16xf32>
    %cst_167 = arith.constant dense<0.000000e+00> : vector<16x32xf32>
    %516 = tpu.matmul %515, %500, %cst_167 {dimension_numbers = #tpu.dot_dimension_numbers<[1], [0], [0], [1], [0, 0, 1, 1], [], []>} : vector<16x16xf32>, vector<16x32xf32>, vector<16x32xf32> -> vector<16x32xf32>
    %517 = vector.extract_strided_slice %280 {offsets = [0, 32], sizes = [1, 32], strides = [1, 1]} : vector<1x64xf32> to vector<1x32xf32>
    %518 = vector.broadcast %517 : vector<1x32xf32> to vector<16x32xf32>
    %519 = arith.mulf %518, %516 : vector<16x32xf32>
    %520 = arith.subf %497, %519 : vector<16x32xf32>
    %cst_168 = arith.constant dense<0.000000e+00> : vector<16xf32>
    %521 = vector.multi_reduction <add>, %520, %cst_168 [1] : vector<16x32xf32> to vector<16xf32>
    %522 = vector.shape_cast %521 : vector<16xf32> to vector<16x1xf32>
    %cst_169 = arith.constant 3.200000e+01 : f32
    %523 = vector.broadcast %cst_169 : f32 to vector<16x1xf32>
    %524 = arith.divf %522, %523 : vector<16x1xf32>
    %525 = vector.broadcast %524 : vector<16x1xf32> to vector<16x32xf32>
    %526 = arith.subf %520, %525 : vector<16x32xf32>
    %527 = arith.mulf %526, %526 : vector<16x32xf32>
    %cst_170 = arith.constant dense<0.000000e+00> : vector<16xf32>
    %528 = vector.multi_reduction <add>, %527, %cst_170 [1] : vector<16x32xf32> to vector<16xf32>
    %529 = vector.shape_cast %528 : vector<16xf32> to vector<16x1xf32>
    %cst_171 = arith.constant 3.200000e+01 : f32
    %530 = vector.broadcast %cst_171 : f32 to vector<16x1xf32>
    %531 = arith.divf %529, %530 : vector<16x1xf32>
    %532 = vector.broadcast %524 : vector<16x1xf32> to vector<16x32xf32>
    %533 = arith.subf %520, %532 : vector<16x32xf32>
    %cst_172 = arith.constant 9.99999974E-6 : f32
    %534 = vector.broadcast %cst_172 : f32 to vector<16x1xf32>
    %535 = arith.addf %531, %534 : vector<16x1xf32>
    %536 = math.rsqrt %535 : vector<16x1xf32>
    %537 = vector.broadcast %536 : vector<16x1xf32> to vector<16x32xf32>
    %538 = arith.mulf %533, %537 : vector<16x32xf32>
    %539 = arith.truncf %538 : vector<16x32xf32> to vector<16x32xbf16>
    %540 = vector.extract_strided_slice %282 {offsets = [32, 0], sizes = [32, 128], strides = [1, 1]} : vector<64x128xbf16> to vector<32x128xbf16>
    %cst_173 = arith.constant dense<0.000000e+00> : vector<16x128xf32>
    %541 = tpu.matmul %539, %540, %cst_173 {dimension_numbers = #tpu.dot_dimension_numbers<[1], [0], [0], [1], [0, 0, 1, 1], [], []>} : vector<16x32xbf16>, vector<32x128xbf16>, vector<16x128xf32> -> vector<16x128xf32>
    %542 = arith.addf %478, %541 : vector<16x128xf32>
    %543 = tpu.concatenate %412, %542 in 0 : vector<16x128xf32>, vector<16x128xf32> -> vector<32x128xf32>
    %c0_174 = arith.constant 0 : index
    %c0_175 = arith.constant 0 : index
    %c0_176 = arith.constant 0 : index
    %544 = vector.load %arg14[%c0_174, %c0_175, %c0_176] : memref<2x1x128xf32, #tpu.memory_space<vmem>>, vector<1x1x128xf32>
    %545 = vector.shape_cast %544 : vector<1x1x128xf32> to vector<1x128xf32>
    %546 = vector.broadcast %545 : vector<1x128xf32> to vector<32x128xf32>
    %547 = arith.addf %543, %546 : vector<32x128xf32>
    %548 = arith.addf %236, %547 : vector<32x128xf32>
    %c0_177 = arith.constant 0 : index
    %c0_178 = arith.constant 0 : index
    %c0_179 = arith.constant 0 : index
    %549 = vector.load %arg16[%c0_177, %c0_178, %c0_179] : memref<2x1x128xf32, #tpu.memory_space<vmem>>, vector<1x1x128xf32>
    %550 = vector.shape_cast %549 : vector<1x1x128xf32> to vector<1x128xf32>
    %cst_180 = arith.constant 9.99999997E-7 : f32
    %551 = vector.broadcast %cst_180 : f32 to vector<32x128xf32>
    %552 = arith.addf %548, %551 : vector<32x128xf32>
    %cst_181 = arith.constant 9.99999997E-7 : f32
    %553 = vector.broadcast %cst_181 : f32 to vector<32x128xf32>
    %554 = arith.addf %552, %553 : vector<32x128xf32>
    %555 = arith.mulf %554, %554 : vector<32x128xf32>
    %cst_182 = arith.constant dense<0.000000e+00> : vector<32xf32>
    %556 = vector.multi_reduction <add>, %555, %cst_182 [1] : vector<32x128xf32> to vector<32xf32>
    %557 = vector.shape_cast %556 : vector<32xf32> to vector<32x1xf32>
    %558 = math.sqrt %557 : vector<32x1xf32>
    %cst_183 = arith.constant 11.3137083 : f32
    %559 = vector.broadcast %cst_183 : f32 to vector<32x1xf32>
    %560 = arith.mulf %558, %559 : vector<32x1xf32>
    %cst_184 = arith.constant 9.99999997E-7 : f32
    %561 = vector.broadcast %cst_184 : f32 to vector<32x1xf32>
    %562 = arith.addf %560, %561 : vector<32x1xf32>
    %563 = tpu.reciprocal %562 {approx = true} : vector<32x1xf32> -> vector<32x1xf32>
    %564 = vector.broadcast %563 : vector<32x1xf32> to vector<32x128xf32>
    %565 = arith.mulf %552, %564 : vector<32x128xf32>
    %566 = vector.broadcast %550 : vector<1x128xf32> to vector<32x128xf32>
    %567 = arith.mulf %565, %566 : vector<32x128xf32>
    %568 = arith.truncf %567 : vector<32x128xf32> to vector<32x128xbf16>
    %c0_185 = arith.constant 0 : index
    %c0_186 = arith.constant 0 : index
    %c0_187 = arith.constant 0 : index
    %569 = vector.load %arg17[%c0_185, %c0_186, %c0_187] : memref<2x128x512xbf16, #tpu.memory_space<vmem>>, vector<1x128x512xbf16>
    %570 = vector.shape_cast %569 : vector<1x128x512xbf16> to vector<128x512xbf16>
    %cst_188 = arith.constant dense<0.000000e+00> : vector<32x512xf32>
    %571 = tpu.matmul %568, %570, %cst_188 {dimension_numbers = #tpu.dot_dimension_numbers<[1], [0], [0], [1], [0, 0, 1, 1], [], []>} : vector<32x128xbf16>, vector<128x512xbf16>, vector<32x512xf32> -> vector<32x512xf32>
    %c0_189 = arith.constant 0 : index
    %c0_190 = arith.constant 0 : index
    %c0_191 = arith.constant 0 : index
    %572 = vector.load %arg18[%c0_189, %c0_190, %c0_191] : memref<2x1x512xf32, #tpu.memory_space<vmem>>, vector<1x1x512xf32>
    %573 = vector.shape_cast %572 : vector<1x1x512xf32> to vector<1x512xf32>
    %574 = vector.broadcast %573 : vector<1x512xf32> to vector<32x512xf32>
    %575 = arith.addf %571, %574 : vector<32x512xf32>
    %576 = vector.extract_strided_slice %575 {offsets = [0, 0], sizes = [32, 256], strides = [1, 1]} : vector<32x512xf32> to vector<32x256xf32>
    %577 = vector.extract_strided_slice %575 {offsets = [0, 256], sizes = [32, 256], strides = [1, 1]} : vector<32x512xf32> to vector<32x256xf32>
    %578 = arith.negf %576 : vector<32x256xf32>
    %579 = math.exp %578 : vector<32x256xf32>
    %cst_192 = arith.constant 1.000000e+00 : f32
    %580 = vector.broadcast %cst_192 : f32 to vector<32x256xf32>
    %581 = arith.addf %580, %579 : vector<32x256xf32>
    %582 = arith.divf %580, %581 : vector<32x256xf32>
    %583 = arith.mulf %576, %582 : vector<32x256xf32>
    %584 = arith.mulf %583, %577 : vector<32x256xf32>
    %585 = arith.truncf %584 : vector<32x256xf32> to vector<32x256xbf16>
    %c0_193 = arith.constant 0 : index
    %c0_194 = arith.constant 0 : index
    %c0_195 = arith.constant 0 : index
    %586 = vector.load %arg19[%c0_193, %c0_194, %c0_195] : memref<2x256x128xbf16, #tpu.memory_space<vmem>>, vector<1x256x128xbf16>
    %587 = vector.shape_cast %586 : vector<1x256x128xbf16> to vector<256x128xbf16>
    %cst_196 = arith.constant dense<0.000000e+00> : vector<32x128xf32>
    %588 = tpu.matmul %585, %587, %cst_196 {dimension_numbers = #tpu.dot_dimension_numbers<[1], [0], [0], [1], [0, 0, 1, 1], [], []>} : vector<32x256xbf16>, vector<256x128xbf16>, vector<32x128xf32> -> vector<32x128xf32>
    %c0_197 = arith.constant 0 : index
    %c0_198 = arith.constant 0 : index
    %c0_199 = arith.constant 0 : index
    %589 = vector.load %arg20[%c0_197, %c0_198, %c0_199] : memref<2x1x128xf32, #tpu.memory_space<vmem>>, vector<1x1x128xf32>
    %590 = vector.shape_cast %589 : vector<1x1x128xf32> to vector<1x128xf32>
    %591 = vector.broadcast %590 : vector<1x128xf32> to vector<32x128xf32>
    %592 = arith.addf %588, %591 : vector<32x128xf32>
    %593 = arith.addf %548, %592 : vector<32x128xf32>
    %c1 = arith.constant 1 : index
    %c0_200 = arith.constant 0 : index
    %c0_201 = arith.constant 0 : index
    %594 = vector.load %arg5[%c1, %c0_200, %c0_201] : memref<2x1x128xf32, #tpu.memory_space<vmem>>, vector<1x1x128xf32>
    %595 = vector.shape_cast %594 : vector<1x1x128xf32> to vector<1x128xf32>
    %cst_202 = arith.constant 9.99999997E-7 : f32
    %596 = vector.broadcast %cst_202 : f32 to vector<32x128xf32>
    %597 = arith.addf %593, %596 : vector<32x128xf32>
    %cst_203 = arith.constant 9.99999997E-7 : f32
    %598 = vector.broadcast %cst_203 : f32 to vector<32x128xf32>
    %599 = arith.addf %597, %598 : vector<32x128xf32>
    %600 = arith.mulf %599, %599 : vector<32x128xf32>
    %cst_204 = arith.constant dense<0.000000e+00> : vector<32xf32>
    %601 = vector.multi_reduction <add>, %600, %cst_204 [1] : vector<32x128xf32> to vector<32xf32>
    %602 = vector.shape_cast %601 : vector<32xf32> to vector<32x1xf32>
    %603 = math.sqrt %602 : vector<32x1xf32>
    %cst_205 = arith.constant 11.3137083 : f32
    %604 = vector.broadcast %cst_205 : f32 to vector<32x1xf32>
    %605 = arith.mulf %603, %604 : vector<32x1xf32>
    %cst_206 = arith.constant 9.99999997E-7 : f32
    %606 = vector.broadcast %cst_206 : f32 to vector<32x1xf32>
    %607 = arith.addf %605, %606 : vector<32x1xf32>
    %608 = tpu.reciprocal %607 {approx = true} : vector<32x1xf32> -> vector<32x1xf32>
    %609 = vector.broadcast %608 : vector<32x1xf32> to vector<32x128xf32>
    %610 = arith.mulf %597, %609 : vector<32x128xf32>
    %611 = vector.broadcast %595 : vector<1x128xf32> to vector<32x128xf32>
    %612 = arith.mulf %610, %611 : vector<32x128xf32>
    %613 = tpu.concatenate %612, %1 in 0 : vector<32x128xf32>, vector<16x128xf32> -> vector<48x128xf32>
    %614 = arith.truncf %613 : vector<48x128xf32> to vector<48x128xbf16>
    %c1_207 = arith.constant 1 : index
    %c0_208 = arith.constant 0 : index
    %c0_209 = arith.constant 0 : index
    %615 = vector.load %arg6[%c1_207, %c0_208, %c0_209] : memref<2x128x384xbf16, #tpu.memory_space<vmem>>, vector<1x128x384xbf16>
    %616 = vector.shape_cast %615 : vector<1x128x384xbf16> to vector<128x384xbf16>
    %cst_210 = arith.constant dense<0.000000e+00> : vector<48x384xf32>
    %617 = tpu.matmul %614, %616, %cst_210 {dimension_numbers = #tpu.dot_dimension_numbers<[1], [0], [0], [1], [0, 0, 1, 1], [], []>} : vector<48x128xbf16>, vector<128x384xbf16>, vector<48x384xf32> -> vector<48x384xf32>
    %c1_211 = arith.constant 1 : index
    %c0_212 = arith.constant 0 : index
    %c0_213 = arith.constant 0 : index
    %618 = vector.load %arg7[%c1_211, %c0_212, %c0_213] : memref<2x1x384xf32, #tpu.memory_space<vmem>>, vector<1x1x384xf32>
    %619 = vector.shape_cast %618 : vector<1x1x384xf32> to vector<1x384xf32>
    %620 = vector.broadcast %619 : vector<1x384xf32> to vector<48x384xf32>
    %621 = arith.addf %617, %620 : vector<48x384xf32>
    %622 = vector.extract_strided_slice %621 {offsets = [0, 0], sizes = [32, 128], strides = [1, 1]} : vector<48x384xf32> to vector<32x128xf32>
    %623 = vector.extract_strided_slice %621 {offsets = [32, 128], sizes = [16, 128], strides = [1, 1]} : vector<48x384xf32> to vector<16x128xf32>
    %624 = vector.extract_strided_slice %621 {offsets = [32, 256], sizes = [16, 128], strides = [1, 1]} : vector<48x384xf32> to vector<16x128xf32>
    %c1_214 = arith.constant 1 : index
    %c0_215 = arith.constant 0 : index
    %c0_216 = arith.constant 0 : index
    %625 = vector.load %arg8[%c1_214, %c0_215, %c0_216] : memref<2x128x128xbf16, #tpu.memory_space<vmem>>, vector<1x128x128xbf16>
    %626 = vector.shape_cast %625 : vector<1x128x128xbf16> to vector<128x128xbf16>
    %627 = vector.extract_strided_slice %622 {offsets = [0, 0], sizes = [16, 128], strides = [1, 1]} : vector<32x128xf32> to vector<16x128xf32>
    %628 = vector.extract_strided_slice %623 {offsets = [0, 0], sizes = [8, 128], strides = [1, 1]} : vector<16x128xf32> to vector<8x128xf32>
    %629 = vector.extract_strided_slice %624 {offsets = [0, 0], sizes = [8, 128], strides = [1, 1]} : vector<16x128xf32> to vector<8x128xf32>
    %630 = vector.extract_strided_slice %627 {offsets = [0, 0], sizes = [16, 32], strides = [1, 1]} : vector<16x128xf32> to vector<16x32xf32>
    %631 = vector.extract_strided_slice %628 {offsets = [0, 0], sizes = [8, 32], strides = [1, 1]} : vector<8x128xf32> to vector<8x32xf32>
    %632 = vector.extract_strided_slice %629 {offsets = [0, 0], sizes = [8, 32], strides = [1, 1]} : vector<8x128xf32> to vector<8x32xf32>
    %cst_217 = arith.constant dense<0.000000e+00> : vector<16x8xf32>
    %633 = tpu.matmul %630, %631, %cst_217 {dimension_numbers = #tpu.dot_dimension_numbers<[1], [1], [0], [0], [0, 0, 1, 0], [], []>} : vector<16x32xf32>, vector<8x32xf32>, vector<16x8xf32> -> vector<16x8xf32>
    %cst_218 = arith.constant 0.176776692 : f32
    %634 = vector.broadcast %cst_218 : f32 to vector<16x8xf32>
    %635 = arith.mulf %633, %634 : vector<16x8xf32>
    %cst_219 = arith.constant dense<0xFF800000> : vector<16xf32>
    %636 = vector.multi_reduction <maximumf>, %635, %cst_219 [1] : vector<16x8xf32> to vector<16xf32>
    %637 = vector.shape_cast %636 : vector<16xf32> to vector<16x1xf32>
    %638 = vector.broadcast %637 : vector<16x1xf32> to vector<16x8xf32>
    %639 = arith.subf %635, %638 : vector<16x8xf32>
    %640 = math.exp %639 : vector<16x8xf32>
    %cst_220 = arith.constant dense<0.000000e+00> : vector<16xf32>
    %641 = vector.multi_reduction <add>, %640, %cst_220 [1] : vector<16x8xf32> to vector<16xf32>
    %642 = vector.shape_cast %641 : vector<16xf32> to vector<16x1xf32>
    %643 = tpu.reciprocal %642 {approx = true} : vector<16x1xf32> -> vector<16x1xf32>
    %644 = vector.broadcast %643 : vector<16x1xf32> to vector<16x8xf32>
    %645 = arith.mulf %640, %644 : vector<16x8xf32>
    %cst_221 = arith.constant dense<0.000000e+00> : vector<16x32xf32>
    %646 = tpu.matmul %645, %632, %cst_221 {dimension_numbers = #tpu.dot_dimension_numbers<[1], [0], [0], [1], [0, 0, 1, 1], [], []>} : vector<16x8xf32>, vector<8x32xf32>, vector<16x32xf32> -> vector<16x32xf32>
    %647 = arith.truncf %646 : vector<16x32xf32> to vector<16x32xbf16>
    %648 = vector.extract_strided_slice %626 {offsets = [0, 0], sizes = [32, 128], strides = [1, 1]} : vector<128x128xbf16> to vector<32x128xbf16>
    %cst_222 = arith.constant dense<0.000000e+00> : vector<16x128xf32>
    %649 = tpu.matmul %647, %648, %cst_222 {dimension_numbers = #tpu.dot_dimension_numbers<[1], [0], [0], [1], [0, 0, 1, 1], [], []>} : vector<16x32xbf16>, vector<32x128xbf16>, vector<16x128xf32> -> vector<16x128xf32>
    %650 = vector.extract_strided_slice %627 {offsets = [0, 32], sizes = [16, 32], strides = [1, 1]} : vector<16x128xf32> to vector<16x32xf32>
    %651 = vector.extract_strided_slice %628 {offsets = [0, 32], sizes = [8, 32], strides = [1, 1]} : vector<8x128xf32> to vector<8x32xf32>
    %652 = vector.extract_strided_slice %629 {offsets = [0, 32], sizes = [8, 32], strides = [1, 1]} : vector<8x128xf32> to vector<8x32xf32>
    %cst_223 = arith.constant dense<0.000000e+00> : vector<16x8xf32>
    %653 = tpu.matmul %650, %651, %cst_223 {dimension_numbers = #tpu.dot_dimension_numbers<[1], [1], [0], [0], [0, 0, 1, 0], [], []>} : vector<16x32xf32>, vector<8x32xf32>, vector<16x8xf32> -> vector<16x8xf32>
    %cst_224 = arith.constant 0.176776692 : f32
    %654 = vector.broadcast %cst_224 : f32 to vector<16x8xf32>
    %655 = arith.mulf %653, %654 : vector<16x8xf32>
    %cst_225 = arith.constant dense<0xFF800000> : vector<16xf32>
    %656 = vector.multi_reduction <maximumf>, %655, %cst_225 [1] : vector<16x8xf32> to vector<16xf32>
    %657 = vector.shape_cast %656 : vector<16xf32> to vector<16x1xf32>
    %658 = vector.broadcast %657 : vector<16x1xf32> to vector<16x8xf32>
    %659 = arith.subf %655, %658 : vector<16x8xf32>
    %660 = math.exp %659 : vector<16x8xf32>
    %cst_226 = arith.constant dense<0.000000e+00> : vector<16xf32>
    %661 = vector.multi_reduction <add>, %660, %cst_226 [1] : vector<16x8xf32> to vector<16xf32>
    %662 = vector.shape_cast %661 : vector<16xf32> to vector<16x1xf32>
    %663 = tpu.reciprocal %662 {approx = true} : vector<16x1xf32> -> vector<16x1xf32>
    %664 = vector.broadcast %663 : vector<16x1xf32> to vector<16x8xf32>
    %665 = arith.mulf %660, %664 : vector<16x8xf32>
    %cst_227 = arith.constant dense<0.000000e+00> : vector<16x32xf32>
    %666 = tpu.matmul %665, %652, %cst_227 {dimension_numbers = #tpu.dot_dimension_numbers<[1], [0], [0], [1], [0, 0, 1, 1], [], []>} : vector<16x8xf32>, vector<8x32xf32>, vector<16x32xf32> -> vector<16x32xf32>
    %667 = arith.truncf %666 : vector<16x32xf32> to vector<16x32xbf16>
    %668 = vector.extract_strided_slice %626 {offsets = [32, 0], sizes = [32, 128], strides = [1, 1]} : vector<128x128xbf16> to vector<32x128xbf16>
    %cst_228 = arith.constant dense<0.000000e+00> : vector<16x128xf32>
    %669 = tpu.matmul %667, %668, %cst_228 {dimension_numbers = #tpu.dot_dimension_numbers<[1], [0], [0], [1], [0, 0, 1, 1], [], []>} : vector<16x32xbf16>, vector<32x128xbf16>, vector<16x128xf32> -> vector<16x128xf32>
    %670 = arith.addf %649, %669 : vector<16x128xf32>
    %671 = vector.extract_strided_slice %627 {offsets = [0, 64], sizes = [16, 32], strides = [1, 1]} : vector<16x128xf32> to vector<16x32xf32>
    %672 = vector.extract_strided_slice %628 {offsets = [0, 64], sizes = [8, 32], strides = [1, 1]} : vector<8x128xf32> to vector<8x32xf32>
    %673 = vector.extract_strided_slice %629 {offsets = [0, 64], sizes = [8, 32], strides = [1, 1]} : vector<8x128xf32> to vector<8x32xf32>
    %cst_229 = arith.constant dense<0.000000e+00> : vector<16x8xf32>
    %674 = tpu.matmul %671, %672, %cst_229 {dimension_numbers = #tpu.dot_dimension_numbers<[1], [1], [0], [0], [0, 0, 1, 0], [], []>} : vector<16x32xf32>, vector<8x32xf32>, vector<16x8xf32> -> vector<16x8xf32>
    %cst_230 = arith.constant 0.176776692 : f32
    %675 = vector.broadcast %cst_230 : f32 to vector<16x8xf32>
    %676 = arith.mulf %674, %675 : vector<16x8xf32>
    %cst_231 = arith.constant dense<0xFF800000> : vector<16xf32>
    %677 = vector.multi_reduction <maximumf>, %676, %cst_231 [1] : vector<16x8xf32> to vector<16xf32>
    %678 = vector.shape_cast %677 : vector<16xf32> to vector<16x1xf32>
    %679 = vector.broadcast %678 : vector<16x1xf32> to vector<16x8xf32>
    %680 = arith.subf %676, %679 : vector<16x8xf32>
    %681 = math.exp %680 : vector<16x8xf32>
    %cst_232 = arith.constant dense<0.000000e+00> : vector<16xf32>
    %682 = vector.multi_reduction <add>, %681, %cst_232 [1] : vector<16x8xf32> to vector<16xf32>
    %683 = vector.shape_cast %682 : vector<16xf32> to vector<16x1xf32>
    %684 = tpu.reciprocal %683 {approx = true} : vector<16x1xf32> -> vector<16x1xf32>
    %685 = vector.broadcast %684 : vector<16x1xf32> to vector<16x8xf32>
    %686 = arith.mulf %681, %685 : vector<16x8xf32>
    %cst_233 = arith.constant dense<0.000000e+00> : vector<16x32xf32>
    %687 = tpu.matmul %686, %673, %cst_233 {dimension_numbers = #tpu.dot_dimension_numbers<[1], [0], [0], [1], [0, 0, 1, 1], [], []>} : vector<16x8xf32>, vector<8x32xf32>, vector<16x32xf32> -> vector<16x32xf32>
    %688 = arith.truncf %687 : vector<16x32xf32> to vector<16x32xbf16>
    %689 = vector.extract_strided_slice %626 {offsets = [64, 0], sizes = [32, 128], strides = [1, 1]} : vector<128x128xbf16> to vector<32x128xbf16>
    %cst_234 = arith.constant dense<0.000000e+00> : vector<16x128xf32>
    %690 = tpu.matmul %688, %689, %cst_234 {dimension_numbers = #tpu.dot_dimension_numbers<[1], [0], [0], [1], [0, 0, 1, 1], [], []>} : vector<16x32xbf16>, vector<32x128xbf16>, vector<16x128xf32> -> vector<16x128xf32>
    %691 = arith.addf %670, %690 : vector<16x128xf32>
    %692 = vector.extract_strided_slice %627 {offsets = [0, 96], sizes = [16, 32], strides = [1, 1]} : vector<16x128xf32> to vector<16x32xf32>
    %693 = vector.extract_strided_slice %628 {offsets = [0, 96], sizes = [8, 32], strides = [1, 1]} : vector<8x128xf32> to vector<8x32xf32>
    %694 = vector.extract_strided_slice %629 {offsets = [0, 96], sizes = [8, 32], strides = [1, 1]} : vector<8x128xf32> to vector<8x32xf32>
    %cst_235 = arith.constant dense<0.000000e+00> : vector<16x8xf32>
    %695 = tpu.matmul %692, %693, %cst_235 {dimension_numbers = #tpu.dot_dimension_numbers<[1], [1], [0], [0], [0, 0, 1, 0], [], []>} : vector<16x32xf32>, vector<8x32xf32>, vector<16x8xf32> -> vector<16x8xf32>
    %cst_236 = arith.constant 0.176776692 : f32
    %696 = vector.broadcast %cst_236 : f32 to vector<16x8xf32>
    %697 = arith.mulf %695, %696 : vector<16x8xf32>
    %cst_237 = arith.constant dense<0xFF800000> : vector<16xf32>
    %698 = vector.multi_reduction <maximumf>, %697, %cst_237 [1] : vector<16x8xf32> to vector<16xf32>
    %699 = vector.shape_cast %698 : vector<16xf32> to vector<16x1xf32>
    %700 = vector.broadcast %699 : vector<16x1xf32> to vector<16x8xf32>
    %701 = arith.subf %697, %700 : vector<16x8xf32>
    %702 = math.exp %701 : vector<16x8xf32>
    %cst_238 = arith.constant dense<0.000000e+00> : vector<16xf32>
    %703 = vector.multi_reduction <add>, %702, %cst_238 [1] : vector<16x8xf32> to vector<16xf32>
    %704 = vector.shape_cast %703 : vector<16xf32> to vector<16x1xf32>
    %705 = tpu.reciprocal %704 {approx = true} : vector<16x1xf32> -> vector<16x1xf32>
    %706 = vector.broadcast %705 : vector<16x1xf32> to vector<16x8xf32>
    %707 = arith.mulf %702, %706 : vector<16x8xf32>
    %cst_239 = arith.constant dense<0.000000e+00> : vector<16x32xf32>
    %708 = tpu.matmul %707, %694, %cst_239 {dimension_numbers = #tpu.dot_dimension_numbers<[1], [0], [0], [1], [0, 0, 1, 1], [], []>} : vector<16x8xf32>, vector<8x32xf32>, vector<16x32xf32> -> vector<16x32xf32>
    %709 = arith.truncf %708 : vector<16x32xf32> to vector<16x32xbf16>
    %710 = vector.extract_strided_slice %626 {offsets = [96, 0], sizes = [32, 128], strides = [1, 1]} : vector<128x128xbf16> to vector<32x128xbf16>
    %cst_240 = arith.constant dense<0.000000e+00> : vector<16x128xf32>
    %711 = tpu.matmul %709, %710, %cst_240 {dimension_numbers = #tpu.dot_dimension_numbers<[1], [0], [0], [1], [0, 0, 1, 1], [], []>} : vector<16x32xbf16>, vector<32x128xbf16>, vector<16x128xf32> -> vector<16x128xf32>
    %712 = arith.addf %691, %711 : vector<16x128xf32>
    %713 = vector.extract_strided_slice %622 {offsets = [16, 0], sizes = [16, 128], strides = [1, 1]} : vector<32x128xf32> to vector<16x128xf32>
    %714 = vector.extract_strided_slice %623 {offsets = [8, 0], sizes = [8, 128], strides = [1, 1]} : vector<16x128xf32> to vector<8x128xf32>
    %715 = vector.extract_strided_slice %624 {offsets = [8, 0], sizes = [8, 128], strides = [1, 1]} : vector<16x128xf32> to vector<8x128xf32>
    %716 = vector.extract_strided_slice %713 {offsets = [0, 0], sizes = [16, 32], strides = [1, 1]} : vector<16x128xf32> to vector<16x32xf32>
    %717 = vector.extract_strided_slice %714 {offsets = [0, 0], sizes = [8, 32], strides = [1, 1]} : vector<8x128xf32> to vector<8x32xf32>
    %718 = vector.extract_strided_slice %715 {offsets = [0, 0], sizes = [8, 32], strides = [1, 1]} : vector<8x128xf32> to vector<8x32xf32>
    %cst_241 = arith.constant dense<0.000000e+00> : vector<16x8xf32>
    %719 = tpu.matmul %716, %717, %cst_241 {dimension_numbers = #tpu.dot_dimension_numbers<[1], [1], [0], [0], [0, 0, 1, 0], [], []>} : vector<16x32xf32>, vector<8x32xf32>, vector<16x8xf32> -> vector<16x8xf32>
    %cst_242 = arith.constant 0.176776692 : f32
    %720 = vector.broadcast %cst_242 : f32 to vector<16x8xf32>
    %721 = arith.mulf %719, %720 : vector<16x8xf32>
    %cst_243 = arith.constant dense<0xFF800000> : vector<16xf32>
    %722 = vector.multi_reduction <maximumf>, %721, %cst_243 [1] : vector<16x8xf32> to vector<16xf32>
    %723 = vector.shape_cast %722 : vector<16xf32> to vector<16x1xf32>
    %724 = vector.broadcast %723 : vector<16x1xf32> to vector<16x8xf32>
    %725 = arith.subf %721, %724 : vector<16x8xf32>
    %726 = math.exp %725 : vector<16x8xf32>
    %cst_244 = arith.constant dense<0.000000e+00> : vector<16xf32>
    %727 = vector.multi_reduction <add>, %726, %cst_244 [1] : vector<16x8xf32> to vector<16xf32>
    %728 = vector.shape_cast %727 : vector<16xf32> to vector<16x1xf32>
    %729 = tpu.reciprocal %728 {approx = true} : vector<16x1xf32> -> vector<16x1xf32>
    %730 = vector.broadcast %729 : vector<16x1xf32> to vector<16x8xf32>
    %731 = arith.mulf %726, %730 : vector<16x8xf32>
    %cst_245 = arith.constant dense<0.000000e+00> : vector<16x32xf32>
    %732 = tpu.matmul %731, %718, %cst_245 {dimension_numbers = #tpu.dot_dimension_numbers<[1], [0], [0], [1], [0, 0, 1, 1], [], []>} : vector<16x8xf32>, vector<8x32xf32>, vector<16x32xf32> -> vector<16x32xf32>
    %733 = arith.truncf %732 : vector<16x32xf32> to vector<16x32xbf16>
    %734 = vector.extract_strided_slice %626 {offsets = [0, 0], sizes = [32, 128], strides = [1, 1]} : vector<128x128xbf16> to vector<32x128xbf16>
    %cst_246 = arith.constant dense<0.000000e+00> : vector<16x128xf32>
    %735 = tpu.matmul %733, %734, %cst_246 {dimension_numbers = #tpu.dot_dimension_numbers<[1], [0], [0], [1], [0, 0, 1, 1], [], []>} : vector<16x32xbf16>, vector<32x128xbf16>, vector<16x128xf32> -> vector<16x128xf32>
    %736 = vector.extract_strided_slice %713 {offsets = [0, 32], sizes = [16, 32], strides = [1, 1]} : vector<16x128xf32> to vector<16x32xf32>
    %737 = vector.extract_strided_slice %714 {offsets = [0, 32], sizes = [8, 32], strides = [1, 1]} : vector<8x128xf32> to vector<8x32xf32>
    %738 = vector.extract_strided_slice %715 {offsets = [0, 32], sizes = [8, 32], strides = [1, 1]} : vector<8x128xf32> to vector<8x32xf32>
    %cst_247 = arith.constant dense<0.000000e+00> : vector<16x8xf32>
    %739 = tpu.matmul %736, %737, %cst_247 {dimension_numbers = #tpu.dot_dimension_numbers<[1], [1], [0], [0], [0, 0, 1, 0], [], []>} : vector<16x32xf32>, vector<8x32xf32>, vector<16x8xf32> -> vector<16x8xf32>
    %cst_248 = arith.constant 0.176776692 : f32
    %740 = vector.broadcast %cst_248 : f32 to vector<16x8xf32>
    %741 = arith.mulf %739, %740 : vector<16x8xf32>
    %cst_249 = arith.constant dense<0xFF800000> : vector<16xf32>
    %742 = vector.multi_reduction <maximumf>, %741, %cst_249 [1] : vector<16x8xf32> to vector<16xf32>
    %743 = vector.shape_cast %742 : vector<16xf32> to vector<16x1xf32>
    %744 = vector.broadcast %743 : vector<16x1xf32> to vector<16x8xf32>
    %745 = arith.subf %741, %744 : vector<16x8xf32>
    %746 = math.exp %745 : vector<16x8xf32>
    %cst_250 = arith.constant dense<0.000000e+00> : vector<16xf32>
    %747 = vector.multi_reduction <add>, %746, %cst_250 [1] : vector<16x8xf32> to vector<16xf32>
    %748 = vector.shape_cast %747 : vector<16xf32> to vector<16x1xf32>
    %749 = tpu.reciprocal %748 {approx = true} : vector<16x1xf32> -> vector<16x1xf32>
    %750 = vector.broadcast %749 : vector<16x1xf32> to vector<16x8xf32>
    %751 = arith.mulf %746, %750 : vector<16x8xf32>
    %cst_251 = arith.constant dense<0.000000e+00> : vector<16x32xf32>
    %752 = tpu.matmul %751, %738, %cst_251 {dimension_numbers = #tpu.dot_dimension_numbers<[1], [0], [0], [1], [0, 0, 1, 1], [], []>} : vector<16x8xf32>, vector<8x32xf32>, vector<16x32xf32> -> vector<16x32xf32>
    %753 = arith.truncf %752 : vector<16x32xf32> to vector<16x32xbf16>
    %754 = vector.extract_strided_slice %626 {offsets = [32, 0], sizes = [32, 128], strides = [1, 1]} : vector<128x128xbf16> to vector<32x128xbf16>
    %cst_252 = arith.constant dense<0.000000e+00> : vector<16x128xf32>
    %755 = tpu.matmul %753, %754, %cst_252 {dimension_numbers = #tpu.dot_dimension_numbers<[1], [0], [0], [1], [0, 0, 1, 1], [], []>} : vector<16x32xbf16>, vector<32x128xbf16>, vector<16x128xf32> -> vector<16x128xf32>
    %756 = arith.addf %735, %755 : vector<16x128xf32>
    %757 = vector.extract_strided_slice %713 {offsets = [0, 64], sizes = [16, 32], strides = [1, 1]} : vector<16x128xf32> to vector<16x32xf32>
    %758 = vector.extract_strided_slice %714 {offsets = [0, 64], sizes = [8, 32], strides = [1, 1]} : vector<8x128xf32> to vector<8x32xf32>
    %759 = vector.extract_strided_slice %715 {offsets = [0, 64], sizes = [8, 32], strides = [1, 1]} : vector<8x128xf32> to vector<8x32xf32>
    %cst_253 = arith.constant dense<0.000000e+00> : vector<16x8xf32>
    %760 = tpu.matmul %757, %758, %cst_253 {dimension_numbers = #tpu.dot_dimension_numbers<[1], [1], [0], [0], [0, 0, 1, 0], [], []>} : vector<16x32xf32>, vector<8x32xf32>, vector<16x8xf32> -> vector<16x8xf32>
    %cst_254 = arith.constant 0.176776692 : f32
    %761 = vector.broadcast %cst_254 : f32 to vector<16x8xf32>
    %762 = arith.mulf %760, %761 : vector<16x8xf32>
    %cst_255 = arith.constant dense<0xFF800000> : vector<16xf32>
    %763 = vector.multi_reduction <maximumf>, %762, %cst_255 [1] : vector<16x8xf32> to vector<16xf32>
    %764 = vector.shape_cast %763 : vector<16xf32> to vector<16x1xf32>
    %765 = vector.broadcast %764 : vector<16x1xf32> to vector<16x8xf32>
    %766 = arith.subf %762, %765 : vector<16x8xf32>
    %767 = math.exp %766 : vector<16x8xf32>
    %cst_256 = arith.constant dense<0.000000e+00> : vector<16xf32>
    %768 = vector.multi_reduction <add>, %767, %cst_256 [1] : vector<16x8xf32> to vector<16xf32>
    %769 = vector.shape_cast %768 : vector<16xf32> to vector<16x1xf32>
    %770 = tpu.reciprocal %769 {approx = true} : vector<16x1xf32> -> vector<16x1xf32>
    %771 = vector.broadcast %770 : vector<16x1xf32> to vector<16x8xf32>
    %772 = arith.mulf %767, %771 : vector<16x8xf32>
    %cst_257 = arith.constant dense<0.000000e+00> : vector<16x32xf32>
    %773 = tpu.matmul %772, %759, %cst_257 {dimension_numbers = #tpu.dot_dimension_numbers<[1], [0], [0], [1], [0, 0, 1, 1], [], []>} : vector<16x8xf32>, vector<8x32xf32>, vector<16x32xf32> -> vector<16x32xf32>
    %774 = arith.truncf %773 : vector<16x32xf32> to vector<16x32xbf16>
    %775 = vector.extract_strided_slice %626 {offsets = [64, 0], sizes = [32, 128], strides = [1, 1]} : vector<128x128xbf16> to vector<32x128xbf16>
    %cst_258 = arith.constant dense<0.000000e+00> : vector<16x128xf32>
    %776 = tpu.matmul %774, %775, %cst_258 {dimension_numbers = #tpu.dot_dimension_numbers<[1], [0], [0], [1], [0, 0, 1, 1], [], []>} : vector<16x32xbf16>, vector<32x128xbf16>, vector<16x128xf32> -> vector<16x128xf32>
    %777 = arith.addf %756, %776 : vector<16x128xf32>
    %778 = vector.extract_strided_slice %713 {offsets = [0, 96], sizes = [16, 32], strides = [1, 1]} : vector<16x128xf32> to vector<16x32xf32>
    %779 = vector.extract_strided_slice %714 {offsets = [0, 96], sizes = [8, 32], strides = [1, 1]} : vector<8x128xf32> to vector<8x32xf32>
    %780 = vector.extract_strided_slice %715 {offsets = [0, 96], sizes = [8, 32], strides = [1, 1]} : vector<8x128xf32> to vector<8x32xf32>
    %cst_259 = arith.constant dense<0.000000e+00> : vector<16x8xf32>
    %781 = tpu.matmul %778, %779, %cst_259 {dimension_numbers = #tpu.dot_dimension_numbers<[1], [1], [0], [0], [0, 0, 1, 0], [], []>} : vector<16x32xf32>, vector<8x32xf32>, vector<16x8xf32> -> vector<16x8xf32>
    %cst_260 = arith.constant 0.176776692 : f32
    %782 = vector.broadcast %cst_260 : f32 to vector<16x8xf32>
    %783 = arith.mulf %781, %782 : vector<16x8xf32>
    %cst_261 = arith.constant dense<0xFF800000> : vector<16xf32>
    %784 = vector.multi_reduction <maximumf>, %783, %cst_261 [1] : vector<16x8xf32> to vector<16xf32>
    %785 = vector.shape_cast %784 : vector<16xf32> to vector<16x1xf32>
    %786 = vector.broadcast %785 : vector<16x1xf32> to vector<16x8xf32>
    %787 = arith.subf %783, %786 : vector<16x8xf32>
    %788 = math.exp %787 : vector<16x8xf32>
    %cst_262 = arith.constant dense<0.000000e+00> : vector<16xf32>
    %789 = vector.multi_reduction <add>, %788, %cst_262 [1] : vector<16x8xf32> to vector<16xf32>
    %790 = vector.shape_cast %789 : vector<16xf32> to vector<16x1xf32>
    %791 = tpu.reciprocal %790 {approx = true} : vector<16x1xf32> -> vector<16x1xf32>
    %792 = vector.broadcast %791 : vector<16x1xf32> to vector<16x8xf32>
    %793 = arith.mulf %788, %792 : vector<16x8xf32>
    %cst_263 = arith.constant dense<0.000000e+00> : vector<16x32xf32>
    %794 = tpu.matmul %793, %780, %cst_263 {dimension_numbers = #tpu.dot_dimension_numbers<[1], [0], [0], [1], [0, 0, 1, 1], [], []>} : vector<16x8xf32>, vector<8x32xf32>, vector<16x32xf32> -> vector<16x32xf32>
    %795 = arith.truncf %794 : vector<16x32xf32> to vector<16x32xbf16>
    %796 = vector.extract_strided_slice %626 {offsets = [96, 0], sizes = [32, 128], strides = [1, 1]} : vector<128x128xbf16> to vector<32x128xbf16>
    %cst_264 = arith.constant dense<0.000000e+00> : vector<16x128xf32>
    %797 = tpu.matmul %795, %796, %cst_264 {dimension_numbers = #tpu.dot_dimension_numbers<[1], [0], [0], [1], [0, 0, 1, 1], [], []>} : vector<16x32xbf16>, vector<32x128xbf16>, vector<16x128xf32> -> vector<16x128xf32>
    %798 = arith.addf %777, %797 : vector<16x128xf32>
    %799 = tpu.concatenate %712, %798 in 0 : vector<16x128xf32>, vector<16x128xf32> -> vector<32x128xf32>
    %c1_265 = arith.constant 1 : index
    %c0_266 = arith.constant 0 : index
    %c0_267 = arith.constant 0 : index
    %800 = vector.load %arg9[%c1_265, %c0_266, %c0_267] : memref<2x1x128xf32, #tpu.memory_space<vmem>>, vector<1x1x128xf32>
    %801 = vector.shape_cast %800 : vector<1x1x128xf32> to vector<1x128xf32>
    %802 = vector.broadcast %801 : vector<1x128xf32> to vector<32x128xf32>
    %803 = arith.addf %799, %802 : vector<32x128xf32>
    %804 = arith.addf %593, %803 : vector<32x128xf32>
    %c1_268 = arith.constant 1 : index
    %c0_269 = arith.constant 0 : index
    %c0_270 = arith.constant 0 : index
    %805 = vector.load %arg10[%c1_268, %c0_269, %c0_270] : memref<2x1x128xf32, #tpu.memory_space<vmem>>, vector<1x1x128xf32>
    %806 = vector.shape_cast %805 : vector<1x1x128xf32> to vector<1x128xf32>
    %cst_271 = arith.constant 9.99999997E-7 : f32
    %807 = vector.broadcast %cst_271 : f32 to vector<32x128xf32>
    %808 = arith.addf %804, %807 : vector<32x128xf32>
    %cst_272 = arith.constant 9.99999997E-7 : f32
    %809 = vector.broadcast %cst_272 : f32 to vector<32x128xf32>
    %810 = arith.addf %808, %809 : vector<32x128xf32>
    %811 = arith.mulf %810, %810 : vector<32x128xf32>
    %cst_273 = arith.constant dense<0.000000e+00> : vector<32xf32>
    %812 = vector.multi_reduction <add>, %811, %cst_273 [1] : vector<32x128xf32> to vector<32xf32>
    %813 = vector.shape_cast %812 : vector<32xf32> to vector<32x1xf32>
    %814 = math.sqrt %813 : vector<32x1xf32>
    %cst_274 = arith.constant 11.3137083 : f32
    %815 = vector.broadcast %cst_274 : f32 to vector<32x1xf32>
    %816 = arith.mulf %814, %815 : vector<32x1xf32>
    %cst_275 = arith.constant 9.99999997E-7 : f32
    %817 = vector.broadcast %cst_275 : f32 to vector<32x1xf32>
    %818 = arith.addf %816, %817 : vector<32x1xf32>
    %819 = tpu.reciprocal %818 {approx = true} : vector<32x1xf32> -> vector<32x1xf32>
    %820 = vector.broadcast %819 : vector<32x1xf32> to vector<32x128xf32>
    %821 = arith.mulf %808, %820 : vector<32x128xf32>
    %822 = vector.broadcast %806 : vector<1x128xf32> to vector<32x128xf32>
    %823 = arith.mulf %821, %822 : vector<32x128xf32>
    %824 = arith.truncf %823 : vector<32x128xf32> to vector<32x128xbf16>
    %c1_276 = arith.constant 1 : index
    %c0_277 = arith.constant 0 : index
    %c0_278 = arith.constant 0 : index
    %825 = vector.load %arg11[%c1_276, %c0_277, %c0_278] : memref<2x128x384xbf16, #tpu.memory_space<vmem>>, vector<1x128x384xbf16>
    %826 = vector.shape_cast %825 : vector<1x128x384xbf16> to vector<128x384xbf16>
    %cst_279 = arith.constant dense<0.000000e+00> : vector<32x384xf32>
    %827 = tpu.matmul %824, %826, %cst_279 {dimension_numbers = #tpu.dot_dimension_numbers<[1], [0], [0], [1], [0, 0, 1, 1], [], []>} : vector<32x128xbf16>, vector<128x384xbf16>, vector<32x384xf32> -> vector<32x384xf32>
    %c1_280 = arith.constant 1 : index
    %c0_281 = arith.constant 0 : index
    %c0_282 = arith.constant 0 : index
    %828 = vector.load %arg12[%c1_280, %c0_281, %c0_282] : memref<2x1x384xf32, #tpu.memory_space<vmem>>, vector<1x1x384xf32>
    %829 = vector.shape_cast %828 : vector<1x1x384xf32> to vector<1x384xf32>
    %830 = vector.broadcast %829 : vector<1x384xf32> to vector<32x384xf32>
    %831 = arith.addf %827, %830 : vector<32x384xf32>
    %832 = vector.extract_strided_slice %831 {offsets = [0, 0], sizes = [32, 128], strides = [1, 1]} : vector<32x384xf32> to vector<32x128xf32>
    %c112_i32_283 = arith.constant 112 : i32
    %833 = tpu.dynamic_rotate %832 by %c112_i32_283 dim 1 : vector<32x128xf32>, i32 -> vector<32x128xf32>
    %c16_i32_284 = arith.constant 16 : i32
    %834 = tpu.dynamic_rotate %832 by %c16_i32_284 dim 1 : vector<32x128xf32>, i32 -> vector<32x128xf32>
    %835 = arith.select %22, %833, %834 : vector<32x128xi1>, vector<32x128xf32>
    %836 = arith.mulf %832, %2 : vector<32x128xf32>
    %837 = arith.mulf %835, %3 : vector<32x128xf32>
    %838 = arith.addf %836, %837 : vector<32x128xf32>
    %839 = vector.extract_strided_slice %831 {offsets = [0, 128], sizes = [32, 128], strides = [1, 1]} : vector<32x384xf32> to vector<32x128xf32>
    %c112_i32_285 = arith.constant 112 : i32
    %840 = tpu.dynamic_rotate %839 by %c112_i32_285 dim 1 : vector<32x128xf32>, i32 -> vector<32x128xf32>
    %c16_i32_286 = arith.constant 16 : i32
    %841 = tpu.dynamic_rotate %839 by %c16_i32_286 dim 1 : vector<32x128xf32>, i32 -> vector<32x128xf32>
    %842 = arith.select %22, %840, %841 : vector<32x128xi1>, vector<32x128xf32>
    %843 = arith.mulf %839, %2 : vector<32x128xf32>
    %844 = arith.mulf %842, %3 : vector<32x128xf32>
    %845 = arith.addf %843, %844 : vector<32x128xf32>
    %846 = vector.extract_strided_slice %831 {offsets = [0, 256], sizes = [32, 128], strides = [1, 1]} : vector<32x384xf32> to vector<32x128xf32>
    %c1_287 = arith.constant 1 : index
    %c0_288 = arith.constant 0 : index
    %c0_289 = arith.constant 0 : index
    %847 = vector.load %arg15[%c1_287, %c0_288, %c0_289] : memref<2x1x64xf32, #tpu.memory_space<vmem>>, vector<1x1x64xf32>
    %848 = vector.shape_cast %847 : vector<1x1x64xf32> to vector<1x64xf32>
    %c1_290 = arith.constant 1 : index
    %c0_291 = arith.constant 0 : index
    %c0_292 = arith.constant 0 : index
    %849 = vector.load %arg13[%c1_290, %c0_291, %c0_292] : memref<2x64x128xbf16, #tpu.memory_space<vmem>>, vector<1x64x128xbf16>
    %850 = vector.shape_cast %849 : vector<1x64x128xbf16> to vector<64x128xbf16>
    %851 = vector.extract_strided_slice %838 {offsets = [0, 0], sizes = [16, 128], strides = [1, 1]} : vector<32x128xf32> to vector<16x128xf32>
    %852 = vector.extract_strided_slice %845 {offsets = [0, 0], sizes = [16, 128], strides = [1, 1]} : vector<32x128xf32> to vector<16x128xf32>
    %853 = vector.extract_strided_slice %846 {offsets = [0, 0], sizes = [16, 128], strides = [1, 1]} : vector<32x128xf32> to vector<16x128xf32>
    %854 = vector.extract_strided_slice %851 {offsets = [0, 0], sizes = [16, 32], strides = [1, 1]} : vector<16x128xf32> to vector<16x32xf32>
    %855 = vector.extract_strided_slice %852 {offsets = [0, 0], sizes = [16, 32], strides = [1, 1]} : vector<16x128xf32> to vector<16x32xf32>
    %856 = vector.extract_strided_slice %853 {offsets = [0, 0], sizes = [16, 32], strides = [1, 1]} : vector<16x128xf32> to vector<16x32xf32>
    %cst_293 = arith.constant dense<0.000000e+00> : vector<16x16xf32>
    %857 = tpu.matmul %854, %855, %cst_293 {dimension_numbers = #tpu.dot_dimension_numbers<[1], [1], [0], [0], [0, 0, 1, 0], [], []>} : vector<16x32xf32>, vector<16x32xf32>, vector<16x16xf32> -> vector<16x16xf32>
    %cst_294 = arith.constant 0.176776692 : f32
    %858 = vector.broadcast %cst_294 : f32 to vector<16x16xf32>
    %859 = arith.mulf %857, %858 : vector<16x16xf32>
    %cst_295 = arith.constant -1.000000e+30 : f32
    %860 = vector.broadcast %cst_295 : f32 to vector<16x16xf32>
    %861 = arith.select %25, %859, %860 : vector<16x16xi1>, vector<16x16xf32>
    %cst_296 = arith.constant dense<0xFF800000> : vector<16xf32>
    %862 = vector.multi_reduction <maximumf>, %861, %cst_296 [1] : vector<16x16xf32> to vector<16xf32>
    %863 = vector.shape_cast %862 : vector<16xf32> to vector<16x1xf32>
    %864 = vector.broadcast %863 : vector<16x1xf32> to vector<16x16xf32>
    %865 = arith.subf %861, %864 : vector<16x16xf32>
    %866 = math.exp %865 : vector<16x16xf32>
    %cst_297 = arith.constant dense<0.000000e+00> : vector<16xf32>
    %867 = vector.multi_reduction <add>, %866, %cst_297 [1] : vector<16x16xf32> to vector<16xf32>
    %868 = vector.shape_cast %867 : vector<16xf32> to vector<16x1xf32>
    %869 = tpu.reciprocal %868 {approx = true} : vector<16x1xf32> -> vector<16x1xf32>
    %870 = vector.broadcast %869 : vector<16x1xf32> to vector<16x16xf32>
    %871 = arith.mulf %866, %870 : vector<16x16xf32>
    %cst_298 = arith.constant dense<0.000000e+00> : vector<16x32xf32>
    %872 = tpu.matmul %871, %856, %cst_298 {dimension_numbers = #tpu.dot_dimension_numbers<[1], [0], [0], [1], [0, 0, 1, 1], [], []>} : vector<16x16xf32>, vector<16x32xf32>, vector<16x32xf32> -> vector<16x32xf32>
    %873 = vector.extract_strided_slice %851 {offsets = [0, 64], sizes = [16, 32], strides = [1, 1]} : vector<16x128xf32> to vector<16x32xf32>
    %874 = vector.extract_strided_slice %852 {offsets = [0, 64], sizes = [16, 32], strides = [1, 1]} : vector<16x128xf32> to vector<16x32xf32>
    %875 = vector.extract_strided_slice %853 {offsets = [0, 64], sizes = [16, 32], strides = [1, 1]} : vector<16x128xf32> to vector<16x32xf32>
    %cst_299 = arith.constant dense<0.000000e+00> : vector<16x16xf32>
    %876 = tpu.matmul %873, %874, %cst_299 {dimension_numbers = #tpu.dot_dimension_numbers<[1], [1], [0], [0], [0, 0, 1, 0], [], []>} : vector<16x32xf32>, vector<16x32xf32>, vector<16x16xf32> -> vector<16x16xf32>
    %cst_300 = arith.constant 0.176776692 : f32
    %877 = vector.broadcast %cst_300 : f32 to vector<16x16xf32>
    %878 = arith.mulf %876, %877 : vector<16x16xf32>
    %cst_301 = arith.constant -1.000000e+30 : f32
    %879 = vector.broadcast %cst_301 : f32 to vector<16x16xf32>
    %880 = arith.select %25, %878, %879 : vector<16x16xi1>, vector<16x16xf32>
    %cst_302 = arith.constant dense<0xFF800000> : vector<16xf32>
    %881 = vector.multi_reduction <maximumf>, %880, %cst_302 [1] : vector<16x16xf32> to vector<16xf32>
    %882 = vector.shape_cast %881 : vector<16xf32> to vector<16x1xf32>
    %883 = vector.broadcast %882 : vector<16x1xf32> to vector<16x16xf32>
    %884 = arith.subf %880, %883 : vector<16x16xf32>
    %885 = math.exp %884 : vector<16x16xf32>
    %cst_303 = arith.constant dense<0.000000e+00> : vector<16xf32>
    %886 = vector.multi_reduction <add>, %885, %cst_303 [1] : vector<16x16xf32> to vector<16xf32>
    %887 = vector.shape_cast %886 : vector<16xf32> to vector<16x1xf32>
    %888 = tpu.reciprocal %887 {approx = true} : vector<16x1xf32> -> vector<16x1xf32>
    %889 = vector.broadcast %888 : vector<16x1xf32> to vector<16x16xf32>
    %890 = arith.mulf %885, %889 : vector<16x16xf32>
    %cst_304 = arith.constant dense<0.000000e+00> : vector<16x32xf32>
    %891 = tpu.matmul %890, %875, %cst_304 {dimension_numbers = #tpu.dot_dimension_numbers<[1], [0], [0], [1], [0, 0, 1, 1], [], []>} : vector<16x16xf32>, vector<16x32xf32>, vector<16x32xf32> -> vector<16x32xf32>
    %892 = vector.extract_strided_slice %848 {offsets = [0, 0], sizes = [1, 32], strides = [1, 1]} : vector<1x64xf32> to vector<1x32xf32>
    %893 = vector.broadcast %892 : vector<1x32xf32> to vector<16x32xf32>
    %894 = arith.mulf %893, %891 : vector<16x32xf32>
    %895 = arith.subf %872, %894 : vector<16x32xf32>
    %cst_305 = arith.constant dense<0.000000e+00> : vector<16xf32>
    %896 = vector.multi_reduction <add>, %895, %cst_305 [1] : vector<16x32xf32> to vector<16xf32>
    %897 = vector.shape_cast %896 : vector<16xf32> to vector<16x1xf32>
    %cst_306 = arith.constant 3.200000e+01 : f32
    %898 = vector.broadcast %cst_306 : f32 to vector<16x1xf32>
    %899 = arith.divf %897, %898 : vector<16x1xf32>
    %900 = vector.broadcast %899 : vector<16x1xf32> to vector<16x32xf32>
    %901 = arith.subf %895, %900 : vector<16x32xf32>
    %902 = arith.mulf %901, %901 : vector<16x32xf32>
    %cst_307 = arith.constant dense<0.000000e+00> : vector<16xf32>
    %903 = vector.multi_reduction <add>, %902, %cst_307 [1] : vector<16x32xf32> to vector<16xf32>
    %904 = vector.shape_cast %903 : vector<16xf32> to vector<16x1xf32>
    %cst_308 = arith.constant 3.200000e+01 : f32
    %905 = vector.broadcast %cst_308 : f32 to vector<16x1xf32>
    %906 = arith.divf %904, %905 : vector<16x1xf32>
    %907 = vector.broadcast %899 : vector<16x1xf32> to vector<16x32xf32>
    %908 = arith.subf %895, %907 : vector<16x32xf32>
    %cst_309 = arith.constant 9.99999974E-6 : f32
    %909 = vector.broadcast %cst_309 : f32 to vector<16x1xf32>
    %910 = arith.addf %906, %909 : vector<16x1xf32>
    %911 = math.rsqrt %910 : vector<16x1xf32>
    %912 = vector.broadcast %911 : vector<16x1xf32> to vector<16x32xf32>
    %913 = arith.mulf %908, %912 : vector<16x32xf32>
    %914 = arith.truncf %913 : vector<16x32xf32> to vector<16x32xbf16>
    %915 = vector.extract_strided_slice %850 {offsets = [0, 0], sizes = [32, 128], strides = [1, 1]} : vector<64x128xbf16> to vector<32x128xbf16>
    %cst_310 = arith.constant dense<0.000000e+00> : vector<16x128xf32>
    %916 = tpu.matmul %914, %915, %cst_310 {dimension_numbers = #tpu.dot_dimension_numbers<[1], [0], [0], [1], [0, 0, 1, 1], [], []>} : vector<16x32xbf16>, vector<32x128xbf16>, vector<16x128xf32> -> vector<16x128xf32>
    %917 = vector.extract_strided_slice %851 {offsets = [0, 32], sizes = [16, 32], strides = [1, 1]} : vector<16x128xf32> to vector<16x32xf32>
    %918 = vector.extract_strided_slice %852 {offsets = [0, 32], sizes = [16, 32], strides = [1, 1]} : vector<16x128xf32> to vector<16x32xf32>
    %919 = vector.extract_strided_slice %853 {offsets = [0, 32], sizes = [16, 32], strides = [1, 1]} : vector<16x128xf32> to vector<16x32xf32>
    %cst_311 = arith.constant dense<0.000000e+00> : vector<16x16xf32>
    %920 = tpu.matmul %917, %918, %cst_311 {dimension_numbers = #tpu.dot_dimension_numbers<[1], [1], [0], [0], [0, 0, 1, 0], [], []>} : vector<16x32xf32>, vector<16x32xf32>, vector<16x16xf32> -> vector<16x16xf32>
    %cst_312 = arith.constant 0.176776692 : f32
    %921 = vector.broadcast %cst_312 : f32 to vector<16x16xf32>
    %922 = arith.mulf %920, %921 : vector<16x16xf32>
    %cst_313 = arith.constant -1.000000e+30 : f32
    %923 = vector.broadcast %cst_313 : f32 to vector<16x16xf32>
    %924 = arith.select %25, %922, %923 : vector<16x16xi1>, vector<16x16xf32>
    %cst_314 = arith.constant dense<0xFF800000> : vector<16xf32>
    %925 = vector.multi_reduction <maximumf>, %924, %cst_314 [1] : vector<16x16xf32> to vector<16xf32>
    %926 = vector.shape_cast %925 : vector<16xf32> to vector<16x1xf32>
    %927 = vector.broadcast %926 : vector<16x1xf32> to vector<16x16xf32>
    %928 = arith.subf %924, %927 : vector<16x16xf32>
    %929 = math.exp %928 : vector<16x16xf32>
    %cst_315 = arith.constant dense<0.000000e+00> : vector<16xf32>
    %930 = vector.multi_reduction <add>, %929, %cst_315 [1] : vector<16x16xf32> to vector<16xf32>
    %931 = vector.shape_cast %930 : vector<16xf32> to vector<16x1xf32>
    %932 = tpu.reciprocal %931 {approx = true} : vector<16x1xf32> -> vector<16x1xf32>
    %933 = vector.broadcast %932 : vector<16x1xf32> to vector<16x16xf32>
    %934 = arith.mulf %929, %933 : vector<16x16xf32>
    %cst_316 = arith.constant dense<0.000000e+00> : vector<16x32xf32>
    %935 = tpu.matmul %934, %919, %cst_316 {dimension_numbers = #tpu.dot_dimension_numbers<[1], [0], [0], [1], [0, 0, 1, 1], [], []>} : vector<16x16xf32>, vector<16x32xf32>, vector<16x32xf32> -> vector<16x32xf32>
    %936 = vector.extract_strided_slice %851 {offsets = [0, 96], sizes = [16, 32], strides = [1, 1]} : vector<16x128xf32> to vector<16x32xf32>
    %937 = vector.extract_strided_slice %852 {offsets = [0, 96], sizes = [16, 32], strides = [1, 1]} : vector<16x128xf32> to vector<16x32xf32>
    %938 = vector.extract_strided_slice %853 {offsets = [0, 96], sizes = [16, 32], strides = [1, 1]} : vector<16x128xf32> to vector<16x32xf32>
    %cst_317 = arith.constant dense<0.000000e+00> : vector<16x16xf32>
    %939 = tpu.matmul %936, %937, %cst_317 {dimension_numbers = #tpu.dot_dimension_numbers<[1], [1], [0], [0], [0, 0, 1, 0], [], []>} : vector<16x32xf32>, vector<16x32xf32>, vector<16x16xf32> -> vector<16x16xf32>
    %cst_318 = arith.constant 0.176776692 : f32
    %940 = vector.broadcast %cst_318 : f32 to vector<16x16xf32>
    %941 = arith.mulf %939, %940 : vector<16x16xf32>
    %cst_319 = arith.constant -1.000000e+30 : f32
    %942 = vector.broadcast %cst_319 : f32 to vector<16x16xf32>
    %943 = arith.select %25, %941, %942 : vector<16x16xi1>, vector<16x16xf32>
    %cst_320 = arith.constant dense<0xFF800000> : vector<16xf32>
    %944 = vector.multi_reduction <maximumf>, %943, %cst_320 [1] : vector<16x16xf32> to vector<16xf32>
    %945 = vector.shape_cast %944 : vector<16xf32> to vector<16x1xf32>
    %946 = vector.broadcast %945 : vector<16x1xf32> to vector<16x16xf32>
    %947 = arith.subf %943, %946 : vector<16x16xf32>
    %948 = math.exp %947 : vector<16x16xf32>
    %cst_321 = arith.constant dense<0.000000e+00> : vector<16xf32>
    %949 = vector.multi_reduction <add>, %948, %cst_321 [1] : vector<16x16xf32> to vector<16xf32>
    %950 = vector.shape_cast %949 : vector<16xf32> to vector<16x1xf32>
    %951 = tpu.reciprocal %950 {approx = true} : vector<16x1xf32> -> vector<16x1xf32>
    %952 = vector.broadcast %951 : vector<16x1xf32> to vector<16x16xf32>
    %953 = arith.mulf %948, %952 : vector<16x16xf32>
    %cst_322 = arith.constant dense<0.000000e+00> : vector<16x32xf32>
    %954 = tpu.matmul %953, %938, %cst_322 {dimension_numbers = #tpu.dot_dimension_numbers<[1], [0], [0], [1], [0, 0, 1, 1], [], []>} : vector<16x16xf32>, vector<16x32xf32>, vector<16x32xf32> -> vector<16x32xf32>
    %955 = vector.extract_strided_slice %848 {offsets = [0, 32], sizes = [1, 32], strides = [1, 1]} : vector<1x64xf32> to vector<1x32xf32>
    %956 = vector.broadcast %955 : vector<1x32xf32> to vector<16x32xf32>
    %957 = arith.mulf %956, %954 : vector<16x32xf32>
    %958 = arith.subf %935, %957 : vector<16x32xf32>
    %cst_323 = arith.constant dense<0.000000e+00> : vector<16xf32>
    %959 = vector.multi_reduction <add>, %958, %cst_323 [1] : vector<16x32xf32> to vector<16xf32>
    %960 = vector.shape_cast %959 : vector<16xf32> to vector<16x1xf32>
    %cst_324 = arith.constant 3.200000e+01 : f32
    %961 = vector.broadcast %cst_324 : f32 to vector<16x1xf32>
    %962 = arith.divf %960, %961 : vector<16x1xf32>
    %963 = vector.broadcast %962 : vector<16x1xf32> to vector<16x32xf32>
    %964 = arith.subf %958, %963 : vector<16x32xf32>
    %965 = arith.mulf %964, %964 : vector<16x32xf32>
    %cst_325 = arith.constant dense<0.000000e+00> : vector<16xf32>
    %966 = vector.multi_reduction <add>, %965, %cst_325 [1] : vector<16x32xf32> to vector<16xf32>
    %967 = vector.shape_cast %966 : vector<16xf32> to vector<16x1xf32>
    %cst_326 = arith.constant 3.200000e+01 : f32
    %968 = vector.broadcast %cst_326 : f32 to vector<16x1xf32>
    %969 = arith.divf %967, %968 : vector<16x1xf32>
    %970 = vector.broadcast %962 : vector<16x1xf32> to vector<16x32xf32>
    %971 = arith.subf %958, %970 : vector<16x32xf32>
    %cst_327 = arith.constant 9.99999974E-6 : f32
    %972 = vector.broadcast %cst_327 : f32 to vector<16x1xf32>
    %973 = arith.addf %969, %972 : vector<16x1xf32>
    %974 = math.rsqrt %973 : vector<16x1xf32>
    %975 = vector.broadcast %974 : vector<16x1xf32> to vector<16x32xf32>
    %976 = arith.mulf %971, %975 : vector<16x32xf32>
    %977 = arith.truncf %976 : vector<16x32xf32> to vector<16x32xbf16>
    %978 = vector.extract_strided_slice %850 {offsets = [32, 0], sizes = [32, 128], strides = [1, 1]} : vector<64x128xbf16> to vector<32x128xbf16>
    %cst_328 = arith.constant dense<0.000000e+00> : vector<16x128xf32>
    %979 = tpu.matmul %977, %978, %cst_328 {dimension_numbers = #tpu.dot_dimension_numbers<[1], [0], [0], [1], [0, 0, 1, 1], [], []>} : vector<16x32xbf16>, vector<32x128xbf16>, vector<16x128xf32> -> vector<16x128xf32>
    %980 = arith.addf %916, %979 : vector<16x128xf32>
    %981 = vector.extract_strided_slice %838 {offsets = [16, 0], sizes = [16, 128], strides = [1, 1]} : vector<32x128xf32> to vector<16x128xf32>
    %982 = vector.extract_strided_slice %845 {offsets = [16, 0], sizes = [16, 128], strides = [1, 1]} : vector<32x128xf32> to vector<16x128xf32>
    %983 = vector.extract_strided_slice %846 {offsets = [16, 0], sizes = [16, 128], strides = [1, 1]} : vector<32x128xf32> to vector<16x128xf32>
    %984 = vector.extract_strided_slice %981 {offsets = [0, 0], sizes = [16, 32], strides = [1, 1]} : vector<16x128xf32> to vector<16x32xf32>
    %985 = vector.extract_strided_slice %982 {offsets = [0, 0], sizes = [16, 32], strides = [1, 1]} : vector<16x128xf32> to vector<16x32xf32>
    %986 = vector.extract_strided_slice %983 {offsets = [0, 0], sizes = [16, 32], strides = [1, 1]} : vector<16x128xf32> to vector<16x32xf32>
    %cst_329 = arith.constant dense<0.000000e+00> : vector<16x16xf32>
    %987 = tpu.matmul %984, %985, %cst_329 {dimension_numbers = #tpu.dot_dimension_numbers<[1], [1], [0], [0], [0, 0, 1, 0], [], []>} : vector<16x32xf32>, vector<16x32xf32>, vector<16x16xf32> -> vector<16x16xf32>
    %cst_330 = arith.constant 0.176776692 : f32
    %988 = vector.broadcast %cst_330 : f32 to vector<16x16xf32>
    %989 = arith.mulf %987, %988 : vector<16x16xf32>
    %cst_331 = arith.constant -1.000000e+30 : f32
    %990 = vector.broadcast %cst_331 : f32 to vector<16x16xf32>
    %991 = arith.select %25, %989, %990 : vector<16x16xi1>, vector<16x16xf32>
    %cst_332 = arith.constant dense<0xFF800000> : vector<16xf32>
    %992 = vector.multi_reduction <maximumf>, %991, %cst_332 [1] : vector<16x16xf32> to vector<16xf32>
    %993 = vector.shape_cast %992 : vector<16xf32> to vector<16x1xf32>
    %994 = vector.broadcast %993 : vector<16x1xf32> to vector<16x16xf32>
    %995 = arith.subf %991, %994 : vector<16x16xf32>
    %996 = math.exp %995 : vector<16x16xf32>
    %cst_333 = arith.constant dense<0.000000e+00> : vector<16xf32>
    %997 = vector.multi_reduction <add>, %996, %cst_333 [1] : vector<16x16xf32> to vector<16xf32>
    %998 = vector.shape_cast %997 : vector<16xf32> to vector<16x1xf32>
    %999 = tpu.reciprocal %998 {approx = true} : vector<16x1xf32> -> vector<16x1xf32>
    %1000 = vector.broadcast %999 : vector<16x1xf32> to vector<16x16xf32>
    %1001 = arith.mulf %996, %1000 : vector<16x16xf32>
    %cst_334 = arith.constant dense<0.000000e+00> : vector<16x32xf32>
    %1002 = tpu.matmul %1001, %986, %cst_334 {dimension_numbers = #tpu.dot_dimension_numbers<[1], [0], [0], [1], [0, 0, 1, 1], [], []>} : vector<16x16xf32>, vector<16x32xf32>, vector<16x32xf32> -> vector<16x32xf32>
    %1003 = vector.extract_strided_slice %981 {offsets = [0, 64], sizes = [16, 32], strides = [1, 1]} : vector<16x128xf32> to vector<16x32xf32>
    %1004 = vector.extract_strided_slice %982 {offsets = [0, 64], sizes = [16, 32], strides = [1, 1]} : vector<16x128xf32> to vector<16x32xf32>
    %1005 = vector.extract_strided_slice %983 {offsets = [0, 64], sizes = [16, 32], strides = [1, 1]} : vector<16x128xf32> to vector<16x32xf32>
    %cst_335 = arith.constant dense<0.000000e+00> : vector<16x16xf32>
    %1006 = tpu.matmul %1003, %1004, %cst_335 {dimension_numbers = #tpu.dot_dimension_numbers<[1], [1], [0], [0], [0, 0, 1, 0], [], []>} : vector<16x32xf32>, vector<16x32xf32>, vector<16x16xf32> -> vector<16x16xf32>
    %cst_336 = arith.constant 0.176776692 : f32
    %1007 = vector.broadcast %cst_336 : f32 to vector<16x16xf32>
    %1008 = arith.mulf %1006, %1007 : vector<16x16xf32>
    %cst_337 = arith.constant -1.000000e+30 : f32
    %1009 = vector.broadcast %cst_337 : f32 to vector<16x16xf32>
    %1010 = arith.select %25, %1008, %1009 : vector<16x16xi1>, vector<16x16xf32>
    %cst_338 = arith.constant dense<0xFF800000> : vector<16xf32>
    %1011 = vector.multi_reduction <maximumf>, %1010, %cst_338 [1] : vector<16x16xf32> to vector<16xf32>
    %1012 = vector.shape_cast %1011 : vector<16xf32> to vector<16x1xf32>
    %1013 = vector.broadcast %1012 : vector<16x1xf32> to vector<16x16xf32>
    %1014 = arith.subf %1010, %1013 : vector<16x16xf32>
    %1015 = math.exp %1014 : vector<16x16xf32>
    %cst_339 = arith.constant dense<0.000000e+00> : vector<16xf32>
    %1016 = vector.multi_reduction <add>, %1015, %cst_339 [1] : vector<16x16xf32> to vector<16xf32>
    %1017 = vector.shape_cast %1016 : vector<16xf32> to vector<16x1xf32>
    %1018 = tpu.reciprocal %1017 {approx = true} : vector<16x1xf32> -> vector<16x1xf32>
    %1019 = vector.broadcast %1018 : vector<16x1xf32> to vector<16x16xf32>
    %1020 = arith.mulf %1015, %1019 : vector<16x16xf32>
    %cst_340 = arith.constant dense<0.000000e+00> : vector<16x32xf32>
    %1021 = tpu.matmul %1020, %1005, %cst_340 {dimension_numbers = #tpu.dot_dimension_numbers<[1], [0], [0], [1], [0, 0, 1, 1], [], []>} : vector<16x16xf32>, vector<16x32xf32>, vector<16x32xf32> -> vector<16x32xf32>
    %1022 = vector.extract_strided_slice %848 {offsets = [0, 0], sizes = [1, 32], strides = [1, 1]} : vector<1x64xf32> to vector<1x32xf32>
    %1023 = vector.broadcast %1022 : vector<1x32xf32> to vector<16x32xf32>
    %1024 = arith.mulf %1023, %1021 : vector<16x32xf32>
    %1025 = arith.subf %1002, %1024 : vector<16x32xf32>
    %cst_341 = arith.constant dense<0.000000e+00> : vector<16xf32>
    %1026 = vector.multi_reduction <add>, %1025, %cst_341 [1] : vector<16x32xf32> to vector<16xf32>
    %1027 = vector.shape_cast %1026 : vector<16xf32> to vector<16x1xf32>
    %cst_342 = arith.constant 3.200000e+01 : f32
    %1028 = vector.broadcast %cst_342 : f32 to vector<16x1xf32>
    %1029 = arith.divf %1027, %1028 : vector<16x1xf32>
    %1030 = vector.broadcast %1029 : vector<16x1xf32> to vector<16x32xf32>
    %1031 = arith.subf %1025, %1030 : vector<16x32xf32>
    %1032 = arith.mulf %1031, %1031 : vector<16x32xf32>
    %cst_343 = arith.constant dense<0.000000e+00> : vector<16xf32>
    %1033 = vector.multi_reduction <add>, %1032, %cst_343 [1] : vector<16x32xf32> to vector<16xf32>
    %1034 = vector.shape_cast %1033 : vector<16xf32> to vector<16x1xf32>
    %cst_344 = arith.constant 3.200000e+01 : f32
    %1035 = vector.broadcast %cst_344 : f32 to vector<16x1xf32>
    %1036 = arith.divf %1034, %1035 : vector<16x1xf32>
    %1037 = vector.broadcast %1029 : vector<16x1xf32> to vector<16x32xf32>
    %1038 = arith.subf %1025, %1037 : vector<16x32xf32>
    %cst_345 = arith.constant 9.99999974E-6 : f32
    %1039 = vector.broadcast %cst_345 : f32 to vector<16x1xf32>
    %1040 = arith.addf %1036, %1039 : vector<16x1xf32>
    %1041 = math.rsqrt %1040 : vector<16x1xf32>
    %1042 = vector.broadcast %1041 : vector<16x1xf32> to vector<16x32xf32>
    %1043 = arith.mulf %1038, %1042 : vector<16x32xf32>
    %1044 = arith.truncf %1043 : vector<16x32xf32> to vector<16x32xbf16>
    %1045 = vector.extract_strided_slice %850 {offsets = [0, 0], sizes = [32, 128], strides = [1, 1]} : vector<64x128xbf16> to vector<32x128xbf16>
    %cst_346 = arith.constant dense<0.000000e+00> : vector<16x128xf32>
    %1046 = tpu.matmul %1044, %1045, %cst_346 {dimension_numbers = #tpu.dot_dimension_numbers<[1], [0], [0], [1], [0, 0, 1, 1], [], []>} : vector<16x32xbf16>, vector<32x128xbf16>, vector<16x128xf32> -> vector<16x128xf32>
    %1047 = vector.extract_strided_slice %981 {offsets = [0, 32], sizes = [16, 32], strides = [1, 1]} : vector<16x128xf32> to vector<16x32xf32>
    %1048 = vector.extract_strided_slice %982 {offsets = [0, 32], sizes = [16, 32], strides = [1, 1]} : vector<16x128xf32> to vector<16x32xf32>
    %1049 = vector.extract_strided_slice %983 {offsets = [0, 32], sizes = [16, 32], strides = [1, 1]} : vector<16x128xf32> to vector<16x32xf32>
    %cst_347 = arith.constant dense<0.000000e+00> : vector<16x16xf32>
    %1050 = tpu.matmul %1047, %1048, %cst_347 {dimension_numbers = #tpu.dot_dimension_numbers<[1], [1], [0], [0], [0, 0, 1, 0], [], []>} : vector<16x32xf32>, vector<16x32xf32>, vector<16x16xf32> -> vector<16x16xf32>
    %cst_348 = arith.constant 0.176776692 : f32
    %1051 = vector.broadcast %cst_348 : f32 to vector<16x16xf32>
    %1052 = arith.mulf %1050, %1051 : vector<16x16xf32>
    %cst_349 = arith.constant -1.000000e+30 : f32
    %1053 = vector.broadcast %cst_349 : f32 to vector<16x16xf32>
    %1054 = arith.select %25, %1052, %1053 : vector<16x16xi1>, vector<16x16xf32>
    %cst_350 = arith.constant dense<0xFF800000> : vector<16xf32>
    %1055 = vector.multi_reduction <maximumf>, %1054, %cst_350 [1] : vector<16x16xf32> to vector<16xf32>
    %1056 = vector.shape_cast %1055 : vector<16xf32> to vector<16x1xf32>
    %1057 = vector.broadcast %1056 : vector<16x1xf32> to vector<16x16xf32>
    %1058 = arith.subf %1054, %1057 : vector<16x16xf32>
    %1059 = math.exp %1058 : vector<16x16xf32>
    %cst_351 = arith.constant dense<0.000000e+00> : vector<16xf32>
    %1060 = vector.multi_reduction <add>, %1059, %cst_351 [1] : vector<16x16xf32> to vector<16xf32>
    %1061 = vector.shape_cast %1060 : vector<16xf32> to vector<16x1xf32>
    %1062 = tpu.reciprocal %1061 {approx = true} : vector<16x1xf32> -> vector<16x1xf32>
    %1063 = vector.broadcast %1062 : vector<16x1xf32> to vector<16x16xf32>
    %1064 = arith.mulf %1059, %1063 : vector<16x16xf32>
    %cst_352 = arith.constant dense<0.000000e+00> : vector<16x32xf32>
    %1065 = tpu.matmul %1064, %1049, %cst_352 {dimension_numbers = #tpu.dot_dimension_numbers<[1], [0], [0], [1], [0, 0, 1, 1], [], []>} : vector<16x16xf32>, vector<16x32xf32>, vector<16x32xf32> -> vector<16x32xf32>
    %1066 = vector.extract_strided_slice %981 {offsets = [0, 96], sizes = [16, 32], strides = [1, 1]} : vector<16x128xf32> to vector<16x32xf32>
    %1067 = vector.extract_strided_slice %982 {offsets = [0, 96], sizes = [16, 32], strides = [1, 1]} : vector<16x128xf32> to vector<16x32xf32>
    %1068 = vector.extract_strided_slice %983 {offsets = [0, 96], sizes = [16, 32], strides = [1, 1]} : vector<16x128xf32> to vector<16x32xf32>
    %cst_353 = arith.constant dense<0.000000e+00> : vector<16x16xf32>
    %1069 = tpu.matmul %1066, %1067, %cst_353 {dimension_numbers = #tpu.dot_dimension_numbers<[1], [1], [0], [0], [0, 0, 1, 0], [], []>} : vector<16x32xf32>, vector<16x32xf32>, vector<16x16xf32> -> vector<16x16xf32>
    %cst_354 = arith.constant 0.176776692 : f32
    %1070 = vector.broadcast %cst_354 : f32 to vector<16x16xf32>
    %1071 = arith.mulf %1069, %1070 : vector<16x16xf32>
    %cst_355 = arith.constant -1.000000e+30 : f32
    %1072 = vector.broadcast %cst_355 : f32 to vector<16x16xf32>
    %1073 = arith.select %25, %1071, %1072 : vector<16x16xi1>, vector<16x16xf32>
    %cst_356 = arith.constant dense<0xFF800000> : vector<16xf32>
    %1074 = vector.multi_reduction <maximumf>, %1073, %cst_356 [1] : vector<16x16xf32> to vector<16xf32>
    %1075 = vector.shape_cast %1074 : vector<16xf32> to vector<16x1xf32>
    %1076 = vector.broadcast %1075 : vector<16x1xf32> to vector<16x16xf32>
    %1077 = arith.subf %1073, %1076 : vector<16x16xf32>
    %1078 = math.exp %1077 : vector<16x16xf32>
    %cst_357 = arith.constant dense<0.000000e+00> : vector<16xf32>
    %1079 = vector.multi_reduction <add>, %1078, %cst_357 [1] : vector<16x16xf32> to vector<16xf32>
    %1080 = vector.shape_cast %1079 : vector<16xf32> to vector<16x1xf32>
    %1081 = tpu.reciprocal %1080 {approx = true} : vector<16x1xf32> -> vector<16x1xf32>
    %1082 = vector.broadcast %1081 : vector<16x1xf32> to vector<16x16xf32>
    %1083 = arith.mulf %1078, %1082 : vector<16x16xf32>
    %cst_358 = arith.constant dense<0.000000e+00> : vector<16x32xf32>
    %1084 = tpu.matmul %1083, %1068, %cst_358 {dimension_numbers = #tpu.dot_dimension_numbers<[1], [0], [0], [1], [0, 0, 1, 1], [], []>} : vector<16x16xf32>, vector<16x32xf32>, vector<16x32xf32> -> vector<16x32xf32>
    %1085 = vector.extract_strided_slice %848 {offsets = [0, 32], sizes = [1, 32], strides = [1, 1]} : vector<1x64xf32> to vector<1x32xf32>
    %1086 = vector.broadcast %1085 : vector<1x32xf32> to vector<16x32xf32>
    %1087 = arith.mulf %1086, %1084 : vector<16x32xf32>
    %1088 = arith.subf %1065, %1087 : vector<16x32xf32>
    %cst_359 = arith.constant dense<0.000000e+00> : vector<16xf32>
    %1089 = vector.multi_reduction <add>, %1088, %cst_359 [1] : vector<16x32xf32> to vector<16xf32>
    %1090 = vector.shape_cast %1089 : vector<16xf32> to vector<16x1xf32>
    %cst_360 = arith.constant 3.200000e+01 : f32
    %1091 = vector.broadcast %cst_360 : f32 to vector<16x1xf32>
    %1092 = arith.divf %1090, %1091 : vector<16x1xf32>
    %1093 = vector.broadcast %1092 : vector<16x1xf32> to vector<16x32xf32>
    %1094 = arith.subf %1088, %1093 : vector<16x32xf32>
    %1095 = arith.mulf %1094, %1094 : vector<16x32xf32>
    %cst_361 = arith.constant dense<0.000000e+00> : vector<16xf32>
    %1096 = vector.multi_reduction <add>, %1095, %cst_361 [1] : vector<16x32xf32> to vector<16xf32>
    %1097 = vector.shape_cast %1096 : vector<16xf32> to vector<16x1xf32>
    %cst_362 = arith.constant 3.200000e+01 : f32
    %1098 = vector.broadcast %cst_362 : f32 to vector<16x1xf32>
    %1099 = arith.divf %1097, %1098 : vector<16x1xf32>
    %1100 = vector.broadcast %1092 : vector<16x1xf32> to vector<16x32xf32>
    %1101 = arith.subf %1088, %1100 : vector<16x32xf32>
    %cst_363 = arith.constant 9.99999974E-6 : f32
    %1102 = vector.broadcast %cst_363 : f32 to vector<16x1xf32>
    %1103 = arith.addf %1099, %1102 : vector<16x1xf32>
    %1104 = math.rsqrt %1103 : vector<16x1xf32>
    %1105 = vector.broadcast %1104 : vector<16x1xf32> to vector<16x32xf32>
    %1106 = arith.mulf %1101, %1105 : vector<16x32xf32>
    %1107 = arith.truncf %1106 : vector<16x32xf32> to vector<16x32xbf16>
    %1108 = vector.extract_strided_slice %850 {offsets = [32, 0], sizes = [32, 128], strides = [1, 1]} : vector<64x128xbf16> to vector<32x128xbf16>
    %cst_364 = arith.constant dense<0.000000e+00> : vector<16x128xf32>
    %1109 = tpu.matmul %1107, %1108, %cst_364 {dimension_numbers = #tpu.dot_dimension_numbers<[1], [0], [0], [1], [0, 0, 1, 1], [], []>} : vector<16x32xbf16>, vector<32x128xbf16>, vector<16x128xf32> -> vector<16x128xf32>
    %1110 = arith.addf %1046, %1109 : vector<16x128xf32>
    %1111 = tpu.concatenate %980, %1110 in 0 : vector<16x128xf32>, vector<16x128xf32> -> vector<32x128xf32>
    %c1_365 = arith.constant 1 : index
    %c0_366 = arith.constant 0 : index
    %c0_367 = arith.constant 0 : index
    %1112 = vector.load %arg14[%c1_365, %c0_366, %c0_367] : memref<2x1x128xf32, #tpu.memory_space<vmem>>, vector<1x1x128xf32>
    %1113 = vector.shape_cast %1112 : vector<1x1x128xf32> to vector<1x128xf32>
    %1114 = vector.broadcast %1113 : vector<1x128xf32> to vector<32x128xf32>
    %1115 = arith.addf %1111, %1114 : vector<32x128xf32>
    %1116 = arith.addf %804, %1115 : vector<32x128xf32>
    %c1_368 = arith.constant 1 : index
    %c0_369 = arith.constant 0 : index
    %c0_370 = arith.constant 0 : index
    %1117 = vector.load %arg16[%c1_368, %c0_369, %c0_370] : memref<2x1x128xf32, #tpu.memory_space<vmem>>, vector<1x1x128xf32>
    %1118 = vector.shape_cast %1117 : vector<1x1x128xf32> to vector<1x128xf32>
    %cst_371 = arith.constant 9.99999997E-7 : f32
    %1119 = vector.broadcast %cst_371 : f32 to vector<32x128xf32>
    %1120 = arith.addf %1116, %1119 : vector<32x128xf32>
    %cst_372 = arith.constant 9.99999997E-7 : f32
    %1121 = vector.broadcast %cst_372 : f32 to vector<32x128xf32>
    %1122 = arith.addf %1120, %1121 : vector<32x128xf32>
    %1123 = arith.mulf %1122, %1122 : vector<32x128xf32>
    %cst_373 = arith.constant dense<0.000000e+00> : vector<32xf32>
    %1124 = vector.multi_reduction <add>, %1123, %cst_373 [1] : vector<32x128xf32> to vector<32xf32>
    %1125 = vector.shape_cast %1124 : vector<32xf32> to vector<32x1xf32>
    %1126 = math.sqrt %1125 : vector<32x1xf32>
    %cst_374 = arith.constant 11.3137083 : f32
    %1127 = vector.broadcast %cst_374 : f32 to vector<32x1xf32>
    %1128 = arith.mulf %1126, %1127 : vector<32x1xf32>
    %cst_375 = arith.constant 9.99999997E-7 : f32
    %1129 = vector.broadcast %cst_375 : f32 to vector<32x1xf32>
    %1130 = arith.addf %1128, %1129 : vector<32x1xf32>
    %1131 = tpu.reciprocal %1130 {approx = true} : vector<32x1xf32> -> vector<32x1xf32>
    %1132 = vector.broadcast %1131 : vector<32x1xf32> to vector<32x128xf32>
    %1133 = arith.mulf %1120, %1132 : vector<32x128xf32>
    %1134 = vector.broadcast %1118 : vector<1x128xf32> to vector<32x128xf32>
    %1135 = arith.mulf %1133, %1134 : vector<32x128xf32>
    %1136 = arith.truncf %1135 : vector<32x128xf32> to vector<32x128xbf16>
    %c1_376 = arith.constant 1 : index
    %c0_377 = arith.constant 0 : index
    %c0_378 = arith.constant 0 : index
    %1137 = vector.load %arg17[%c1_376, %c0_377, %c0_378] : memref<2x128x512xbf16, #tpu.memory_space<vmem>>, vector<1x128x512xbf16>
    %1138 = vector.shape_cast %1137 : vector<1x128x512xbf16> to vector<128x512xbf16>
    %cst_379 = arith.constant dense<0.000000e+00> : vector<32x512xf32>
    %1139 = tpu.matmul %1136, %1138, %cst_379 {dimension_numbers = #tpu.dot_dimension_numbers<[1], [0], [0], [1], [0, 0, 1, 1], [], []>} : vector<32x128xbf16>, vector<128x512xbf16>, vector<32x512xf32> -> vector<32x512xf32>
    %c1_380 = arith.constant 1 : index
    %c0_381 = arith.constant 0 : index
    %c0_382 = arith.constant 0 : index
    %1140 = vector.load %arg18[%c1_380, %c0_381, %c0_382] : memref<2x1x512xf32, #tpu.memory_space<vmem>>, vector<1x1x512xf32>
    %1141 = vector.shape_cast %1140 : vector<1x1x512xf32> to vector<1x512xf32>
    %1142 = vector.broadcast %1141 : vector<1x512xf32> to vector<32x512xf32>
    %1143 = arith.addf %1139, %1142 : vector<32x512xf32>
    %1144 = vector.extract_strided_slice %1143 {offsets = [0, 0], sizes = [32, 256], strides = [1, 1]} : vector<32x512xf32> to vector<32x256xf32>
    %1145 = vector.extract_strided_slice %1143 {offsets = [0, 256], sizes = [32, 256], strides = [1, 1]} : vector<32x512xf32> to vector<32x256xf32>
    %1146 = arith.negf %1144 : vector<32x256xf32>
    %1147 = math.exp %1146 : vector<32x256xf32>
    %cst_383 = arith.constant 1.000000e+00 : f32
    %1148 = vector.broadcast %cst_383 : f32 to vector<32x256xf32>
    %1149 = arith.addf %1148, %1147 : vector<32x256xf32>
    %1150 = arith.divf %1148, %1149 : vector<32x256xf32>
    %1151 = arith.mulf %1144, %1150 : vector<32x256xf32>
    %1152 = arith.mulf %1151, %1145 : vector<32x256xf32>
    %1153 = arith.truncf %1152 : vector<32x256xf32> to vector<32x256xbf16>
    %c1_384 = arith.constant 1 : index
    %c0_385 = arith.constant 0 : index
    %c0_386 = arith.constant 0 : index
    %1154 = vector.load %arg19[%c1_384, %c0_385, %c0_386] : memref<2x256x128xbf16, #tpu.memory_space<vmem>>, vector<1x256x128xbf16>
    %1155 = vector.shape_cast %1154 : vector<1x256x128xbf16> to vector<256x128xbf16>
    %cst_387 = arith.constant dense<0.000000e+00> : vector<32x128xf32>
    %1156 = tpu.matmul %1153, %1155, %cst_387 {dimension_numbers = #tpu.dot_dimension_numbers<[1], [0], [0], [1], [0, 0, 1, 1], [], []>} : vector<32x256xbf16>, vector<256x128xbf16>, vector<32x128xf32> -> vector<32x128xf32>
    %c1_388 = arith.constant 1 : index
    %c0_389 = arith.constant 0 : index
    %c0_390 = arith.constant 0 : index
    %1157 = vector.load %arg20[%c1_388, %c0_389, %c0_390] : memref<2x1x128xf32, #tpu.memory_space<vmem>>, vector<1x1x128xf32>
    %1158 = vector.shape_cast %1157 : vector<1x1x128xf32> to vector<1x128xf32>
    %1159 = vector.broadcast %1158 : vector<1x128xf32> to vector<32x128xf32>
    %1160 = arith.addf %1156, %1159 : vector<32x128xf32>
    %1161 = arith.addf %1116, %1160 : vector<32x128xf32>
    %1162 = arith.truncf %1161 : vector<32x128xf32> to vector<32x128xbf16>
    %c0_391 = arith.constant 0 : index
    %c0_392 = arith.constant 0 : index
    %1163 = vector.load %arg21[%c0_391, %c0_392] : memref<128x256xbf16, #tpu.memory_space<vmem>>, vector<128x256xbf16>
    %cst_393 = arith.constant dense<0.000000e+00> : vector<32x256xf32>
    %1164 = tpu.matmul %1162, %1163, %cst_393 {dimension_numbers = #tpu.dot_dimension_numbers<[1], [0], [0], [1], [0, 0, 1, 1], [], []>} : vector<32x128xbf16>, vector<128x256xbf16>, vector<32x256xf32> -> vector<32x256xf32>
    %c0_394 = arith.constant 0 : index
    %c0_395 = arith.constant 0 : index
    %1165 = vector.load %arg22[%c0_394, %c0_395] : memref<1x256xf32, #tpu.memory_space<vmem>>, vector<1x256xf32>
    %1166 = vector.broadcast %1165 : vector<1x256xf32> to vector<32x256xf32>
    %1167 = arith.addf %1164, %1166 : vector<32x256xf32>
    %c0_396 = arith.constant 0 : index
    %c0_397 = arith.constant 0 : index
    %1168 = vector.load %arg23[%c0_396, %c0_397] : memref<32x256xf32, #tpu.memory_space<vmem>>, vector<32x256xf32>
    tpu.vector_store %arg23[%c0_396, %c0_397], %1167 {strides = array<i32>} : memref<32x256xf32, #tpu.memory_space<vmem>>, vector<32x256xf32>,
    return
  }
  func.func @transform_0(%arg0: i32) -> (i32, i32) {
    %c0_i32 = arith.constant 0 : i32
    %c0_i32_0 = arith.constant 0 : i32
    return %arg0, %c0_i32 : i32, i32
  }
  func.func @transform_1(%arg0: i32) -> (i32, i32) {
    %c0_i32 = arith.constant 0 : i32
    %c0_i32_0 = arith.constant 0 : i32
    return %arg0, %c0_i32 : i32, i32
  }
  func.func @transform_2(%arg0: i32) -> (i32, i32) {
    %c0_i32 = arith.constant 0 : i32
    %c0_i32_0 = arith.constant 0 : i32
    return %arg0, %c0_i32 : i32, i32
  }
  func.func @transform_3(%arg0: i32) -> (i32, i32) {
    %c0_i32 = arith.constant 0 : i32
    %c0_i32_0 = arith.constant 0 : i32
    return %arg0, %c0_i32 : i32, i32
  }
  func.func @transform_4(%arg0: i32) -> (i32, i32, i32) {
    %c0_i32 = arith.constant 0 : i32
    %c0_i32_0 = arith.constant 0 : i32
    %c0_i32_1 = arith.constant 0 : i32
    %c0_i32_2 = arith.constant 0 : i32
    return %c0_i32, %c0_i32_0, %c0_i32_1 : i32, i32, i32
  }
  func.func @transform_5(%arg0: i32) -> (i32, i32, i32) {
    %c0_i32 = arith.constant 0 : i32
    %c0_i32_0 = arith.constant 0 : i32
    %c0_i32_1 = arith.constant 0 : i32
    %c0_i32_2 = arith.constant 0 : i32
    return %c0_i32, %c0_i32_0, %c0_i32_1 : i32, i32, i32
  }
  func.func @transform_6(%arg0: i32) -> (i32, i32, i32) {
    %c0_i32 = arith.constant 0 : i32
    %c0_i32_0 = arith.constant 0 : i32
    %c0_i32_1 = arith.constant 0 : i32
    %c0_i32_2 = arith.constant 0 : i32
    return %c0_i32, %c0_i32_0, %c0_i32_1 : i32, i32, i32
  }
  func.func @transform_7(%arg0: i32) -> (i32, i32, i32) {
    %c0_i32 = arith.constant 0 : i32
    %c0_i32_0 = arith.constant 0 : i32
    %c0_i32_1 = arith.constant 0 : i32
    %c0_i32_2 = arith.constant 0 : i32
    return %c0_i32, %c0_i32_0, %c0_i32_1 : i32, i32, i32
  }
  func.func @transform_8(%arg0: i32) -> (i32, i32, i32) {
    %c0_i32 = arith.constant 0 : i32
    %c0_i32_0 = arith.constant 0 : i32
    %c0_i32_1 = arith.constant 0 : i32
    %c0_i32_2 = arith.constant 0 : i32
    return %c0_i32, %c0_i32_0, %c0_i32_1 : i32, i32, i32
  }
  func.func @transform_9(%arg0: i32) -> (i32, i32, i32) {
    %c0_i32 = arith.constant 0 : i32
    %c0_i32_0 = arith.constant 0 : i32
    %c0_i32_1 = arith.constant 0 : i32
    %c0_i32_2 = arith.constant 0 : i32
    return %c0_i32, %c0_i32_0, %c0_i32_1 : i32, i32, i32
  }
  func.func @transform_10(%arg0: i32) -> (i32, i32, i32) {
    %c0_i32 = arith.constant 0 : i32
    %c0_i32_0 = arith.constant 0 : i32
    %c0_i32_1 = arith.constant 0 : i32
    %c0_i32_2 = arith.constant 0 : i32
    return %c0_i32, %c0_i32_0, %c0_i32_1 : i32, i32, i32
  }
  func.func @transform_11(%arg0: i32) -> (i32, i32, i32) {
    %c0_i32 = arith.constant 0 : i32
    %c0_i32_0 = arith.constant 0 : i32
    %c0_i32_1 = arith.constant 0 : i32
    %c0_i32_2 = arith.constant 0 : i32
    return %c0_i32, %c0_i32_0, %c0_i32_1 : i32, i32, i32
  }
  func.func @transform_12(%arg0: i32) -> (i32, i32, i32) {
    %c0_i32 = arith.constant 0 : i32
    %c0_i32_0 = arith.constant 0 : i32
    %c0_i32_1 = arith.constant 0 : i32
    %c0_i32_2 = arith.constant 0 : i32
    return %c0_i32, %c0_i32_0, %c0_i32_1 : i32, i32, i32
  }
  func.func @transform_13(%arg0: i32) -> (i32, i32, i32) {
    %c0_i32 = arith.constant 0 : i32
    %c0_i32_0 = arith.constant 0 : i32
    %c0_i32_1 = arith.constant 0 : i32
    %c0_i32_2 = arith.constant 0 : i32
    return %c0_i32, %c0_i32_0, %c0_i32_1 : i32, i32, i32
  }
  func.func @transform_14(%arg0: i32) -> (i32, i32, i32) {
    %c0_i32 = arith.constant 0 : i32
    %c0_i32_0 = arith.constant 0 : i32
    %c0_i32_1 = arith.constant 0 : i32
    %c0_i32_2 = arith.constant 0 : i32
    return %c0_i32, %c0_i32_0, %c0_i32_1 : i32, i32, i32
  }
  func.func @transform_15(%arg0: i32) -> (i32, i32, i32) {
    %c0_i32 = arith.constant 0 : i32
    %c0_i32_0 = arith.constant 0 : i32
    %c0_i32_1 = arith.constant 0 : i32
    %c0_i32_2 = arith.constant 0 : i32
    return %c0_i32, %c0_i32_0, %c0_i32_1 : i32, i32, i32
  }
  func.func @transform_16(%arg0: i32) -> (i32, i32, i32) {
    %c0_i32 = arith.constant 0 : i32
    %c0_i32_0 = arith.constant 0 : i32
    %c0_i32_1 = arith.constant 0 : i32
    %c0_i32_2 = arith.constant 0 : i32
    return %c0_i32, %c0_i32_0, %c0_i32_1 : i32, i32, i32
  }
  func.func @transform_17(%arg0: i32) -> (i32, i32, i32) {
    %c0_i32 = arith.constant 0 : i32
    %c0_i32_0 = arith.constant 0 : i32
    %c0_i32_1 = arith.constant 0 : i32
    %c0_i32_2 = arith.constant 0 : i32
    return %c0_i32, %c0_i32_0, %c0_i32_1 : i32, i32, i32
  }
  func.func @transform_18(%arg0: i32) -> (i32, i32, i32) {
    %c0_i32 = arith.constant 0 : i32
    %c0_i32_0 = arith.constant 0 : i32
    %c0_i32_1 = arith.constant 0 : i32
    %c0_i32_2 = arith.constant 0 : i32
    return %c0_i32, %c0_i32_0, %c0_i32_1 : i32, i32, i32
  }
  func.func @transform_19(%arg0: i32) -> (i32, i32, i32) {
    %c0_i32 = arith.constant 0 : i32
    %c0_i32_0 = arith.constant 0 : i32
    %c0_i32_1 = arith.constant 0 : i32
    %c0_i32_2 = arith.constant 0 : i32
    return %c0_i32, %c0_i32_0, %c0_i32_1 : i32, i32, i32
  }
  func.func @transform_20(%arg0: i32) -> (i32, i32) {
    %c0_i32 = arith.constant 0 : i32
    %c0_i32_0 = arith.constant 0 : i32
    %c0_i32_1 = arith.constant 0 : i32
    return %c0_i32, %c0_i32_0 : i32, i32
  }
  func.func @transform_21(%arg0: i32) -> (i32, i32) {
    %c0_i32 = arith.constant 0 : i32
    %c0_i32_0 = arith.constant 0 : i32
    %c0_i32_1 = arith.constant 0 : i32
    return %c0_i32, %c0_i32_0 : i32, i32
  }
  func.func @transform_22(%arg0: i32) -> (i32, i32) {
    %c0_i32 = arith.constant 0 : i32
    %c0_i32_0 = arith.constant 0 : i32
    return %arg0, %c0_i32 : i32, i32
  }
}

</mosaic_0001>

<bundles_post_ra>
// kernel: local_decoder_forward.1
= control target key start
LH: loop header
LB: loop body
LE: loop exit
PB: predicated region body
PF: predicated region fallthrough
CT: control target
= control target key end

     0   :  { %s16384_s0 = inlined_call_operand.vmem [shape: f32[32,128], index: 0, kind: input, shape index: {}]   ;;  %s16385_s1 = inlined_call_operand.hbm [shape: f32[16,128], index: 1, kind: input, shape index: {}]   ;;  %s16386_s2 = inlined_call_operand.hbm [shape: f32[32,128], index: 2, kind: input, shape index: {}]   ;;  %s16387_s3 = inlined_call_operand.hbm [shape: f32[32,128], index: 3, kind: input, shape index: {}]   ;;  %s16388_s4 = inlined_call_operand.hbm [shape: f32[2,1,128], index: 4, kind: input, shape index: {}]   ;;  %s16389_s5 = inlined_call_operand.hbm [shape: bf16[2,128,384], index: 5, kind: input, shape index: {}]   ;;  %s16390_s6 = inlined_call_operand.hbm [shape: f32[2,1,384], index: 6, kind: input, shape index: {}]   ;;  %s16391_s7 = inlined_call_operand.hbm [shape: bf16[2,128,128], index: 7, kind: input, shape index: {}]   ;;  %s16392_s8 = inlined_call_operand.hbm [shape: f32[2,1,128], index: 8, kind: input, shape index: {}]   ;;  %s16393_s9 = inlined_call_operand.hbm [shape: f32[2,1,128], index: 9, kind: input, shape index: {}]   ;;  %s16394_s10 = inlined_call_operand.hbm [shape: bf16[2,128,384], index: 10, kind: input, shape index: {}]   ;;  %s16395_s11 = inlined_call_operand.hbm [shape: f32[2,1,384], index: 11, kind: input, shape index: {}]   ;;  %s16396_s12 = inlined_call_operand.hbm [shape: bf16[2,64,128], index: 12, kind: input, shape index: {}]   ;;  %s16397_s13 = inlined_call_operand.hbm [shape: f32[2,1,128], index: 13, kind: input, shape index: {}]   ;;  %s16398_s14 = inlined_call_operand.hbm [shape: f32[2,1,64], index: 14, kind: input, shape index: {}]   ;;  %s16399_s15 = inlined_call_operand.hbm [shape: f32[2,1,128], index: 15, kind: input, shape index: {}]   ;;  %s16400_s16 = inlined_call_operand.hbm [shape: bf16[2,128,512], index: 16, kind: input, shape index: {}]   ;;  %s16401_s17 = inlined_call_operand.vmem [shape: f32[2,1,512], index: 17, kind: input, shape index: {}]   ;;  %s16402_s18 = inlined_call_operand.hbm [shape: bf16[2,256,128], index: 18, kind: input, shape index: {}]   ;;  %s16403_s19 = inlined_call_operand.hbm [shape: f32[2,1,128], index: 19, kind: input, shape index: {}]   ;;  %s16404_s20 = inlined_call_operand.hbm [shape: bf16[128,256], index: 20, kind: input, shape index: {}]   ;;  %s16405_s21 = inlined_call_operand.hbm [shape: f32[1,256], index: 21, kind: input, shape index: {}]   ;;  %s16406_s22 = inlined_call_operand.hbm [shape: f32[32,256], index: 22, kind: output, shape index: {}]  }
   0x1   :  { %16412 = sst [smem:[#allocation47_spill]] %s16384_s0 }
   0x2   :  { %16413 = sst [smem:[#allocation48_spill]] %s16385_s1 }
   0x3   :  { %16414 = sst [smem:[#allocation49_spill]] %s16386_s2 }
   0x4   :  { %16415 = sst [smem:[#allocation50_spill]] %s16387_s3 }
   0x5   :  { %16416 = sst [smem:[#allocation51_spill]] %s16388_s4 }
   0x6   :  { %16417 = sst [smem:[#allocation52_spill]] %s16389_s5 }
   0x7   :  { %16418 = sst [smem:[#allocation53_spill]] %s16390_s6 }
   0x8   :  { %27 = vsyncpa [#allocation3], 0 }
   0x9   :  { %28 = vsyncpa [#allocation6], 0 }
   0xa   :  { %29 = vsyncpa [#allocation9], 0 }
   0xb   :  { %30 = vsyncpa [#allocation12], 0 }
   0xc   :  { %31 = vsyncpa [#allocation15], 0 }
   0xd   :  { %32 = vsyncpa [#allocation18], 0 }
   0xe   :  { %33 = vsyncpa [#allocation21], 0 }
   0xf   :  { %34 = vsyncpa [#allocation24], 0 }
  0x10   :  { %35 = vsyncpa [#allocation27], 0 }
  0x11   :  { %36 = vsyncpa [#allocation30], 0 }
  0x12   :  { %37 = vsyncpa [#allocation33], 0 }
  0x13   :  { %38 = vsyncpa [#allocation4], 0  ;;  %s14242_s3 = smov [#allocation5]   ;;  %s14243_s29 = smov [#allocation8]  }
  0x14   :  { %s58_s28 = sshll.u32 %s14242_s3, 4  ;;  %s82_s30 = sshll.u32 %s14243_s29, 4  ;;  %s59_s28 = int_to_ptr.vmem [resolvable:$true] %s58_s28  ;;  %s83_s30 = int_to_ptr.vmem [resolvable:$true] %s82_s30 }
  0x15   :  { %s13806_s4 = scalar_lea.vmem %s59_s28, 512  ;;  %p13811_p1 = scmp.lt.s32.totalorder %s59_s28, %s59_s28 }
  0x16   :  { %p13807_p0 = scmp.ne.s32.totalorder %s59_s28, %s13806_s4  ;;  %p13812_p2 = scmp.lt.s32.totalorder %s13806_s4, %s13806_s4 }
  0x18   :  { %p13813_p3 = por %p13812_p2, %p13811_p1 }
  0x1a   :  { %p13814_p4 = pnand %p13813_p3, %p13807_p0 }
  0x1c   :  { %13817 = shalt.err (!%p13814_p4)
}
  0x1d   :  { %s16408_s0 = smov 128   ;;  %s14245_s23 = smov 8  }
  0x1e   :  { %s16419_s24 = sld [smem:[#allocation49_spill]]  ;;  %s13826_s6 = scalar_lea.vmem %s83_s30, 32 }
  0x1f   :  { %p13827_p5 = scmp.ne.s32.totalorder %s83_s30, %s13826_s6  ;;  %p13831_p6 = scmp.lt.s32.totalorder %s83_s30, %s83_s30 }
  0x20   :  { %p13832_p7 = scmp.lt.s32.totalorder %s13826_s6, %s13826_s6 }
  0x22   :  { %p13833_p8 = por %p13832_p7, %p13831_p6 }
  0x24   :  { %64 = dma.hbm_to_vmem [thread:$0]  %s16419_s24, 512, %s59_s28, [#allocation6], %s16408_s0, %s16408_s0, %s14245_s23  }
  0x25   :  { %p13834_p9 = pnand %p13833_p8, %p13827_p5 }
  0x27   :  { %13837 = shalt.err (!%p13834_p9)
}
  0x28   :  { %s14246_s25 = smov 16   ;;  %s14247_s26 = smov 1  }
  0x29   :  { %s16420_s3 = sld [smem:[#allocation51_spill]]  ;;  %s14248_s29 = smov [#allocation11]  }
  0x2a   :  { %s106_s4 = sshll.u32 %s14248_s29, 4  ;;  %s107_s4 = int_to_ptr.vmem [resolvable:$true] %s106_s4 }
  0x2b   :  { %s13846_s28 = scalar_lea.vmem %s107_s4, 96  ;;  %p13851_p11 = scmp.lt.s32.totalorder %s107_s4, %s107_s4 }
  0x2c   :  { %p13847_p10 = scmp.ne.s32.totalorder %s107_s4, %s13846_s28  ;;  %p13852_p12 = scmp.lt.s32.totalorder %s13846_s28, %s13846_s28 }
  0x2e   :  { %p13853_p13 = por %p13852_p12, %p13851_p11 }
  0x2f   :  { %88 = dma.hbm_to_vmem [thread:$0]  %s16420_s3, 32, %s83_s30, [#allocation9], %s14246_s25, %s14246_s25, %s14247_s26  }
  0x30   :  { %p13854_p0 = pnand %p13853_p13, %p13847_p10 }
  0x32   :  { %13857 = shalt.err (!%p13854_p0)
}
  0x33   :  { %s16410_s1 = smov 48   ;;  %s16411_s5 = smov 3  }
  0x34   :  { %s16421_s0 = sld [smem:[#allocation53_spill]]  ;;  %s14251_s30 = smov [#allocation14]  }
  0x35   :  { %s130_s2 = sshll.u32 %s14251_s30, 4  ;;  %s131_s2 = int_to_ptr.vmem [resolvable:$true] %s130_s2 }
  0x36   :  { %s13866_s27 = scalar_lea.vmem %s131_s2, 32  ;;  %p13871_p2 = scmp.lt.s32.totalorder %s131_s2, %s131_s2 }
  0x37   :  { %p13867_p1 = scmp.ne.s32.totalorder %s131_s2, %s13866_s27  ;;  %p13872_p3 = scmp.lt.s32.totalorder %s13866_s27, %s13866_s27 }
  0x39   :  { %p13873_p4 = por %p13872_p3, %p13871_p2 }
  0x3a   :  { %112 = dma.hbm_to_vmem [thread:$0]  %s16421_s0, 96, %s107_s4, [#allocation12], %s16410_s1, %s16410_s1, %s16411_s5  }
  0x3b   :  { %p13874_p5 = pnand %p13873_p4, %p13867_p1 }
  0x3d   :  { %13877 = shalt.err (!%p13874_p5)
}
  0x3e   :  { %136 = dma.hbm_to_vmem [thread:$0]  %s16392_s8, 32, %s131_s2, [#allocation15], %s14246_s25, %s14246_s25, %s14247_s26  }
  0x3f   :  { %s14252_s28 = smov [#allocation17]  }
  0x40   :  { %s154_s24 = sshll.u32 %s14252_s28, 4  ;;  %s155_s24 = int_to_ptr.vmem [resolvable:$true] %s154_s24 }
  0x41   :  { %s13886_s0 = scalar_lea.vmem %s155_s24, 6144  ;;  %p13891_p7 = scmp.lt.s32.totalorder %s155_s24, %s155_s24 }
  0x42   :  { %p13887_p6 = scmp.ne.s32.totalorder %s155_s24, %s13886_s0  ;;  %p13892_p8 = scmp.lt.s32.totalorder %s13886_s0, %s13886_s0 }
  0x44   :  { %p13893_p9 = por %p13892_p8, %p13891_p7 }
  0x46   :  { %p13894_p10 = pnand %p13893_p9, %p13887_p6 }
  0x48   :  { %13897 = shalt.err (!%p13894_p10)
}
  0x49   :  { %s14253_s4 = smov 192   ;;  %s14254_s6 = smov 12  }
  0x4a   :  { %160 = dma.hbm_to_vmem [thread:$0]  %s16394_s10, 6144, %s155_s24, [#allocation18], %s14253_s4, %s14253_s4, %s14254_s6  }
  0x4b   :  { %s14255_s8 = smov [#allocation20]   ;;  %s14256_s3 = smov [#allocation23]  }
  0x4c   :  { %s178_s2 = sshll.u32 %s14255_s8, 4  ;;  %s202_s29 = sshll.u32 %s14256_s3, 4  ;;  %s179_s2 = int_to_ptr.vmem [resolvable:$true] %s178_s2  ;;  %s203_s29 = int_to_ptr.vmem [resolvable:$true] %s202_s29 }
  0x4d   :  { %s13906_s28 = scalar_lea.vmem %s179_s2, 1024  ;;  %p13911_p12 = scmp.lt.s32.totalorder %s179_s2, %s179_s2 }
  0x4e   :  { %p13907_p11 = scmp.ne.s32.totalorder %s179_s2, %s13906_s28  ;;  %p13912_p13 = scmp.lt.s32.totalorder %s13906_s28, %s13906_s28 }
  0x50   :  { %p13913_p0 = por %p13912_p13, %p13911_p12 }
  0x52   :  { %p13914_p1 = pnand %p13913_p0, %p13907_p11 }
  0x54   :  { %13917 = shalt.err (!%p13914_p1)
}
  0x55   :  { %s14257_s0 = smov 64   ;;  %s14258_s1 = smov 4  }
  0x56   :  { %184 = dma.hbm_to_vmem [thread:$0]  %s16396_s12, 1024, %s179_s2, [#allocation21], %s14257_s0, %s14257_s0, %s14258_s1  }
  0x57   :  { %s13926_s10 = scalar_lea.vmem %s203_s29, 32  ;;  %p13931_p3 = scmp.lt.s32.totalorder %s203_s29, %s203_s29 }
  0x58   :  { %p13927_p2 = scmp.ne.s32.totalorder %s203_s29, %s13926_s10  ;;  %p13932_p4 = scmp.lt.s32.totalorder %s13926_s10, %s13926_s10 }
  0x5a   :  { %p13933_p5 = por %p13932_p4, %p13931_p3 }
  0x5c   :  { %p13934_p6 = pnand %p13933_p5, %p13927_p2 }
  0x5e   :  { %13937 = shalt.err (!%p13934_p6)
}
  0x5f   :  { %208 = dma.hbm_to_vmem [thread:$0]  %s16398_s14, 32, %s203_s29, [#allocation24], %s14246_s25, %s14246_s25, %s14247_s26  }
  0x60   :  { %s14259_s8 = smov [#allocation26]  }
  0x61   :  { %s226_s3 = sshll.u32 %s14259_s8, 4  ;;  %s227_s3 = int_to_ptr.vmem [resolvable:$true] %s226_s3 }
  0x62   :  { %s13946_s5 = scalar_lea.vmem %s227_s3, 8192  ;;  %p13951_p8 = scmp.lt.s32.totalorder %s227_s3, %s227_s3 }
  0x63   :  { %p13947_p7 = scmp.ne.s32.totalorder %s227_s3, %s13946_s5  ;;  %p13952_p9 = scmp.lt.s32.totalorder %s13946_s5, %s13946_s5 }
  0x65   :  { %p13953_p10 = por %p13952_p9, %p13951_p8 }
  0x67   :  { %p13954_p11 = pnand %p13953_p10, %p13947_p7 }
  0x69   :  { %13957 = shalt.err (!%p13954_p11)
}
  0x6a   :  { %s14260_s12 = smov 256   ;;  %s14261_s30 = smov [#allocation29]  }
  0x6b   :  { %232 = dma.hbm_to_vmem [thread:$0]  %s16400_s16, 8192, %s227_s3, [#allocation27], %s14260_s12, %s14260_s12, %s14246_s25  }
  0x6c   :  { %s252_s14 = sshll.u32 %s14261_s30, 4  ;;  %s14262_s29 = smov [#allocation2]   ;;  %s253_s14 = int_to_ptr.vmem [resolvable:$true] %s252_s14 }
  0x6d   :  { %s46_s10 = sshll.u32 %s14262_s29, 4  ;;  %s13966_s24 = scalar_lea.vmem %s253_s14, 32  ;;  %s47_s10 = int_to_ptr.vmem [resolvable:$true] %s46_s10 }
  0x6e   :  { %p13967_p12 = scmp.ne.s32.totalorder %s253_s14, %s13966_s24  ;;  %p13971_p13 = scmp.lt.s32.totalorder %s253_s14, %s253_s14 }
  0x6f   :  { %p13972_p0 = scmp.lt.s32.totalorder %s13966_s24, %s13966_s24 }
  0x71   :  { %p13973_p1 = por %p13972_p0, %p13971_p13 }
  0x73   :  { %p13974_p2 = pnand %p13973_p1, %p13967_p12 }
  0x75   :  { %13977 = shalt.err (!%p13974_p2)
}
  0x76   :  { %258 = dma.hbm_to_vmem [thread:$0]  %s16403_s19, 32, %s253_s14, [#allocation30], %s14246_s25, %s14246_s25, %s14247_s26  }
  0x77   :  { %s13986_s16 = scalar_lea.vmem %s47_s10, 256  ;;  %p13991_p4 = scmp.lt.s32.totalorder %s47_s10, %s47_s10 }
  0x78   :  { %p13987_p3 = scmp.ne.s32.totalorder %s47_s10, %s13986_s16  ;;  %p13992_p5 = scmp.lt.s32.totalorder %s13986_s16, %s13986_s16 }
  0x7a   :  { %p13993_p6 = por %p13992_p5, %p13991_p4 }
  0x7c   :  { %p13994_p7 = pnand %p13993_p6, %p13987_p3 }
  0x7e   :  { %13997 = shalt.err (!%p13994_p7)
}
  0x7f   :  { %s16422_s3 = smov 128   ;;  %s16423_s28 = sld [smem:[#allocation48_spill]] }
  0x80   :  { %s14263_s30 = smov [#allocation7]   ;;  %s14264_s24 = smov [#allocation10]  }
  0x81   :  { %s70_s29 = sshll.u32 %s14263_s30, 4  ;;  %s94_s19 = sshll.u32 %s14264_s24, 4  ;;  %s71_s29 = int_to_ptr.vmem [resolvable:$true] %s70_s29  ;;  %s95_s19 = int_to_ptr.vmem [resolvable:$true] %s94_s19 }
  0x82   :  { %s14006_s14 = scalar_lea.vmem %s71_s29, 512  ;;  %p14011_p9 = scmp.lt.s32.totalorder %s71_s29, %s71_s29 }
  0x83   :  { %p14007_p8 = scmp.ne.s32.totalorder %s71_s29, %s14006_s14  ;;  %p14012_p10 = scmp.lt.s32.totalorder %s14006_s14, %s14006_s14 }
  0x85   :  { %52 = dma.hbm_to_vmem [thread:$0]  %s16423_s28, 256, %s47_s10, [#allocation3], %s16422_s3, %s16422_s3, %s14245_s23  }
  0x86   :  { %p14013_p11 = por %p14012_p10, %p14011_p9 }
  0x88   :  { %p14014_p12 = pnand %p14013_p11, %p14007_p8 }
  0x8a   :  { %14017 = shalt.err (!%p14014_p12)
}
  0x8b   :  { %s16424_s16 = sld [smem:[#allocation50_spill]]  ;;  %s14026_s10 = scalar_lea.vmem %s95_s19, 6144 }
  0x8c   :  { %p14027_p13 = scmp.ne.s32.totalorder %s95_s19, %s14026_s10  ;;  %p14031_p0 = scmp.lt.s32.totalorder %s95_s19, %s95_s19 }
  0x8d   :  { %p14032_p1 = scmp.lt.s32.totalorder %s14026_s10, %s14026_s10 }
  0x8f   :  { %p14033_p2 = por %p14032_p1, %p14031_p0 }
  0x91   :  { %76 = dma.hbm_to_vmem [thread:$0]  %s16424_s16, 512, %s71_s29, [#allocation6], %s16422_s3, %s16422_s3, %s14245_s23  }
  0x92   :  { %p14034_p3 = pnand %p14033_p2, %p14027_p13 }
  0x94   :  { %14037 = shalt.err (!%p14034_p3)
}
  0x95   :  { %s16425_s28 = sld [smem:[#allocation52_spill]]  ;;  %s14265_s30 = smov [#allocation13]  }
  0x96   :  { %s118_s24 = sshll.u32 %s14265_s30, 4  ;;  %s14266_s14 = smov [#allocation16]   ;;  %s119_s24 = int_to_ptr.vmem [resolvable:$true] %s118_s24 }
  0x97   :  { %s142_s29 = sshll.u32 %s14266_s14, 4  ;;  %s14046_s27 = scalar_lea.vmem %s119_s24, 2048  ;;  %s143_s29 = int_to_ptr.vmem [resolvable:$true] %s142_s29 }
  0x98   :  { %p14047_p4 = scmp.ne.s32.totalorder %s119_s24, %s14046_s27  ;;  %p14051_p5 = scmp.lt.s32.totalorder %s119_s24, %s119_s24 }
  0x99   :  { %p14052_p6 = scmp.lt.s32.totalorder %s14046_s27, %s14046_s27 }
  0x9b   :  { %100 = dma.hbm_to_vmem [thread:$0]  %s16425_s28, 6144, %s95_s19, [#allocation9], %s14253_s4, %s14253_s4, %s14254_s6  }
  0x9c   :  { %p14053_p7 = por %p14052_p6, %p14051_p5 }
  0x9e   :  { %p14054_p8 = pnand %p14053_p7, %p14047_p4 }
  0xa0   :  { %14057 = shalt.err (!%p14054_p8)
}
  0xa1   :  { %124 = dma.hbm_to_vmem [thread:$0]  %s16391_s7, 2048, %s119_s24, [#allocation12], %s14257_s0, %s14257_s0, %s14258_s1  }
  0xa2   :  { %s14066_s4 = scalar_lea.vmem %s143_s29, 32  ;;  %p14071_p10 = scmp.lt.s32.totalorder %s143_s29, %s143_s29 }
  0xa3   :  { %p14067_p9 = scmp.ne.s32.totalorder %s143_s29, %s14066_s4  ;;  %p14072_p11 = scmp.lt.s32.totalorder %s14066_s4, %s14066_s4 }
  0xa5   :  { %p14073_p12 = por %p14072_p11, %p14071_p10 }
  0xa7   :  { %p14074_p13 = pnand %p14073_p12, %p14067_p9 }
  0xa9   :  { %14077 = shalt.err (!%p14074_p13)
}
  0xaa   :  { %148 = dma.hbm_to_vmem [thread:$0]  %s16393_s9, 32, %s143_s29, [#allocation15], %s14246_s25, %s14246_s25, %s14247_s26  }
  0xab   :  { %s14267_s10 = smov [#allocation19]   ;;  %s14268_s2 = smov [#allocation22]  }
  0xac   :  { %s166_s5 = sshll.u32 %s14267_s10, 4  ;;  %s190_s7 = sshll.u32 %s14268_s2, 4  ;;  %s167_s5 = int_to_ptr.vmem [resolvable:$true] %s166_s5  ;;  %s191_s7 = int_to_ptr.vmem [resolvable:$true] %s190_s7 }
  0xad   :  { %s14086_s28 = scalar_lea.vmem %s167_s5, 96  ;;  %p14091_p1 = scmp.lt.s32.totalorder %s167_s5, %s167_s5 }
  0xae   :  { %p14087_p0 = scmp.ne.s32.totalorder %s167_s5, %s14086_s28  ;;  %p14092_p2 = scmp.lt.s32.totalorder %s14086_s28, %s14086_s28 }
  0xb0   :  { %p14093_p3 = por %p14092_p2, %p14091_p1 }
  0xb2   :  { %p14094_p4 = pnand %p14093_p3, %p14087_p0 }
  0xb4   :  { %14097 = shalt.err (!%p14094_p4)
}
  0xb5   :  { %s16426_s30 = smov 3   ;;  %s16427_s24 = smov 48  }
  0xb6   :  { %172 = dma.hbm_to_vmem [thread:$0]  %s16395_s11, 96, %s167_s5, [#allocation18], %s16427_s24, %s16427_s24, %s16426_s30  }
  0xb7   :  { %s14106_s9 = scalar_lea.vmem %s191_s7, 32  ;;  %p14111_p6 = scmp.lt.s32.totalorder %s191_s7, %s191_s7 }
  0xb8   :  { %p14107_p5 = scmp.ne.s32.totalorder %s191_s7, %s14106_s9  ;;  %p14112_p7 = scmp.lt.s32.totalorder %s14106_s9, %s14106_s9 }
  0xba   :  { %p14113_p8 = por %p14112_p7, %p14111_p6 }
  0xbc   :  { %p14114_p9 = pnand %p14113_p8, %p14107_p5 }
  0xbe   :  { %14117 = shalt.err (!%p14114_p9)
}
  0xbf   :  { %196 = dma.hbm_to_vmem [thread:$0]  %s16397_s13, 32, %s191_s7, [#allocation21], %s14246_s25, %s14246_s25, %s14247_s26  }
  0xc0   :  { %s14269_s16 = smov [#allocation25]   ;;  %s14270_s6 = smov [#allocation28]  }
  0xc1   :  { %s214_s4 = sshll.u32 %s14269_s16, 4  ;;  %s240_s11 = sshll.u32 %s14270_s6, 4  ;;  %s215_s4 = int_to_ptr.vmem [resolvable:$true] %s214_s4  ;;  %s241_s11 = int_to_ptr.vmem [resolvable:$true] %s240_s11 }
  0xc2   :  { %s14126_s19 = scalar_lea.vmem %s215_s4, 32  ;;  %p14131_p11 = scmp.lt.s32.totalorder %s215_s4, %s215_s4 }
  0xc3   :  { %p14127_p10 = scmp.ne.s32.totalorder %s215_s4, %s14126_s19  ;;  %p14132_p12 = scmp.lt.s32.totalorder %s14126_s19, %s14126_s19 }
  0xc5   :  { %p14133_p13 = por %p14132_p12, %p14131_p11 }
  0xc7   :  { %p14134_p0 = pnand %p14133_p13, %p14127_p10 }
  0xc9   :  { %14137 = shalt.err (!%p14134_p0)
}
  0xca   :  { %220 = dma.hbm_to_vmem [thread:$0]  %s16399_s15, 32, %s215_s4, [#allocation24], %s14246_s25, %s14246_s25, %s14247_s26  }
  0xcb   :  { %s14146_s13 = scalar_lea.vmem %s241_s11, 4096  ;;  %p14151_p2 = scmp.lt.s32.totalorder %s241_s11, %s241_s11 }
  0xcc   :  { %p14147_p1 = scmp.ne.s32.totalorder %s241_s11, %s14146_s13  ;;  %p14152_p3 = scmp.lt.s32.totalorder %s14146_s13, %s14146_s13 }
  0xce   :  { %p14153_p4 = por %p14152_p3, %p14151_p2 }
  0xd0   :  { %p14154_p5 = pnand %p14153_p4, %p14147_p1 }
  0xd2   :  { %14157 = shalt.err (!%p14154_p5)
}
  0xd3   :  { %246 = dma.hbm_to_vmem [thread:$0]  %s16402_s18, 4096, %s241_s11, [#allocation27], %s14257_s0, %s14257_s0, %s14258_s1  }
  0xd4   :  { %s14271_s28 = smov [#allocation31]   ;;  %s14272_s24 = smov [#allocation32]  }
  0xd5   :  { %s264_s30 = sshll.u32 %s14271_s28, 4  ;;  %s277_s15 = sshll.u32 %s14272_s24, 4  ;;  %s265_s30 = int_to_ptr.vmem [resolvable:$true] %s264_s30  ;;  %s278_s15 = int_to_ptr.vmem [resolvable:$true] %s277_s15 }
  0xd6   :  { %s14166_s26 = scalar_lea.vmem %s265_s30, 2048  ;;  %p14171_p7 = scmp.lt.s32.totalorder %s265_s30, %s265_s30 }
  0xd7   :  { %p14167_p6 = scmp.ne.s32.totalorder %s265_s30, %s14166_s26  ;;  %p14172_p8 = scmp.lt.s32.totalorder %s14166_s26, %s14166_s26 }
  0xd9   :  { %p14173_p9 = por %p14172_p8, %p14171_p7 }
  0xdb   :  { %p14174_p10 = pnand %p14173_p9, %p14167_p6 }
  0xdd   :  { %14177 = shalt.err (!%p14174_p10)
}
  0xde   :  { %270 = dma.hbm_to_vmem [thread:$0]  %s16404_s20, 2048, %s265_s30, [#allocation30], %s16422_s3, %s16422_s3, %s14245_s23  }
  0xdf   :  { %s14186_s18 = scalar_lea.vmem %s278_s15, 32  ;;  %p14191_p12 = scmp.lt.s32.totalorder %s278_s15, %s278_s15 }
  0xe0   :  { %p14187_p11 = scmp.ne.s32.totalorder %s278_s15, %s14186_s18  ;;  %p14192_p13 = scmp.lt.s32.totalorder %s14186_s18, %s14186_s18 }
  0xe2   :  { %p14193_p0 = por %p14192_p13, %p14191_p12 }
  0xe4   :  { %p14194_p1 = pnand %p14193_p0, %p14187_p11 }
  0xe6   :  { %14197 = shalt.err (!%p14194_p1)
}
  0xe7   :  { %280 = dma.hbm_to_vmem [thread:$0]  %s16405_s21, 32, %s278_s15, [#allocation33]  }
  0xe8   :  { %14218 = dma.done.wait [#allocation3], 256  }
  0xe9   :  { %14219 = vsyncadd [#allocation3], 4294967040 }
  0xea   :  { %14220 = dma.done.wait [#allocation6], 1024  }
  0xeb   :  { %14221 = vsyncadd [#allocation6], 4294966272 }
  0xec   :  { %14222 = dma.done.wait [#allocation9], 6176  }
  0xed   :  { %14223 = vsyncadd [#allocation9], 4294961120 }
  0xee   :  { %14224 = dma.done.wait [#allocation12], 2144  }
  0xef   :  { %14225 = vsyncadd [#allocation12], 4294965152 }
  0xf0   :  { %14226 = dma.done.wait [#allocation15], 64  }
  0xf1   :  { %14227 = vsyncadd [#allocation15], 4294967232 }
  0xf2   :  { %14228 = dma.done.wait [#allocation18], 6240  }
  0xf3   :  { %14229 = vsyncadd [#allocation18], 4294961056 }
  0xf4   :  { %14230 = dma.done.wait [#allocation21], 1056  }
  0xf5   :  { %14231 = vsyncadd [#allocation21], 4294966240 }
  0xf6   :  { %14232 = dma.done.wait [#allocation24], 64  }
  0xf7   :  { %14233 = vsyncadd [#allocation24], 4294967232 }
  0xf8   :  { %14234 = dma.done.wait [#allocation27], 12288  }
  0xf9   :  { %14235 = vsyncadd [#allocation27], 4294955008 }
  0xfa   :  { %14236 = dma.done.wait [#allocation30], 2080  }
  0xfb   :  { %14237 = vsyncadd [#allocation30], 4294965216 }
  0xfc   :  { %14238 = dma.done.wait [#allocation33], 32  }
  0xfd   :  { %14239 = vsyncadd [#allocation33], 4294967264  ;;  %s16428_s23 = sld [smem:[#allocation47_spill]]  ;;  %v13034_v16 = vld [vmem:[#allocation10 + $0xac] ss:$12 sps:$4 sm:$0xff]   ;;  %v14273_v19 = vmov 0.0  }
  0xfe   :  { %v13036_v17 = vld [vmem:[#allocation10 + $0xa8] ss:$12 sps:$4 sm:$0xff]   ;;  %v13037_v18 = vld [vmem:[#allocation10 + $0xb0] ss:$12 sps:$4 sm:$0xff]   ;;  %631 = vmatprep.subr.bf16.mxu0 %v13034_v16  ;;  %12324 = vmatprep.subr.bf16.mxu1 %v14273_v19  ;;  %v13041_v22 = vld [vmem:[#allocation10 + $0x98] ss:$12 sps:$4 sm:$0xff]  }
  0xff   :  { %632 = vmatpush1.bf16.msra.mxu0 %v13036_v17  ;;  %12325 = vmatpush3.bf16.msra.mxu1 %v13037_v18  ;;  %v13038_v20 = vld [vmem:[#allocation10 + $0x94] ss:$12 sps:$4 sm:$0xff]   ;;  %v13040_v21 = vld [vmem:[#allocation10 + $0x90] ss:$12 sps:$4 sm:$0xff]   ;;  %v13044_v24 = vld [vmem:[#allocation10 + $0x78] ss:$12 sps:$4 sm:$0xff]  }
 0x100   :  { %12326 = vmatprep.subr.bf16.mxu1 %v14273_v19  ;;  %633 = vmatprep.subr.bf16.mxu0 %v13038_v20  ;;  %v13042_v23 = vld [vmem:[#allocation10 + $0x7c] ss:$12 sps:$4 sm:$0xff]   ;;  %v13045_v25 = vld [vmem:[#allocation10 + $0x80] ss:$12 sps:$4 sm:$0xff]   ;;  %v13046_v26 = vld [vmem:[#allocation10 + $0x64] ss:$12 sps:$4 sm:$0xff]  }
 0x101   :  { %v13048_v27 = vld [vmem:[#allocation10 + $0x60] ss:$12 sps:$4 sm:$0xff]   ;;  %v13049_v28 = vld [vmem:[#allocation10 + $0x68] ss:$12 sps:$4 sm:$0xff]   ;;  %v13053_v31 = vld [vmem:[#allocation10 + $0x50] ss:$12 sps:$4 sm:$0xff]  }
 0x102   :  { %v13050_v29 = vld [vmem:[#allocation10 + $0x4c] ss:$12 sps:$4 sm:$0xff]   ;;  %v13052_v30 = vld [vmem:[#allocation10 + $0x48] ss:$12 sps:$4 sm:$0xff]   ;;  %v13056_v33 = vld [vmem:[#allocation10 + $0x30] ss:$12 sps:$4 sm:$0xff]  }
 0x103   :  { %v344_v0 = vld [vmem:[%s16428_s23 + $0x10] sm:$0xff]  ;;  %v342_v1 = vld [vmem:[%s16428_s23] sm:$0xff]  ;;  %v345_v2 = vld [vmem:[%s16428_s23 + $0x18] sm:$0xff]  ;;  %634 = vmatpush1.bf16.msra.mxu0 %v13040_v21  ;;  %12327 = vmatpush3.bf16.msra.mxu1 %v13041_v22  ;;  %v14274_v38 = vmov 0   ;;  %vm14275_vm0 = vmmov 0   ;;  %vm757_vm9 = vcmask 261120  }
 0x104   :  { %v14521_v3 = vadd.f32 1e-06, %v344_v0  ;;  %v14523_v4 = vadd.f32 1e-06, %v342_v1  ;;  %v14525_v5 = vadd.f32 1e-06, %v345_v2  ;;  %12328 = vmatprep.subr.bf16.mxu1 %v14273_v19  ;;  %635 = vmatprep.subr.bf16.mxu0 %v13042_v23 }
 0x105   :  { %v343_v6 = vld [vmem:[%s16428_s23 + $0x8] sm:$0xff]  ;;  %v13061_v37 = vld [vmem:[#allocation10 + $0x20] ss:$12 sps:$4 sm:$0xff]   ;;  %663 = vmatprep.mubr.bf16.mxu0 %v14274_v38  ;;  %12340 = vmatprep.mubr.msk.bf16.mxu1 %vm14275_vm0, %v14273_v19  ;;  %v13062_v39 = vld [vmem:[#allocation10 + $0x4] ss:$12 sps:$4 sm:$0xff]   ;;  %s14276_s11 = smov 96  }
 0x106   :  { %v383_v7 = vadd.f32 1e-06, %v14521_v3  ;;  %v381_v8 = vadd.f32 1e-06, %v14523_v4  ;;  %v384_v9 = vadd.f32 1e-06, %v14525_v5 }
 0x107   :  { %v14533_v10 = vadd.f32 1e-06, %v343_v6  ;;  %636 = vmatpush1.bf16.msra.mxu0 %v13044_v24  ;;  %12329 = vmatpush3.bf16.msra.mxu1 %v13045_v25  ;;  %v13054_v32 = vld [vmem:[#allocation10 + $0x34] ss:$12 sps:$4 sm:$0xff]   ;;  %v13057_v34 = vld [vmem:[#allocation10 + $0x38] ss:$12 sps:$4 sm:$0xff]  }
 0x108   :  { %v387_v11 = vmul.f32 %v383_v7, %v383_v7  ;;  %v385_v12 = vmul.f32 %v381_v8, %v381_v8  ;;  %v388_v14 = vmul.f32 %v384_v9, %v384_v9  ;;  %12330 = vmatprep.subr.bf16.mxu1 %v14273_v19  ;;  %637 = vmatprep.subr.bf16.mxu0 %v13046_v26  ;;  %v13058_v35 = vld [vmem:[#allocation10 + $0x1c] ss:$12 sps:$4 sm:$0xff]   ;;  %v13060_v36 = vld [vmem:[#allocation10 + $0x18] ss:$12 sps:$4 sm:$0xff]   ;;  %v13064_v40 = vld [vmem:[#allocation10] ss:$12 sps:$4 sm:$0xff]  }
 0x109   :  { %v382_v13 = vadd.f32 1e-06, %v14533_v10  ;;  %v13065_v41 = vld [vmem:[#allocation10 + $0x8] ss:$12 sps:$4 sm:$0xff]   ;;  %v11467_v17 = vld [vmem:[#allocation8] ss:$0 sm:$0xff] }
 0x10a   :  { %393 = vadd.xlane.f32.xlu1 %v387_v11  ;;  %389 = vadd.xlane.f32.xlu0 %v385_v12  ;;  %vm844_vm10 = vcmask 64512   ;;  %s14277_s19 = smov 32   ;;  %s14278_s7 = smov 112  }
 0x10b   :  { %v386_v15 = vmul.f32 %v382_v13, %v382_v13  ;;  %638 = vmatpush1.bf16.msra.mxu0 %v13048_v27  ;;  %12331 = vmatpush3.bf16.msra.mxu1 %v13049_v28 }
 0x10c   :  { %639 = vmatprep.subr.bf16.mxu0 %v13050_v29  ;;  %12332 = vmatprep.subr.bf16.mxu1 %v14273_v19  ;;  %v347_v29 = vld [vmem:[#allocation2 + $0x8] sm:$0xff] }
 0x10e   :  { %395 = vadd.xlane.f32.xlu1 %v388_v14  ;;  %391 = vadd.xlane.f32.xlu0 %v386_v15 }
 0x10f   :  { %640 = vmatpush1.bf16.msra.mxu0 %v13052_v30  ;;  %12333 = vmatpush3.bf16.msra.mxu1 %v13053_v31 }
 0x110   :  { %641 = vmatprep.subr.bf16.mxu0 %v13054_v32  ;;  %12334 = vmatprep.subr.bf16.mxu1 %v14273_v19  ;;  %v14567_v32 = vld [vmem:[#allocation11] sm:$0x7] }
 0x113   :  { %642 = vmatpush1.bf16.msra.mxu0 %v13056_v33  ;;  %12335 = vmatpush3.bf16.msra.mxu1 %v13057_v34 }
 0x114   :  { %643 = vmatprep.subr.bf16.mxu0 %v13058_v35  ;;  %12336 = vmatprep.subr.bf16.mxu1 %v14273_v19 }
 0x117   :  { %644 = vmatpush1.bf16.msra.mxu0 %v13060_v36  ;;  %12337 = vmatpush3.bf16.msra.mxu1 %v13061_v37 }
 0x118   :  { %645 = vmatprep.subr.bf16.mxu0 %v13062_v39  ;;  %12338 = vmatprep.subr.bf16.mxu1 %v14273_v19 }
 0x11b   :  { %646 = vmatpush1.bf16.msra.mxu0 %v13064_v40  ;;  %12339 = vmatpush3.bf16.msra.mxu1 %v13065_v41 }
 0x193   :  { %v394_v42 = vpop.xlane.xlu1 %393  ;;  %v390_v43 = vpop.xlane.xlu0 %389 }
 0x194   :  { %13338 = vrsqrt.f32 %v394_v42  ;;  %vm413_vm1 = vcmp.eq.f32.partialorder %v394_v42, inf  ;;  %vm399_vm2 = vcmp.eq.f32.partialorder %v390_v43, inf  ;;  %v402_v50 = vand.u32 2147483648, %v390_v43 }
 0x195   :  { %13340 = vrsqrt.f32 %v390_v43  ;;  %vm415_vm3 = vcmp.eq.f32.partialorder %v394_v42, 0.0  ;;  %vm401_vm4 = vcmp.eq.f32.partialorder %v390_v43, 0.0  ;;  %v416_v55 = vand.u32 2147483648, %v394_v42 }
 0x197   :  { %v396_v44 = vpop.xlane.xlu1 %395  ;;  %v392_v45 = vpop.xlane.xlu0 %391 }
 0x198   :  { %13342 = vrsqrt.f32 %v396_v44  ;;  %vm420_vm5 = vcmp.eq.f32.partialorder %v396_v44, inf  ;;  %vm422_vm6 = vcmp.eq.f32.partialorder %v396_v44, 0.0  ;;  %v423_v59 = vand.u32 2147483648, %v396_v44 }
 0x199   :  { %13344 = vrsqrt.f32 %v392_v45  ;;  %vm406_vm7 = vcmp.eq.f32.partialorder %v392_v45, inf  ;;  %v409_v63 = vand.u32 2147483648, %v392_v45  ;;  %vm408_vm8 = vcmp.eq.f32.partialorder %v392_v45, 0.0 }
 0x1a1   :  { %v13339_v46 = vpop.eup %13338 }
 0x1a2   :  { %v13341_v47 = vpop.eup %13340  ;;  %v412_v48 = vmul.f32 %v13339_v46, %v394_v42 }
 0x1a3   :  { %v398_v49 = vmul.f32 %v13341_v47, %v390_v43 }
 0x1a4   :  { %v414_v52 = vsel %vm413_vm1, %v394_v42, %v412_v48 }
 0x1a5   :  { %v13343_v51 = vpop.eup %13342  ;;  %v400_v53 = vsel %vm399_vm2, %v390_v43, %v398_v49  ;;  %v417_v61 = vsel %vm415_vm3, %v416_v55, %v414_v52 }
 0x1a6   :  { %v13345_v54 = vpop.eup %13344  ;;  %v403_v56 = vsel %vm401_vm4, %v402_v50, %v400_v53  ;;  %v419_v57 = vmul.f32 %v13343_v51, %v396_v44  ;;  %v427_v8 = vmul.f32 11.313708, %v417_v61 }
 0x1a7   :  { %v425_v58 = vmul.f32 11.313708, %v403_v56  ;;  %v405_v60 = vmul.f32 %v13345_v54, %v392_v45 }
 0x1a8   :  { %v421_v62 = vsel %vm420_vm5, %v396_v44, %v419_v57  ;;  %v431_v13 = vadd.f32 1e-06, %v427_v8 }
 0x1a9   :  { %v429_v0 = vadd.f32 1e-06, %v425_v58  ;;  %v424_v1 = vsel %vm422_vm6, %v423_v59, %v421_v62  ;;  %v407_v2 = vsel %vm406_vm7, %v392_v45, %v405_v60  ;;  %vm3260_vm6 = vcmask 130048  }
 0x1aa   :  { %v428_v6 = vmul.f32 11.313708, %v424_v1  ;;  %v410_v7 = vsel %vm408_vm8, %v409_v63, %v407_v2 }
 0x1ab   :  { %13346 = vrcp.f32 %v429_v0  ;;  %v426_v9 = vmul.f32 11.313708, %v410_v7 }
 0x1ac   :  { %v432_v11 = vadd.f32 1e-06, %v428_v6 }
 0x1ad   :  { %v430_v12 = vadd.f32 1e-06, %v426_v9 }
 0x1af   :  { %13348 = vrcp.f32 %v430_v12 }
 0x1b0   :  { %13350 = vrcp.f32 %v432_v11 }
 0x1b1   :  { %13352 = vrcp.f32 %v431_v13 }
 0x1b8   :  { %v13347_v14 = vpop.eup %13346 }
 0x1b9   :  { %v437_v15 = vmul.f32 %v13347_v14, %v14523_v4 }
 0x1bb   :  { %v447_v21 = vmul.f32 %v11467_v17, %v437_v15 }
 0x1bc   :  { %v13349_v16 = vpop.eup %13348 }
 0x1bd   :  { %v438_v18 = vmul.f32 %v13349_v16, %v14533_v10  ;;  %v13351_v20 = vpop.eup %13350  ;;  %v346_v10 = vld [vmem:[#allocation2] sm:$0xff] }
 0x1be   :  { %v13353_v23 = vpop.eup %13352  ;;  %v440_v25 = vmul.f32 %v13351_v20, %v14525_v5  ;;  %v14557_v5 = vpack.c.bf16 %v347_v29, %v346_v10 }
 0x1bf   :  { %v448_v22 = vmul.f32 %v11467_v17, %v438_v18  ;;  %v439_v26 = vmul.f32 %v13353_v23, %v14521_v3  ;;  %v356_v3 = vlaneseq }
 0x1c0   :  { %v450_v4 = vmul.f32 %v11467_v17, %v440_v25 }
 0x1c1   :  { %v451_v24 = vpack.c.bf16 %v448_v22, %v447_v21  ;;  %v449_v27 = vmul.f32 %v11467_v17, %v439_v26  ;;  %v14562_v30 = vshrl.u32 %v356_v3, 7 }
 0x1c3   :  { %664 = vmatmul.mubr.bf16.vlgmr.msra.gmra.mxu0 %v451_v24  ;;  %12341 = vmatmul.mubr.bf16.vlgmr.msra.gmra.mxu1 %v451_v24  ;;  %v452_v28 = vpack.c.bf16 %v450_v4, %v449_v27  ;;  %v14565_v31 = vsub.s32 0, %v14562_v30  ;;  %v14584_v50 = vsub.s32 1, %v14562_v30  ;;  %v14617_v24 = vsub.s32 2, %v14562_v30 }
 0x1c4   :  { %671 = vmatprep.mubr.bf16.mxu0 %v14274_v38  ;;  %12344 = vmatprep.mubr.msk.bf16.mxu1 %vm14275_vm0, %v14273_v19 }
 0x1c5   :  { %v491_v33 = vrot.slane %v14567_v32, %v14565_v31  ;;  %v14590_v56 = vrot.slane %v14567_v32, %v14584_v50  ;;  %v499_v26 = vrot.slane %v14567_v32, %v14617_v24 }
 0x1cb   :  { %672 = vmatmul.mubr.bf16.gmra.mxu0 %v452_v28  ;;  %12345 = vmatmul.mubr.bf16.gmra.mxu1 %v452_v28 }
 0x1cc   :  { %679 = vmatprep.mubr.bf16.mxu0 %v14274_v38  ;;  %12348 = vmatprep.mubr.msk.bf16.mxu1 %vm14275_vm0, %v14273_v19 }
 0x1d3   :  { %680 = vmatmul.mubr.bf16.gmra.mxu0 %v14557_v5  ;;  %12349 = vmatmul.mubr.bf16.gmra.mxu1 %v14557_v5 }
 0x283   :  { %v665_v34 = vpop.f32.mrf.mxu0  ;;  %v722_v35 = vpop.f32.mrf.mxu1 }
 0x284   :  { %v14571_v36 = vadd.f32 %v665_v34, %v491_v33 }
 0x285   :  { %v667_v37 = vpop.f32.mrf.mxu0  ;;  %v12342_v39 = vpop.f32.mrf.mxu1 }
 0x286   :  { %949 = vrot.lane.b32.xlu1 %v14571_v36, %s14276_s11  ;;  %12354 = vmatprep.mubr.msk.f32.mxu0 %vm757_vm9, %v14571_v36 }
 0x287   :  { %v668_v40 = vpop.f32.mrf.mxu0  ;;  %v724_v41 = vpop.f32.mrf.mxu1 }
 0x288   :  { %v14577_v42 = vadd.f32 %v668_v40, %v491_v33 }
 0x289   :  { %v670_v43 = vpop.f32.mrf.mxu0  ;;  %v12343_v44 = vpop.f32.mrf.mxu1 }
 0x28a   :  { %951 = vrot.lane.b32.xlu1 %v14577_v42, %s14276_s11 }
 0x28b   :  { %v673_v45 = vpop.f32.mrf.mxu0  ;;  %v728_v46 = vpop.f32.mrf.mxu1 }
 0x28c   :  { %v14581_v47 = vadd.f32 %v673_v45, %v491_v33 }
 0x28d   :  { %v675_v48 = vpop.f32.mrf.mxu0  ;;  %v12346_v49 = vpop.f32.mrf.mxu1 }
 0x28f   :  { %v676_v51 = vpop.f32.mrf.mxu0  ;;  %v730_v52 = vpop.f32.mrf.mxu1 }
 0x290   :  { %v14586_v53 = vadd.f32 %v676_v51, %v491_v33  ;;  %v14631_v51 = vld [vmem:[#allocation13 + $0x18] sm:$0xff]   ;;  %v14635_v52 = vld [vmem:[#allocation13 + $0x10] sm:$0xff]  }
 0x291   :  { %v678_v54 = vpop.f32.mrf.mxu0  ;;  %v12347_v55 = vpop.f32.mrf.mxu1 }
 0x293   :  { %v681_v57 = vpop.f32.mrf.mxu0  ;;  %v734_v25 = vpop.f32.mrf.mxu1 }
 0x294   :  { %v14621_v27 = vadd.f32 %v734_v25, %v499_v26 }
 0x295   :  { %v682_v58 = vpop.f32.mrf.mxu0  ;;  %v12350_v4 = vpop.f32.mrf.mxu1 }
 0x296   :  { %v14593_v59 = vadd.f32 %v682_v58, %v14590_v56  ;;  %12357 = vmatprep.subr.mxu1 %v14621_v27 }
 0x297   :  { %v684_v60 = vpop.f32.mrf.mxu0  ;;  %12358 = vmatpush3.msra.mxu1 %v14621_v27  ;;  %v737_v34 = vpop.f32.mrf.mxu1 }
 0x298   :  { %953 = vrot.lane.b32.xlu0 %v14593_v59, %s14276_s11  ;;  %12352 = vmatprep.subr.msk.mxu0 %vm757_vm9, %v14593_v59  ;;  %v14627_v35 = vadd.f32 %v737_v34, %v499_v26 }
 0x299   :  { %12353 = vmatpush3.xpose.msk.msra.mxu0 %vm757_vm9, %v14593_v59  ;;  %v14610_v0 = vpop.f32.mrf.mxu0  ;;  %v12351_v37 = vpop.f32.mrf.mxu1 }
 0x29c   :  { %12355 = vmatmul.mubr.msk.f32.vlgmr.msra.gmra.mxu0 %vm757_vm9, %v14577_v42 }
 0x2f8   :  { %v950_v61 = vpop.permute.xlu1 %949 }
 0x2f9   :  { %12364 = vmatprep.mubr.msk.f32.mxu0 %vm757_vm9, %v950_v61 }
 0x2fc   :  { %v952_v63 = vpop.permute.xlu1 %951 }
 0x30a   :  { %v954_v62 = vpop.permute.xlu0 %953 }
 0x30b   :  { %12362 = vmatprep.subr.msk.mxu0 %vm757_vm9, %v954_v62 }
 0x30c   :  { %12363 = vmatpush3.xpose.msk.msra.mxu0 %vm757_vm9, %v954_v62 }
 0x30d   :  { %12372 = vmatprep.subr.bf16.mxu0 %v14273_v19 }
 0x30f   :  { %12365 = vmatmul.mubr.msk.f32.vlgmr.msra.gmra.mxu0 %vm757_vm9, %v952_v63 }
 0x310   :  { %12376 = vmatprep.mubr.msk.bf16.mxu0 %vm14275_vm0, %v14273_v19  ;;  %12373 = vmatpush3.bf16.msra.mxu0 %v14631_v51 }
 0x311   :  { %12374 = vmatprep.subr.bf16.mxu0 %v14273_v19 }
 0x314   :  { %12375 = vmatpush3.bf16.msra.mxu0 %v14635_v52 }
 0x35c   :  { %v12356_v1 = vpop.f32.mrf.mxu0 }
 0x35d   :  { %v843_v2 = vmul.f32 0.17677669, %v12356_v1 }
 0x35e   :  { %v833_v6 = vpop.f32.mrf.mxu0 }
 0x35f   :  { %v842_v7 = vmul.f32 0.17677669, %v833_v6  ;;  %v848_v8 = vsel %vm844_vm10, %v843_v2, -inf }
 0x360   :  { %849 = vmax.xlane.f32.xlu0 %v848_v8 }
 0x361   :  { %v845_v9 = vsel %vm844_vm10, %v842_v7, -inf }
 0x362   :  { %846 = vmax.xlane.f32.xlu1 %v845_v9  ;;  %v14651_v9 = vld [vmem:[#allocation13 + $0x8] sm:$0xff]  }
 0x3cf   :  { %v12366_v11 = vpop.f32.mrf.mxu0 }
 0x3d0   :  { %v1037_v14 = vmul.f32 0.17677669, %v12366_v11 }
 0x3d1   :  { %v1027_v12 = vpop.f32.mrf.mxu0 }
 0x3d2   :  { %v1036_v13 = vmul.f32 0.17677669, %v1027_v12  ;;  %v1041_v16 = vsel %vm844_vm10, %v1037_v14, -inf  ;;  %v14655_v12 = vld [vmem:[#allocation13] sm:$0xff]  }
 0x3d4   :  { %v1038_v15 = vsel %vm844_vm10, %v1036_v13, -inf }
 0x3d5   :  { %1039 = vmax.xlane.f32.xlu0 %v1038_v15 }
 0x3d9   :  { %1042 = vmax.xlane.f32.xlu0 %v1041_v16 }
 0x3e9   :  { %v850_v17 = vpop.xlane.xlu0 %849 }
 0x3ea   :  { %v852_v18 = vsub.f32 %v843_v2, %v850_v17 }
 0x3eb   :  { %v847_v20 = vpop.xlane.xlu1 %846 }
 0x3ec   :  { %v855_v21 = vmul.f32 1.442695, %v852_v18  ;;  %v851_v22 = vsub.f32 %v842_v7, %v847_v20 }
 0x3ee   :  { %13354 = vpow2.f32 %v855_v21  ;;  %v853_v23 = vmul.f32 1.442695, %v851_v22 }
 0x3f0   :  { %13356 = vpow2.f32 %v853_v23 }
 0x3fb   :  { %v13355_v28 = vpop.eup %13354 }
 0x3fc   :  { %v860_v10 = vsel %vm844_vm10, %v13355_v28, 0.0 }
 0x3fd   :  { %v13357_v29 = vpop.eup %13356  ;;  %861 = vadd.xlane.f32.xlu0 %v860_v10 }
 0x3fe   :  { %v857_v33 = vsel %vm844_vm10, %v13357_v29, 0.0 }
 0x3ff   :  { %858 = vadd.xlane.f32.xlu1 %v857_v33 }
 0x45e   :  { %v1040_v32 = vpop.xlane.xlu0 %1039 }
 0x45f   :  { %v1044_v39 = vsub.f32 %v1036_v13, %v1040_v32 }
 0x461   :  { %v1046_v40 = vmul.f32 1.442695, %v1044_v39 }
 0x462   :  { %v1043_v41 = vpop.xlane.xlu0 %1042 }
 0x463   :  { %13358 = vpow2.f32 %v1046_v40  ;;  %v1045_v43 = vsub.f32 %v1037_v14, %v1043_v41 }
 0x465   :  { %v1048_v44 = vmul.f32 1.442695, %v1045_v43 }
 0x467   :  { %13360 = vpow2.f32 %v1048_v44 }
 0x470   :  { %v13359_v45 = vpop.eup %13358 }
 0x471   :  { %v1050_v46 = vsel %vm844_vm10, %v13359_v45, 0.0 }
 0x472   :  { %1051 = vadd.xlane.f32.xlu1 %v1050_v46 }
 0x474   :  { %v13361_v48 = vpop.eup %13360 }
 0x475   :  { %v1053_v49 = vsel %vm844_vm10, %v13361_v48, 0.0 }
 0x476   :  { %1054 = vadd.xlane.f32.xlu0 %v1053_v49 }
 0x483   :  { %1061 = vrot.lane.b32.xlu1 %v14621_v27, %s14276_s11 }
 0x486   :  { %v862_v54 = vpop.xlane.xlu0 %861 }
 0x487   :  { %1258 = vrot.lane.b32.xlu1 %v14571_v36, %s14257_s0  ;;  %13362 = vrcp.f32 %v862_v54 }
 0x488   :  { %v859_v55 = vpop.xlane.xlu1 %858 }
 0x489   :  { %13364 = vrcp.f32 %v859_v55 }
 0x48b   :  { %1260 = vrot.lane.b32.xlu1 %v14577_v42, %s14257_s0 }
 0x48c   :  { %1262 = vrot.lane.b32.xlu0 %v14593_v59, %s14257_s0 }
 0x494   :  { %v13363_v57 = vpop.eup %13362 }
 0x495   :  { %v866_v61 = vmul.f32 %v13363_v57, %v13355_v28 }
 0x496   :  { %v13365_v58 = vpop.eup %13364 }
 0x497   :  { %v865_v60 = vmul.f32 %v13365_v58, %v13357_v29 }
 0x499   :  { %12359 = vmatprep.mubr.msk.f32.mxu1 %vm844_vm10, %v865_v60 }
 0x49a   :  { %12360 = vmatmul.mubr.msk.f32.vlgmr.msra.gmra.mxu1 %vm844_vm10, %v866_v61 }
 0x4fb   :  { %v1052_v62 = vpop.xlane.xlu1 %1051 }
 0x4fc   :  { %13366 = vrcp.f32 %v1052_v62 }
 0x4ff   :  { %v1055_v63 = vpop.xlane.xlu0 %1054  ;;  %v1062_v1 = vpop.permute.xlu1 %1061 }
 0x500   :  { %13368 = vrcp.f32 %v1055_v63  ;;  %12367 = vmatprep.subr.mxu1 %v1062_v1 }
 0x501   :  { %12368 = vmatpush3.msra.mxu1 %v1062_v1 }
 0x502   :  { %12380 = vmatprep.subr.bf16.mxu1 %v14273_v19 }
 0x503   :  { %v1263_v2 = vpop.permute.xlu0 %1262  ;;  %v1259_v20 = vpop.permute.xlu1 %1258 }
 0x504   :  { %12388 = vmatprep.subr.msk.mxu0 %vm757_vm9, %v1263_v2 }
 0x507   :  { %v1261_v21 = vpop.permute.xlu1 %1260 }
 0x509   :  { %v13367_v6 = vpop.eup %13366 }
 0x50a   :  { %v1058_v7 = vmul.f32 %v13367_v6, %v13359_v45 }
 0x50c   :  { %12369 = vmatprep.mubr.msk.f32.mxu1 %vm844_vm10, %v1058_v7  ;;  %v14699_v7 = vld [vmem:[#allocation13 + $0x20] sm:$0xff]  }
 0x50d   :  { %v13369_v8 = vpop.eup %13368 }
 0x50e   :  { %v1059_v11 = vmul.f32 %v13369_v8, %v13361_v48 }
 0x510   :  { %12370 = vmatmul.mubr.msk.f32.vlgmr.msra.gmra.mxu1 %vm844_vm10, %v1059_v11 }
 0x511   :  { %12381 = vmatpush3.bf16.msra.mxu1 %v14651_v9  ;;  %12384 = vmatprep.mubr.msk.bf16.mxu1 %vm14275_vm0, %v14273_v19 }
 0x512   :  { %12382 = vmatprep.subr.bf16.mxu1 %v14273_v19 }
 0x515   :  { %12383 = vmatpush3.bf16.msra.mxu1 %v14655_v12 }
 0x55a   :  { %v12361_v13 = vpop.f32.mrf.mxu1 }
 0x55c   :  { %v939_v14 = vpop.f32.mrf.mxu1 }
 0x55d   :  { %v948_v15 = vpack.c.bf16 %v12361_v13, %v939_v14 }
 0x55f   :  { %12385 = vmatmul.mubr.msk.bf16.vlgmr.msra.gmra.mxu1 %vm757_vm9, %v948_v15 }
 0x5d0   :  { %v12371_v16 = vpop.f32.mrf.mxu1 }
 0x5d2   :  { %v1136_v17 = vpop.f32.mrf.mxu1 }
 0x5d3   :  { %v1145_v18 = vpack.c.bf16 %v12371_v16, %v1136_v17 }
 0x5d5   :  { %12377 = vmatmul.mubr.msk.bf16.vlgmr.msra.gmra.mxu0 %vm757_vm9, %v1145_v18 }
 0x5d6   :  { %12389 = vmatpush3.xpose.msk.msra.mxu0 %vm757_vm9, %v1263_v2  ;;  %12390 = vmatprep.mubr.msk.f32.mxu0 %vm757_vm9, %v1259_v20 }
 0x5d7   :  { %12398 = vmatprep.subr.bf16.mxu0 %v14273_v19 }
 0x5dd   :  { %12391 = vmatmul.mubr.msk.f32.vlgmr.msra.gmra.mxu0 %vm757_vm9, %v1261_v21  ;;  %v14712_v21 = vadd.f32 %v14610_v0, %v14590_v56 }
 0x5de   :  { %12402 = vmatprep.mubr.msk.bf16.mxu0 %vm14275_vm0, %v14273_v19 }
 0x61f   :  { %v14669_v22 = vpop.f32.mrf.mxu1 }
 0x621   :  { %v12386_v23 = vpop.f32.mrf.mxu1 }
 0x623   :  { %v14671_v25 = vpop.f32.mrf.mxu1 }
 0x625   :  { %v12387_v26 = vpop.f32.mrf.mxu1 }
 0x695   :  { %v14673_v4 = vpop.f32.mrf.mxu0 }
 0x697   :  { %v12378_v28 = vpop.f32.mrf.mxu0 }
 0x699   :  { %v14675_v10 = vpop.f32.mrf.mxu0 }
 0x69b   :  { %v12379_v29 = vpop.f32.mrf.mxu0 }
 0x69d   :  { %v12392_v33 = vpop.f32.mrf.mxu0 }
 0x69e   :  { %v1346_v34 = vmul.f32 0.17677669, %v12392_v33 }
 0x69f   :  { %v1336_v37 = vpop.f32.mrf.mxu0 }
 0x6a0   :  { %v1345_v32 = vmul.f32 0.17677669, %v1336_v37  ;;  %v1350_v39 = vsel %vm844_vm10, %v1346_v34, -inf }
 0x6a1   :  { %1351 = vmax.xlane.f32.xlu0 %v1350_v39  ;;  %v1252_v39 = vadd.f32 %v14669_v22, %v14673_v4 }
 0x6a2   :  { %v1347_v40 = vsel %vm844_vm10, %v1345_v32, -inf }
 0x6a3   :  { %1348 = vmax.xlane.f32.xlu1 %v1347_v40 }
 0x6b4   :  { %1369 = vrot.lane.b32.xlu1 %v14621_v27, %s14257_s0 }
 0x6b8   :  { %1512 = vrot.lane.b32.xlu1 %v14571_v36, %s14277_s19 }
 0x6bc   :  { %1514 = vrot.lane.b32.xlu1 %v14577_v42, %s14277_s19  ;;  %v14689_v42 = vld [vmem:[#allocation13 + $0x28] sm:$0xff]  }
 0x6bd   :  { %12399 = vmatpush3.bf16.msra.mxu0 %v14689_v42 }
 0x6be   :  { %12400 = vmatprep.subr.bf16.mxu0 %v14273_v19 }
 0x6c1   :  { %12401 = vmatpush3.bf16.msra.mxu0 %v14699_v7 }
 0x6c2   :  { %12416 = vmatprep.subr.bf16.mxu0 %v14273_v19 }
 0x72a   :  { %v1352_v41 = vpop.xlane.xlu0 %1351 }
 0x72b   :  { %v1354_v43 = vsub.f32 %v1346_v34, %v1352_v41 }
 0x72c   :  { %v1349_v44 = vpop.xlane.xlu1 %1348 }
 0x72d   :  { %v1357_v45 = vmul.f32 1.442695, %v1354_v43  ;;  %v1353_v46 = vsub.f32 %v1345_v32, %v1349_v44  ;;  %v1255_v44 = vadd.f32 %v14671_v25, %v14675_v10  ;;  %v14741_v10 = vld [vmem:[#allocation13 + $0x30] sm:$0xff]  }
 0x72f   :  { %13370 = vpow2.f32 %v1357_v45  ;;  %v1355_v48 = vmul.f32 1.442695, %v1353_v46 }
 0x730   :  { %v1370_v49 = vpop.permute.xlu1 %1369 }
 0x731   :  { %13372 = vpow2.f32 %v1355_v48  ;;  %12393 = vmatprep.subr.mxu1 %v1370_v49 }
 0x732   :  { %12394 = vmatpush3.msra.mxu1 %v1370_v49  ;;  %v14726_v49 = vld [vmem:[#allocation13 + $0x38] sm:$0xff]  }
 0x734   :  { %v1513_v1 = vpop.permute.xlu1 %1512 }
 0x73c   :  { %v13371_v54 = vpop.eup %13370 }
 0x73d   :  { %v1362_v55 = vsel %vm844_vm10, %v13371_v54, 0.0 }
 0x73e   :  { %v13373_v57 = vpop.eup %13372  ;;  %1363 = vadd.xlane.f32.xlu0 %v1362_v55 }
 0x73f   :  { %v1359_v36 = vsel %vm844_vm10, %v13373_v57, 0.0 }
 0x742   :  { %1360 = vadd.xlane.f32.xlu0 %v1359_v36 }
 0x758   :  { %1516 = vrot.lane.b32.xlu0 %v14593_v59, %s14277_s19  ;;  %v1515_v59 = vpop.permute.xlu1 %1514 }
 0x7c7   :  { %v1364_v58 = vpop.xlane.xlu0 %1363 }
 0x7c8   :  { %13374 = vrcp.f32 %v1364_v58 }
 0x7cb   :  { %v1361_v60 = vpop.xlane.xlu0 %1360 }
 0x7cc   :  { %13376 = vrcp.f32 %v1361_v60 }
 0x7cf   :  { %v1517_v61 = vpop.permute.xlu0 %1516 }
 0x7d0   :  { %12406 = vmatprep.subr.msk.mxu1 %vm757_vm9, %v1517_v61 }
 0x7d5   :  { %v13375_v62 = vpop.eup %13374 }
 0x7d6   :  { %v1368_v6 = vmul.f32 %v13375_v62, %v13371_v54 }
 0x7d9   :  { %v13377_v63 = vpop.eup %13376 }
 0x7da   :  { %v1367_v2 = vmul.f32 %v13377_v63, %v13373_v57 }
 0x7dc   :  { %12395 = vmatprep.mubr.msk.f32.mxu1 %vm844_vm10, %v1367_v2 }
 0x7dd   :  { %12396 = vmatmul.mubr.msk.f32.vlgmr.msra.gmra.mxu1 %vm844_vm10, %v1368_v6 }
 0x7de   :  { %12407 = vmatpush3.xpose.msk.msra.mxu1 %vm757_vm9, %v1517_v61  ;;  %12408 = vmatprep.mubr.msk.f32.mxu1 %vm757_vm9, %v1513_v1 }
 0x7e1   :  { %12409 = vmatmul.mubr.msk.f32.vlgmr.msra.gmra.mxu1 %vm757_vm9, %v1515_v59 }
 0x89d   :  { %v12397_v8 = vpop.f32.mrf.mxu1 }
 0x89f   :  { %v1444_v11 = vpop.f32.mrf.mxu1 }
 0x8a0   :  { %v1453_v13 = vpack.c.bf16 %v12397_v8, %v1444_v11 }
 0x8a1   :  { %v12410_v14 = vpop.f32.mrf.mxu1 }
 0x8a2   :  { %v1600_v15 = vmul.f32 0.17677669, %v12410_v14  ;;  %12403 = vmatmul.mubr.msk.bf16.vlgmr.msra.gmra.mxu0 %vm757_vm9, %v1453_v13 }
 0x8a3   :  { %v1590_v16 = vpop.f32.mrf.mxu1  ;;  %12420 = vmatprep.mubr.msk.bf16.mxu0 %vm14275_vm0, %v14273_v19  ;;  %12417 = vmatpush3.bf16.msra.mxu0 %v14726_v49 }
 0x8a4   :  { %v1599_v17 = vmul.f32 0.17677669, %v1590_v16  ;;  %v1604_v18 = vsel %vm844_vm10, %v1600_v15, -inf  ;;  %12418 = vmatprep.subr.bf16.mxu0 %v14273_v19 }
 0x8a5   :  { %1605 = vmax.xlane.f32.xlu0 %v1604_v18 }
 0x8a6   :  { %v1601_v20 = vsel %vm844_vm10, %v1599_v17, -inf }
 0x8a7   :  { %1602 = vmax.xlane.f32.xlu1 %v1601_v20  ;;  %12419 = vmatpush3.bf16.msra.mxu0 %v14741_v10 }
 0x8b8   :  { %1623 = vrot.lane.b32.xlu1 %v14621_v27, %s14277_s19 }
 0x8bc   :  { %1960 = vrot.lane.b32.xlu1 %v14712_v21, %s14276_s11 }
 0x8c0   :  { %1958 = vrot.lane.b32.xlu1 %v14586_v53, %s14276_s11 }
 0x92e   :  { %v1606_v23 = vpop.xlane.xlu0 %1605 }
 0x92f   :  { %v1608_v26 = vsub.f32 %v1600_v15, %v1606_v23 }
 0x930   :  { %v1603_v28 = vpop.xlane.xlu1 %1602 }
 0x931   :  { %v1607_v29 = vsub.f32 %v1599_v17, %v1603_v28  ;;  %v1611_v33 = vmul.f32 1.442695, %v1608_v26 }
 0x933   :  { %v1609_v34 = vmul.f32 1.442695, %v1607_v29 }
 0x934   :  { %v1624_v37 = vpop.permute.xlu1 %1623 }
 0x935   :  { %13378 = vpow2.f32 %v1609_v34  ;;  %12411 = vmatprep.subr.mxu1 %v1624_v37 }
 0x936   :  { %12412 = vmatpush3.msra.mxu1 %v1624_v37  ;;  %13380 = vpow2.f32 %v1611_v33 }
 0x937   :  { %12424 = vmatprep.subr.msk.mxu1 %vm757_vm9, %v14712_v21 }
 0x938   :  { %v1961_v25 = vpop.permute.xlu1 %1960 }
 0x942   :  { %v13379_v56 = vpop.eup %13378 }
 0x943   :  { %v1613_v0 = vsel %vm844_vm10, %v13379_v56, 0.0  ;;  %v13381_v27 = vpop.eup %13380 }
 0x944   :  { %1614 = vadd.xlane.f32.xlu0 %v1613_v0  ;;  %v1616_v32 = vsel %vm844_vm10, %v13381_v27, 0.0 }
 0x948   :  { %1617 = vadd.xlane.f32.xlu0 %v1616_v32 }
 0x962   :  { %v1503_v40 = vpop.f32.mrf.mxu0 }
 0x963   :  { %v1510_v41 = vadd.f32 %v1503_v40, %v1252_v39 }
 0x964   :  { %v12404_v43 = vpop.f32.mrf.mxu0 }
 0x966   :  { %v1506_v45 = vpop.f32.mrf.mxu0 }
 0x967   :  { %v1511_v46 = vadd.f32 %v1506_v45, %v1255_v44 }
 0x968   :  { %v12405_v48 = vpop.f32.mrf.mxu0 }
 0x9cd   :  { %v1615_v54 = vpop.xlane.xlu0 %1614 }
 0x9ce   :  { %13382 = vrcp.f32 %v1615_v54 }
 0x9d1   :  { %v1618_v55 = vpop.xlane.xlu0 %1617 }
 0x9d2   :  { %13384 = vrcp.f32 %v1618_v55 }
 0x9db   :  { %v13383_v22 = vpop.eup %13382 }
 0x9dc   :  { %v1621_v4 = vmul.f32 %v13383_v22, %v13379_v56 }
 0x9de   :  { %12413 = vmatprep.mubr.msk.f32.mxu1 %vm844_vm10, %v1621_v4 }
 0x9df   :  { %v13385_v57 = vpop.eup %13384 }
 0x9e0   :  { %v1622_v36 = vmul.f32 %v13385_v57, %v13381_v27 }
 0x9e2   :  { %12414 = vmatmul.mubr.msk.f32.vlgmr.msra.gmra.mxu1 %vm844_vm10, %v1622_v36 }
 0x9e3   :  { %12425 = vmatpush3.xpose.msk.msra.mxu1 %vm757_vm9, %v14712_v21  ;;  %12426 = vmatprep.mubr.msk.f32.mxu1 %vm757_vm9, %v14581_v47 }
 0x9e4   :  { %12429 = vmatprep.subr.mxu1 %v14627_v35 }
 0x9e6   :  { %12427 = vmatmul.mubr.msk.f32.vlgmr.msra.gmra.mxu1 %vm757_vm9, %v14586_v53 }
 0x9e7   :  { %12430 = vmatpush3.msra.mxu1 %v14627_v35 }
 0x9e8   :  { %12434 = vmatprep.subr.msk.mxu1 %vm757_vm9, %v1961_v25 }
 0xaa2   :  { %v12415_v58 = vpop.f32.mrf.mxu1 }
 0xaa4   :  { %v1698_v60 = vpop.f32.mrf.mxu1 }
 0xaa5   :  { %v1707_v61 = vpack.c.bf16 %v12415_v58, %v1698_v60 }
 0xaa6   :  { %v12428_v62 = vpop.f32.mrf.mxu1 }
 0xaa7   :  { %12421 = vmatmul.mubr.msk.bf16.vlgmr.msra.gmra.mxu0 %vm757_vm9, %v1707_v61  ;;  %v1851_v2 = vmul.f32 0.17677669, %v12428_v62 }
 0xaa8   :  { %v1841_v63 = vpop.f32.mrf.mxu1 }
 0xaa9   :  { %v1850_v1 = vmul.f32 0.17677669, %v1841_v63  ;;  %v1855_v59 = vsel %vm844_vm10, %v1851_v2, -inf }
 0xaab   :  { %v1852_v6 = vsel %vm844_vm10, %v1850_v1, -inf }
 0xaac   :  { %1853 = vmax.xlane.f32.xlu0 %v1852_v6 }
 0xab0   :  { %1856 = vmax.xlane.f32.xlu0 %v1855_v59 }
 0xb35   :  { %v1854_v8 = vpop.xlane.xlu0 %1853 }
 0xb36   :  { %v1858_v11 = vsub.f32 %v1850_v1, %v1854_v8 }
 0xb38   :  { %v1860_v13 = vmul.f32 1.442695, %v1858_v11 }
 0xb39   :  { %v1857_v14 = vpop.xlane.xlu0 %1856 }
 0xb3a   :  { %13386 = vpow2.f32 %v1860_v13  ;;  %v1859_v15 = vsub.f32 %v1851_v2, %v1857_v14 }
 0xb3c   :  { %v1862_v16 = vmul.f32 1.442695, %v1859_v15 }
 0xb3e   :  { %13388 = vpow2.f32 %v1862_v16 }
 0xb47   :  { %v13387_v17 = vpop.eup %13386 }
 0xb48   :  { %v1864_v18 = vsel %vm844_vm10, %v13387_v17, 0.0 }
 0xb49   :  { %1865 = vadd.xlane.f32.xlu0 %v1864_v18 }
 0xb4b   :  { %v13389_v20 = vpop.eup %13388 }
 0xb4c   :  { %v1867_v23 = vsel %vm844_vm10, %v13389_v20, 0.0 }
 0xb4d   :  { %1868 = vadd.xlane.f32.xlu0 %v1867_v23 }
 0xb63   :  { %1956 = vrot.lane.b32.xlu0 %v14581_v47, %s14276_s11 }
 0xb67   :  { %v1757_v26 = vpop.f32.mrf.mxu0 }
 0xb68   :  { %v14751_v28 = vadd.f32 %v1757_v26, %v1510_v41  ;;  %v1959_v41 = vpop.permute.xlu1 %1958 }
 0xb69   :  { %v12422_v29 = vpop.f32.mrf.mxu0 }
 0xb6b   :  { %v1760_v33 = vpop.f32.mrf.mxu0 }
 0xb6c   :  { %v14753_v34 = vadd.f32 %v1760_v33, %v1511_v46 }
 0xb6d   :  { %v12423_v37 = vpop.f32.mrf.mxu0 }
 0xbd2   :  { %v1866_v56 = vpop.xlane.xlu0 %1865 }
 0xbd3   :  { %13390 = vrcp.f32 %v1866_v56 }
 0xbd6   :  { %v1869_v0 = vpop.xlane.xlu0 %1868 }
 0xbd7   :  { %13392 = vrcp.f32 %v1869_v0 }
 0xbda   :  { %v1957_v43 = vpop.permute.xlu0 %1956 }
 0xbe0   :  { %v13391_v27 = vpop.eup %13390 }
 0xbe1   :  { %v1872_v32 = vmul.f32 %v13391_v27, %v13387_v17 }
 0xbe3   :  { %12431 = vmatprep.mubr.msk.f32.mxu1 %vm844_vm10, %v1872_v32 }
 0xbe4   :  { %v13393_v39 = vpop.eup %13392 }
 0xbe5   :  { %v1873_v40 = vmul.f32 %v13393_v39, %v13389_v20 }
 0xbe7   :  { %12432 = vmatmul.mubr.msk.f32.vlgmr.msra.gmra.mxu1 %vm844_vm10, %v1873_v40 }
 0xbe8   :  { %12435 = vmatpush3.xpose.msk.msra.mxu1 %vm757_vm9, %v1961_v25  ;;  %12436 = vmatprep.mubr.msk.f32.mxu1 %vm757_vm9, %v1957_v43 }
 0xbe9   :  { %12444 = vmatprep.subr.bf16.mxu1 %v14273_v19 }
 0xbeb   :  { %12437 = vmatmul.mubr.msk.f32.vlgmr.msra.gmra.mxu1 %vm757_vm9, %v1959_v41 }
 0xbec   :  { %12445 = vmatpush3.bf16.msra.mxu1 %v14631_v51  ;;  %12448 = vmatprep.mubr.msk.bf16.mxu1 %vm14275_vm0, %v14273_v19 }
 0xbed   :  { %12446 = vmatprep.subr.bf16.mxu1 %v14273_v19 }
 0xbf0   :  { %12447 = vmatpush3.bf16.msra.mxu1 %v14635_v52 }
 0xca7   :  { %v12433_v44 = vpop.f32.mrf.mxu1 }
 0xca9   :  { %v1946_v45 = vpop.f32.mrf.mxu1 }
 0xcaa   :  { %v1955_v15 = vpack.c.bf16 %v12433_v44, %v1946_v45 }
 0xcab   :  { %v12438_v46 = vpop.f32.mrf.mxu1 }
 0xcac   :  { %v2044_v48 = vmul.f32 0.17677669, %v12438_v46 }
 0xcad   :  { %v2034_v54 = vpop.f32.mrf.mxu1 }
 0xcae   :  { %v2043_v55 = vmul.f32 0.17677669, %v2034_v54  ;;  %v2048_v22 = vsel %vm844_vm10, %v2044_v48, -inf }
 0xcaf   :  { %2049 = vmax.xlane.f32.xlu0 %v2048_v22 }
 0xcb0   :  { %v2045_v4 = vsel %vm844_vm10, %v2043_v55, -inf }
 0xcb1   :  { %2046 = vmax.xlane.f32.xlu1 %v2045_v4 }
 0xcc5   :  { %2245 = vrot.lane.b32.xlu0 %v14712_v21, %s14257_s0 }
 0xd38   :  { %v2050_v51 = vpop.xlane.xlu0 %2049 }
 0xd39   :  { %v2052_v57 = vsub.f32 %v2044_v48, %v2050_v51 }
 0xd3a   :  { %v2047_v36 = vpop.xlane.xlu1 %2046 }
 0xd3b   :  { %v2055_v25 = vmul.f32 1.442695, %v2052_v57  ;;  %v2051_v52 = vsub.f32 %v2043_v55, %v2047_v36 }
 0xd3c   :  { %v2246_v58 = vpop.permute.xlu0 %2245 }
 0xd3d   :  { %13394 = vpow2.f32 %v2055_v25  ;;  %v2053_v60 = vmul.f32 1.442695, %v2051_v52  ;;  %12460 = vmatprep.subr.msk.mxu1 %vm757_vm9, %v2246_v58 }
 0xd3f   :  { %13396 = vpow2.f32 %v2053_v60 }
 0xd4a   :  { %v13395_v61 = vpop.eup %13394 }
 0xd4b   :  { %v2060_v62 = vsel %vm844_vm10, %v13395_v61, 0.0 }
 0xd4c   :  { %v13397_v63 = vpop.eup %13396  ;;  %2061 = vadd.xlane.f32.xlu1 %v2060_v62 }
 0xd4d   :  { %v2057_v1 = vsel %vm844_vm10, %v13397_v63, 0.0 }
 0xd50   :  { %2058 = vadd.xlane.f32.xlu1 %v2057_v1 }
 0xd61   :  { %2068 = vrot.lane.b32.xlu1 %v14627_v35, %s14276_s11 }
 0xd65   :  { %2241 = vrot.lane.b32.xlu1 %v14581_v47, %s14257_s0 }
 0xd69   :  { %2243 = vrot.lane.b32.xlu1 %v14586_v53, %s14257_s0 }
 0xdd5   :  { %v2062_v2 = vpop.xlane.xlu1 %2061 }
 0xdd6   :  { %13398 = vrcp.f32 %v2062_v2 }
 0xdd9   :  { %v2059_v6 = vpop.xlane.xlu1 %2058 }
 0xdda   :  { %13400 = vrcp.f32 %v2059_v6 }
 0xddd   :  { %v2069_v59 = vpop.permute.xlu1 %2068 }
 0xdde   :  { %12439 = vmatprep.subr.mxu0 %v2069_v59 }
 0xddf   :  { %12440 = vmatpush3.msra.mxu0 %v2069_v59 }
 0xde0   :  { %12452 = vmatprep.subr.bf16.mxu0 %v14273_v19 }
 0xde1   :  { %v2242_v20 = vpop.permute.xlu1 %2241 }
 0xde3   :  { %v13399_v8 = vpop.eup %13398 }
 0xde4   :  { %v2066_v14 = vmul.f32 %v13399_v8, %v13395_v61 }
 0xde5   :  { %v2244_v26 = vpop.permute.xlu1 %2243 }
 0xde7   :  { %v13401_v11 = vpop.eup %13400 }
 0xde8   :  { %v2065_v13 = vmul.f32 %v13401_v11, %v13397_v63 }
 0xdea   :  { %12441 = vmatprep.mubr.msk.f32.mxu0 %vm844_vm10, %v2065_v13 }
 0xdeb   :  { %12442 = vmatmul.mubr.msk.f32.vlgmr.msra.gmra.mxu0 %vm844_vm10, %v2066_v14 }
 0xdec   :  { %12453 = vmatpush3.bf16.msra.mxu0 %v14651_v9  ;;  %12456 = vmatprep.mubr.msk.bf16.mxu0 %vm14275_vm0, %v14273_v19 }
 0xded   :  { %12454 = vmatprep.subr.bf16.mxu0 %v14273_v19 }
 0xdf0   :  { %12455 = vmatpush3.bf16.msra.mxu0 %v14655_v12 }
 0xdf3   :  { %12457 = vmatmul.mubr.msk.bf16.vlgmr.msra.gmra.mxu0 %vm757_vm9, %v1955_v15 }
 0xeab   :  { %v12443_v16 = vpop.f32.mrf.mxu0 }
 0xead   :  { %v2143_v17 = vpop.f32.mrf.mxu0 }
 0xeae   :  { %v2152_v18 = vpack.c.bf16 %v12443_v16, %v2143_v17 }
 0xeb0   :  { %12449 = vmatmul.mubr.msk.bf16.vlgmr.msra.gmra.mxu1 %vm757_vm9, %v2152_v18 }
 0xeb1   :  { %12461 = vmatpush3.xpose.msk.msra.mxu1 %vm757_vm9, %v2246_v58  ;;  %12462 = vmatprep.mubr.msk.f32.mxu1 %vm757_vm9, %v2242_v20  ;;  %v14835_v20 = vld [vmem:[#allocation14] ss:$0 sm:$0xff] }
 0xeb2   :  { %12470 = vmatprep.subr.bf16.mxu1 %v14273_v19 }
 0xeb3   :  { %v14792_v9 = vpop.f32.mrf.mxu0 }
 0xeb5   :  { %v12458_v23 = vpop.f32.mrf.mxu0 }
 0xeb6   :  { %v2732_v23 = vadd.f32 %v14835_v20, %v14751_v28 }
 0xeb7   :  { %v14794_v12 = vpop.f32.mrf.mxu0 }
 0xeb8   :  { %12463 = vmatmul.mubr.msk.f32.vlgmr.msra.gmra.mxu1 %vm757_vm9, %v2244_v26  ;;  %v2733_v26 = vadd.f32 %v14835_v20, %v14753_v34 }
 0xeb9   :  { %v12459_v29 = vpop.f32.mrf.mxu0  ;;  %12471 = vmatpush3.bf16.msra.mxu1 %v14689_v42  ;;  %12474 = vmatprep.mubr.msk.bf16.mxu1 %vm14275_vm0, %v14273_v19 }
 0xeba   :  { %12472 = vmatprep.subr.bf16.mxu1 %v14273_v19 }
 0xebd   :  { %12473 = vmatpush3.bf16.msra.mxu1 %v14699_v7 }
 0xebe   :  { %12488 = vmatprep.subr.bf16.mxu1 %v14273_v19 }
 0xf70   :  { %v14803_v33 = vpop.f32.mrf.mxu1 }
 0xf72   :  { %v12450_v37 = vpop.f32.mrf.mxu1 }
 0xf73   :  { %v13787_v37 = vld [vmem:[%s16428_s23 + $0x8] sm:$0xff] }
 0xf74   :  { %v14805_v56 = vpop.f32.mrf.mxu1 }
 0xf76   :  { %v12451_v0 = vpop.f32.mrf.mxu1 }
 0xf77   :  { %v14849_v0 = vadd.f32 %v13787_v37, %v2733_v26  ;;  %v13089_v26 = vld [vmem:[#allocation17 + $0x30] ss:$12 sps:$4 sm:$0xff]   ;;  %v13092_v37 = vld [vmem:[#allocation17 + $0x18] ss:$12 sps:$4 sm:$0xff]  }
 0xf78   :  { %v12464_v27 = vpop.f32.mrf.mxu1 }
 0xf79   :  { %v2329_v32 = vmul.f32 0.17677669, %v12464_v27 }
 0xf7a   :  { %v2319_v39 = vpop.f32.mrf.mxu1 }
 0xf7b   :  { %v2328_v40 = vmul.f32 0.17677669, %v2319_v39  ;;  %v2333_v42 = vsel %vm844_vm10, %v2329_v32, -inf }
 0xf7c   :  { %2334 = vmax.xlane.f32.xlu0 %v2333_v42 }
 0xf7d   :  { %v2330_v43 = vsel %vm844_vm10, %v2328_v40, -inf }
 0xf7e   :  { %2331 = vmax.xlane.f32.xlu1 %v2330_v43 }
 0xf8f   :  { %2352 = vrot.lane.b32.xlu1 %v14627_v35, %s14257_s0 }
 0xf93   :  { %2483 = vrot.lane.b32.xlu1 %v14581_v47, %s14277_s19 }
 0xf97   :  { %2485 = vrot.lane.b32.xlu1 %v14586_v53, %s14277_s19 }
0x1005   :  { %v2335_v7 = vpop.xlane.xlu0 %2334 }
0x1006   :  { %v2337_v41 = vsub.f32 %v2329_v32, %v2335_v7 }
0x1007   :  { %v2332_v44 = vpop.xlane.xlu1 %2331 }
0x1008   :  { %v2340_v45 = vmul.f32 1.442695, %v2337_v41  ;;  %v2336_v46 = vsub.f32 %v2328_v40, %v2332_v44  ;;  %v14857_v40 = vadd.f32 1e-06, %v14849_v0  ;;  %v2235_v41 = vadd.f32 %v14792_v9, %v14803_v33 }
0x100a   :  { %13402 = vpow2.f32 %v2340_v45  ;;  %v2338_v48 = vmul.f32 1.442695, %v2336_v46  ;;  %v2746_v43 = vadd.f32 1e-06, %v14857_v40  ;;  %v13076_v46 = vld [vmem:[#allocation17 + $0xac] ss:$12 sps:$4 sm:$0xff]  }
0x100b   :  { %v2353_v54 = vpop.permute.xlu1 %2352 }
0x100c   :  { %13404 = vpow2.f32 %v2338_v48  ;;  %12465 = vmatprep.subr.mxu0 %v2353_v54  ;;  %v2750_v7 = vmul.f32 %v2746_v43, %v2746_v43  ;;  %v14873_v43 = vld [vmem:[#allocation16] ss:$0 sm:$0xff] }
0x100d   :  { %12466 = vmatpush3.msra.mxu0 %v2353_v54  ;;  %v2238_v54 = vadd.f32 %v14794_v12, %v14805_v56  ;;  %v13079_v56 = vld [vmem:[#allocation17 + $0x94] ss:$12 sps:$4 sm:$0xff]  }
0x100f   :  { %v2484_v52 = vpop.permute.xlu1 %2483 }
0x1017   :  { %v13403_v55 = vpop.eup %13402 }
0x1018   :  { %v2345_v22 = vsel %vm844_vm10, %v13403_v55, 0.0 }
0x1019   :  { %v13405_v4 = vpop.eup %13404  ;;  %2346 = vadd.xlane.f32.xlu0 %v2345_v22 }
0x101a   :  { %v2342_v47 = vsel %vm844_vm10, %v13405_v4, 0.0 }
0x101d   :  { %2343 = vadd.xlane.f32.xlu0 %v2342_v47 }
0x1033   :  { %2487 = vrot.lane.b32.xlu0 %v14712_v21, %s14277_s19  ;;  %v2486_v21 = vpop.permute.xlu1 %2485 }
0x10a2   :  { %v2347_v53 = vpop.xlane.xlu0 %2346 }
0x10a3   :  { %13406 = vrcp.f32 %v2347_v53 }
0x10a6   :  { %v2344_v51 = vpop.xlane.xlu0 %2343 }
0x10a7   :  { %13408 = vrcp.f32 %v2344_v51 }
0x10aa   :  { %v2488_v57 = vpop.permute.xlu0 %2487 }
0x10ab   :  { %12478 = vmatprep.subr.msk.mxu0 %vm757_vm9, %v2488_v57 }
0x10b0   :  { %v13407_v36 = vpop.eup %13406 }
0x10b1   :  { %v2351_v60 = vmul.f32 %v13407_v36, %v13403_v55 }
0x10b4   :  { %v13409_v25 = vpop.eup %13408 }
0x10b5   :  { %v2350_v58 = vmul.f32 %v13409_v25, %v13405_v4  ;;  %v13074_v25 = vld [vmem:[#allocation17 + $0xa8] ss:$12 sps:$4 sm:$0xff]  }
0x10b7   :  { %12467 = vmatprep.mubr.msk.f32.mxu0 %vm844_vm10, %v2350_v58  ;;  %v13077_v58 = vld [vmem:[#allocation17 + $0x90] ss:$12 sps:$4 sm:$0xff]  }
0x10b8   :  { %12468 = vmatmul.mubr.msk.f32.vlgmr.msra.gmra.mxu0 %vm844_vm10, %v2351_v60 }
0x10b9   :  { %12479 = vmatpush3.xpose.msk.msra.mxu0 %vm757_vm9, %v2488_v57  ;;  %12480 = vmatprep.mubr.msk.f32.mxu0 %vm757_vm9, %v2484_v52 }
0x10bc   :  { %12481 = vmatmul.mubr.msk.f32.vlgmr.msra.gmra.mxu0 %vm757_vm9, %v2486_v21  ;;  %v13082_v21 = vld [vmem:[#allocation17 + $0x7c] ss:$12 sps:$4 sm:$0xff]  }
0x1178   :  { %v12469_v61 = vpop.f32.mrf.mxu0 }
0x117a   :  { %v2427_v62 = vpop.f32.mrf.mxu0 }
0x117b   :  { %v2436_v63 = vpack.c.bf16 %v12469_v61, %v2427_v62 }
0x117c   :  { %v12482_v1 = vpop.f32.mrf.mxu0 }
0x117d   :  { %v2571_v2 = vmul.f32 0.17677669, %v12482_v1  ;;  %12475 = vmatmul.mubr.msk.bf16.vlgmr.msra.gmra.mxu1 %vm757_vm9, %v2436_v63 }
0x117e   :  { %v2561_v6 = vpop.f32.mrf.mxu0  ;;  %12489 = vmatpush3.bf16.msra.mxu1 %v14726_v49  ;;  %12492 = vmatprep.mubr.msk.bf16.mxu1 %vm14275_vm0, %v14273_v19 }
0x117f   :  { %v2570_v59 = vmul.f32 0.17677669, %v2561_v6  ;;  %v2575_v8 = vsel %vm844_vm10, %v2571_v2, -inf  ;;  %12490 = vmatprep.subr.bf16.mxu1 %v14273_v19 }
0x1180   :  { %2576 = vmax.xlane.f32.xlu0 %v2575_v8  ;;  %v13085_v8 = vld [vmem:[#allocation17 + $0x64] ss:$12 sps:$4 sm:$0xff]  }
0x1181   :  { %v2572_v11 = vsel %vm844_vm10, %v2570_v59, -inf }
0x1182   :  { %2573 = vmax.xlane.f32.xlu1 %v2572_v11  ;;  %12491 = vmatpush3.bf16.msra.mxu1 %v14741_v10 }
0x1193   :  { %2594 = vrot.lane.b32.xlu1 %v14627_v35, %s14277_s19  ;;  %v13786_v35 = vld [vmem:[%s16428_s23] sm:$0xff] }
0x1194   :  { %v14842_v10 = vadd.f32 %v13786_v35, %v2732_v23  ;;  %v13086_v23 = vld [vmem:[#allocation17 + $0x48] ss:$12 sps:$4 sm:$0xff]  }
0x1195   :  { %v13091_v35 = vld [vmem:[#allocation17 + $0x34] ss:$12 sps:$4 sm:$0xff]  }
0x1196   :  { %v14852_v27 = vadd.f32 1e-06, %v14842_v10 }
0x1198   :  { %v2745_v39 = vadd.f32 1e-06, %v14852_v27 }
0x119a   :  { %v2749_v42 = vmul.f32 %v2745_v39, %v2745_v39  ;;  %v13095_v39 = vld [vmem:[#allocation17] ss:$12 sps:$4 sm:$0xff]  }
0x1209   :  { %v2577_v13 = vpop.xlane.xlu0 %2576 }
0x120a   :  { %v2579_v14 = vsub.f32 %v2571_v2, %v2577_v13  ;;  %v13080_v2 = vld [vmem:[#allocation17 + $0x78] ss:$12 sps:$4 sm:$0xff]  }
0x120b   :  { %v2574_v49 = vpop.xlane.xlu1 %2573 }
0x120c   :  { %v2578_v15 = vsub.f32 %v2570_v59, %v2574_v49  ;;  %v2582_v16 = vmul.f32 1.442695, %v2579_v14 }
0x120e   :  { %v2580_v17 = vmul.f32 1.442695, %v2578_v15  ;;  %v13083_v15 = vld [vmem:[#allocation17 + $0x60] ss:$12 sps:$4 sm:$0xff]  }
0x120f   :  { %v2595_v18 = vpop.permute.xlu1 %2594 }
0x1210   :  { %13410 = vpow2.f32 %v2580_v17  ;;  %12483 = vmatprep.subr.mxu0 %v2595_v18  ;;  %v13088_v17 = vld [vmem:[#allocation17 + $0x4c] ss:$12 sps:$4 sm:$0xff]  }
0x1211   :  { %12484 = vmatpush3.msra.mxu0 %v2595_v18  ;;  %13412 = vpow2.f32 %v2582_v16 }
0x1212   :  { %2994 = vmatprep.subr.bf16.mxu0 %v13076_v46 }
0x121d   :  { %v13411_v29 = vpop.eup %13410 }
0x121e   :  { %v2584_v28 = vsel %vm844_vm10, %v13411_v29, 0.0  ;;  %v13413_v32 = vpop.eup %13412 }
0x121f   :  { %2585 = vadd.xlane.f32.xlu0 %v2584_v28  ;;  %v2587_v34 = vsel %vm844_vm10, %v13413_v32, 0.0  ;;  %v13097_v28 = vld [vmem:[#allocation17 + $0x4] ss:$12 sps:$4 sm:$0xff]  }
0x1223   :  { %2588 = vadd.xlane.f32.xlu0 %v2587_v34 }
0x1227   :  { %2753 = vadd.xlane.f32.xlu0 %v2749_v42 }
0x122b   :  { %2755 = vadd.xlane.f32.xlu0 %v2750_v7 }
0x123d   :  { %v2474_v44 = vpop.f32.mrf.mxu1 }
0x123e   :  { %v14863_v45 = vadd.f32 %v2474_v44, %v2235_v41 }
0x123f   :  { %v12476_v48 = vpop.f32.mrf.mxu1 }
0x1240   :  { %v13098_v48 = vld [vmem:[#allocation17 + $0xb0] ss:$12 sps:$4 sm:$0xff]  }
0x1241   :  { %v2477_v55 = vpop.f32.mrf.mxu1  ;;  %12496 = vmatprep.subr.bf16.mxu1 %v13098_v48 }
0x1242   :  { %v14867_v22 = vadd.f32 %v2477_v55, %v2238_v54 }
0x1243   :  { %v12477_v4 = vpop.f32.mrf.mxu1 }
0x12a8   :  { %v2586_v47 = vpop.xlane.xlu0 %2585 }
0x12a9   :  { %13414 = vrcp.f32 %v2586_v47  ;;  %v13101_v47 = vld [vmem:[#allocation17 + $0x68] ss:$12 sps:$4 sm:$0xff]  }
0x12ac   :  { %v2589_v53 = vpop.xlane.xlu0 %2588 }
0x12ad   :  { %13416 = vrcp.f32 %v2589_v53  ;;  %v13102_v53 = vld [vmem:[#allocation17 + $0x50] ss:$12 sps:$4 sm:$0xff]  }
0x12b0   :  { %v2754_v51 = vpop.xlane.xlu0 %2753 }
0x12b1   :  { %13418 = vrsqrt.f32 %v2754_v51  ;;  %vm2763_vm11 = vcmp.eq.f32.partialorder %v2754_v51, inf  ;;  %v2766_v61 = vand.u32 2147483648, %v2754_v51  ;;  %vm2765_vm12 = vcmp.eq.f32.partialorder %v2754_v51, 0.0 }
0x12b4   :  { %v2756_v9 = vpop.xlane.xlu0 %2755 }
0x12b5   :  { %13420 = vrsqrt.f32 %v2756_v9  ;;  %vm2770_vm13 = vcmp.eq.f32.partialorder %v2756_v9, inf  ;;  %v2773_v11 = vand.u32 2147483648, %v2756_v9  ;;  %vm2772_vm14 = vcmp.eq.f32.partialorder %v2756_v9, 0.0 }
0x12b6   :  { %v13415_v33 = vpop.eup %13414 }
0x12b7   :  { %v2592_v57 = vmul.f32 %v13415_v33, %v13411_v29  ;;  %v13094_v29 = vld [vmem:[#allocation17 + $0x1c] ss:$12 sps:$4 sm:$0xff]   ;;  %v14880_v33 = vld [vmem:[#allocation19] sm:$0x7] }
0x12b9   :  { %12485 = vmatprep.mubr.msk.f32.mxu0 %vm844_vm10, %v2592_v57  ;;  %v13105_v57 = vld [vmem:[#allocation17 + $0x8] ss:$12 sps:$4 sm:$0xff]  }
0x12ba   :  { %v13417_v36 = vpop.eup %13416 }
0x12bb   :  { %v2593_v12 = vmul.f32 %v13417_v36, %v13413_v32  ;;  %v14884_v36 = vrot.slane %v14880_v33, %v14584_v50 }
0x12bd   :  { %12486 = vmatmul.mubr.msk.f32.vlgmr.msra.gmra.mxu0 %vm844_vm10, %v2593_v12 }
0x12be   :  { %v13419_v52 = vpop.eup %13418  ;;  %2995 = vmatpush1.bf16.msra.mxu0 %v13074_v25  ;;  %3026 = vmatprep.mubr.bf16.mxu0 %v14274_v38 }
0x12bf   :  { %v2762_v60 = vmul.f32 %v13419_v52, %v2754_v51  ;;  %2996 = vmatprep.subr.bf16.mxu0 %v13079_v56 }
0x12c1   :  { %v2764_v62 = vsel %vm2763_vm11, %v2754_v51, %v2762_v60  ;;  %v13103_v51 = vld [vmem:[#allocation17 + $0x38] ss:$12 sps:$4 sm:$0xff]  }
0x12c2   :  { %v13421_v63 = vpop.eup %13420  ;;  %v2767_v1 = vsel %vm2765_vm12, %v2766_v61, %v2764_v62  ;;  %2997 = vmatpush1.bf16.msra.mxu0 %v13077_v58 }
0x12c3   :  { %v2789_v6 = vmul.f32 11.313708, %v2767_v1  ;;  %v2769_v59 = vmul.f32 %v13421_v63, %v2756_v9  ;;  %2998 = vmatprep.subr.bf16.mxu0 %v13082_v21  ;;  %v14892_v21 = vand.u32 127, %v356_v3  ;;  %v14899_v1 = vld [vmem:[#allocation7 + $0x8] sm:$0xff] }
0x12c5   :  { %v2793_v13 = vadd.f32 1e-06, %v2789_v6  ;;  %v2771_v14 = vsel %vm2770_vm13, %v2756_v9, %v2769_v59  ;;  %v13104_v9 = vld [vmem:[#allocation17 + $0x20] ss:$12 sps:$4 sm:$0xff]   ;;  %v362_v61 = vand.u32 31, %v14892_v21  ;;  %vm15005_vm7 = vcmp.le.s32.totalorder %v14892_v21, %v14562_v30 }
0x12c6   :  { %v2774_v49 = vsel %vm2772_vm14, %v2773_v11, %v2771_v14  ;;  %2999 = vmatpush1.bf16.msra.mxu0 %v13080_v2  ;;  %v14901_v59 = vld [vmem:[#allocation5 + $0x8] sm:$0xff] }
0x12c7   :  { %13422 = vrcp.f32 %v2793_v13  ;;  %v2790_v16 = vmul.f32 11.313708, %v2774_v49  ;;  %3000 = vmatprep.subr.bf16.mxu0 %v13085_v8  ;;  %vm14895_vm15 = vcmp.lt.s32.totalorder %v362_v61, 16 }
0x12c9   :  { %v2794_v18 = vadd.f32 1e-06, %v2790_v16 }
0x12ca   :  { %3001 = vmatpush1.bf16.msra.mxu0 %v13083_v15 }
0x12cb   :  { %13424 = vrcp.f32 %v2794_v18  ;;  %3002 = vmatprep.subr.bf16.mxu0 %v13088_v17  ;;  %v13788_v18 = vld [vmem:[%s16428_s23 + $0x10] sm:$0xff] }
0x12ce   :  { %3003 = vmatpush1.bf16.msra.mxu0 %v13086_v23 }
0x12cf   :  { %3004 = vmatprep.subr.bf16.mxu0 %v13091_v35 }
0x12d2   :  { %3005 = vmatpush1.bf16.msra.mxu0 %v13089_v26 }
0x12d3   :  { %3006 = vmatprep.subr.bf16.mxu0 %v13094_v29 }
0x12d4   :  { %v13423_v32 = vpop.eup %13422 }
0x12d5   :  { %v2801_v34 = vmul.f32 %v13423_v32, %v14852_v27  ;;  %v13099_v27 = vld [vmem:[#allocation17 + $0x98] ss:$12 sps:$4 sm:$0xff]  }
0x12d6   :  { %3007 = vmatpush1.bf16.msra.mxu0 %v13092_v37 }
0x12d7   :  { %3008 = vmatprep.subr.bf16.mxu0 %v13097_v28  ;;  %v2811_v41 = vmul.f32 %v14873_v43, %v2801_v34 }
0x12d8   :  { %v13425_v42 = vpop.eup %13424 }
0x12d9   :  { %v2802_v7 = vmul.f32 %v13425_v42, %v14857_v40  ;;  %v13100_v40 = vld [vmem:[#allocation17 + $0x80] ss:$12 sps:$4 sm:$0xff]  }
0x12da   :  { %3009 = vmatpush1.bf16.msra.mxu0 %v13095_v39 }
0x12db   :  { %v2812_v44 = vmul.f32 %v14873_v43, %v2802_v7 }
0x12dd   :  { %v2815_v46 = vpack.c.bf16 %v2812_v44, %v2811_v41 }
0x12df   :  { %3027 = vmatmul.mubr.bf16.vlgmr.msra.gmra.mxu0 %v2815_v46 }
0x12e0   :  { %3036 = vmatprep.mubr.bf16.mxu0 %v14274_v38 }
0x137d   :  { %v12487_v54 = vpop.f32.mrf.mxu0 }
0x137f   :  { %v2669_v55 = vpop.f32.mrf.mxu0 }
0x1380   :  { %v2678_v4 = vpack.c.bf16 %v12487_v54, %v2669_v55  ;;  %v348_v54 = vld [vmem:[#allocation5] sm:$0xff] }
0x1381   :  { %v352_v55 = vld [vmem:[#allocation7] sm:$0xff] }
0x1382   :  { %12493 = vmatmul.mubr.msk.bf16.vlgmr.msra.gmra.mxu1 %vm757_vm9, %v2678_v4 }
0x1383   :  { %12512 = vmatprep.mubr.bf16.mxu1 %v2815_v46  ;;  %12497 = vmatpush3.bf16.msra.mxu1 %v13098_v48 }
0x1384   :  { %12498 = vmatprep.subr.bf16.mxu1 %v13099_v27 }
0x1387   :  { %12499 = vmatpush3.bf16.msra.mxu1 %v13099_v27 }
0x1388   :  { %12500 = vmatprep.subr.bf16.mxu1 %v13100_v40 }
0x138b   :  { %12501 = vmatpush3.bf16.msra.mxu1 %v13100_v40 }
0x138c   :  { %12502 = vmatprep.subr.bf16.mxu1 %v13101_v47 }
0x138f   :  { %12503 = vmatpush3.bf16.msra.mxu1 %v13101_v47 }
0x1390   :  { %12504 = vmatprep.subr.bf16.mxu1 %v13102_v53 }
0x1393   :  { %12505 = vmatpush3.bf16.msra.mxu1 %v13102_v53 }
0x1394   :  { %12506 = vmatprep.subr.bf16.mxu1 %v13103_v51 }
0x1397   :  { %12507 = vmatpush3.bf16.msra.mxu1 %v13103_v51 }
0x1398   :  { %12508 = vmatprep.subr.bf16.mxu1 %v13104_v9 }
0x139b   :  { %12509 = vmatpush3.bf16.msra.mxu1 %v13104_v9 }
0x139c   :  { %12510 = vmatprep.subr.bf16.mxu1 %v13105_v57 }
0x139f   :  { %v3028_v25 = vpop.f32.mrf.mxu0  ;;  %12511 = vmatpush3.bf16.msra.mxu1 %v13105_v57 }
0x13a1   :  { %v3030_v12 = vpop.f32.mrf.mxu0 }
0x13a2   :  { %v3031_v56 = vadd.f32 %v3030_v12, %v14884_v36 }
0x13a3   :  { %v3032_v52 = vpop.f32.mrf.mxu0 }
0x13a4   :  { %3128 = vrot.lane.b32.xlu1 %v3031_v56, %s14278_s7  ;;  %v3148_v51 = vmul.f32 %v3031_v56, %v348_v54 }
0x13a5   :  { %v3034_v58 = vpop.f32.mrf.mxu0 }
0x13a6   :  { %v3035_v60 = vadd.f32 %v3034_v58, %v14884_v36 }
0x13a8   :  { %3130 = vrot.lane.b32.xlu0 %v3035_v60, %s14278_s7  ;;  %3138 = vrot.lane.b32.xlu1 %v3035_v60, %s14246_s25  ;;  %v3149_v11 = vmul.f32 %v3035_v60, %v14901_v59 }
0x1416   :  { %v3129_v62 = vpop.permute.xlu1 %3128 }
0x141a   :  { %v3131_v2 = vpop.permute.xlu0 %3130  ;;  %v3139_v6 = vpop.permute.xlu1 %3138 }
0x141b   :  { %v3145_v8 = vsel %vm14895_vm15, %v3131_v2, %v3139_v6 }
0x141c   :  { %v3153_v3 = vmul.f32 %v3145_v8, %v14899_v1 }
0x141e   :  { %v14907_v13 = vadd.f32 %v3153_v3, %v3149_v11 }
0x1420   :  { %12516 = vmatprep.subr.msk.mxu1 %vm757_vm9, %v14907_v13 }
0x1442   :  { %v2716_v14 = vpop.f32.mrf.mxu1 }
0x1443   :  { %v2723_v49 = vadd.f32 %v2716_v14, %v14863_v45  ;;  %v13789_v45 = vld [vmem:[%s16428_s23 + $0x18] sm:$0xff] }
0x1444   :  { %v12494_v15 = vpop.f32.mrf.mxu1 }
0x1445   :  { %v2734_v16 = vadd.f32 %v14835_v20, %v2723_v49 }
0x1446   :  { %v2719_v17 = vpop.f32.mrf.mxu1 }
0x1447   :  { %v14916_v23 = vadd.f32 %v13788_v18, %v2734_v16  ;;  %v2724_v35 = vadd.f32 %v2719_v17, %v14867_v22 }
0x1448   :  { %v12495_v26 = vpop.f32.mrf.mxu1 }
0x1449   :  { %v2735_v29 = vadd.f32 %v14835_v20, %v2724_v35  ;;  %v14921_v37 = vadd.f32 1e-06, %v14916_v23  ;;  %v14935_v20 = vrot.slane %v14880_v33, %v14565_v31 }
0x144b   :  { %v14926_v28 = vadd.f32 %v13789_v45, %v2735_v29  ;;  %v2747_v32 = vadd.f32 1e-06, %v14921_v37  ;;  %v3029_v7 = vadd.f32 %v3028_v25, %v14935_v20  ;;  %v3033_v41 = vadd.f32 %v3032_v52, %v14935_v20 }
0x144d   :  { %v2751_v39 = vmul.f32 %v2747_v32, %v2747_v32  ;;  %v14930_v34 = vadd.f32 1e-06, %v14926_v28  ;;  %v3116_v53 = vmul.f32 %v3029_v7, %v348_v54  ;;  %v3117_v8 = vmul.f32 %v3033_v41, %v14901_v59 }
0x144e   :  { %v373_v54 = vadd.s32 8, %v14562_v30 }
0x144f   :  { %2757 = vadd.xlane.f32.xlu1 %v2751_v39  ;;  %v2748_v22 = vadd.f32 1e-06, %v14930_v34 }
0x1450   :  { %vm14996_vm5 = vcmp.le.s32.totalorder %v14892_v21, %v373_v54 }
0x1451   :  { %v2752_v42 = vmul.f32 %v2748_v22, %v2748_v22 }
0x1453   :  { %2759 = vadd.xlane.f32.xlu0 %v2752_v42 }
0x1460   :  { %3096 = vrot.lane.b32.xlu1 %v3029_v7, %s14278_s7 }
0x1464   :  { %3104 = vrot.lane.b32.xlu1 %v3029_v7, %s14246_s25 }
0x1468   :  { %3098 = vrot.lane.b32.xlu1 %v3033_v41, %s14278_s7 }
0x1469   :  { %3136 = vrot.lane.b32.xlu0 %v3031_v56, %s14246_s25 }
0x146c   :  { %3106 = vrot.lane.b32.xlu1 %v3033_v41, %s14246_s25  ;;  %v2862_v41 = vrot.slane %v14880_v33, %v14617_v24 }
0x146d   :  { %3370 = vrot.lane.b32.xlu0 %v14907_v13, %s14257_s0 }
0x14d8   :  { %v2758_v44 = vpop.xlane.xlu1 %2757 }
0x14d9   :  { %13426 = vrsqrt.f32 %v2758_v44  ;;  %vm2777_vm1 = vcmp.eq.f32.partialorder %v2758_v44, inf  ;;  %v2780_v61 = vand.u32 2147483648, %v2758_v44  ;;  %vm2779_vm2 = vcmp.eq.f32.partialorder %v2758_v44, 0.0 }
0x14dc   :  { %v3097_v46 = vpop.permute.xlu1 %3096  ;;  %v2760_v48 = vpop.xlane.xlu0 %2759 }
0x14dd   :  { %13428 = vrsqrt.f32 %v2760_v48  ;;  %vm2784_vm3 = vcmp.eq.f32.partialorder %v2760_v48, inf  ;;  %v2787_v15 = vand.u32 2147483648, %v2760_v48  ;;  %vm2786_vm4 = vcmp.eq.f32.partialorder %v2760_v48, 0.0 }
0x14e0   :  { %v3105_v4 = vpop.permute.xlu1 %3104  ;;  %v3137_v27 = vpop.permute.xlu0 %3136 }
0x14e1   :  { %v3112_v40 = vsel %vm14895_vm15, %v3097_v46, %v3105_v4  ;;  %v3144_v47 = vsel %vm14895_vm15, %v3129_v62, %v3137_v27 }
0x14e2   :  { %v3120_v9 = vmul.f32 %v3112_v40, %v352_v55  ;;  %v3152_v57 = vmul.f32 %v3144_v47, %v352_v55 }
0x14e4   :  { %v14950_v25 = vadd.f32 %v3120_v9, %v3116_v53  ;;  %v14952_v12 = vadd.f32 %v3152_v57, %v3148_v51  ;;  %v3099_v52 = vpop.permute.xlu1 %3098 }
0x14e6   :  { %v13427_v58 = vpop.eup %13426  ;;  %3364 = vrot.lane.b32.xlu0 %v14950_v25, %s14257_s0  ;;  %3368 = vrot.lane.b32.xlu1 %v14952_v12, %s14257_s0 }
0x14e7   :  { %v2776_v60 = vmul.f32 %v13427_v58, %v2758_v44 }
0x14e8   :  { %v3107_v62 = vpop.permute.xlu1 %3106 }
0x14e9   :  { %v2778_v2 = vsel %vm2777_vm1, %v2758_v44, %v2776_v60  ;;  %v3113_v56 = vsel %vm14895_vm15, %v3099_v52, %v3107_v62 }
0x14ea   :  { %v13429_v6 = vpop.eup %13428  ;;  %v2781_v11 = vsel %vm2779_vm2, %v2780_v61, %v2778_v2  ;;  %v3121_v3 = vmul.f32 %v3113_v56, %v14899_v1 }
0x14eb   :  { %v2791_v14 = vmul.f32 11.313708, %v2781_v11  ;;  %v2783_v49 = vmul.f32 %v13429_v6, %v2760_v48 }
0x14ec   :  { %v14962_v16 = vadd.f32 %v3121_v3, %v3117_v8 }
0x14ed   :  { %v2795_v17 = vadd.f32 1e-06, %v2791_v14  ;;  %v2785_v18 = vsel %vm2784_vm3, %v2760_v48, %v2783_v49 }
0x14ee   :  { %v2788_v35 = vsel %vm2786_vm4, %v2787_v15, %v2785_v18  ;;  %3366 = vrot.lane.b32.xlu1 %v14962_v16, %s14257_s0 }
0x14ef   :  { %13430 = vrcp.f32 %v2795_v17  ;;  %v2792_v26 = vmul.f32 11.313708, %v2788_v35 }
0x14f1   :  { %v2796_v29 = vadd.f32 1e-06, %v2792_v26 }
0x14f3   :  { %13432 = vrcp.f32 %v2796_v29 }
0x14fc   :  { %v13431_v59 = vpop.eup %13430 }
0x14fd   :  { %v2803_v1 = vmul.f32 %v13431_v59, %v14921_v37  ;;  %v3371_v37 = vpop.permute.xlu0 %3370 }
0x14ff   :  { %v2813_v39 = vmul.f32 %v14873_v43, %v2803_v1 }
0x1500   :  { %v13433_v45 = vpop.eup %13432 }
0x1501   :  { %v2804_v32 = vmul.f32 %v13433_v45, %v14930_v34 }
0x1503   :  { %v2814_v22 = vmul.f32 %v14873_v43, %v2804_v32 }
0x1505   :  { %v2816_v42 = vpack.c.bf16 %v2814_v22, %v2813_v39 }
0x1507   :  { %3037 = vmatmul.mubr.bf16.gmra.mxu0 %v2816_v42  ;;  %12513 = vmatmul.mubr.bf16.vlgmr.msra.gmra.mxu1 %v2816_v42 }
0x1508   :  { %12517 = vmatpush3.xpose.msk.msra.mxu1 %vm757_vm9, %v14907_v13  ;;  %12520 = vmatprep.mubr.msk.f32.mxu1 %vm757_vm9, %v14950_v25 }
0x1509   :  { %12518 = vmatprep.subr.msk.mxu1 %vm757_vm9, %v14952_v12 }
0x150c   :  { %12519 = vmatpush3.xpose.msk.msra.mxu1 %vm757_vm9, %v14952_v12 }
0x150d   :  { %12530 = vmatprep.subr.msk.mxu1 %vm757_vm9, %v3371_v37 }
0x150f   :  { %12521 = vmatmul.mubr.msk.f32.vlgmr.msra.gmra.mxu1 %vm757_vm9, %v14962_v16 }
0x1510   :  { %12531 = vmatpush3.xpose.msk.msra.mxu1 %vm757_vm9, %v3371_v37 }
0x1558   :  { %v3369_v43 = vpop.permute.xlu1 %3368  ;;  %v3365_v34 = vpop.permute.xlu0 %3364 }
0x1559   :  { %12532 = vmatprep.subr.msk.mxu1 %vm757_vm9, %v3369_v43  ;;  %12534 = vmatprep.mubr.msk.f32.mxu1 %vm757_vm9, %v3365_v34 }
0x155a   :  { %12533 = vmatpush3.xpose.msk.msra.mxu1 %vm757_vm9, %v3369_v43 }
0x1560   :  { %v3367_v7 = vpop.permute.xlu1 %3366 }
0x1561   :  { %12535 = vmatmul.mubr.msk.f32.vlgmr.msra.gmra.mxu1 %vm757_vm9, %v3367_v7 }
0x15c7   :  { %v12514_v44 = vpop.f32.mrf.mxu1 }
0x15c8   :  { %v14988_v46 = vadd.f32 %v12514_v44, %v2862_v41 }
0x15c9   :  { %v3081_v48 = vpop.f32.mrf.mxu1 }
0x15ca   :  { %v15000_v51 = vadd.f32 %v3081_v48, %v2862_v41 }
0x15cb   :  { %v12515_v55 = vpop.f32.mrf.mxu1 }
0x15cc   :  { %v14991_v4 = vadd.f32 %v12515_v55, %v2862_v41 }
0x15cd   :  { %v3084_v27 = vpop.f32.mrf.mxu1 }
0x15ce   :  { %v14993_v40 = vadd.f32 %v3084_v27, %v2862_v41 }
0x15cf   :  { %v12522_v53 = vpop.f32.mrf.mxu1 }
0x15d0   :  { %v3257_v33 = vmul.f32 0.17677669, %v12522_v53  ;;  %12523 = vmatprep.subr.mxu0 %v14993_v40 }
0x15d1   :  { %v3247_v57 = vpop.f32.mrf.mxu1  ;;  %12524 = vmatpush3.msra.mxu0 %v14993_v40 }
0x15d2   :  { %v3256_v52 = vmul.f32 0.17677669, %v3247_v57  ;;  %12525 = vmatprep.subr.mxu0 %v15000_v51  ;;  %v3259_v58 = vsel %vm14996_vm5, %v3257_v33, -1e+30 }
0x15d3   :  { %12526 = vmatpush3.msra.mxu0 %v15000_v51  ;;  %v3264_v60 = vsel %vm3260_vm6, %v3259_v58, -inf }
0x15d4   :  { %3265 = vmax.xlane.f32.xlu1 %v3264_v60  ;;  %v3258_v21 = vsel %vm15005_vm7, %v3256_v52, -1e+30 }
0x15d5   :  { %v3261_v61 = vsel %vm3260_vm6, %v3258_v21, -inf }
0x15d6   :  { %3262 = vmax.xlane.f32.xlu0 %v3261_v61 }
0x1621   :  { %v12536_v62 = vpop.f32.mrf.mxu1 }
0x1622   :  { %v3456_v56 = vmul.f32 0.17677669, %v12536_v62 }
0x1623   :  { %v3446_v2 = vpop.f32.mrf.mxu1 }
0x1624   :  { %v3455_v6 = vmul.f32 0.17677669, %v3446_v2  ;;  %v3458_v3 = vsel %vm14996_vm5, %v3456_v56, -1e+30 }
0x1625   :  { %v3462_v14 = vsel %vm3260_vm6, %v3458_v3, -inf }
0x1626   :  { %v3457_v8 = vsel %vm15005_vm7, %v3455_v6, -1e+30 }
0x1627   :  { %v3459_v11 = vsel %vm3260_vm6, %v3457_v8, -inf }
0x1628   :  { %3460 = vmax.xlane.f32.xlu0 %v3459_v11 }
0x162c   :  { %3463 = vmax.xlane.f32.xlu0 %v3462_v14 }
0x165d   :  { %v3266_v49 = vpop.xlane.xlu1 %3265 }
0x165e   :  { %v3268_v15 = vsub.f32 %v3259_v58, %v3266_v49 }
0x165f   :  { %v3263_v17 = vpop.xlane.xlu0 %3262 }
0x1660   :  { %v3271_v18 = vmul.f32 1.442695, %v3268_v15  ;;  %v3267_v35 = vsub.f32 %v3258_v21, %v3263_v17 }
0x1662   :  { %13434 = vpow2.f32 %v3271_v18  ;;  %v3269_v26 = vmul.f32 1.442695, %v3267_v35 }
0x1664   :  { %13436 = vpow2.f32 %v3269_v26 }
0x166f   :  { %v13435_v29 = vpop.eup %13434 }
0x1670   :  { %v3276_v59 = vsel %vm3260_vm6, %v13435_v29, 0.0 }
0x1671   :  { %v13437_v1 = vpop.eup %13436  ;;  %3277 = vadd.xlane.f32.xlu1 %v3276_v59 }
0x1672   :  { %v3273_v45 = vsel %vm3260_vm6, %v13437_v1, 0.0 }
0x1673   :  { %3274 = vadd.xlane.f32.xlu0 %v3273_v45 }
0x16b1   :  { %v3461_v32 = vpop.xlane.xlu0 %3460 }
0x16b2   :  { %v3465_v39 = vsub.f32 %v3457_v8, %v3461_v32 }
0x16b4   :  { %v3467_v22 = vmul.f32 1.442695, %v3465_v39 }
0x16b5   :  { %v3464_v42 = vpop.xlane.xlu0 %3463 }
0x16b6   :  { %13438 = vpow2.f32 %v3467_v22  ;;  %v3466_v37 = vsub.f32 %v3458_v3, %v3464_v42  ;;  %v15050_v3 = vpop.f32.mrf.mxu0 }
0x16b8   :  { %v3469_v43 = vmul.f32 1.442695, %v3466_v37  ;;  %v15052_v14 = vpop.f32.mrf.mxu0 }
0x16ba   :  { %13440 = vpow2.f32 %v3469_v43  ;;  %v15054_v49 = vpop.f32.mrf.mxu0 }
0x16bc   :  { %v15056_v15 = vpop.f32.mrf.mxu0 }
0x16c3   :  { %v13439_v34 = vpop.eup %13438 }
0x16c4   :  { %v3471_v7 = vsel %vm3260_vm6, %v13439_v34, 0.0 }
0x16c5   :  { %3472 = vadd.xlane.f32.xlu0 %v3471_v7 }
0x16c7   :  { %v13441_v41 = vpop.eup %13440 }
0x16c8   :  { %v3474_v44 = vsel %vm3260_vm6, %v13441_v41, 0.0 }
0x16c9   :  { %3475 = vadd.xlane.f32.xlu1 %v3474_v44 }
0x16da   :  { %3483 = vrot.lane.b32.xlu1 %v15000_v51, %s14257_s0 }
0x16db   :  { %3485 = vrot.lane.b32.xlu0 %v14993_v40, %s14257_s0 }
0x16de   :  { %3614 = vrot.lane.b32.xlu1 %v14907_v13, %s14276_s11 }
0x16df   :  { %3608 = vrot.lane.b32.xlu0 %v14950_v25, %s14276_s11 }
0x16e2   :  { %3612 = vrot.lane.b32.xlu1 %v14952_v12, %s14276_s11 }
0x16e6   :  { %3610 = vrot.lane.b32.xlu1 %v14962_v16, %s14276_s11 }
0x16fa   :  { %v3278_v48 = vpop.xlane.xlu1 %3277 }
0x16fb   :  { %13442 = vrcp.f32 %v3278_v48 }
0x16fc   :  { %v3275_v54 = vpop.xlane.xlu0 %3274 }
0x16fd   :  { %13444 = vrcp.f32 %v3275_v54 }
0x1708   :  { %v13443_v55 = vpop.eup %13442 }
0x1709   :  { %v3282_v33 = vmul.f32 %v13443_v55, %v13435_v29 }
0x170a   :  { %v13445_v27 = vpop.eup %13444 }
0x170b   :  { %v3281_v53 = vmul.f32 %v13445_v27, %v13437_v1 }
0x170d   :  { %12527 = vmatprep.mubr.msk.f32.mxu0 %vm3260_vm6, %v3281_v53 }
0x170e   :  { %12528 = vmatmul.mubr.msk.f32.vlgmr.msra.gmra.mxu0 %vm3260_vm6, %v3282_v33 }
0x174e   :  { %v3473_v57 = vpop.xlane.xlu0 %3472 }
0x174f   :  { %13446 = vrcp.f32 %v3473_v57 }
0x1752   :  { %v3476_v52 = vpop.xlane.xlu1 %3475  ;;  %v3486_v58 = vpop.permute.xlu0 %3485 }
0x1753   :  { %13448 = vrcp.f32 %v3476_v52  ;;  %12537 = vmatprep.subr.mxu0 %v3486_v58 }
0x1754   :  { %12538 = vmatpush3.msra.mxu0 %v3486_v58 }
0x1756   :  { %v3484_v60 = vpop.permute.xlu1 %3483  ;;  %v3609_v6 = vpop.permute.xlu0 %3608 }
0x1757   :  { %12539 = vmatprep.subr.mxu0 %v3484_v60 }
0x1758   :  { %12540 = vmatpush3.msra.mxu0 %v3484_v60 }
0x175a   :  { %v3615_v21 = vpop.permute.xlu1 %3614 }
0x175b   :  { %12544 = vmatprep.subr.msk.mxu0 %vm757_vm9, %v3615_v21 }
0x175c   :  { %v13447_v61 = vpop.eup %13446 }
0x175d   :  { %v3479_v62 = vmul.f32 %v13447_v61, %v13439_v34  ;;  %v15093_v61 = vld [vmem:[#allocation20 + $0x8] sm:$0xff]  }
0x175e   :  { %v3613_v8 = vpop.permute.xlu1 %3612 }
0x175f   :  { %12541 = vmatprep.mubr.msk.f32.mxu0 %vm3260_vm6, %v3479_v62 }
0x1760   :  { %v13449_v2 = vpop.eup %13448 }
0x1761   :  { %v3480_v56 = vmul.f32 %v13449_v2, %v13441_v41  ;;  %v15098_v2 = vld [vmem:[#allocation20] sm:$0xff]  }
0x1762   :  { %v3611_v11 = vpop.permute.xlu1 %3610 }
0x1763   :  { %12542 = vmatmul.mubr.msk.f32.vlgmr.msra.gmra.mxu0 %vm3260_vm6, %v3480_v56 }
0x1764   :  { %12545 = vmatpush3.xpose.msk.msra.mxu0 %vm757_vm9, %v3615_v21  ;;  %12548 = vmatprep.mubr.msk.f32.mxu0 %vm757_vm9, %v3609_v6 }
0x1765   :  { %12546 = vmatprep.subr.msk.mxu0 %vm757_vm9, %v3613_v8 }
0x1768   :  { %12547 = vmatpush3.xpose.msk.msra.mxu0 %vm757_vm9, %v3613_v8 }
0x176b   :  { %12549 = vmatmul.mubr.msk.f32.vlgmr.msra.gmra.mxu0 %vm757_vm9, %v3611_v11 }
0x17ce   :  { %v15058_v17 = vpop.f32.mrf.mxu0 }
0x17d0   :  { %v15060_v18 = vpop.f32.mrf.mxu0 }
0x1823   :  { %v15062_v35 = vpop.f32.mrf.mxu0 }
0x1825   :  { %v15064_v26 = vpop.f32.mrf.mxu0 }
0x182b   :  { %v12550_v29 = vpop.f32.mrf.mxu0 }
0x182c   :  { %v3700_v59 = vmul.f32 0.17677669, %v12550_v29 }
0x182d   :  { %v3690_v1 = vpop.f32.mrf.mxu0 }
0x182e   :  { %v3699_v45 = vmul.f32 0.17677669, %v3690_v1  ;;  %v3702_v32 = vsel %vm14996_vm5, %v3700_v59, -1e+30 }
0x182f   :  { %v3706_v39 = vsel %vm3260_vm6, %v3702_v32, -inf }
0x1830   :  { %3707 = vmax.xlane.f32.xlu1 %v3706_v39  ;;  %v3701_v22 = vsel %vm15005_vm7, %v3699_v45, -1e+30 }
0x1831   :  { %v3703_v42 = vsel %vm3260_vm6, %v3701_v22, -inf }
0x1832   :  { %3704 = vmax.xlane.f32.xlu0 %v3703_v42 }
0x1841   :  { %3725 = vrot.lane.b32.xlu1 %v15000_v51, %s14276_s11 }
0x1845   :  { %3818 = vrot.lane.b32.xlu1 %v14907_v13, %s14277_s19 }
0x1849   :  { %3816 = vrot.lane.b32.xlu1 %v14952_v12, %s14277_s19 }
0x184d   :  { %3814 = vrot.lane.b32.xlu1 %v14962_v16, %s14277_s19 }
0x18b9   :  { %v3708_v37 = vpop.xlane.xlu1 %3707 }
0x18ba   :  { %v3710_v43 = vsub.f32 %v3702_v32, %v3708_v37 }
0x18bb   :  { %v3705_v34 = vpop.xlane.xlu0 %3704 }
0x18bc   :  { %v3713_v7 = vmul.f32 1.442695, %v3710_v43  ;;  %v3709_v41 = vsub.f32 %v3701_v22, %v3705_v34 }
0x18bd   :  { %v3726_v27 = vpop.permute.xlu1 %3725 }
0x18be   :  { %13450 = vpow2.f32 %v3713_v7  ;;  %v3711_v44 = vmul.f32 1.442695, %v3709_v41 }
0x18c0   :  { %13452 = vpow2.f32 %v3711_v44 }
0x18c1   :  { %v3819_v33 = vpop.permute.xlu1 %3818 }
0x18c5   :  { %v3817_v21 = vpop.permute.xlu1 %3816 }
0x18c9   :  { %v3815_v62 = vpop.permute.xlu1 %3814 }
0x18cb   :  { %v13451_v48 = vpop.eup %13450 }
0x18cc   :  { %v3718_v54 = vsel %vm3260_vm6, %v13451_v48, 0.0 }
0x18cd   :  { %v13453_v55 = vpop.eup %13452  ;;  %3719 = vadd.xlane.f32.xlu0 %v3718_v54 }
0x18ce   :  { %v3715_v13 = vsel %vm3260_vm6, %v13453_v55, 0.0 }
0x18d1   :  { %3716 = vadd.xlane.f32.xlu0 %v3715_v13 }
0x18e7   :  { %3727 = vrot.lane.b32.xlu0 %v14993_v40, %s14276_s11 }
0x18eb   :  { %3812 = vrot.lane.b32.xlu0 %v14950_v25, %s14277_s19 }
0x1956   :  { %v3720_v12 = vpop.xlane.xlu0 %3719 }
0x1957   :  { %13454 = vrcp.f32 %v3720_v12 }
0x195a   :  { %v3717_v16 = vpop.xlane.xlu0 %3716 }
0x195b   :  { %13456 = vrcp.f32 %v3717_v16 }
0x195e   :  { %v3728_v53 = vpop.permute.xlu0 %3727 }
0x195f   :  { %12551 = vmatprep.subr.mxu1 %v3728_v53 }
0x1960   :  { %12552 = vmatpush3.msra.mxu1 %v3728_v53 }
0x1961   :  { %12553 = vmatprep.subr.mxu1 %v3726_v27 }
0x1962   :  { %12554 = vmatpush3.msra.mxu1 %v3726_v27  ;;  %v3813_v25 = vpop.permute.xlu0 %3812 }
0x1963   :  { %12558 = vmatprep.subr.msk.mxu1 %vm757_vm9, %v3819_v33 }
0x1964   :  { %v13455_v57 = vpop.eup %13454 }
0x1965   :  { %v3724_v60 = vmul.f32 %v13455_v57, %v13451_v48 }
0x1968   :  { %v13457_v52 = vpop.eup %13456 }
0x1969   :  { %v3723_v58 = vmul.f32 %v13457_v52, %v13453_v55  ;;  %v15124_v52 = vld [vmem:[#allocation23] ss:$0 sm:$0xff] }
0x196b   :  { %12555 = vmatprep.mubr.msk.f32.mxu1 %vm3260_vm6, %v3723_v58 }
0x196c   :  { %12556 = vmatmul.mubr.msk.f32.vlgmr.msra.gmra.mxu1 %vm3260_vm6, %v3724_v60 }
0x196d   :  { %12559 = vmatpush3.xpose.msk.msra.mxu1 %vm757_vm9, %v3819_v33  ;;  %12562 = vmatprep.mubr.msk.f32.mxu1 %vm757_vm9, %v3813_v25 }
0x196e   :  { %12560 = vmatprep.subr.msk.mxu1 %vm757_vm9, %v3817_v21 }
0x1971   :  { %12561 = vmatpush3.xpose.msk.msra.mxu1 %vm757_vm9, %v3817_v21 }
0x1972   :  { %12580 = vmatprep.subr.bf16.mxu1 %v14273_v19 }
0x1974   :  { %12563 = vmatmul.mubr.msk.f32.vlgmr.msra.gmra.mxu1 %vm757_vm9, %v3815_v62 }
0x1975   :  { %12581 = vmatpush3.bf16.msra.mxu1 %v15093_v61  ;;  %12584 = vmatprep.mubr.msk.bf16.mxu1 %vm14275_vm0, %v14273_v19 }
0x1976   :  { %12582 = vmatprep.subr.bf16.mxu1 %v14273_v19 }
0x1979   :  { %12583 = vmatpush3.bf16.msra.mxu1 %v15098_v2 }
0x197a   :  { %12595 = vmatprep.subr.mxu1 %v14991_v4 }
0x1a2c   :  { %v12557_v56 = vpop.f32.mrf.mxu1 }
0x1a2e   :  { %v3803_v6 = vpop.f32.mrf.mxu1 }
0x1a34   :  { %v12564_v8 = vpop.f32.mrf.mxu1 }
0x1a35   :  { %v3904_v11 = vmul.f32 0.17677669, %v12564_v8 }
0x1a36   :  { %v3894_v29 = vpop.f32.mrf.mxu1 }
0x1a37   :  { %v3906_v59 = vsel %vm14996_vm5, %v3904_v11, -1e+30  ;;  %v3903_v1 = vmul.f32 0.17677669, %v3894_v29 }
0x1a38   :  { %v3910_v45 = vsel %vm3260_vm6, %v3906_v59, -inf }
0x1a39   :  { %3911 = vmax.xlane.f32.xlu1 %v3910_v45  ;;  %v3905_v32 = vsel %vm15005_vm7, %v3903_v1, -1e+30  ;;  %v15132_v45 = vld [vmem:[#allocation20 + $0x18] sm:$0xff]  }
0x1a3a   :  { %v3907_v39 = vsel %vm3260_vm6, %v3905_v32, -inf }
0x1a3b   :  { %3908 = vmax.xlane.f32.xlu0 %v3907_v39  ;;  %v15138_v39 = vld [vmem:[#allocation20 + $0x10] sm:$0xff]  }
0x1a4a   :  { %3929 = vrot.lane.b32.xlu1 %v15000_v51, %s14277_s19 }
0x1ac2   :  { %v3912_v22 = vpop.xlane.xlu1 %3911 }
0x1ac3   :  { %v3914_v42 = vsub.f32 %v3906_v59, %v3912_v22 }
0x1ac4   :  { %v3909_v37 = vpop.xlane.xlu0 %3908 }
0x1ac5   :  { %v3917_v43 = vmul.f32 1.442695, %v3914_v42  ;;  %v3913_v34 = vsub.f32 %v3905_v32, %v3909_v37  ;;  %v3045_v32 = vadd.f32 %v15056_v15, %v14884_v36  ;;  %v3039_v15 = vadd.f32 %v15050_v3, %v14935_v20 }
0x1ac6   :  { %v3930_v12 = vpop.permute.xlu1 %3929 }
0x1ac7   :  { %13458 = vpow2.f32 %v3917_v43  ;;  %v3915_v7 = vmul.f32 1.442695, %v3913_v34 }
0x1ac9   :  { %13460 = vpow2.f32 %v3915_v7 }
0x1ad4   :  { %v13459_v41 = vpop.eup %13458 }
0x1ad5   :  { %v3922_v44 = vsel %vm3260_vm6, %v13459_v41, 0.0 }
0x1ad6   :  { %v13461_v48 = vpop.eup %13460  ;;  %3923 = vadd.xlane.f32.xlu0 %v3922_v44 }
0x1ad7   :  { %v3919_v54 = vsel %vm3260_vm6, %v13461_v48, 0.0 }
0x1ada   :  { %3920 = vadd.xlane.f32.xlu0 %v3919_v54 }
0x1af0   :  { %3931 = vrot.lane.b32.xlu0 %v14993_v40, %s14277_s19 }
0x1b5f   :  { %v3924_v51 = vpop.xlane.xlu0 %3923 }
0x1b60   :  { %13462 = vrcp.f32 %v3924_v51 }
0x1b63   :  { %v3921_v55 = vpop.xlane.xlu0 %3920 }
0x1b64   :  { %13464 = vrcp.f32 %v3921_v55 }
0x1b67   :  { %v3932_v13 = vpop.permute.xlu0 %3931 }
0x1b68   :  { %12565 = vmatprep.subr.mxu0 %v3932_v13 }
0x1b69   :  { %12566 = vmatpush3.msra.mxu0 %v3932_v13 }
0x1b6a   :  { %12567 = vmatprep.subr.mxu0 %v3930_v12 }
0x1b6b   :  { %12568 = vmatpush3.msra.mxu0 %v3930_v12 }
0x1b6c   :  { %12572 = vmatprep.subr.bf16.mxu0 %v14273_v19 }
0x1b6d   :  { %v13463_v16 = vpop.eup %13462 }
0x1b6e   :  { %v3928_v33 = vmul.f32 %v13463_v16, %v13459_v41  ;;  %v355_v41 = vld [vmem:[#allocation7 + $0x18] sm:$0xff] }
0x1b71   :  { %v13465_v27 = vpop.eup %13464 }
0x1b72   :  { %v3927_v53 = vmul.f32 %v13465_v27, %v13461_v48  ;;  %v351_v48 = vld [vmem:[#allocation5 + $0x18] sm:$0xff] }
0x1b73   :  { %v3151_v54 = vmul.f32 %v3045_v32, %v351_v48 }
0x1b74   :  { %12569 = vmatprep.mubr.msk.f32.mxu0 %vm3260_vm6, %v3927_v53 }
0x1b75   :  { %12570 = vmatmul.mubr.msk.f32.vlgmr.msra.gmra.mxu0 %vm3260_vm6, %v3928_v33  ;;  %v354_v33 = vld [vmem:[#allocation7 + $0x10] sm:$0xff] }
0x1b76   :  { %12576 = vmatprep.mubr.msk.bf16.mxu0 %vm14275_vm0, %v14273_v19  ;;  %12573 = vmatpush3.bf16.msra.mxu0 %v15132_v45 }
0x1b77   :  { %12574 = vmatprep.subr.bf16.mxu0 %v14273_v19 }
0x1b7a   :  { %12575 = vmatpush3.bf16.msra.mxu0 %v15138_v39 }
0x1c35   :  { %v12571_v40 = vpop.f32.mrf.mxu0 }
0x1c37   :  { %v4007_v57 = vpop.f32.mrf.mxu0 }
0x1c38   :  { %4018 = vrot.lane.b32.xlu1 %v4007_v57, %s14277_s19 }
0x1c3c   :  { %4020 = vrot.lane.b32.xlu1 %v12571_v40, %s14277_s19 }
0x1caa   :  { %v4019_v58 = vpop.permute.xlu1 %4018 }
0x1cab   :  { %v4024_v60 = vmul.f32 %v15124_v52, %v4019_v58 }
0x1cad   :  { %4028 = vrot.lane.b32.xlu0 %v4024_v60, %s14276_s11 }
0x1cae   :  { %v4021_v25 = vpop.permute.xlu1 %4020 }
0x1caf   :  { %v4025_v21 = vmul.f32 %v15124_v52, %v4021_v25  ;;  %v350_v25 = vld [vmem:[#allocation5 + $0x10] sm:$0xff] }
0x1cb1   :  { %4030 = vrot.lane.b32.xlu1 %v4025_v21, %s14276_s11 }
0x1d1f   :  { %v4029_v62 = vpop.permute.xlu0 %4028 }
0x1d20   :  { %v4034_v8 = vsub.f32 %v3803_v6, %v4029_v62  ;;  %v3043_v6 = vadd.f32 %v15054_v49, %v14935_v20 }
0x1d22   :  { %v4036_v11 = vsel %vm757_vm9, %v4034_v8, 0.0 }
0x1d23   :  { %4037 = vadd.xlane.f32.xlu0 %v4036_v11  ;;  %v4031_v29 = vpop.permute.xlu1 %4030 }
0x1d24   :  { %v4035_v59 = vsub.f32 %v12557_v56, %v4031_v29  ;;  %v3041_v56 = vadd.f32 %v15052_v14, %v14884_v36 }
0x1d26   :  { %v4039_v1 = vsel %vm757_vm9, %v4035_v59, 0.0  ;;  %v3150_v62 = vmul.f32 %v3041_v56, %v350_v25 }
0x1d27   :  { %4040 = vadd.xlane.f32.xlu1 %v4039_v1  ;;  %v3119_v1 = vmul.f32 %v3043_v6, %v351_v48 }
0x1d38   :  { %3142 = vrot.lane.b32.xlu1 %v3045_v32, %s14246_s25 }
0x1d39   :  { %3134 = vrot.lane.b32.xlu0 %v3045_v32, %s14278_s7  ;;  %v3118_v32 = vmul.f32 %v3039_v15, %v350_v25 }
0x1d3c   :  { %3140 = vrot.lane.b32.xlu1 %v3041_v56, %s14246_s25 }
0x1d3d   :  { %3132 = vrot.lane.b32.xlu0 %v3041_v56, %s14278_s7  ;;  %v3576_v56 = vmul.f32 %v15124_v52, %v15064_v26 }
0x1d40   :  { %3108 = vrot.lane.b32.xlu1 %v3039_v15, %s14246_s25 }
0x1d41   :  { %3100 = vrot.lane.b32.xlu0 %v3039_v15, %s14278_s7  ;;  %v3578_v15 = vsub.f32 %v15060_v18, %v3576_v56 }
0x1d44   :  { %3110 = vrot.lane.b32.xlu1 %v3043_v6, %s14246_s25 }
0x1d45   :  { %3102 = vrot.lane.b32.xlu0 %v3043_v6, %s14278_s7  ;;  %v3577_v6 = vmul.f32 %v15062_v35, %v15124_v52 }
0x1dac   :  { %v4038_v22 = vpop.xlane.xlu0 %4037 }
0x1dad   :  { %v4042_v36 = vmul.f32 0.03125, %v4038_v22 }
0x1daf   :  { %v4044_v14 = vsub.f32 %v4034_v8, %v4042_v36 }
0x1db0   :  { %v4041_v42 = vpop.xlane.xlu1 %4040  ;;  %v3135_v37 = vpop.permute.xlu0 %3134 }
0x1db1   :  { %v4043_v43 = vmul.f32 0.03125, %v4041_v42  ;;  %v4046_v34 = vmul.f32 %v4044_v14, %v4044_v14  ;;  %v3579_v42 = vsub.f32 %v15058_v17, %v3577_v6 }
0x1db3   :  { %v4045_v7 = vsub.f32 %v4035_v59, %v4043_v43  ;;  %v4048_v3 = vsel %vm757_vm9, %v4046_v34, 0.0  ;;  %v3583_v43 = vsel %vm757_vm9, %v3579_v42, 0.0 }
0x1db4   :  { %4049 = vadd.xlane.f32.xlu0 %v4048_v3  ;;  %v3143_v44 = vpop.permute.xlu1 %3142  ;;  %v3133_v55 = vpop.permute.xlu0 %3132 }
0x1db5   :  { %v3147_v20 = vsel %vm14895_vm15, %v3135_v37, %v3143_v44  ;;  %v4047_v49 = vmul.f32 %v4045_v7, %v4045_v7  ;;  %v3580_v37 = vsel %vm757_vm9, %v3578_v15, 0.0 }
0x1db6   :  { %v3155_v51 = vmul.f32 %v3147_v20, %v355_v41 }
0x1db7   :  { %v4051_v13 = vsel %vm757_vm9, %v4047_v49, 0.0 }
0x1db8   :  { %v15159_v12 = vadd.f32 %v3155_v51, %v3151_v54  ;;  %4052 = vadd.xlane.f32.xlu1 %v4051_v13  ;;  %v3141_v16 = vpop.permute.xlu1 %3140  ;;  %v3101_v53 = vpop.permute.xlu0 %3100 }
0x1db9   :  { %v3146_v40 = vsel %vm14895_vm15, %v3133_v55, %v3141_v16 }
0x1dba   :  { %12588 = vmatprep.subr.msk.mxu0 %vm757_vm9, %v15159_v12  ;;  %v3154_v58 = vmul.f32 %v3146_v40, %v354_v33 }
0x1dbc   :  { %v3109_v27 = vpop.permute.xlu1 %3108  ;;  %v3103_v60 = vpop.permute.xlu0 %3102  ;;  %v15169_v11 = vadd.f32 %v3154_v58, %v3150_v62 }
0x1dbd   :  { %v3114_v8 = vsel %vm14895_vm15, %v3101_v53, %v3109_v27 }
0x1dbe   :  { %v3122_v59 = vmul.f32 %v3114_v8, %v354_v33 }
0x1dc0   :  { %v3111_v57 = vpop.permute.xlu1 %3110  ;;  %v15177_v36 = vadd.f32 %v3122_v59, %v3118_v32 }
0x1dc1   :  { %v3115_v21 = vsel %vm14895_vm15, %v3103_v60, %v3111_v57 }
0x1dc2   :  { %v3123_v29 = vmul.f32 %v3115_v21, %v355_v41 }
0x1dc4   :  { %v15175_v22 = vadd.f32 %v3123_v29, %v3119_v1 }
0x1dc9   :  { %4373 = vrot.lane.b32.xlu1 %v15169_v11, %s14257_s0 }
0x1dca   :  { %4375 = vrot.lane.b32.xlu0 %v15159_v12, %s14257_s0 }
0x1dcd   :  { %4371 = vrot.lane.b32.xlu1 %v15175_v22, %s14257_s0 }
0x1dce   :  { %4369 = vrot.lane.b32.xlu0 %v15177_v36, %s14257_s0 }
0x1ded   :  { %3581 = vadd.xlane.f32.xlu0 %v3580_v37 }
0x1df1   :  { %3584 = vadd.xlane.f32.xlu1 %v3583_v43 }
0x1e3d   :  { %v4050_v34 = vpop.xlane.xlu0 %4049 }
0x1e3e   :  { %v4054_v3 = vmul.f32 0.03125, %v4050_v34 }
0x1e40   :  { %v4056_v41 = vadd.f32 1e-05, %v4054_v3 }
0x1e41   :  { %v4053_v44 = vpop.xlane.xlu1 %4052  ;;  %v4376_v17 = vpop.permute.xlu0 %4375 }
0x1e42   :  { %v4055_v48 = vmul.f32 0.03125, %v4053_v44  ;;  %13466 = vrsqrt.f32 %v4056_v41 }
0x1e44   :  { %v4057_v26 = vadd.f32 1e-05, %v4055_v48 }
0x1e46   :  { %13468 = vrsqrt.f32 %v4057_v26 }
0x1e4f   :  { %v13467_v20 = vpop.eup %13466 }
0x1e50   :  { %v4060_v49 = vmul.f32 %v13467_v20, %v4044_v14  ;;  %v4370_v14 = vpop.permute.xlu0 %4369 }
0x1e53   :  { %v13469_v35 = vpop.eup %13468 }
0x1e54   :  { %v4061_v18 = vmul.f32 %v13469_v35, %v4045_v7  ;;  %v4374_v7 = vpop.permute.xlu1 %4373 }
0x1e56   :  { %v4062_v54 = vpack.c.bf16 %v4061_v18, %v4060_v49 }
0x1e58   :  { %12577 = vmatmul.mubr.msk.bf16.vlgmr.msra.gmra.mxu0 %vm757_vm9, %v4062_v54  ;;  %v4372_v51 = vpop.permute.xlu1 %4371 }
0x1e59   :  { %12589 = vmatpush3.xpose.msk.msra.mxu0 %vm757_vm9, %v15159_v12  ;;  %12592 = vmatprep.mubr.msk.f32.mxu0 %vm757_vm9, %v15177_v36 }
0x1e5a   :  { %12590 = vmatprep.subr.msk.mxu0 %vm757_vm9, %v15169_v11 }
0x1e5d   :  { %12591 = vmatpush3.xpose.msk.msra.mxu0 %vm757_vm9, %v15169_v11 }
0x1e5e   :  { %12602 = vmatprep.subr.msk.mxu0 %vm757_vm9, %v4376_v17 }
0x1e60   :  { %12593 = vmatmul.mubr.msk.f32.vlgmr.msra.gmra.mxu0 %vm757_vm9, %v15175_v22 }
0x1e61   :  { %12603 = vmatpush3.xpose.msk.msra.mxu0 %vm757_vm9, %v4376_v17  ;;  %12606 = vmatprep.mubr.msk.f32.mxu0 %vm757_vm9, %v4370_v14 }
0x1e62   :  { %12604 = vmatprep.subr.msk.mxu0 %vm757_vm9, %v4374_v7 }
0x1e65   :  { %12605 = vmatpush3.xpose.msk.msra.mxu0 %vm757_vm9, %v4374_v7 }
0x1e68   :  { %12607 = vmatmul.mubr.msk.f32.vlgmr.msra.gmra.mxu0 %vm757_vm9, %v4372_v51 }
0x1e76   :  { %v3582_v58 = vpop.xlane.xlu0 %3581 }
0x1e77   :  { %v3587_v29 = vmul.f32 0.03125, %v3582_v58 }
0x1e79   :  { %v3589_v6 = vsub.f32 %v3578_v15, %v3587_v29 }
0x1e7a   :  { %v3585_v33 = vpop.xlane.xlu1 %3584 }
0x1e7b   :  { %v3588_v21 = vmul.f32 0.03125, %v3585_v33  ;;  %v3591_v48 = vmul.f32 %v3589_v6, %v3589_v6 }
0x1e7d   :  { %v3590_v59 = vsub.f32 %v3579_v42, %v3588_v21  ;;  %v3593_v15 = vsel %vm757_vm9, %v3591_v48, 0.0 }
0x1e7f   :  { %v3592_v41 = vmul.f32 %v3590_v59, %v3590_v59 }
0x1e81   :  { %v3596_v26 = vsel %vm757_vm9, %v3592_v41, 0.0 }
0x1f18   :  { %v15208_v55 = vpop.f32.mrf.mxu0 }
0x1f1a   :  { %v12578_v13 = vpop.f32.mrf.mxu0 }
0x1f1c   :  { %v15210_v16 = vpop.f32.mrf.mxu0 }
0x1f1e   :  { %v12579_v27 = vpop.f32.mrf.mxu0 }
0x1f20   :  { %v12594_v53 = vpop.f32.mrf.mxu0 }
0x1f21   :  { %v4263_v40 = vmul.f32 0.17677669, %v12594_v53 }
0x1f22   :  { %v4253_v57 = vpop.f32.mrf.mxu0 }
0x1f23   :  { %v4265_v60 = vsel %vm14996_vm5, %v4263_v40, -1e+30  ;;  %v4262_v25 = vmul.f32 0.17677669, %v4253_v57 }
0x1f24   :  { %v4269_v62 = vsel %vm3260_vm6, %v4265_v60, -inf }
0x1f25   :  { %v4264_v8 = vsel %vm15005_vm7, %v4262_v25, -1e+30  ;;  %4270 = vmax.xlane.f32.xlu0 %v4269_v62 }
0x1f26   :  { %v4266_v32 = vsel %vm3260_vm6, %v4264_v8, -inf }
0x1f28   :  { %v12608_v1 = vpop.f32.mrf.mxu0 }
0x1f29   :  { %v4461_v56 = vmul.f32 0.17677669, %v12608_v1  ;;  %4267 = vmax.xlane.f32.xlu0 %v4266_v32 }
0x1f2a   :  { %v4451_v37 = vpop.f32.mrf.mxu0 }
0x1f2b   :  { %v4463_v43 = vsel %vm14996_vm5, %v4461_v56, -1e+30  ;;  %v4460_v34 = vmul.f32 0.17677669, %v4451_v37 }
0x1f2c   :  { %v4467_v3 = vsel %vm3260_vm6, %v4463_v43, -inf }
0x1f2d   :  { %4468 = vmax.xlane.f32.xlu1 %v4467_v3  ;;  %v4462_v44 = vsel %vm15005_vm7, %v4460_v34, -1e+30 }
0x1f2e   :  { %v4464_v42 = vsel %vm3260_vm6, %v4462_v44, -inf }
0x1f2f   :  { %4465 = vmax.xlane.f32.xlu0 %v4464_v42 }
0x1f31   :  { %3597 = vadd.xlane.f32.xlu1 %v3596_v26 }
0x1f33   :  { %3594 = vadd.xlane.f32.xlu0 %v3593_v15 }
0x1fae   :  { %v4271_v20 = vpop.xlane.xlu0 %4270 }
0x1faf   :  { %v4273_v35 = vsub.f32 %v4265_v60, %v4271_v20 }
0x1fb1   :  { %v4276_v49 = vmul.f32 1.442695, %v4273_v35 }
0x1fb2   :  { %v4268_v18 = vpop.xlane.xlu0 %4267 }
0x1fb3   :  { %13470 = vpow2.f32 %v4276_v49  ;;  %v4272_v54 = vsub.f32 %v4264_v8, %v4268_v18 }
0x1fb5   :  { %v4274_v17 = vmul.f32 1.442695, %v4272_v54 }
0x1fb6   :  { %v4469_v14 = vpop.xlane.xlu1 %4468 }
0x1fb7   :  { %13472 = vpow2.f32 %v4274_v17  ;;  %v4471_v7 = vsub.f32 %v4463_v43, %v4469_v14 }
0x1fb8   :  { %v4466_v51 = vpop.xlane.xlu0 %4465 }
0x1fb9   :  { %v4474_v13 = vmul.f32 1.442695, %v4471_v7  ;;  %v4470_v27 = vsub.f32 %v4462_v44, %v4466_v51 }
0x1fba   :  { %v3598_v53 = vpop.xlane.xlu1 %3597 }
0x1fbb   :  { %13474 = vpow2.f32 %v4474_v13  ;;  %v4472_v33 = vmul.f32 1.442695, %v4470_v27  ;;  %v3600_v40 = vmul.f32 0.03125, %v3598_v53 }
0x1fbc   :  { %v3595_v57 = vpop.xlane.xlu0 %3594 }
0x1fbd   :  { %13476 = vpow2.f32 %v4472_v33  ;;  %v3602_v58 = vadd.f32 1e-05, %v3600_v40  ;;  %v3599_v25 = vmul.f32 0.03125, %v3595_v57 }
0x1fbf   :  { %13478 = vrsqrt.f32 %v3602_v58  ;;  %v3601_v60 = vadd.f32 1e-05, %v3599_v25 }
0x1fc0   :  { %v13471_v21 = vpop.eup %13470 }
0x1fc1   :  { %13480 = vrsqrt.f32 %v3601_v60  ;;  %v4281_v62 = vsel %vm3260_vm6, %v13471_v21, 0.0 }
0x1fc2   :  { %4282 = vadd.xlane.f32.xlu1 %v4281_v62 }
0x1fc4   :  { %v13473_v8 = vpop.eup %13472 }
0x1fc5   :  { %v4278_v29 = vsel %vm3260_vm6, %v13473_v8, 0.0 }
0x1fc6   :  { %4279 = vadd.xlane.f32.xlu0 %v4278_v29 }
0x1fc8   :  { %v13475_v1 = vpop.eup %13474 }
0x1fc9   :  { %v4479_v32 = vsel %vm3260_vm6, %v13475_v1, 0.0 }
0x1fca   :  { %v13477_v56 = vpop.eup %13476  ;;  %4480 = vadd.xlane.f32.xlu1 %v4479_v32 }
0x1fcb   :  { %v4476_v37 = vsel %vm3260_vm6, %v13477_v56, 0.0 }
0x1fcc   :  { %v13479_v43 = vpop.eup %13478  ;;  %4477 = vadd.xlane.f32.xlu0 %v4476_v37 }
0x1fcd   :  { %v3606_v41 = vmul.f32 %v13479_v43, %v3590_v59 }
0x1fce   :  { %v13481_v34 = vpop.eup %13480 }
0x1fcf   :  { %v3605_v3 = vmul.f32 %v13481_v34, %v3589_v6 }
0x1fd1   :  { %v3607_v44 = vpack.c.bf16 %v3606_v41, %v3605_v3 }
0x1fd3   :  { %12585 = vmatmul.mubr.msk.bf16.vlgmr.msra.gmra.mxu1 %vm757_vm9, %v3607_v44 }
0x1fd4   :  { %12596 = vmatpush3.msra.mxu1 %v14991_v4 }
0x1fd5   :  { %12597 = vmatprep.subr.mxu1 %v14988_v46 }
0x1fd6   :  { %12598 = vmatpush3.msra.mxu1 %v14988_v46 }
0x1fdb   :  { %4488 = vrot.lane.b32.xlu1 %v14988_v46, %s14257_s0 }
0x1fdf   :  { %4612 = vrot.lane.b32.xlu1 %v15159_v12, %s14276_s11 }
0x1fe2   :  { %4490 = vrot.lane.b32.xlu0 %v14991_v4, %s14257_s0 }
0x1fe3   :  { %4610 = vrot.lane.b32.xlu1 %v15169_v11, %s14276_s11 }
0x1fe6   :  { %4606 = vrot.lane.b32.xlu0 %v15177_v36, %s14276_s11 }
0x1fe7   :  { %4608 = vrot.lane.b32.xlu1 %v15175_v22, %s14276_s11 }
0x204b   :  { %v4283_v59 = vpop.xlane.xlu1 %4282 }
0x204c   :  { %13482 = vrcp.f32 %v4283_v59 }
0x204f   :  { %v4280_v6 = vpop.xlane.xlu0 %4279 }
0x2050   :  { %13484 = vrcp.f32 %v4280_v6 }
0x2053   :  { %v4481_v42 = vpop.xlane.xlu1 %4480 }
0x2054   :  { %13486 = vrcp.f32 %v4481_v42 }
0x2055   :  { %v4478_v48 = vpop.xlane.xlu0 %4477 }
0x2056   :  { %13488 = vrcp.f32 %v4478_v48 }
0x2057   :  { %v4489_v20 = vpop.permute.xlu1 %4488 }
0x2059   :  { %v4491_v26 = vpop.permute.xlu0 %4490  ;;  %v13483_v15 = vpop.eup %13482 }
0x205a   :  { %12609 = vmatprep.subr.mxu1 %v4491_v26  ;;  %v4287_v18 = vmul.f32 %v13483_v15, %v13471_v21 }
0x205b   :  { %v4613_v17 = vpop.permute.xlu1 %4612 }
0x205d   :  { %v13485_v35 = vpop.eup %13484  ;;  %v4607_v13 = vpop.permute.xlu0 %4606 }
0x205e   :  { %v4286_v49 = vmul.f32 %v13485_v35, %v13473_v8 }
0x205f   :  { %v4611_v27 = vpop.permute.xlu1 %4610 }
0x2060   :  { %12599 = vmatprep.mubr.msk.f32.mxu1 %vm3260_vm6, %v4286_v49 }
0x2061   :  { %12600 = vmatmul.mubr.msk.f32.vlgmr.msra.gmra.mxu1 %vm3260_vm6, %v4287_v18  ;;  %v13487_v54 = vpop.eup %13486 }
0x2062   :  { %12610 = vmatpush3.msra.mxu1 %v4491_v26  ;;  %v4485_v51 = vmul.f32 %v13487_v54, %v13475_v1 }
0x2063   :  { %v13489_v14 = vpop.eup %13488  ;;  %12611 = vmatprep.subr.mxu1 %v4489_v20  ;;  %v4609_v53 = vpop.permute.xlu1 %4608 }
0x2064   :  { %12612 = vmatpush3.msra.mxu1 %v4489_v20  ;;  %v4484_v7 = vmul.f32 %v13489_v14, %v13477_v56 }
0x2065   :  { %12616 = vmatprep.subr.msk.mxu1 %vm757_vm9, %v4613_v17 }
0x2066   :  { %12613 = vmatprep.mubr.msk.f32.mxu1 %vm3260_vm6, %v4484_v7 }
0x2067   :  { %12614 = vmatmul.mubr.msk.f32.vlgmr.msra.gmra.mxu1 %vm3260_vm6, %v4485_v51 }
0x2068   :  { %12617 = vmatpush3.xpose.msk.msra.mxu1 %vm757_vm9, %v4613_v17  ;;  %12620 = vmatprep.mubr.msk.f32.mxu1 %vm757_vm9, %v4607_v13 }
0x2069   :  { %12618 = vmatprep.subr.msk.mxu1 %vm757_vm9, %v4611_v27 }
0x206c   :  { %12619 = vmatpush3.xpose.msk.msra.mxu1 %vm757_vm9, %v4611_v27 }
0x206f   :  { %12621 = vmatmul.mubr.msk.f32.vlgmr.msra.gmra.mxu1 %vm757_vm9, %v4609_v53 }
0x2093   :  { %v15256_v33 = vpop.f32.mrf.mxu1 }
0x2095   :  { %v12586_v40 = vpop.f32.mrf.mxu1 }
0x2097   :  { %v15258_v57 = vpop.f32.mrf.mxu1 }
0x2099   :  { %v12587_v58 = vpop.f32.mrf.mxu1 }
0x2121   :  { %v12601_v25 = vpop.f32.mrf.mxu1 }
0x2123   :  { %v4360_v60 = vpop.f32.mrf.mxu1 }
0x2127   :  { %v12615_v21 = vpop.f32.mrf.mxu1 }
0x2128   :  { %v4576_v62 = vmul.f32 %v12615_v21, %v15124_v52 }
0x2129   :  { %v4566_v8 = vpop.f32.mrf.mxu1 }
0x212a   :  { %v15261_v29 = vsub.f32 %v12601_v25, %v4576_v62  ;;  %v4575_v1 = vmul.f32 %v15124_v52, %v4566_v8 }
0x212c   :  { %v15264_v32 = vsub.f32 %v4360_v60, %v4575_v1 }
0x212f   :  { %v12622_v56 = vpop.f32.mrf.mxu1 }
0x2130   :  { %v4698_v37 = vmul.f32 0.17677669, %v12622_v56 }
0x2131   :  { %v4688_v43 = vpop.f32.mrf.mxu1 }
0x2132   :  { %v4700_v34 = vsel %vm14996_vm5, %v4698_v37, -1e+30  ;;  %v4697_v3 = vmul.f32 0.17677669, %v4688_v43 }
0x2133   :  { %v4704_v41 = vsel %vm3260_vm6, %v4700_v34, -inf }
0x2134   :  { %v4699_v44 = vsel %vm15005_vm7, %v4697_v3, -1e+30  ;;  %4705 = vmax.xlane.f32.xlu1 %v4704_v41 }
0x2135   :  { %v4701_v59 = vsel %vm3260_vm6, %v4699_v44, -inf }
0x2136   :  { %4702 = vmax.xlane.f32.xlu0 %v4701_v59 }
0x2145   :  { %4723 = vrot.lane.b32.xlu1 %v14988_v46, %s14276_s11 }
0x2149   :  { %4816 = vrot.lane.b32.xlu1 %v15159_v12, %s14277_s19 }
0x214d   :  { %4814 = vrot.lane.b32.xlu1 %v15169_v11, %s14277_s19 }
0x2151   :  { %4812 = vrot.lane.b32.xlu1 %v15175_v22, %s14277_s19 }
0x21bd   :  { %v4706_v6 = vpop.xlane.xlu1 %4705 }
0x21be   :  { %v4708_v42 = vsub.f32 %v4700_v34, %v4706_v6 }
0x21bf   :  { %v4703_v48 = vpop.xlane.xlu0 %4702 }
0x21c0   :  { %v4711_v26 = vmul.f32 1.442695, %v4708_v42  ;;  %v4707_v15 = vsub.f32 %v4699_v44, %v4703_v48 }
0x21c1   :  { %v4724_v54 = vpop.permute.xlu1 %4723 }
0x21c2   :  { %13490 = vpow2.f32 %v4711_v26  ;;  %v4709_v20 = vmul.f32 1.442695, %v4707_v15 }
0x21c4   :  { %13492 = vpow2.f32 %v4709_v20 }
0x21c5   :  { %v4817_v14 = vpop.permute.xlu1 %4816 }
0x21c9   :  { %v4815_v53 = vpop.permute.xlu1 %4814 }
0x21cd   :  { %v4813_v40 = vpop.permute.xlu1 %4812 }
0x21cf   :  { %v13491_v35 = vpop.eup %13490 }
0x21d0   :  { %v4716_v49 = vsel %vm3260_vm6, %v13491_v35, 0.0 }
0x21d1   :  { %v13493_v18 = vpop.eup %13492  ;;  %4717 = vadd.xlane.f32.xlu0 %v4716_v49 }
0x21d2   :  { %v4713_v12 = vsel %vm3260_vm6, %v13493_v18, 0.0 }
0x21d5   :  { %4714 = vadd.xlane.f32.xlu0 %v4713_v12 }
0x21eb   :  { %4725 = vrot.lane.b32.xlu0 %v14991_v4, %s14276_s11 }
0x21ef   :  { %4810 = vrot.lane.b32.xlu0 %v15177_v36, %s14277_s19 }
0x225a   :  { %v4718_v11 = vpop.xlane.xlu0 %4717 }
0x225b   :  { %13494 = vrcp.f32 %v4718_v11 }
0x225e   :  { %v4715_v22 = vpop.xlane.xlu0 %4714 }
0x225f   :  { %13496 = vrcp.f32 %v4715_v22 }
0x2262   :  { %v4726_v17 = vpop.permute.xlu0 %4725 }
0x2263   :  { %12623 = vmatprep.subr.mxu0 %v4726_v17 }
0x2264   :  { %12624 = vmatpush3.msra.mxu0 %v4726_v17 }
0x2265   :  { %12625 = vmatprep.subr.mxu0 %v4724_v54 }
0x2266   :  { %12626 = vmatpush3.msra.mxu0 %v4724_v54  ;;  %v4811_v36 = vpop.permute.xlu0 %4810 }
0x2267   :  { %12630 = vmatprep.subr.msk.mxu0 %vm757_vm9, %v4817_v14 }
0x2268   :  { %v13495_v7 = vpop.eup %13494 }
0x2269   :  { %v4722_v27 = vmul.f32 %v13495_v7, %v13491_v35 }
0x226c   :  { %v13497_v51 = vpop.eup %13496 }
0x226d   :  { %v4721_v13 = vmul.f32 %v13497_v51, %v13493_v18 }
0x226f   :  { %12627 = vmatprep.mubr.msk.f32.mxu0 %vm3260_vm6, %v4721_v13 }
0x2270   :  { %12628 = vmatmul.mubr.msk.f32.vlgmr.msra.gmra.mxu0 %vm3260_vm6, %v4722_v27 }
0x2271   :  { %12631 = vmatpush3.xpose.msk.msra.mxu0 %vm757_vm9, %v4817_v14  ;;  %12634 = vmatprep.mubr.msk.f32.mxu0 %vm757_vm9, %v4811_v36  ;;  %v4579_v14 = vsel %vm757_vm9, %v15264_v32, 0.0 }
0x2272   :  { %12632 = vmatprep.subr.msk.mxu0 %vm757_vm9, %v4815_v53 }
0x2275   :  { %12633 = vmatpush3.xpose.msk.msra.mxu0 %vm757_vm9, %v4815_v53 }
0x2276   :  { %12652 = vmatprep.subr.bf16.mxu0 %v14273_v19 }
0x2278   :  { %12635 = vmatmul.mubr.msk.f32.vlgmr.msra.gmra.mxu0 %vm757_vm9, %v4813_v40 }
0x2279   :  { %12653 = vmatpush3.bf16.msra.mxu0 %v15093_v61  ;;  %12656 = vmatprep.mubr.msk.bf16.mxu0 %vm14275_vm0, %v14273_v19 }
0x227a   :  { %12654 = vmatprep.subr.bf16.mxu0 %v14273_v19 }
0x227d   :  { %12655 = vmatpush3.bf16.msra.mxu0 %v15098_v2 }
0x2330   :  { %v15300_v58 = vpop.f32.mrf.mxu0 }
0x2332   :  { %v15302_v25 = vpop.f32.mrf.mxu0 }
0x2338   :  { %v12636_v60 = vpop.f32.mrf.mxu0 }
0x2339   :  { %v4902_v21 = vmul.f32 0.17677669, %v12636_v60 }
0x233a   :  { %v4892_v62 = vpop.f32.mrf.mxu0 }
0x233b   :  { %v4904_v8 = vsel %vm14996_vm5, %v4902_v21, -1e+30  ;;  %v4901_v1 = vmul.f32 0.17677669, %v4892_v62 }
0x233c   :  { %v4908_v61 = vsel %vm3260_vm6, %v4904_v8, -inf }
0x233d   :  { %v4903_v56 = vsel %vm15005_vm7, %v4901_v1, -1e+30  ;;  %4909 = vmax.xlane.f32.xlu1 %v4908_v61 }
0x233e   :  { %v4905_v37 = vsel %vm3260_vm6, %v4903_v56, -inf }
0x233f   :  { %4906 = vmax.xlane.f32.xlu0 %v4905_v37  ;;  %v15344_v37 = vld [vmem:[#allocation22] ss:$0 sm:$0xff] }
0x234e   :  { %4927 = vrot.lane.b32.xlu1 %v14988_v46, %s14277_s19 }
0x23c6   :  { %v4910_v2 = vpop.xlane.xlu1 %4909 }
0x23c7   :  { %v4912_v43 = vsub.f32 %v4904_v8, %v4910_v2 }
0x23c8   :  { %v4907_v34 = vpop.xlane.xlu0 %4906 }
0x23c9   :  { %v4915_v3 = vmul.f32 1.442695, %v4912_v43  ;;  %v4911_v41 = vsub.f32 %v4903_v56, %v4907_v34 }
0x23ca   :  { %v4928_v20 = vpop.permute.xlu1 %4927 }
0x23cb   :  { %13498 = vpow2.f32 %v4915_v3  ;;  %v4913_v44 = vmul.f32 1.442695, %v4911_v41 }
0x23cd   :  { %13500 = vpow2.f32 %v4913_v44 }
0x23d8   :  { %v13499_v59 = vpop.eup %13498 }
0x23d9   :  { %v4920_v6 = vsel %vm3260_vm6, %v13499_v59, 0.0 }
0x23da   :  { %v13501_v42 = vpop.eup %13500  ;;  %4921 = vadd.xlane.f32.xlu0 %v4920_v6 }
0x23db   :  { %v4917_v48 = vsel %vm3260_vm6, %v13501_v42, 0.0 }
0x23de   :  { %4918 = vadd.xlane.f32.xlu0 %v4917_v48 }
0x23f4   :  { %4929 = vrot.lane.b32.xlu0 %v14991_v4, %s14277_s19 }
0x2463   :  { %v4922_v46 = vpop.xlane.xlu0 %4921 }
0x2464   :  { %13502 = vrcp.f32 %v4922_v46 }
0x2467   :  { %v4919_v26 = vpop.xlane.xlu0 %4918 }
0x2468   :  { %13504 = vrcp.f32 %v4919_v26 }
0x246b   :  { %v4930_v15 = vpop.permute.xlu0 %4929 }
0x246c   :  { %12637 = vmatprep.subr.mxu1 %v4930_v15 }
0x246d   :  { %12638 = vmatpush3.msra.mxu1 %v4930_v15 }
0x246e   :  { %12639 = vmatprep.subr.mxu1 %v4928_v20 }
0x246f   :  { %12640 = vmatpush3.msra.mxu1 %v4928_v20  ;;  %v13112_v20 = vld [vmem:[#allocation26 + $0xec] ss:$16 sps:$4 sm:$0xff]  }
0x2470   :  { %12644 = vmatprep.subr.bf16.mxu1 %v14273_v19  ;;  %5508 = vmatprep.subr.bf16.mxu0 %v13112_v20 }
0x2471   :  { %v13503_v35 = vpop.eup %13502 }
0x2472   :  { %v4926_v12 = vmul.f32 %v13503_v35, %v13499_v59  ;;  %v13118_v35 = vld [vmem:[#allocation26 + $0xe4] ss:$16 sps:$4 sm:$0xff]  }
0x2475   :  { %v13505_v49 = vpop.eup %13504 }
0x2476   :  { %v4925_v18 = vmul.f32 %v13505_v49, %v13501_v42 }
0x2478   :  { %12641 = vmatprep.mubr.msk.f32.mxu1 %vm3260_vm6, %v4925_v18 }
0x2479   :  { %12642 = vmatmul.mubr.msk.f32.vlgmr.msra.gmra.mxu1 %vm3260_vm6, %v4926_v12 }
0x247a   :  { %12645 = vmatpush3.bf16.msra.mxu1 %v15132_v45  ;;  %12648 = vmatprep.mubr.msk.bf16.mxu1 %vm14275_vm0, %v14273_v19 }
0x247b   :  { %12646 = vmatprep.subr.bf16.mxu1 %v14273_v19 }
0x247e   :  { %12647 = vmatpush3.bf16.msra.mxu1 %v15138_v39  ;;  %v4582_v39 = vsel %vm757_vm9, %v15261_v29, 0.0 }
0x247f   :  { %5455 = vmatprep.subr.bf16.mxu1 %v13118_v35 }
0x2539   :  { %v12643_v4 = vpop.f32.mrf.mxu1 }
0x253b   :  { %v5005_v11 = vpop.f32.mrf.mxu1 }
0x253c   :  { %5016 = vrot.lane.b32.xlu1 %v5005_v11, %s14277_s19 }
0x2540   :  { %5018 = vrot.lane.b32.xlu1 %v12643_v4, %s14277_s19 }
0x25ae   :  { %v5017_v22 = vpop.permute.xlu1 %5016 }
0x25af   :  { %v5022_v54 = vmul.f32 %v15124_v52, %v5017_v22 }
0x25b1   :  { %5026 = vrot.lane.b32.xlu0 %v5022_v54, %s14276_s11 }
0x25b2   :  { %v5019_v17 = vpop.permute.xlu1 %5018 }
0x25b3   :  { %v5023_v45 = vmul.f32 %v15124_v52, %v5019_v17 }
0x25b5   :  { %5028 = vrot.lane.b32.xlu1 %v5023_v45, %s14276_s11 }
0x25d0   :  { %4580 = vadd.xlane.f32.xlu0 %v4579_v14 }
0x25d9   :  { %4583 = vadd.xlane.f32.xlu1 %v4582_v39  ;;  %v13110_v39 = vld [vmem:[#allocation26 + $0xe8] ss:$16 sps:$4 sm:$0xff]  }
0x2623   :  { %v5027_v7 = vpop.permute.xlu0 %5026 }
0x2624   :  { %v5032_v51 = vsub.f32 %v15302_v25, %v5027_v7 }
0x2626   :  { %v5034_v13 = vsel %vm757_vm9, %v5032_v51, 0.0 }
0x2627   :  { %5035 = vadd.xlane.f32.xlu0 %v5034_v13  ;;  %v5029_v27 = vpop.permute.xlu1 %5028  ;;  %v13113_v13 = vld [vmem:[#allocation26 + $0xc8] ss:$16 sps:$4 sm:$0xff]  }
0x2628   :  { %v5033_v36 = vsub.f32 %v15300_v58, %v5029_v27  ;;  %v4169_v58 = vadd.f32 %v15256_v33, %v15208_v55  ;;  %v13121_v27 = vld [vmem:[#allocation26 + $0xac] ss:$16 sps:$4 sm:$0xff]  }
0x262a   :  { %v5037_v52 = vsel %vm757_vm9, %v5033_v36, 0.0  ;;  %v5156_v2 = vadd.f32 %v15344_v37, %v4169_v58 }
0x262b   :  { %5038 = vadd.xlane.f32.xlu0 %v5037_v52  ;;  %v13127_v52 = vld [vmem:[#allocation26 + $0x8c] ss:$16 sps:$4 sm:$0xff]  }
0x262c   :  { %v15350_v43 = vadd.f32 %v5156_v2, %v14842_v10 }
0x262e   :  { %v15357_v44 = vadd.f32 1e-06, %v15350_v43 }
0x2630   :  { %v5169_v10 = vadd.f32 1e-06, %v15357_v44 }
0x2632   :  { %v5173_v48 = vmul.f32 %v5169_v10, %v5169_v10 }
0x2659   :  { %v4581_v53 = vpop.xlane.xlu0 %4580 }
0x265a   :  { %v4585_v40 = vmul.f32 0.03125, %v4581_v53  ;;  %v13125_v53 = vld [vmem:[#allocation26 + $0x88] ss:$16 sps:$4 sm:$0xff]  }
0x265c   :  { %v4587_v60 = vsub.f32 %v15264_v32, %v4585_v40  ;;  %v4172_v32 = vadd.f32 %v15258_v57, %v15210_v16  ;;  %v13133_v40 = vld [vmem:[#allocation26 + $0x6c] ss:$16 sps:$4 sm:$0xff]  }
0x265e   :  { %v4589_v21 = vmul.f32 %v4587_v60, %v4587_v60  ;;  %v5157_v34 = vadd.f32 %v15344_v37, %v4172_v32 }
0x2660   :  { %v4591_v62 = vsel %vm757_vm9, %v4589_v21, 0.0  ;;  %v15354_v41 = vadd.f32 %v5157_v34, %v14849_v0  ;;  %v13139_v21 = vld [vmem:[#allocation26 + $0x4c] ss:$16 sps:$4 sm:$0xff]  }
0x2661   :  { %4592 = vadd.xlane.f32.xlu0 %v4591_v62  ;;  %v13137_v62 = vld [vmem:[#allocation26 + $0x48] ss:$16 sps:$4 sm:$0xff]  }
0x2662   :  { %v4584_v8 = vpop.xlane.xlu1 %4583  ;;  %v15365_v57 = vadd.f32 1e-06, %v15354_v41 }
0x2663   :  { %v4586_v1 = vmul.f32 0.03125, %v4584_v8  ;;  %v13145_v8 = vld [vmem:[#allocation26 + $0x2c] ss:$16 sps:$4 sm:$0xff]  }
0x2664   :  { %v5170_v46 = vadd.f32 1e-06, %v15365_v57 }
0x2665   :  { %v4588_v25 = vsub.f32 %v15261_v29, %v4586_v1  ;;  %v13143_v1 = vld [vmem:[#allocation26 + $0x28] ss:$16 sps:$4 sm:$0xff]  }
0x2666   :  { %v5174_v15 = vmul.f32 %v5170_v46, %v5170_v46 }
0x2667   :  { %v4590_v61 = vmul.f32 %v4588_v25, %v4588_v25 }
0x2669   :  { %v4594_v56 = vsel %vm757_vm9, %v4590_v61, 0.0  ;;  %v13149_v61 = vld [vmem:[#allocation26 + $0x8] ss:$16 sps:$4 sm:$0xff]  }
0x266a   :  { %4595 = vadd.xlane.f32.xlu1 %v4594_v56 }
0x26b0   :  { %v5036_v29 = vpop.xlane.xlu0 %5035 }
0x26b1   :  { %v5040_v3 = vmul.f32 0.03125, %v5036_v29 }
0x26b3   :  { %v15359_v55 = vsub.f32 %v5032_v51, %v5040_v3  ;;  %v13115_v51 = vld [vmem:[#allocation26 + $0xcc] ss:$16 sps:$4 sm:$0xff]  }
0x26b4   :  { %v5039_v33 = vpop.xlane.xlu0 %5038 }
0x26b5   :  { %v5041_v59 = vmul.f32 0.03125, %v5039_v33  ;;  %v5044_v16 = vmul.f32 %v15359_v55, %v15359_v55 }
0x26b7   :  { %v15367_v6 = vsub.f32 %v5033_v36, %v5041_v59  ;;  %v5046_v0 = vsel %vm757_vm9, %v5044_v16, 0.0  ;;  %v13119_v36 = vld [vmem:[#allocation26 + $0xa8] ss:$16 sps:$4 sm:$0xff]  }
0x26b8   :  { %5047 = vadd.xlane.f32.xlu0 %v5046_v0 }
0x26b9   :  { %v5045_v42 = vmul.f32 %v15367_v6, %v15367_v6 }
0x26bb   :  { %v5049_v26 = vsel %vm757_vm9, %v5045_v42, 0.0 }
0x26bc   :  { %5177 = vadd.xlane.f32.xlu0 %v5173_v48  ;;  %5050 = vadd.xlane.f32.xlu1 %v5049_v26 }
0x26c0   :  { %5179 = vadd.xlane.f32.xlu1 %v5174_v15 }
0x26ea   :  { %v4593_v49 = vpop.xlane.xlu0 %4592 }
0x26eb   :  { %v4597_v18 = vmul.f32 0.03125, %v4593_v49 }
0x26ed   :  { %v4599_v12 = vadd.f32 1e-05, %v4597_v18 }
0x26ef   :  { %13506 = vrsqrt.f32 %v4599_v12 }
0x26f3   :  { %v4596_v4 = vpop.xlane.xlu1 %4595 }
0x26f4   :  { %v4598_v11 = vmul.f32 0.03125, %v4596_v4  ;;  %v13116_v4 = vld [vmem:[#allocation26 + $0xe0] ss:$16 sps:$4 sm:$0xff]  }
0x26f6   :  { %v4600_v22 = vadd.f32 1e-05, %v4598_v11 }
0x26f8   :  { %13508 = vrsqrt.f32 %v4600_v22 }
0x26fc   :  { %v13507_v54 = vpop.eup %13506 }
0x26fd   :  { %v4603_v45 = vmul.f32 %v13507_v54, %v4587_v60  ;;  %v13131_v60 = vld [vmem:[#allocation26 + $0x68] ss:$16 sps:$4 sm:$0xff]  }
0x2705   :  { %v13509_v17 = vpop.eup %13508 }
0x2706   :  { %v4604_v14 = vmul.f32 %v13509_v17, %v4588_v25  ;;  %v13151_v25 = vld [vmem:[#allocation26 + $0xc] ss:$16 sps:$4 sm:$0xff]   ;;  %v13124_v17 = vld [vmem:[#allocation26 + $0xc4] ss:$16 sps:$4 sm:$0xff]  }
0x2708   :  { %v4605_v7 = vpack.c.bf16 %v4604_v14, %v4603_v45 }
0x270a   :  { %12657 = vmatmul.mubr.msk.bf16.vlgmr.msra.gmra.mxu0 %vm757_vm9, %v4605_v7  ;;  %v13136_v7 = vld [vmem:[#allocation26 + $0x84] ss:$16 sps:$4 sm:$0xff]  }
0x270b   :  { %5509 = vmatpush1.bf16.msra.mxu0 %v13110_v39  ;;  %5540 = vmatprep.mubr.bf16.mxu0 %v14274_v38  ;;  %v13122_v39 = vld [vmem:[#allocation26 + $0xc0] ss:$16 sps:$4 sm:$0xff]  }
0x270c   :  { %5510 = vmatprep.subr.bf16.mxu0 %v13115_v51  ;;  %v13134_v51 = vld [vmem:[#allocation26 + $0x80] ss:$16 sps:$4 sm:$0xff]  }
0x270f   :  { %5511 = vmatpush1.bf16.msra.mxu0 %v13113_v13  ;;  %v13142_v13 = vld [vmem:[#allocation26 + $0x64] ss:$16 sps:$4 sm:$0xff]  }
0x2710   :  { %5512 = vmatprep.subr.bf16.mxu0 %v13121_v27 }
0x2713   :  { %5513 = vmatpush1.bf16.msra.mxu0 %v13119_v36  ;;  %v13140_v36 = vld [vmem:[#allocation26 + $0x60] ss:$16 sps:$4 sm:$0xff]  }
0x2714   :  { %5514 = vmatprep.subr.bf16.mxu0 %v13127_v52  ;;  %v13148_v52 = vld [vmem:[#allocation26 + $0x44] ss:$16 sps:$4 sm:$0xff]  }
0x2717   :  { %5515 = vmatpush1.bf16.msra.mxu0 %v13125_v53 }
0x2718   :  { %5516 = vmatprep.subr.bf16.mxu0 %v13133_v40 }
0x271b   :  { %5517 = vmatpush1.bf16.msra.mxu0 %v13131_v60  ;;  %v15381_v60 = vld [vmem:[#allocation25] ss:$0 sm:$0xff] }
0x271c   :  { %5518 = vmatprep.subr.bf16.mxu0 %v13139_v21  ;;  %v13146_v21 = vld [vmem:[#allocation26 + $0x40] ss:$16 sps:$4 sm:$0xff]  }
0x271f   :  { %5519 = vmatpush1.bf16.msra.mxu0 %v13137_v62 }
0x2720   :  { %5520 = vmatprep.subr.bf16.mxu0 %v13145_v8  ;;  %v13154_v8 = vld [vmem:[#allocation26 + $0x24] ss:$16 sps:$4 sm:$0xff]  }
0x2723   :  { %5521 = vmatpush1.bf16.msra.mxu0 %v13143_v1 }
0x2724   :  { %5522 = vmatprep.subr.bf16.mxu0 %v13151_v25 }
0x2727   :  { %5523 = vmatpush1.bf16.msra.mxu0 %v13149_v61  ;;  %v13152_v61 = vld [vmem:[#allocation26 + $0x20] ss:$16 sps:$4 sm:$0xff]  }
0x2741   :  { %v5048_v56 = vpop.xlane.xlu0 %5047 }
0x2742   :  { %v5052_v58 = vmul.f32 0.03125, %v5048_v56 }
0x2744   :  { %v5054_v2 = vadd.f32 1e-05, %v5052_v58  ;;  %v13157_v58 = vld [vmem:[#allocation26 + $0x4] ss:$16 sps:$4 sm:$0xff]  }
0x2745   :  { %v5178_v32 = vpop.xlane.xlu0 %5177  ;;  %v5051_v34 = vpop.xlane.xlu1 %5050 }
0x2746   :  { %13510 = vrsqrt.f32 %v5178_v32  ;;  %v5053_v29 = vmul.f32 0.03125, %v5051_v34  ;;  %vm5187_vm8 = vcmp.eq.f32.partialorder %v5178_v32, inf  ;;  %v5190_v0 = vand.u32 2147483648, %v5178_v32 }
0x2747   :  { %13512 = vrsqrt.f32 %v5054_v2  ;;  %vm5189_vm11 = vcmp.eq.f32.partialorder %v5178_v32, 0.0 }
0x2748   :  { %v5055_v3 = vadd.f32 1e-05, %v5053_v29 }
0x2749   :  { %v5180_v33 = vpop.xlane.xlu1 %5179 }
0x274a   :  { %13514 = vrsqrt.f32 %v5180_v33  ;;  %vm5194_vm12 = vcmp.eq.f32.partialorder %v5180_v33, inf  ;;  %v5197_v35 = vand.u32 2147483648, %v5180_v33  ;;  %vm5196_vm13 = vcmp.eq.f32.partialorder %v5180_v33, 0.0 }
0x274b   :  { %13516 = vrsqrt.f32 %v5055_v3 }
0x2753   :  { %v13511_v59 = vpop.eup %13510 }
0x2754   :  { %v5186_v16 = vmul.f32 %v13511_v59, %v5178_v32  ;;  %v13513_v10 = vpop.eup %13512 }
0x2755   :  { %v5058_v49 = vmul.f32 %v13513_v10, %v15359_v55  ;;  %v13130_v55 = vld [vmem:[#allocation26 + $0xa4] ss:$16 sps:$4 sm:$0xff]  }
0x2756   :  { %v5188_v48 = vsel %vm5187_vm8, %v5178_v32, %v5186_v16 }
0x2757   :  { %v13515_v42 = vpop.eup %13514  ;;  %v5191_v26 = vsel %vm5189_vm11, %v5190_v0, %v5188_v48 }
0x2758   :  { %v13517_v46 = vpop.eup %13516  ;;  %v5193_v15 = vmul.f32 %v13515_v42, %v5180_v33  ;;  %v5213_v20 = vmul.f32 11.313708, %v5191_v26 }
0x2759   :  { %v5059_v18 = vmul.f32 %v13517_v46, %v15367_v6  ;;  %v13128_v6 = vld [vmem:[#allocation26 + $0xa0] ss:$16 sps:$4 sm:$0xff]  }
0x275a   :  { %v5195_v12 = vsel %vm5194_vm12, %v5180_v33, %v5193_v15  ;;  %v5217_v11 = vadd.f32 1e-06, %v5213_v20 }
0x275b   :  { %v5198_v22 = vsel %vm5196_vm13, %v5197_v35, %v5195_v12  ;;  %v5060_v54 = vpack.c.bf16 %v5059_v18, %v5058_v49  ;;  %v13158_v18 = vld [vmem:[#allocation28 + $0x78] sm:$0xff]  }
0x275c   :  { %v5214_v45 = vmul.f32 11.313708, %v5198_v22  ;;  %13518 = vrcp.f32 %v5217_v11  ;;  %v13159_v12 = vld [vmem:[#allocation28 + $0x38] sm:$0xff]   ;;  %v13162_v11 = vld [vmem:[#allocation28 + $0x68] sm:$0xff]   ;;  %v13164_v22 = vld [vmem:[#allocation28 + $0x60] sm:$0xff]  }
0x275d   :  { %12649 = vmatmul.mubr.msk.bf16.vlgmr.msra.gmra.mxu1 %vm757_vm9, %v5060_v54  ;;  %v13165_v54 = vld [vmem:[#allocation28 + $0x20] sm:$0xff]  }
0x275e   :  { %v5218_v14 = vadd.f32 1e-06, %v5214_v45  ;;  %5456 = vmatpush1.bf16.msra.mxu1 %v13116_v4  ;;  %5487 = vmatprep.mubr.bf16.mxu1 %v14274_v38  ;;  %v13161_v4 = vld [vmem:[#allocation28 + $0x30] sm:$0xff]   ;;  %v13167_v45 = vld [vmem:[#allocation28 + $0x18] sm:$0xff]  }
0x275f   :  { %5457 = vmatprep.subr.bf16.mxu1 %v13124_v17  ;;  %v13166_v17 = vld [vmem:[#allocation28 + $0x58] sm:$0xff]  }
0x2760   :  { %13520 = vrcp.f32 %v5218_v14  ;;  %v13168_v14 = vld [vmem:[#allocation28 + $0x50] sm:$0xff]  }
0x2762   :  { %5458 = vmatpush1.bf16.msra.mxu1 %v13122_v39  ;;  %v13169_v39 = vld [vmem:[#allocation28 + $0x10] sm:$0xff]  }
0x2763   :  { %5459 = vmatprep.subr.bf16.mxu1 %v13130_v55  ;;  %v13170_v55 = vld [vmem:[#allocation28 + $0x48] sm:$0xff]  }
0x2766   :  { %5460 = vmatpush1.bf16.msra.mxu1 %v13128_v6  ;;  %v13171_v6 = vld [vmem:[#allocation28 + $0x8] sm:$0xff]  }
0x2767   :  { %5461 = vmatprep.subr.bf16.mxu1 %v13136_v7  ;;  %v13172_v7 = vld [vmem:[#allocation28 + $0x40] sm:$0xff]  }
0x2769   :  { %v13519_v27 = vpop.eup %13518 }
0x276a   :  { %5462 = vmatpush1.bf16.msra.mxu1 %v13134_v51  ;;  %v5225_v53 = vmul.f32 %v13519_v27, %v15357_v44  ;;  %v13155_v44 = vld [vmem:[#allocation26] ss:$16 sps:$4 sm:$0xff]  }
0x276b   :  { %5463 = vmatprep.subr.bf16.mxu1 %v13142_v13  ;;  %v13173_v51 = vld [vmem:[#allocation28] sm:$0xff]  }
0x276c   :  { %v5235_v1 = vmul.f32 %v15381_v60, %v5225_v53 }
0x276d   :  { %v13521_v40 = vpop.eup %13520 }
0x276e   :  { %5464 = vmatpush1.bf16.msra.mxu1 %v13140_v36  ;;  %v5226_v62 = vmul.f32 %v13521_v40, %v15365_v57 }
0x276f   :  { %5465 = vmatprep.subr.bf16.mxu1 %v13148_v52  ;;  %v15408_v52 = vld [vmem:[%s16401_s17] sm:$0xf] }
0x2770   :  { %v5236_v25 = vmul.f32 %v15381_v60, %v5226_v62  ;;  %v15412_v40 = vrot.slane %v15408_v52, %v14584_v50 }
0x2772   :  { %5466 = vmatpush1.bf16.msra.mxu1 %v13146_v21  ;;  %v5239_v56 = vpack.c.bf16 %v5236_v25, %v5235_v1  ;;  %v15418_v1 = vrot.slane %v15408_v52, %v14565_v31 }
0x2773   :  { %5467 = vmatprep.subr.bf16.mxu1 %v13154_v8 }
0x2774   :  { %5541 = vmatmul.mubr.bf16.vlgmr.msra.gmra.mxu0 %v5239_v56 }
0x2775   :  { %5550 = vmatprep.mubr.bf16.mxu0 %v14274_v38 }
0x2776   :  { %5468 = vmatpush1.bf16.msra.mxu1 %v13152_v61 }
0x2777   :  { %5469 = vmatprep.subr.bf16.mxu1 %v13157_v58 }
0x277a   :  { %5470 = vmatpush1.bf16.msra.mxu1 %v13155_v44 }
0x277b   :  { %12099 = vmatprep.subr.bf16.mxu1 %v13158_v18 }
0x277d   :  { %5488 = vmatmul.mubr.bf16.vlgmr.msra.gmra.mxu1 %v5239_v56 }
0x277e   :  { %5497 = vmatprep.mubr.bf16.mxu1 %v14274_v38  ;;  %12100 = vmatpush3.bf16.msra.mxu1 %v13159_v12 }
0x27ca   :  { %v5142_v57 = vpop.f32.mrf.mxu0 }
0x27cc   :  { %v12658_v2 = vpop.f32.mrf.mxu0 }
0x27ce   :  { %v5145_v32 = vpop.f32.mrf.mxu0 }
0x27d0   :  { %v12659_v34 = vpop.f32.mrf.mxu0 }
0x281d   :  { %v5098_v29 = vpop.f32.mrf.mxu1 }
0x281e   :  { %v5143_v3 = vadd.f32 %v5142_v57, %v5098_v29 }
0x281f   :  { %v12650_v33 = vpop.f32.mrf.mxu1 }
0x2820   :  { %v5158_v59 = vadd.f32 %v15344_v37, %v5143_v3 }
0x2821   :  { %v5101_v16 = vpop.f32.mrf.mxu1 }
0x2822   :  { %v15390_v10 = vadd.f32 %v5158_v59, %v14916_v23  ;;  %v5146_v0 = vadd.f32 %v5145_v32, %v5101_v16 }
0x2823   :  { %v12651_v42 = vpop.f32.mrf.mxu1 }
0x2824   :  { %v5159_v48 = vadd.f32 %v15344_v37, %v5146_v0  ;;  %v15394_v46 = vadd.f32 1e-06, %v15390_v10  ;;  %v13160_v37 = vld [vmem:[#allocation28 + $0x70] sm:$0xff]  }
0x2825   :  { %12101 = vmatprep.subr.bf16.mxu1 %v13160_v37 }
0x2826   :  { %v15397_v26 = vadd.f32 %v5159_v48, %v14926_v28  ;;  %v5171_v15 = vadd.f32 1e-06, %v15394_v46  ;;  %12102 = vmatpush3.bf16.msra.mxu1 %v13161_v4  ;;  %v13163_v28 = vld [vmem:[#allocation28 + $0x28] sm:$0xff]  }
0x2827   :  { %12103 = vmatprep.subr.bf16.mxu1 %v13162_v11 }
0x2828   :  { %v5175_v20 = vmul.f32 %v5171_v15, %v5171_v15  ;;  %v15401_v35 = vadd.f32 1e-06, %v15397_v26 }
0x282a   :  { %5181 = vadd.xlane.f32.xlu0 %v5175_v20  ;;  %v5172_v23 = vadd.f32 1e-06, %v15401_v35  ;;  %12104 = vmatpush3.bf16.msra.mxu1 %v13163_v28 }
0x282b   :  { %12105 = vmatprep.subr.bf16.mxu1 %v13164_v22 }
0x282c   :  { %v5176_v49 = vmul.f32 %v5172_v23, %v5172_v23 }
0x282e   :  { %5183 = vadd.xlane.f32.xlu1 %v5176_v49  ;;  %12106 = vmatpush3.bf16.msra.mxu1 %v13165_v54 }
0x282f   :  { %12107 = vmatprep.subr.bf16.mxu1 %v13166_v17 }
0x2832   :  { %12108 = vmatpush3.bf16.msra.mxu1 %v13167_v45 }
0x2833   :  { %12109 = vmatprep.subr.bf16.mxu1 %v13168_v14 }
0x2834   :  { %v5542_v28 = vpop.f32.mrf.mxu0 }
0x2836   :  { %12110 = vmatpush3.bf16.msra.mxu1 %v13169_v39  ;;  %v5544_v45 = vpop.f32.mrf.mxu0  ;;  %v5289_v39 = vsub.s32 3, %v14562_v30 }
0x2837   :  { %12111 = vmatprep.subr.bf16.mxu1 %v13170_v55 }
0x2838   :  { %v5546_v14 = vpop.f32.mrf.mxu0 }
0x283a   :  { %12112 = vmatpush3.bf16.msra.mxu1 %v13171_v6 }
0x283b   :  { %12113 = vmatprep.subr.bf16.mxu1 %v13172_v7 }
0x283d   :  { %v5489_v13 = vpop.f32.mrf.mxu1 }
0x283e   :  { %12114 = vmatpush3.bf16.msra.mxu1 %v13173_v51  ;;  %v15424_v58 = vadd.f32 %v5489_v13, %v15418_v1  ;;  %v5548_v51 = vpop.f32.mrf.mxu0  ;;  %v15432_v13 = vrot.slane %v15408_v52, %v5289_v39 }
0x283f   :  { %12660 = vmatprep.subr.bf16.mxu1 %v14273_v19  ;;  %v5491_v27 = vpop.f32.mrf.mxu1 }
0x2840   :  { %v5492_v62 = vadd.f32 %v5491_v27, %v15412_v40  ;;  %v11665_v2 = vmul.f32 -1.442695, %v15424_v58 }
0x2841   :  { %v5493_v36 = vpop.f32.mrf.mxu1 }
0x2842   :  { %v11666_v25 = vmul.f32 -1.442695, %v5492_v62  ;;  %v15421_v56 = vadd.f32 %v5493_v36, %v15418_v1 }
0x2843   :  { %v5495_v53 = vpop.f32.mrf.mxu1 }
0x2844   :  { %v5496_v21 = vadd.f32 %v5495_v53, %v15412_v40  ;;  %v11667_v57 = vmul.f32 -1.442695, %v15421_v56 }
0x2846   :  { %v11668_v8 = vmul.f32 -1.442695, %v5496_v21 }
0x28b3   :  { %v5182_v61 = vpop.xlane.xlu0 %5181 }
0x28b4   :  { %13522 = vrsqrt.f32 %v5182_v61  ;;  %vm5201_vm14 = vcmp.eq.f32.partialorder %v5182_v61, inf  ;;  %v5204_v3 = vand.u32 2147483648, %v5182_v61  ;;  %vm5203_vm1 = vcmp.eq.f32.partialorder %v5182_v61, 0.0 }
0x28b5   :  { %13524 = vpow2.f32 %v11668_v8  ;;  %v5549_v8 = vadd.f32 %v5548_v51, %v15432_v13 }
0x28b6   :  { %13526 = vpow2.f32 %v11666_v25 }
0x28b7   :  { %v5184_v44 = vpop.xlane.xlu1 %5183 }
0x28b8   :  { %13528 = vrsqrt.f32 %v5184_v44  ;;  %vm5208_vm2 = vcmp.eq.f32.partialorder %v5184_v44, inf  ;;  %v5211_v23 = vand.u32 2147483648, %v5184_v44  ;;  %vm5210_vm3 = vcmp.eq.f32.partialorder %v5184_v44, 0.0 }
0x28b9   :  { %13530 = vpow2.f32 %v11667_v57  ;;  %v5545_v57 = vadd.f32 %v5544_v45, %v15432_v13 }
0x28ba   :  { %13532 = vpow2.f32 %v11665_v2 }
0x28c1   :  { %v13523_v32 = vpop.eup %13522 }
0x28c2   :  { %v13525_v34 = vpop.eup %13524  ;;  %v5200_v29 = vmul.f32 %v13523_v32, %v5182_v61 }
0x28c3   :  { %v13527_v33 = vpop.eup %13526  ;;  %v5588_v0 = vadd.f32 1.0, %v13525_v34 }
0x28c4   :  { %v5202_v59 = vsel %vm5201_vm14, %v5182_v61, %v5200_v29  ;;  %v5586_v20 = vadd.f32 1.0, %v13527_v33 }
0x28c5   :  { %v13529_v16 = vpop.eup %13528  ;;  %v5205_v42 = vsel %vm5203_vm1, %v5204_v3, %v5202_v59  ;;  %13534 = vrcp.f32 %v5588_v0 }
0x28c6   :  { %v5215_v48 = vmul.f32 11.313708, %v5205_v42  ;;  %v5207_v15 = vmul.f32 %v13529_v16, %v5184_v44  ;;  %v13531_v12 = vpop.eup %13530 }
0x28c7   :  { %v13533_v11 = vpop.eup %13532  ;;  %v5587_v22 = vadd.f32 1.0, %v13531_v12 }
0x28c8   :  { %v5219_v49 = vadd.f32 1e-06, %v5215_v48  ;;  %v5209_v18 = vsel %vm5208_vm2, %v5184_v44, %v5207_v15  ;;  %v5585_v17 = vadd.f32 1.0, %v13533_v11 }
0x28c9   :  { %v5212_v37 = vsel %vm5210_vm3, %v5211_v23, %v5209_v18 }
0x28ca   :  { %13536 = vrcp.f32 %v5219_v49  ;;  %v5216_v4 = vmul.f32 11.313708, %v5212_v37 }
0x28cb   :  { %13538 = vrcp.f32 %v5586_v20 }
0x28cc   :  { %v5220_v54 = vadd.f32 1e-06, %v5216_v4 }
0x28ce   :  { %13540 = vrcp.f32 %v5220_v54 }
0x28cf   :  { %13542 = vrcp.f32 %v5587_v22 }
0x28d0   :  { %13544 = vrcp.f32 %v5585_v17 }
0x28d2   :  { %v13535_v55 = vpop.eup %13534 }
0x28d3   :  { %v5612_v27 = vmul.f32 %v13535_v55, %v5496_v21  ;;  %v15442_v21 = vrot.slane %v15408_v52, %v14617_v24 }
0x28d5   :  { %v5620_v2 = vmul.f32 %v5612_v27, %v5549_v8 }
0x28d7   :  { %v13537_v6 = vpop.eup %13536 }
0x28d8   :  { %v13539_v7 = vpop.eup %13538  ;;  %v5227_v36 = vmul.f32 %v13537_v6, %v15394_v46 }
0x28d9   :  { %v5610_v25 = vmul.f32 %v13539_v7, %v5492_v62 }
0x28da   :  { %v5237_v32 = vmul.f32 %v15381_v60, %v5227_v36 }
0x28db   :  { %v13541_v53 = vpop.eup %13540  ;;  %v5618_v3 = vmul.f32 %v5610_v25, %v5545_v57 }
0x28dc   :  { %v5228_v61 = vmul.f32 %v13541_v53, %v15401_v35  ;;  %v13543_v44 = vpop.eup %13542  ;;  %v5547_v35 = vadd.f32 %v5546_v14, %v15442_v21 }
0x28dd   :  { %v13545_v29 = vpop.eup %13544  ;;  %v5611_v46 = vmul.f32 %v13543_v44, %v15421_v56  ;;  %v5626_v62 = vpack.c.bf16 %v5620_v2, %v5618_v3 }
0x28de   :  { %v5238_v34 = vmul.f32 %v15381_v60, %v5228_v61  ;;  %v5609_v59 = vmul.f32 %v13545_v29, %v15424_v58  ;;  %v5543_v60 = vadd.f32 %v5542_v28, %v15442_v21  ;;  %v15453_v28 = vld [vmem:[#allocation29] ss:$0 sm:$0xff] }
0x28df   :  { %v5619_v16 = vmul.f32 %v5611_v46, %v5547_v35 }
0x28e0   :  { %v5240_v33 = vpack.c.bf16 %v5238_v34, %v5237_v32  ;;  %v5617_v0 = vmul.f32 %v5609_v59, %v5543_v60 }
0x28e2   :  { %5498 = vmatmul.mubr.bf16.gmra.mxu1 %v5240_v33  ;;  %5551 = vmatmul.mubr.bf16.gmra.mxu0 %v5240_v33  ;;  %v5625_v42 = vpack.c.bf16 %v5619_v16, %v5617_v0 }
0x28e3   :  { %5796 = vmatprep.mubr.bf16.mxu1 %v5626_v62  ;;  %6106 = vmatprep.mubr.bf16.mxu0 %v14274_v38 }
0x28ea   :  { %5797 = vmatmul.mubr.bf16.vlgmr.msra.gmra.mxu1 %v5625_v42 }
0x29a2   :  { %v5499_v52 = vpop.f32.mrf.mxu1  ;;  %v5552_v34 = vpop.f32.mrf.mxu0 }
0x29a3   :  { %v5500_v56 = vadd.f32 %v5499_v52, %v15418_v1 }
0x29a4   :  { %v5501_v48 = vpop.f32.mrf.mxu1  ;;  %v5554_v29 = vpop.f32.mrf.mxu0 }
0x29a5   :  { %v11669_v15 = vmul.f32 -1.442695, %v5500_v56  ;;  %v5502_v20 = vadd.f32 %v5501_v48, %v15412_v40  ;;  %v5555_v52 = vadd.f32 %v5554_v29, %v15432_v13 }
0x29a6   :  { %v5503_v23 = vpop.f32.mrf.mxu1  ;;  %v5556_v3 = vpop.f32.mrf.mxu0 }
0x29a7   :  { %13546 = vpow2.f32 %v11669_v15  ;;  %v11670_v58 = vmul.f32 -1.442695, %v5502_v20  ;;  %v5504_v49 = vadd.f32 %v5503_v23, %v15418_v1  ;;  %v5557_v42 = vadd.f32 %v5556_v3, %v15442_v21 }
0x29a8   :  { %v5505_v18 = vpop.f32.mrf.mxu1  ;;  %v5558_v35 = vpop.f32.mrf.mxu0  ;;  %v5553_v23 = vadd.f32 %v5552_v34, %v15442_v21  ;;  %v13181_v21 = vld [vmem:[#allocation10 + $0x158] ss:$12 sps:$4 sm:$0xff]  }
0x29a9   :  { %13548 = vpow2.f32 %v11670_v58  ;;  %v11671_v12 = vmul.f32 -1.442695, %v5504_v49  ;;  %v5506_v37 = vadd.f32 %v5505_v18, %v15412_v40  ;;  %v5559_v15 = vadd.f32 %v5558_v35, %v15432_v13  ;;  %v13178_v13 = vld [vmem:[#allocation10 + $0x150] ss:$12 sps:$4 sm:$0xff]  }
0x29aa   :  { %v12115_v4 = vpop.f32.mrf.mxu1 }
0x29ab   :  { %13550 = vpow2.f32 %v11671_v12  ;;  %v11672_v11 = vmul.f32 -1.442695, %v5506_v37 }
0x29ac   :  { %v12116_v22 = vpop.f32.mrf.mxu1 }
0x29ad   :  { %13552 = vpow2.f32 %v11672_v11  ;;  %v12117_v54 = vadd.f32 %v12116_v22, %v12115_v4 }
0x29ae   :  { %v12118_v17 = vpop.f32.mrf.mxu1 }
0x29af   :  { %v5799_v45 = vadd.f32 %v12117_v54, %v15453_v28  ;;  %v13176_v54 = vld [vmem:[#allocation10 + $0x16c] ss:$12 sps:$4 sm:$0xff]  }
0x29b0   :  { %v12119_v14 = vpop.f32.mrf.mxu1  ;;  %6074 = vmatprep.subr.bf16.mxu0 %v13176_v54 }
0x29b1   :  { %v15457_v55 = vadd.f32 %v5799_v45, %v15350_v43  ;;  %v12120_v1 = vadd.f32 %v12119_v14, %v12118_v17  ;;  %v13182_v17 = vld [vmem:[#allocation10 + $0x138] ss:$12 sps:$4 sm:$0xff]   ;;  %v13185_v45 = vld [vmem:[#allocation10 + $0x140] ss:$12 sps:$4 sm:$0xff]  }
0x29b2   :  { %v13188_v14 = vld [vmem:[#allocation10 + $0x124] ss:$12 sps:$4 sm:$0xff]  }
0x29b3   :  { %v5802_v6 = vadd.f32 %v12120_v1, %v15453_v28  ;;  %v15461_v40 = vadd.f32 1e-06, %v15457_v55  ;;  %v13186_v1 = vld [vmem:[#allocation10 + $0x120] ss:$12 sps:$4 sm:$0xff]  }
0x29b4   :  { %v13547_v7 = vpop.eup %13546 }
0x29b5   :  { %v15464_v51 = vadd.f32 %v5802_v6, %v15354_v41  ;;  %v5823_v27 = vadd.f32 1e-06, %v15461_v40  ;;  %v5589_v53 = vadd.f32 1.0, %v13547_v7  ;;  %v13189_v6 = vld [vmem:[#allocation10 + $0x128] ss:$12 sps:$4 sm:$0xff]  }
0x29b6   :  { %v13549_v36 = vpop.eup %13548  ;;  %v13192_v7 = vld [vmem:[#allocation10 + $0x10c] ss:$12 sps:$4 sm:$0xff]  }
0x29b7   :  { %v5590_v8 = vadd.f32 1.0, %v13549_v36  ;;  %v5827_v25 = vmul.f32 %v5823_v27, %v5823_v27  ;;  %v15468_v61 = vadd.f32 1e-06, %v15464_v51  ;;  %v13190_v27 = vld [vmem:[#allocation10 + $0x108] ss:$12 sps:$4 sm:$0xff]  }
0x29b8   :  { %v13551_v43 = vpop.eup %13550  ;;  %v13193_v36 = vld [vmem:[#allocation10 + $0x110] ss:$12 sps:$4 sm:$0xff]  }
0x29b9   :  { %13554 = vrcp.f32 %v5590_v8  ;;  %v5591_v44 = vadd.f32 1.0, %v13551_v43  ;;  %5831 = vadd.xlane.f32.xlu0 %v5827_v25  ;;  %v5824_v57 = vadd.f32 1e-06, %v15468_v61  ;;  %v13194_v8 = vld [vmem:[#allocation10 + $0xf0] ss:$12 sps:$4 sm:$0xff]  }
0x29ba   :  { %v13553_v2 = vpop.eup %13552  ;;  %13556 = vrcp.f32 %v5589_v53  ;;  %v13196_v53 = vld [vmem:[#allocation10 + $0xf4] ss:$12 sps:$4 sm:$0xff]   ;;  %v13197_v25 = vld [vmem:[#allocation10 + $0xf8] ss:$12 sps:$4 sm:$0xff]   ;;  %v13200_v43 = vld [vmem:[#allocation10 + $0xdc] ss:$12 sps:$4 sm:$0xff]  }
0x29bb   :  { %13558 = vrcp.f32 %v5591_v44  ;;  %v5592_v41 = vadd.f32 1.0, %v13553_v2  ;;  %v5828_v32 = vmul.f32 %v5824_v57, %v5824_v57  ;;  %v13198_v44 = vld [vmem:[#allocation10 + $0xd8] ss:$12 sps:$4 sm:$0xff]   ;;  %v13201_v57 = vld [vmem:[#allocation10 + $0xe0] ss:$12 sps:$4 sm:$0xff]  }
0x29bc   :  { %v13204_v2 = vld [vmem:[#allocation10 + $0xc4] ss:$12 sps:$4 sm:$0xff]  }
0x29bd   :  { %13560 = vrcp.f32 %v5592_v41  ;;  %5833 = vadd.xlane.f32.xlu1 %v5828_v32  ;;  %v13202_v41 = vld [vmem:[#allocation10 + $0xc0] ss:$12 sps:$4 sm:$0xff]   ;;  %v13205_v32 = vld [vmem:[#allocation10 + $0xc8] ss:$12 sps:$4 sm:$0xff]  }
0x29c6   :  { %v13555_v46 = vpop.eup %13554 }
0x29c7   :  { %v13557_v33 = vpop.eup %13556  ;;  %v5614_v59 = vmul.f32 %v13555_v46, %v5502_v20  ;;  %v13174_v20 = vld [vmem:[#allocation10 + $0x168] ss:$12 sps:$4 sm:$0xff]  }
0x29c8   :  { %v13559_v62 = vpop.eup %13558  ;;  %v5613_v0 = vmul.f32 %v13557_v33, %v5500_v56  ;;  %6075 = vmatpush1.bf16.msra.mxu0 %v13174_v20  ;;  %v13180_v56 = vld [vmem:[#allocation10 + $0x154] ss:$12 sps:$4 sm:$0xff]  }
0x29c9   :  { %v5615_v60 = vmul.f32 %v13559_v62, %v5504_v49  ;;  %v5622_v18 = vmul.f32 %v5614_v59, %v5555_v52  ;;  %v13177_v49 = vld [vmem:[#allocation10 + $0x170] ss:$12 sps:$4 sm:$0xff]   ;;  %6076 = vmatprep.subr.bf16.mxu0 %v13180_v56 }
0x29ca   :  { %v13561_v16 = vpop.eup %13560  ;;  %v5621_v4 = vmul.f32 %v5613_v0, %v5553_v23  ;;  %12661 = vmatpush3.bf16.msra.mxu1 %v13177_v49 }
0x29cb   :  { %v5616_v48 = vmul.f32 %v13561_v16, %v5506_v37  ;;  %v5623_v58 = vmul.f32 %v5615_v60, %v5557_v42  ;;  %12662 = vmatprep.subr.bf16.mxu1 %v14273_v19  ;;  %v13184_v37 = vld [vmem:[#allocation10 + $0x13c] ss:$12 sps:$4 sm:$0xff]  }
0x29cc   :  { %6077 = vmatpush1.bf16.msra.mxu0 %v13178_v13 }
0x29cd   :  { %v5624_v12 = vmul.f32 %v5616_v48, %v5559_v15  ;;  %v5627_v22 = vpack.c.bf16 %v5623_v58, %v5621_v4  ;;  %6078 = vmatprep.subr.bf16.mxu0 %v13184_v37  ;;  %v15485_v4 = vld [vmem:[#allocation8 + $0x1] ss:$0 sm:$0xff] }
0x29ce   :  { %12663 = vmatpush3.bf16.msra.mxu1 %v13181_v21 }
0x29cf   :  { %v5628_v11 = vpack.c.bf16 %v5624_v12, %v5622_v18  ;;  %12664 = vmatprep.subr.bf16.mxu1 %v14273_v19 }
0x29d0   :  { %6079 = vmatpush1.bf16.msra.mxu0 %v13182_v17 }
0x29d1   :  { %5804 = vmatprep.mubr.bf16.mxu1 %v5628_v11  ;;  %6080 = vmatprep.subr.bf16.mxu0 %v13188_v14 }
0x29d2   :  { %5805 = vmatmul.mubr.bf16.gmra.mxu1 %v5627_v22 }
0x29d3   :  { %12676 = vmatprep.mubr.msk.bf16.mxu1 %vm14275_vm0, %v14273_v19  ;;  %12665 = vmatpush3.bf16.msra.mxu1 %v13185_v45 }
0x29d4   :  { %12666 = vmatprep.subr.bf16.mxu1 %v14273_v19  ;;  %6081 = vmatpush1.bf16.msra.mxu0 %v13186_v1 }
0x29d5   :  { %6082 = vmatprep.subr.bf16.mxu0 %v13192_v7 }
0x29d7   :  { %12667 = vmatpush3.bf16.msra.mxu1 %v13189_v6 }
0x29d8   :  { %12668 = vmatprep.subr.bf16.mxu1 %v14273_v19  ;;  %6083 = vmatpush1.bf16.msra.mxu0 %v13190_v27 }
0x29d9   :  { %6084 = vmatprep.subr.bf16.mxu0 %v13196_v53 }
0x29db   :  { %12669 = vmatpush3.bf16.msra.mxu1 %v13193_v36 }
0x29dc   :  { %12670 = vmatprep.subr.bf16.mxu1 %v14273_v19  ;;  %6085 = vmatpush1.bf16.msra.mxu0 %v13194_v8 }
0x29dd   :  { %6086 = vmatprep.subr.bf16.mxu0 %v13200_v43 }
0x29df   :  { %12671 = vmatpush3.bf16.msra.mxu1 %v13197_v25 }
0x29e0   :  { %12672 = vmatprep.subr.bf16.mxu1 %v14273_v19  ;;  %6087 = vmatpush1.bf16.msra.mxu0 %v13198_v44 }
0x29e1   :  { %6088 = vmatprep.subr.bf16.mxu0 %v13204_v2 }
0x29e3   :  { %12673 = vmatpush3.bf16.msra.mxu1 %v13201_v57 }
0x29e4   :  { %12674 = vmatprep.subr.bf16.mxu1 %v14273_v19  ;;  %6089 = vmatpush1.bf16.msra.mxu0 %v13202_v41 }
0x29e7   :  { %12675 = vmatpush3.bf16.msra.mxu1 %v13205_v32 }
0x2a42   :  { %v5832_v34 = vpop.xlane.xlu0 %5831 }
0x2a43   :  { %13562 = vrsqrt.f32 %v5832_v34  ;;  %vm5841_vm4 = vcmp.eq.f32.partialorder %v5832_v34, inf  ;;  %v5844_v33 = vand.u32 2147483648, %v5832_v34  ;;  %vm5843_vm8 = vcmp.eq.f32.partialorder %v5832_v34, 0.0 }
0x2a46   :  { %v5834_v29 = vpop.xlane.xlu1 %5833 }
0x2a47   :  { %13564 = vrsqrt.f32 %v5834_v29  ;;  %vm5848_vm11 = vcmp.eq.f32.partialorder %v5834_v29, inf  ;;  %v5851_v0 = vand.u32 2147483648, %v5834_v29  ;;  %vm5850_vm12 = vcmp.eq.f32.partialorder %v5834_v29, 0.0 }
0x2a50   :  { %v13563_v3 = vpop.eup %13562 }
0x2a51   :  { %v5840_v46 = vmul.f32 %v13563_v3, %v5832_v34 }
0x2a53   :  { %v5842_v62 = vsel %vm5841_vm4, %v5832_v34, %v5840_v46 }
0x2a54   :  { %v13565_v35 = vpop.eup %13564  ;;  %v5845_v59 = vsel %vm5843_vm8, %v5844_v33, %v5842_v62 }
0x2a55   :  { %v5867_v60 = vmul.f32 11.313708, %v5845_v59  ;;  %v5847_v16 = vmul.f32 %v13565_v35, %v5834_v29 }
0x2a57   :  { %v5871_v42 = vadd.f32 1e-06, %v5867_v60  ;;  %v5849_v52 = vsel %vm5848_vm11, %v5834_v29, %v5847_v16 }
0x2a58   :  { %v5852_v48 = vsel %vm5850_vm12, %v5851_v0, %v5849_v52 }
0x2a59   :  { %13566 = vrcp.f32 %v5871_v42  ;;  %v5868_v15 = vmul.f32 11.313708, %v5852_v48 }
0x2a5b   :  { %v5872_v23 = vadd.f32 1e-06, %v5868_v15 }
0x2a5d   :  { %13568 = vrcp.f32 %v5872_v23 }
0x2a66   :  { %v13567_v58 = vpop.eup %13566 }
0x2a67   :  { %v5879_v18 = vmul.f32 %v13567_v58, %v15461_v40 }
0x2a69   :  { %v5889_v22 = vmul.f32 %v15485_v4, %v5879_v18 }
0x2a6a   :  { %v13569_v12 = vpop.eup %13568 }
0x2a6b   :  { %v5880_v11 = vmul.f32 %v13569_v12, %v15468_v61 }
0x2a6d   :  { %v5890_v54 = vmul.f32 %v15485_v4, %v5880_v11 }
0x2a6f   :  { %v5893_v20 = vpack.c.bf16 %v5890_v54, %v5889_v22 }
0x2a71   :  { %6107 = vmatmul.mubr.bf16.vlgmr.msra.gmra.mxu0 %v5893_v20  ;;  %12677 = vmatmul.mubr.bf16.vlgmr.msra.gmra.mxu1 %v5893_v20 }
0x2a72   :  { %6114 = vmatprep.mubr.bf16.mxu0 %v14274_v38  ;;  %12680 = vmatprep.mubr.msk.bf16.mxu1 %vm14275_vm0, %v14273_v19 }
0x2a92   :  { %v12121_v49 = vpop.f32.mrf.mxu1 }
0x2a94   :  { %v12122_v56 = vpop.f32.mrf.mxu1 }
0x2a95   :  { %v12123_v40 = vadd.f32 %v12122_v56, %v12121_v49 }
0x2a96   :  { %v12124_v13 = vpop.f32.mrf.mxu1 }
0x2a97   :  { %v5807_v21 = vadd.f32 %v12123_v40, %v15453_v28 }
0x2a98   :  { %v12125_v37 = vpop.f32.mrf.mxu1 }
0x2a99   :  { %v15495_v61 = vadd.f32 %v5807_v21, %v15390_v10  ;;  %v12126_v17 = vadd.f32 %v12125_v37, %v12124_v13  ;;  %v15503_v10 = vld [vmem:[#allocation11 + $0x3] sm:$0x7] }
0x2a9b   :  { %v5810_v45 = vadd.f32 %v12126_v17, %v15453_v28  ;;  %v5821_v14 = vadd.f32 1e-06, %v15495_v61  ;;  %v15507_v28 = vrot.slane %v15503_v10, %v14565_v31 }
0x2a9d   :  { %v15500_v1 = vadd.f32 %v5810_v45, %v15397_v26  ;;  %v5825_v6 = vadd.f32 1e-06, %v5821_v14 }
0x2a9f   :  { %v5829_v7 = vmul.f32 %v5825_v6, %v5825_v6  ;;  %v5822_v27 = vadd.f32 1e-06, %v15500_v1  ;;  %v15535_v6 = vrot.slane %v15503_v10, %v14584_v50 }
0x2aa1   :  { %5835 = vadd.xlane.f32.xlu0 %v5829_v7  ;;  %v5826_v36 = vadd.f32 1e-06, %v5822_v27 }
0x2aa3   :  { %v5830_v53 = vmul.f32 %v5826_v36, %v5826_v36 }
0x2aa5   :  { %5837 = vadd.xlane.f32.xlu1 %v5830_v53  ;;  %v5942_v53 = vrot.slane %v15503_v10, %v14617_v24 }
0x2b2a   :  { %v5836_v8 = vpop.xlane.xlu0 %5835 }
0x2b2b   :  { %13570 = vrsqrt.f32 %v5836_v8  ;;  %vm5855_vm13 = vcmp.eq.f32.partialorder %v5836_v8, inf  ;;  %v5858_v62 = vand.u32 2147483648, %v5836_v8  ;;  %vm5857_vm14 = vcmp.eq.f32.partialorder %v5836_v8, 0.0 }
0x2b2e   :  { %v5838_v25 = vpop.xlane.xlu1 %5837 }
0x2b2f   :  { %13572 = vrsqrt.f32 %v5838_v25  ;;  %vm5862_vm1 = vcmp.eq.f32.partialorder %v5838_v25, inf  ;;  %v5865_v42 = vand.u32 2147483648, %v5838_v25  ;;  %vm5864_vm2 = vcmp.eq.f32.partialorder %v5838_v25, 0.0 }
0x2b31   :  { %v6108_v26 = vpop.f32.mrf.mxu0  ;;  %v6165_v43 = vpop.f32.mrf.mxu1 }
0x2b32   :  { %v15510_v44 = vadd.f32 %v6108_v26, %v15507_v28 }
0x2b33   :  { %v6110_v57 = vpop.f32.mrf.mxu0  ;;  %v12678_v2 = vpop.f32.mrf.mxu1 }
0x2b34   :  { %6700 = vrot.lane.b32.xlu1 %v15510_v44, %s14257_s0 }
0x2b35   :  { %v6111_v41 = vpop.f32.mrf.mxu0  ;;  %v6167_v32 = vpop.f32.mrf.mxu1 }
0x2b36   :  { %v15515_v34 = vadd.f32 %v6111_v41, %v15507_v28 }
0x2b37   :  { %v6113_v29 = vpop.f32.mrf.mxu0  ;;  %v12679_v3 = vpop.f32.mrf.mxu1 }
0x2b38   :  { %v13571_v46 = vpop.eup %13570  ;;  %6702 = vrot.lane.b32.xlu1 %v15515_v34, %s14257_s0 }
0x2b39   :  { %v5854_v33 = vmul.f32 %v13571_v46, %v5836_v8 }
0x2b3b   :  { %v5856_v35 = vsel %vm5855_vm13, %v5836_v8, %v5854_v33 }
0x2b3c   :  { %v13573_v59 = vpop.eup %13572  ;;  %v5859_v60 = vsel %vm5857_vm14, %v5858_v62, %v5856_v35 }
0x2b3d   :  { %v5869_v16 = vmul.f32 11.313708, %v5859_v60  ;;  %v5861_v0 = vmul.f32 %v13573_v59, %v5838_v25 }
0x2b3f   :  { %v5873_v52 = vadd.f32 1e-06, %v5869_v16  ;;  %v5863_v48 = vsel %vm5862_vm1, %v5838_v25, %v5861_v0 }
0x2b40   :  { %v5866_v15 = vsel %vm5864_vm2, %v5865_v42, %v5863_v48 }
0x2b41   :  { %13574 = vrcp.f32 %v5873_v52  ;;  %v5870_v23 = vmul.f32 11.313708, %v5866_v15 }
0x2b43   :  { %v5874_v58 = vadd.f32 1e-06, %v5870_v23 }
0x2b45   :  { %13576 = vrcp.f32 %v5874_v58 }
0x2b4e   :  { %v13575_v18 = vpop.eup %13574 }
0x2b4f   :  { %v5881_v12 = vmul.f32 %v13575_v18, %v5821_v14 }
0x2b51   :  { %v5891_v54 = vmul.f32 %v15485_v4, %v5881_v12 }
0x2b52   :  { %v13577_v11 = vpop.eup %13576 }
0x2b53   :  { %v5882_v22 = vmul.f32 %v13577_v11, %v5822_v27 }
0x2b55   :  { %v5892_v20 = vmul.f32 %v15485_v4, %v5882_v22 }
0x2b57   :  { %v5894_v49 = vpack.c.bf16 %v5892_v20, %v5891_v54 }
0x2b59   :  { %6115 = vmatmul.mubr.bf16.gmra.mxu0 %v5894_v49  ;;  %12681 = vmatmul.mubr.bf16.gmra.mxu1 %v5894_v49 }
0x2b5a   :  { %6122 = vmatprep.mubr.bf16.mxu0 %v14274_v38  ;;  %12684 = vmatprep.mubr.msk.bf16.mxu1 %vm14275_vm0, %v14273_v19 }
0x2b61   :  { %6123 = vmatmul.mubr.bf16.gmra.mxu0 %v14557_v5  ;;  %12685 = vmatmul.mubr.bf16.gmra.mxu1 %v14557_v5 }
0x2b62   :  { %12690 = vmatprep.mubr.msk.f32.mxu0 %vm757_vm9, %v15510_v44 }
0x2ba6   :  { %v6701_v56 = vpop.permute.xlu1 %6700 }
0x2ba7   :  { %12726 = vmatprep.mubr.msk.f32.mxu1 %vm757_vm9, %v6701_v56 }
0x2baa   :  { %v6703_v32 = vpop.permute.xlu1 %6702 }
0x2c19   :  { %v15529_v40 = vpop.f32.mrf.mxu0  ;;  %v6171_v4 = vpop.f32.mrf.mxu1 }
0x2c1b   :  { %v6118_v13 = vpop.f32.mrf.mxu0  ;;  %v12682_v21 = vpop.f32.mrf.mxu1 }
0x2c1d   :  { %v15531_v37 = vpop.f32.mrf.mxu0  ;;  %v6173_v17 = vpop.f32.mrf.mxu1 }
0x2c1f   :  { %v6121_v45 = vpop.f32.mrf.mxu0  ;;  %v12683_v14 = vpop.f32.mrf.mxu1 }
0x2c21   :  { %v6124_v5 = vpop.f32.mrf.mxu0  ;;  %v6177_v8 = vpop.f32.mrf.mxu1 }
0x2c22   :  { %v15545_v25 = vadd.f32 %v6177_v8, %v5942_v53 }
0x2c23   :  { %v6125_v7 = vpop.f32.mrf.mxu0  ;;  %v12686_v26 = vpop.f32.mrf.mxu1 }
0x2c24   :  { %v6126_v27 = vadd.f32 %v6125_v7, %v15535_v6 }
0x2c25   :  { %v6127_v36 = vpop.f32.mrf.mxu0  ;;  %v6180_v43 = vpop.f32.mrf.mxu1 }
0x2c26   :  { %6704 = vrot.lane.b32.xlu0 %v6126_v27, %s14257_s0  ;;  %12688 = vmatprep.subr.msk.mxu0 %vm757_vm9, %v6126_v27  ;;  %v15548_v57 = vadd.f32 %v6180_v43, %v5942_v53 }
0x2c27   :  { %12689 = vmatpush3.xpose.msk.msra.mxu0 %vm757_vm9, %v6126_v27  ;;  %v12687_v2 = vpop.f32.mrf.mxu1  ;;  %v15554_v10 = vpop.f32.mrf.mxu0 }
0x2c28   :  { %12693 = vmatprep.subr.mxu0 %v15545_v25 }
0x2c2a   :  { %12691 = vmatmul.mubr.msk.f32.vlgmr.msra.gmra.mxu0 %vm757_vm9, %v15515_v34 }
0x2c2b   :  { %12694 = vmatpush3.msra.mxu0 %v15545_v25 }
0x2c98   :  { %v6705_v41 = vpop.permute.xlu0 %6704 }
0x2c99   :  { %12724 = vmatprep.subr.msk.mxu1 %vm757_vm9, %v6705_v41 }
0x2c9a   :  { %12725 = vmatpush3.xpose.msk.msra.mxu1 %vm757_vm9, %v6705_v41 }
0x2c9d   :  { %12727 = vmatmul.mubr.msk.f32.vlgmr.msra.gmra.mxu1 %vm757_vm9, %v6703_v32 }
0x2cea   :  { %v12692_v29 = vpop.f32.mrf.mxu0 }
0x2ceb   :  { %v6286_v3 = vmul.f32 0.17677669, %v12692_v29 }
0x2cec   :  { %v6276_v46 = vpop.f32.mrf.mxu0 }
0x2ced   :  { %v6285_v33 = vmul.f32 0.17677669, %v6276_v46  ;;  %v6290_v62 = vsel %vm844_vm10, %v6286_v3, -inf }
0x2cee   :  { %6291 = vmax.xlane.f32.xlu0 %v6290_v62 }
0x2cef   :  { %v6287_v35 = vsel %vm844_vm10, %v6285_v33, -inf }
0x2cf0   :  { %6288 = vmax.xlane.f32.xlu1 %v6287_v35 }
0x2d01   :  { %6395 = vrot.lane.b32.xlu1 %v6126_v27, %s14276_s11 }
0x2d05   :  { %6393 = vrot.lane.b32.xlu1 %v15515_v34, %s14276_s11 }
0x2d09   :  { %6811 = vrot.lane.b32.xlu1 %v15545_v25, %s14257_s0 }
0x2d5d   :  { %v12728_v59 = vpop.f32.mrf.mxu1 }
0x2d5e   :  { %v6788_v0 = vmul.f32 0.17677669, %v12728_v59 }
0x2d5f   :  { %v6778_v60 = vpop.f32.mrf.mxu1 }
0x2d60   :  { %v6787_v16 = vmul.f32 0.17677669, %v6778_v60  ;;  %v6792_v52 = vsel %vm844_vm10, %v6788_v0, -inf }
0x2d62   :  { %v6789_v42 = vsel %vm844_vm10, %v6787_v16, -inf }
0x2d63   :  { %6790 = vmax.xlane.f32.xlu0 %v6789_v42 }
0x2d67   :  { %6793 = vmax.xlane.f32.xlu0 %v6792_v52 }
0x2d77   :  { %v6292_v48 = vpop.xlane.xlu0 %6291 }
0x2d78   :  { %v6294_v15 = vsub.f32 %v6286_v3, %v6292_v48 }
0x2d79   :  { %v6289_v23 = vpop.xlane.xlu1 %6288 }
0x2d7a   :  { %v6297_v58 = vmul.f32 1.442695, %v6294_v15  ;;  %v6293_v18 = vsub.f32 %v6285_v33, %v6289_v23 }
0x2d7c   :  { %13578 = vpow2.f32 %v6297_v58  ;;  %v6295_v12 = vmul.f32 1.442695, %v6293_v18 }
0x2d7d   :  { %v6396_v11 = vpop.permute.xlu1 %6395 }
0x2d7e   :  { %13580 = vpow2.f32 %v6295_v12  ;;  %12698 = vmatprep.subr.msk.mxu0 %vm757_vm9, %v6396_v11 }
0x2d81   :  { %v6394_v22 = vpop.permute.xlu1 %6393 }
0x2d85   :  { %v6812_v54 = vpop.permute.xlu1 %6811 }
0x2d86   :  { %12729 = vmatprep.subr.mxu1 %v6812_v54 }
0x2d87   :  { %12730 = vmatpush3.msra.mxu1 %v6812_v54 }
0x2d89   :  { %v13579_v20 = vpop.eup %13578 }
0x2d8a   :  { %v6302_v49 = vsel %vm844_vm10, %v13579_v20, 0.0 }
0x2d8b   :  { %v13581_v56 = vpop.eup %13580  ;;  %6303 = vadd.xlane.f32.xlu0 %v6302_v49 }
0x2d8c   :  { %v6299_v4 = vsel %vm844_vm10, %v13581_v56, 0.0 }
0x2d8d   :  { %6300 = vadd.xlane.f32.xlu1 %v6299_v4 }
0x2d9e   :  { %6958 = vrot.lane.b32.xlu1 %v6126_v27, %s14277_s19 }
0x2da1   :  { %6391 = vrot.lane.b32.xlu0 %v15510_v44, %s14276_s11 }
0x2dec   :  { %v6791_v13 = vpop.xlane.xlu0 %6790 }
0x2ded   :  { %v6795_v21 = vsub.f32 %v6787_v16, %v6791_v13 }
0x2def   :  { %v6797_v17 = vmul.f32 1.442695, %v6795_v21 }
0x2df0   :  { %v6794_v45 = vpop.xlane.xlu0 %6793 }
0x2df1   :  { %13582 = vpow2.f32 %v6797_v17  ;;  %v6796_v14 = vsub.f32 %v6788_v0, %v6794_v45 }
0x2df3   :  { %v6799_v5 = vmul.f32 1.442695, %v6796_v14 }
0x2df5   :  { %13584 = vpow2.f32 %v6799_v5 }
0x2dfe   :  { %v13583_v7 = vpop.eup %13582 }
0x2dff   :  { %v6801_v36 = vsel %vm844_vm10, %v13583_v7, 0.0 }
0x2e00   :  { %6802 = vadd.xlane.f32.xlu1 %v6801_v36 }
0x2e02   :  { %v13585_v53 = vpop.eup %13584 }
0x2e03   :  { %v6804_v8 = vsel %vm844_vm10, %v13585_v53, 0.0 }
0x2e04   :  { %6805 = vadd.xlane.f32.xlu0 %v6804_v8 }
0x2e11   :  { %6956 = vrot.lane.b32.xlu1 %v15515_v34, %s14277_s19 }
0x2e14   :  { %v6304_v27 = vpop.xlane.xlu0 %6303 }
0x2e15   :  { %13586 = vrcp.f32 %v6304_v27 }
0x2e16   :  { %v6301_v26 = vpop.xlane.xlu1 %6300 }
0x2e17   :  { %13588 = vrcp.f32 %v6301_v26 }
0x2e18   :  { %v6392_v3 = vpop.permute.xlu0 %6391 }
0x2e1a   :  { %6954 = vrot.lane.b32.xlu0 %v15510_v44, %s14277_s19  ;;  %v6959_v43 = vpop.permute.xlu1 %6958 }
0x2e1b   :  { %12742 = vmatprep.subr.msk.mxu1 %vm757_vm9, %v6959_v43 }
0x2e22   :  { %v13587_v2 = vpop.eup %13586 }
0x2e23   :  { %v6308_v29 = vmul.f32 %v13587_v2, %v13579_v20 }
0x2e24   :  { %v13589_v41 = vpop.eup %13588 }
0x2e25   :  { %v6307_v32 = vmul.f32 %v13589_v41, %v13581_v56 }
0x2e27   :  { %12695 = vmatprep.mubr.msk.f32.mxu0 %vm844_vm10, %v6307_v32 }
0x2e28   :  { %12696 = vmatmul.mubr.msk.f32.vlgmr.msra.gmra.mxu0 %vm844_vm10, %v6308_v29 }
0x2e29   :  { %12699 = vmatpush3.xpose.msk.msra.mxu0 %vm757_vm9, %v6396_v11  ;;  %12700 = vmatprep.mubr.msk.f32.mxu0 %vm757_vm9, %v6392_v3 }
0x2e2c   :  { %12701 = vmatmul.mubr.msk.f32.vlgmr.msra.gmra.mxu0 %vm757_vm9, %v6394_v22 }
0x2e89   :  { %v6803_v34 = vpop.xlane.xlu1 %6802 }
0x2e8a   :  { %13590 = vrcp.f32 %v6803_v34 }
0x2e8d   :  { %v6806_v44 = vpop.xlane.xlu0 %6805  ;;  %v6957_v60 = vpop.permute.xlu1 %6956 }
0x2e8e   :  { %13592 = vrcp.f32 %v6806_v44 }
0x2e91   :  { %v6955_v59 = vpop.permute.xlu0 %6954 }
0x2e97   :  { %v13591_v46 = vpop.eup %13590 }
0x2e98   :  { %v6809_v33 = vmul.f32 %v13591_v46, %v13583_v7 }
0x2e9a   :  { %12731 = vmatprep.mubr.msk.f32.mxu1 %vm844_vm10, %v6809_v33 }
0x2e9b   :  { %v13593_v62 = vpop.eup %13592 }
0x2e9c   :  { %v6810_v35 = vmul.f32 %v13593_v62, %v13585_v53  ;;  %v15614_v62 = vadd.f32 %v15554_v10, %v15535_v6 }
0x2e9e   :  { %12732 = vmatmul.mubr.msk.f32.vlgmr.msra.gmra.mxu1 %vm844_vm10, %v6810_v35  ;;  %v15618_v35 = vadd.f32 %v15531_v37, %v15507_v28 }
0x2e9f   :  { %12743 = vmatpush3.xpose.msk.msra.mxu1 %vm757_vm9, %v6959_v43  ;;  %12744 = vmatprep.mubr.msk.f32.mxu1 %vm757_vm9, %v6955_v59  ;;  %v15626_v59 = vadd.f32 %v15529_v40, %v15507_v28 }
0x2ea2   :  { %12745 = vmatmul.mubr.msk.f32.vlgmr.msra.gmra.mxu1 %vm757_vm9, %v6957_v60 }
0x2ee8   :  { %v15588_v16 = vpop.f32.mrf.mxu0 }
0x2eea   :  { %v15590_v0 = vpop.f32.mrf.mxu0 }
0x2eeb   :  { %v6390_v42 = vpack.c.bf16 %v15588_v16, %v15590_v0 }
0x2eec   :  { %v12702_v52 = vpop.f32.mrf.mxu0 }
0x2eed   :  { %v6479_v48 = vmul.f32 0.17677669, %v12702_v52 }
0x2eee   :  { %v6469_v15 = vpop.f32.mrf.mxu0 }
0x2eef   :  { %v6478_v23 = vmul.f32 0.17677669, %v6469_v15  ;;  %v6483_v58 = vsel %vm844_vm10, %v6479_v48, -inf  ;;  %v15631_v15 = vld [vmem:[#allocation13 + $0x58] sm:$0xff]  }
0x2ef0   :  { %6484 = vmax.xlane.f32.xlu1 %v6483_v58 }
0x2ef1   :  { %v6480_v18 = vsel %vm844_vm10, %v6478_v23, -inf }
0x2ef2   :  { %6481 = vmax.xlane.f32.xlu0 %v6480_v18 }
0x2f5e   :  { %v15596_v12 = vpop.f32.mrf.mxu1 }
0x2f60   :  { %v15598_v11 = vpop.f32.mrf.mxu1 }
0x2f61   :  { %v6895_v22 = vpack.c.bf16 %v15596_v12, %v15598_v11 }
0x2f62   :  { %v12746_v54 = vpop.f32.mrf.mxu1 }
0x2f63   :  { %v7042_v56 = vmul.f32 0.17677669, %v12746_v54 }
0x2f64   :  { %v7032_v20 = vpop.f32.mrf.mxu1 }
0x2f65   :  { %v7041_v49 = vmul.f32 0.17677669, %v7032_v20  ;;  %v7046_v13 = vsel %vm844_vm10, %v7042_v56, -inf  ;;  %v13207_v20 = vld [vmem:[#allocation13 + $0x50] sm:$0xff]  }
0x2f67   :  { %v7043_v4 = vsel %vm844_vm10, %v7041_v49, -inf }
0x2f68   :  { %7044 = vmax.xlane.f32.xlu0 %v7043_v4  ;;  %v15652_v4 = vld [vmem:[#allocation13 + $0x48] sm:$0xff]  }
0x2f6c   :  { %7047 = vmax.xlane.f32.xlu0 %v7046_v13 }
0x2f79   :  { %v6485_v21 = vpop.xlane.xlu1 %6484 }
0x2f7a   :  { %v6487_v17 = vsub.f32 %v6479_v48, %v6485_v21  ;;  %v15656_v21 = vld [vmem:[#allocation13 + $0x40] sm:$0xff]  }
0x2f7b   :  { %v6482_v45 = vpop.xlane.xlu0 %6481 }
0x2f7c   :  { %v6490_v14 = vmul.f32 1.442695, %v6487_v17  ;;  %v6486_v5 = vsub.f32 %v6478_v23, %v6482_v45  ;;  %v15662_v17 = vld [vmem:[#allocation13 + $0x68] sm:$0xff]  }
0x2f7e   :  { %13594 = vpow2.f32 %v6490_v14  ;;  %v6488_v7 = vmul.f32 1.442695, %v6486_v5  ;;  %v15670_v14 = vld [vmem:[#allocation13 + $0x60] sm:$0xff]  }
0x2f80   :  { %13596 = vpow2.f32 %v6488_v7 }
0x2f8b   :  { %v13595_v36 = vpop.eup %13594 }
0x2f8c   :  { %v6495_v53 = vsel %vm844_vm10, %v13595_v36, 0.0 }
0x2f8d   :  { %v13597_v8 = vpop.eup %13596  ;;  %6496 = vadd.xlane.f32.xlu1 %v6495_v53 }
0x2f8e   :  { %v6492_v27 = vsel %vm844_vm10, %v13597_v8, 0.0 }
0x2f8f   :  { %6493 = vadd.xlane.f32.xlu0 %v6492_v27 }
0x2ff1   :  { %v7045_v26 = vpop.xlane.xlu0 %7044 }
0x2ff2   :  { %v7049_v43 = vsub.f32 %v7041_v49, %v7045_v26 }
0x2ff4   :  { %v7051_v2 = vmul.f32 1.442695, %v7049_v43 }
0x2ff5   :  { %v7048_v41 = vpop.xlane.xlu0 %7047 }
0x2ff6   :  { %13598 = vpow2.f32 %v7051_v2  ;;  %v7050_v32 = vsub.f32 %v7042_v56, %v7048_v41 }
0x2ff8   :  { %v7053_v29 = vmul.f32 1.442695, %v7050_v32 }
0x2ffa   :  { %13600 = vpow2.f32 %v7053_v29 }
0x3003   :  { %v13599_v3 = vpop.eup %13598 }
0x3004   :  { %v7055_v34 = vsel %vm844_vm10, %v13599_v3, 0.0 }
0x3005   :  { %7056 = vadd.xlane.f32.xlu0 %v7055_v34 }
0x3007   :  { %v13601_v44 = vpop.eup %13600 }
0x3008   :  { %v7058_v46 = vsel %vm844_vm10, %v13601_v44, 0.0 }
0x3009   :  { %7059 = vadd.xlane.f32.xlu1 %v7058_v46 }
0x3016   :  { %v6497_v10 = vpop.xlane.xlu1 %6496 }
0x3018   :  { %v6494_v33 = vpop.xlane.xlu0 %6493 }
0x3019   :  { %13602 = vrcp.f32 %v6494_v33 }
0x301a   :  { %7065 = vrot.lane.b32.xlu1 %v15545_v25, %s14277_s19  ;;  %13604 = vrcp.f32 %v6497_v10 }
0x301b   :  { %6503 = vrot.lane.b32.xlu0 %v15545_v25, %s14276_s11 }
0x301e   :  { %7402 = vrot.lane.b32.xlu1 %v15614_v62, %s14276_s11 }
0x301f   :  { %7400 = vrot.lane.b32.xlu0 %v15618_v35, %s14276_s11 }
0x3022   :  { %7398 = vrot.lane.b32.xlu1 %v15626_v59, %s14276_s11 }
0x3026   :  { %v13603_v25 = vpop.eup %13602 }
0x3027   :  { %v6500_v6 = vmul.f32 %v13603_v25, %v13597_v8  ;;  %v13605_v60 = vpop.eup %13604  ;;  %v15685_v8 = vld [vmem:[#allocation13 + $0x70] sm:$0xff]  }
0x3028   :  { %v6501_v28 = vmul.f32 %v13605_v60, %v13595_v36  ;;  %v15676_v36 = vld [vmem:[#allocation13 + $0x78] sm:$0xff]  }
0x3029   :  { %12705 = vmatprep.mubr.msk.f32.mxu0 %vm844_vm10, %v6500_v6 }
0x308e   :  { %v7057_v37 = vpop.xlane.xlu0 %7056 }
0x308f   :  { %13606 = vrcp.f32 %v7057_v37 }
0x3092   :  { %v6504_v52 = vpop.permute.xlu0 %6503  ;;  %v7060_v48 = vpop.xlane.xlu1 %7059 }
0x3093   :  { %13608 = vrcp.f32 %v7060_v48  ;;  %12703 = vmatprep.subr.mxu0 %v6504_v52 }
0x3094   :  { %12704 = vmatpush3.msra.mxu0 %v6504_v52 }
0x3095   :  { %12706 = vmatmul.mubr.msk.f32.vlgmr.msra.gmra.mxu0 %vm844_vm10, %v6501_v28  ;;  %12708 = vmatprep.subr.bf16.mxu0 %v14273_v19 }
0x3096   :  { %v7066_v40 = vpop.permute.xlu1 %7065  ;;  %12709 = vmatpush3.bf16.msra.mxu0 %v15631_v15  ;;  %12712 = vmatprep.mubr.msk.bf16.mxu0 %vm14275_vm0, %v14273_v19 }
0x3097   :  { %12747 = vmatprep.subr.mxu1 %v7066_v40  ;;  %12710 = vmatprep.subr.bf16.mxu0 %v14273_v19 }
0x3098   :  { %12748 = vmatpush3.msra.mxu1 %v7066_v40 }
0x3099   :  { %12760 = vmatprep.subr.msk.mxu1 %vm757_vm9, %v15614_v62 }
0x309a   :  { %12711 = vmatpush3.bf16.msra.mxu0 %v13207_v20  ;;  %v7403_v27 = vpop.permute.xlu1 %7402 }
0x309b   :  { %12716 = vmatprep.subr.bf16.mxu0 %v14273_v19 }
0x309c   :  { %v13607_v23 = vpop.eup %13606 }
0x309d   :  { %v7063_v58 = vmul.f32 %v13607_v23, %v13599_v3 }
0x309e   :  { %v7399_v11 = vpop.permute.xlu1 %7398 }
0x309f   :  { %12749 = vmatprep.mubr.msk.f32.mxu1 %vm844_vm10, %v7063_v58 }
0x30a0   :  { %v13609_v18 = vpop.eup %13608 }
0x30a1   :  { %v7064_v54 = vmul.f32 %v13609_v18, %v13601_v44 }
0x30a3   :  { %12750 = vmatmul.mubr.msk.f32.vlgmr.msra.gmra.mxu1 %vm844_vm10, %v7064_v54 }
0x30a4   :  { %12761 = vmatpush3.xpose.msk.msra.mxu1 %vm757_vm9, %v15614_v62  ;;  %12762 = vmatprep.mubr.msk.f32.mxu1 %vm757_vm9, %v15626_v59 }
0x30a5   :  { %12765 = vmatprep.subr.mxu1 %v15548_v57 }
0x30a7   :  { %12763 = vmatmul.mubr.msk.f32.vlgmr.msra.gmra.mxu1 %vm757_vm9, %v15618_v35 }
0x30a8   :  { %12766 = vmatpush3.msra.mxu1 %v15548_v57 }
0x3155   :  { %v12707_v49 = vpop.f32.mrf.mxu0 }
0x3157   :  { %v6578_v56 = vpop.f32.mrf.mxu0 }
0x3158   :  { %v6587_v13 = vpack.c.bf16 %v12707_v49, %v6578_v56 }
0x315a   :  { %12713 = vmatmul.mubr.msk.bf16.vlgmr.msra.gmra.mxu0 %vm757_vm9, %v6587_v13 }
0x315b   :  { %12717 = vmatpush3.bf16.msra.mxu0 %v15652_v4  ;;  %12720 = vmatprep.mubr.msk.bf16.mxu0 %vm14275_vm0, %v14273_v19 }
0x315c   :  { %12718 = vmatprep.subr.bf16.mxu0 %v14273_v19 }
0x315f   :  { %12719 = vmatpush3.bf16.msra.mxu0 %v15656_v21 }
0x3160   :  { %12734 = vmatprep.subr.bf16.mxu0 %v14273_v19 }
0x3162   :  { %12721 = vmatmul.mubr.msk.bf16.vlgmr.msra.gmra.mxu0 %vm757_vm9, %v6390_v42 }
0x3163   :  { %12735 = vmatpush3.bf16.msra.mxu0 %v15662_v17  ;;  %v12751_v45 = vpop.f32.mrf.mxu1  ;;  %12738 = vmatprep.mubr.msk.bf16.mxu0 %vm14275_vm0, %v14273_v19 }
0x3164   :  { %12736 = vmatprep.subr.bf16.mxu0 %v14273_v19 }
0x3165   :  { %v7140_v5 = vpop.f32.mrf.mxu1 }
0x3166   :  { %v7149_v12 = vpack.c.bf16 %v12751_v45, %v7140_v5 }
0x3167   :  { %12737 = vmatpush3.bf16.msra.mxu0 %v15670_v14  ;;  %v12764_v7 = vpop.f32.mrf.mxu1 }
0x3168   :  { %v7293_v53 = vmul.f32 0.17677669, %v12764_v7  ;;  %12752 = vmatprep.subr.bf16.mxu0 %v14273_v19 }
0x3169   :  { %v7283_v16 = vpop.f32.mrf.mxu1 }
0x316a   :  { %v7292_v0 = vmul.f32 0.17677669, %v7283_v16  ;;  %12739 = vmatmul.mubr.msk.bf16.vlgmr.msra.gmra.mxu0 %vm757_vm9, %v6895_v22  ;;  %v7297_v42 = vsel %vm844_vm10, %v7293_v53, -inf  ;;  %v7401_v22 = vpop.permute.xlu0 %7400 }
0x316b   :  { %12753 = vmatpush3.bf16.msra.mxu0 %v15676_v36  ;;  %7298 = vmax.xlane.f32.xlu0 %v7297_v42 }
0x316c   :  { %12754 = vmatprep.subr.bf16.mxu0 %v14273_v19  ;;  %v7294_v26 = vsel %vm844_vm10, %v7292_v0, -inf  ;;  %12756 = vmatprep.mubr.msk.bf16.mxu0 %vm14275_vm0, %v14273_v19 }
0x316d   :  { %7295 = vmax.xlane.f32.xlu1 %v7294_v26 }
0x316f   :  { %12755 = vmatpush3.bf16.msra.mxu0 %v15685_v8 }
0x3170   :  { %12770 = vmatprep.subr.msk.mxu0 %vm757_vm9, %v7403_v27 }
0x3172   :  { %12757 = vmatmul.mubr.msk.bf16.vlgmr.msra.gmra.mxu0 %vm757_vm9, %v7149_v12 }
0x3173   :  { %12771 = vmatpush3.xpose.msk.msra.mxu0 %vm757_vm9, %v7403_v27  ;;  %12772 = vmatprep.mubr.msk.f32.mxu0 %vm757_vm9, %v7399_v11 }
0x3174   :  { %12780 = vmatprep.subr.bf16.mxu0 %v14273_v19 }
0x317a   :  { %12773 = vmatmul.mubr.msk.f32.vlgmr.msra.gmra.mxu0 %vm757_vm9, %v7401_v22 }
0x317b   :  { %12781 = vmatpush3.bf16.msra.mxu0 %v15631_v15  ;;  %12784 = vmatprep.mubr.msk.bf16.mxu0 %vm14275_vm0, %v14273_v19 }
0x317c   :  { %12782 = vmatprep.subr.bf16.mxu0 %v14273_v19 }
0x317f   :  { %12783 = vmatpush3.bf16.msra.mxu0 %v13207_v20 }
0x31f4   :  { %v7299_v15 = vpop.xlane.xlu0 %7298 }
0x31f5   :  { %v7301_v23 = vsub.f32 %v7293_v53, %v7299_v15 }
0x31f6   :  { %v7296_v43 = vpop.xlane.xlu1 %7295 }
0x31f7   :  { %v7300_v2 = vsub.f32 %v7292_v0, %v7296_v43  ;;  %v7304_v20 = vmul.f32 1.442695, %v7301_v23 }
0x31f9   :  { %v7302_v41 = vmul.f32 1.442695, %v7300_v2 }
0x31fb   :  { %13610 = vpow2.f32 %v7302_v41 }
0x31fc   :  { %13612 = vpow2.f32 %v7304_v20 }
0x3208   :  { %v13611_v32 = vpop.eup %13610 }
0x3209   :  { %v7306_v29 = vsel %vm844_vm10, %v13611_v32, 0.0  ;;  %v13613_v26 = vpop.eup %13612 }
0x320a   :  { %7307 = vadd.xlane.f32.xlu1 %v7306_v29  ;;  %v7309_v12 = vsel %vm844_vm10, %v13613_v26, 0.0 }
0x321a   :  { %v6637_v3 = vpop.f32.mrf.mxu0 }
0x321c   :  { %v12714_v34 = vpop.f32.mrf.mxu0 }
0x321e   :  { %v6640_v44 = vpop.f32.mrf.mxu0 }
0x3220   :  { %v12715_v46 = vpop.f32.mrf.mxu0 }
0x3222   :  { %v6693_v33 = vpop.f32.mrf.mxu0 }
0x3223   :  { %v6694_v25 = vadd.f32 %v6693_v33, %v6637_v3 }
0x3224   :  { %v12722_v6 = vpop.f32.mrf.mxu0 }
0x3226   :  { %v6696_v10 = vpop.f32.mrf.mxu0 }
0x3227   :  { %v6697_v37 = vadd.f32 %v6696_v10, %v6640_v44 }
0x3228   :  { %v12723_v60 = vpop.f32.mrf.mxu0 }
0x322a   :  { %v6945_v52 = vpop.f32.mrf.mxu0 }
0x322b   :  { %v6952_v48 = vadd.f32 %v6945_v52, %v6694_v25 }
0x322c   :  { %v12740_v28 = vpop.f32.mrf.mxu0 }
0x322e   :  { %v6948_v40 = vpop.f32.mrf.mxu0 }
0x322f   :  { %v6953_v58 = vadd.f32 %v6948_v40, %v6697_v37 }
0x3230   :  { %v12741_v18 = vpop.f32.mrf.mxu0 }
0x3232   :  { %v7199_v54 = vpop.f32.mrf.mxu0 }
0x3233   :  { %v15703_v49 = vadd.f32 %v7199_v54, %v6952_v48 }
0x3234   :  { %v12758_v56 = vpop.f32.mrf.mxu0 }
0x3236   :  { %v7202_v13 = vpop.f32.mrf.mxu0 }
0x3237   :  { %v15705_v45 = vadd.f32 %v7202_v13, %v6953_v58 }
0x3238   :  { %v12759_v5 = vpop.f32.mrf.mxu0 }
0x323a   :  { %v12774_v7 = vpop.f32.mrf.mxu0 }
0x323b   :  { %v7486_v42 = vmul.f32 0.17677669, %v12774_v7 }
0x323c   :  { %v7476_v16 = vpop.f32.mrf.mxu0 }
0x323d   :  { %v7485_v0 = vmul.f32 0.17677669, %v7476_v16  ;;  %v7490_v53 = vsel %vm844_vm10, %v7486_v42, -inf }
0x323f   :  { %v7487_v27 = vsel %vm844_vm10, %v7485_v0, -inf }
0x3240   :  { %7488 = vmax.xlane.f32.xlu0 %v7487_v27 }
0x3244   :  { %7491 = vmax.xlane.f32.xlu0 %v7490_v53 }
0x3248   :  { %7310 = vadd.xlane.f32.xlu0 %v7309_v12 }
0x3293   :  { %v7308_v11 = vpop.xlane.xlu1 %7307 }
0x3294   :  { %13614 = vrcp.f32 %v7308_v11 }
0x32a1   :  { %v13615_v22 = vpop.eup %13614 }
0x32a2   :  { %v7314_v43 = vmul.f32 %v13615_v22, %v13611_v32 }
0x32a4   :  { %12767 = vmatprep.mubr.msk.f32.mxu1 %vm844_vm10, %v7314_v43 }
0x32c9   :  { %v7489_v2 = vpop.xlane.xlu0 %7488 }
0x32ca   :  { %v7493_v41 = vsub.f32 %v7485_v0, %v7489_v2 }
0x32cc   :  { %v7495_v29 = vmul.f32 1.442695, %v7493_v41 }
0x32cd   :  { %v7492_v3 = vpop.xlane.xlu0 %7491 }
0x32ce   :  { %13616 = vpow2.f32 %v7495_v29  ;;  %v7494_v34 = vsub.f32 %v7486_v42, %v7492_v3 }
0x32d0   :  { %v7497_v44 = vmul.f32 1.442695, %v7494_v34 }
0x32d1   :  { %v7311_v46 = vpop.xlane.xlu0 %7310 }
0x32d2   :  { %13618 = vpow2.f32 %v7497_v44 }
0x32d3   :  { %13620 = vrcp.f32 %v7311_v46 }
0x32db   :  { %v13617_v33 = vpop.eup %13616 }
0x32dc   :  { %v7499_v25 = vsel %vm844_vm10, %v13617_v33, 0.0 }
0x32dd   :  { %7500 = vadd.xlane.f32.xlu1 %v7499_v25 }
0x32df   :  { %v13619_v6 = vpop.eup %13618 }
0x32e0   :  { %v13621_v10 = vpop.eup %13620  ;;  %v7502_v32 = vsel %vm844_vm10, %v13619_v6, 0.0 }
0x32e1   :  { %v7315_v37 = vmul.f32 %v13621_v10, %v13613_v26  ;;  %7503 = vadd.xlane.f32.xlu0 %v7502_v32 }
0x32e3   :  { %12768 = vmatmul.mubr.msk.f32.vlgmr.msra.gmra.mxu1 %vm844_vm10, %v7315_v37 }
0x32ee   :  { %7510 = vrot.lane.b32.xlu1 %v15548_v57, %s14276_s11 }
0x32f2   :  { %7683 = vrot.lane.b32.xlu1 %v15626_v59, %s14257_s0 }
0x32f6   :  { %7685 = vrot.lane.b32.xlu1 %v15618_v35, %s14257_s0 }
0x32f7   :  { %7687 = vrot.lane.b32.xlu0 %v15614_v62, %s14257_s0 }
0x3366   :  { %v7501_v60 = vpop.xlane.xlu1 %7500 }
0x3367   :  { %13622 = vrcp.f32 %v7501_v60 }
0x336a   :  { %v7504_v52 = vpop.xlane.xlu0 %7503  ;;  %v7511_v48 = vpop.permute.xlu1 %7510 }
0x336b   :  { %13624 = vrcp.f32 %v7504_v52  ;;  %12775 = vmatprep.subr.mxu1 %v7511_v48 }
0x336c   :  { %12776 = vmatpush3.msra.mxu1 %v7511_v48 }
0x336d   :  { %12788 = vmatprep.subr.bf16.mxu1 %v14273_v19 }
0x336e   :  { %v7688_v15 = vpop.permute.xlu0 %7687  ;;  %v7684_v7 = vpop.permute.xlu1 %7683 }
0x336f   :  { %12796 = vmatprep.subr.msk.mxu0 %vm757_vm9, %v7688_v15 }
0x3374   :  { %v13623_v28 = vpop.eup %13622 }
0x3375   :  { %v7507_v40 = vmul.f32 %v13623_v28, %v13617_v33 }
0x3377   :  { %12777 = vmatprep.mubr.msk.f32.mxu1 %vm844_vm10, %v7507_v40 }
0x3378   :  { %v13625_v23 = vpop.eup %13624 }
0x3379   :  { %v7508_v58 = vmul.f32 %v13625_v23, %v13619_v6 }
0x337b   :  { %12778 = vmatmul.mubr.msk.f32.vlgmr.msra.gmra.mxu1 %vm844_vm10, %v7508_v58 }
0x337c   :  { %12789 = vmatpush3.bf16.msra.mxu1 %v15652_v4  ;;  %12792 = vmatprep.mubr.msk.bf16.mxu1 %vm14275_vm0, %v14273_v19  ;;  %v7686_v4 = vpop.permute.xlu1 %7685 }
0x337d   :  { %12790 = vmatprep.subr.bf16.mxu1 %v14273_v19 }
0x3380   :  { %12791 = vmatpush3.bf16.msra.mxu1 %v15656_v21 }
0x33a3   :  { %v12769_v18 = vpop.f32.mrf.mxu1 }
0x33a5   :  { %v7388_v54 = vpop.f32.mrf.mxu1 }
0x33a6   :  { %v7397_v20 = vpack.c.bf16 %v12769_v18, %v7388_v54 }
0x33a8   :  { %12793 = vmatmul.mubr.msk.bf16.vlgmr.msra.gmra.mxu1 %vm757_vm9, %v7397_v20 }
0x343b   :  { %v12779_v56 = vpop.f32.mrf.mxu1 }
0x343d   :  { %v7585_v13 = vpop.f32.mrf.mxu1 }
0x343e   :  { %v7594_v5 = vpack.c.bf16 %v12779_v56, %v7585_v13 }
0x3440   :  { %12785 = vmatmul.mubr.msk.bf16.vlgmr.msra.gmra.mxu0 %vm757_vm9, %v7594_v5 }
0x3441   :  { %12797 = vmatpush3.xpose.msk.msra.mxu0 %vm757_vm9, %v7688_v15  ;;  %12798 = vmatprep.mubr.msk.f32.mxu0 %vm757_vm9, %v7684_v7 }
0x3442   :  { %12806 = vmatprep.subr.bf16.mxu0 %v14273_v19 }
0x3448   :  { %12799 = vmatmul.mubr.msk.f32.vlgmr.msra.gmra.mxu0 %vm757_vm9, %v7686_v4 }
0x3449   :  { %12807 = vmatpush3.bf16.msra.mxu0 %v15662_v17  ;;  %12810 = vmatprep.mubr.msk.bf16.mxu0 %vm14275_vm0, %v14273_v19 }
0x344a   :  { %12808 = vmatprep.subr.bf16.mxu0 %v14273_v19 }
0x344d   :  { %12809 = vmatpush3.bf16.msra.mxu0 %v15670_v14 }
0x344e   :  { %12824 = vmatprep.subr.bf16.mxu0 %v14273_v19 }
0x3468   :  { %v15743_v21 = vpop.f32.mrf.mxu1 }
0x346a   :  { %v12794_v16 = vpop.f32.mrf.mxu1 }
0x346c   :  { %v15745_v0 = vpop.f32.mrf.mxu1 }
0x346e   :  { %v12795_v42 = vpop.f32.mrf.mxu1 }
0x3500   :  { %v15747_v27 = vpop.f32.mrf.mxu0 }
0x3502   :  { %v12786_v53 = vpop.f32.mrf.mxu0 }
0x3504   :  { %v15749_v26 = vpop.f32.mrf.mxu0 }
0x3506   :  { %v12787_v17 = vpop.f32.mrf.mxu0 }
0x3508   :  { %v12800_v12 = vpop.f32.mrf.mxu0 }
0x3509   :  { %v7771_v11 = vmul.f32 0.17677669, %v12800_v12  ;;  %v15779_v12 = vld [vmem:[#allocation14 + $0x1] ss:$0 sm:$0xff] }
0x350a   :  { %v7761_v22 = vpop.f32.mrf.mxu0 }
0x350b   :  { %v7770_v43 = vmul.f32 0.17677669, %v7761_v22  ;;  %v7775_v14 = vsel %vm844_vm10, %v7771_v11, -inf }
0x350c   :  { %7776 = vmax.xlane.f32.xlu0 %v7775_v14 }
0x350d   :  { %v7772_v2 = vsel %vm844_vm10, %v7770_v43, -inf }
0x350e   :  { %7773 = vmax.xlane.f32.xlu1 %v7772_v2 }
0x351f   :  { %7794 = vrot.lane.b32.xlu1 %v15548_v57, %s14257_s0 }
0x3523   :  { %7925 = vrot.lane.b32.xlu1 %v15626_v59, %s14277_s19 }
0x3527   :  { %7927 = vrot.lane.b32.xlu1 %v15618_v35, %s14277_s19 }
0x3595   :  { %v7777_v41 = vpop.xlane.xlu0 %7776 }
0x3596   :  { %v7779_v29 = vsub.f32 %v7771_v11, %v7777_v41  ;;  %v8175_v11 = vadd.f32 %v15779_v12, %v15703_v49 }
0x3597   :  { %v7774_v3 = vpop.xlane.xlu1 %7773 }
0x3598   :  { %v7782_v34 = vmul.f32 1.442695, %v7779_v29  ;;  %v7778_v44 = vsub.f32 %v7770_v43, %v7774_v3 }
0x359a   :  { %13626 = vpow2.f32 %v7782_v34  ;;  %v7780_v46 = vmul.f32 1.442695, %v7778_v44  ;;  %v7677_v34 = vadd.f32 %v15743_v21, %v15747_v27 }
0x359b   :  { %v7795_v33 = vpop.permute.xlu1 %7794 }
0x359c   :  { %13628 = vpow2.f32 %v7780_v46  ;;  %12801 = vmatprep.subr.mxu1 %v7795_v33 }
0x359d   :  { %12802 = vmatpush3.msra.mxu1 %v7795_v33  ;;  %v13216_v33 = vld [vmem:[#allocation17 + $0x16c] ss:$12 sps:$4 sm:$0xff]  }
0x359f   :  { %v7926_v48 = vpop.permute.xlu1 %7925 }
0x35a7   :  { %v13627_v25 = vpop.eup %13626 }
0x35a8   :  { %v7787_v6 = vsel %vm844_vm10, %v13627_v25, 0.0 }
0x35a9   :  { %v13629_v10 = vpop.eup %13628  ;;  %7788 = vadd.xlane.f32.xlu0 %v7787_v6  ;;  %v7680_v6 = vadd.f32 %v15745_v0, %v15749_v26  ;;  %v13219_v26 = vld [vmem:[#allocation17 + $0x154] ss:$12 sps:$4 sm:$0xff]  }
0x35aa   :  { %v7784_v59 = vsel %vm844_vm10, %v13629_v10, 0.0 }
0x35ad   :  { %7785 = vadd.xlane.f32.xlu0 %v7784_v59 }
0x35c3   :  { %7929 = vrot.lane.b32.xlu0 %v15614_v62, %s14277_s19  ;;  %v7928_v62 = vpop.permute.xlu1 %7927 }
0x3632   :  { %v7789_v35 = vpop.xlane.xlu0 %7788 }
0x3633   :  { %13630 = vrcp.f32 %v7789_v35 }
0x3636   :  { %v7786_v32 = vpop.xlane.xlu0 %7785 }
0x3637   :  { %13632 = vrcp.f32 %v7786_v32 }
0x363a   :  { %v7930_v37 = vpop.permute.xlu0 %7929 }
0x363b   :  { %12814 = vmatprep.subr.msk.mxu1 %vm757_vm9, %v7930_v37 }
0x3640   :  { %v13631_v60 = vpop.eup %13630 }
0x3641   :  { %v7793_v28 = vmul.f32 %v13631_v60, %v13627_v25 }
0x3644   :  { %v13633_v52 = vpop.eup %13632 }
0x3645   :  { %v7792_v15 = vmul.f32 %v13633_v52, %v13629_v10 }
0x3647   :  { %12803 = vmatprep.mubr.msk.f32.mxu1 %vm844_vm10, %v7792_v15  ;;  %v13214_v15 = vld [vmem:[#allocation17 + $0x168] ss:$12 sps:$4 sm:$0xff]  }
0x3648   :  { %12804 = vmatmul.mubr.msk.f32.vlgmr.msra.gmra.mxu1 %vm844_vm10, %v7793_v28 }
0x3649   :  { %12815 = vmatpush3.xpose.msk.msra.mxu1 %vm757_vm9, %v7930_v37  ;;  %12816 = vmatprep.mubr.msk.f32.mxu1 %vm757_vm9, %v7926_v48 }
0x364c   :  { %12817 = vmatmul.mubr.msk.f32.vlgmr.msra.gmra.mxu1 %vm757_vm9, %v7928_v62  ;;  %v13217_v62 = vld [vmem:[#allocation17 + $0x150] ss:$12 sps:$4 sm:$0xff]  }
0x3708   :  { %v12805_v40 = vpop.f32.mrf.mxu1 }
0x370a   :  { %v7869_v23 = vpop.f32.mrf.mxu1 }
0x370b   :  { %v7878_v58 = vpack.c.bf16 %v12805_v40, %v7869_v23  ;;  %v13222_v23 = vld [vmem:[#allocation17 + $0x13c] ss:$12 sps:$4 sm:$0xff]  }
0x370c   :  { %v12818_v18 = vpop.f32.mrf.mxu1 }
0x370d   :  { %v8013_v54 = vmul.f32 0.17677669, %v12818_v18  ;;  %12811 = vmatmul.mubr.msk.bf16.vlgmr.msra.gmra.mxu0 %vm757_vm9, %v7878_v58 }
0x370e   :  { %v8003_v20 = vpop.f32.mrf.mxu1  ;;  %12825 = vmatpush3.bf16.msra.mxu0 %v15676_v36  ;;  %12828 = vmatprep.mubr.msk.bf16.mxu0 %vm14275_vm0, %v14273_v19 }
0x370f   :  { %v8012_v56 = vmul.f32 0.17677669, %v8003_v20  ;;  %v8017_v13 = vsel %vm844_vm10, %v8013_v54, -inf  ;;  %12826 = vmatprep.subr.bf16.mxu0 %v14273_v19 }
0x3710   :  { %8018 = vmax.xlane.f32.xlu0 %v8017_v13 }
0x3711   :  { %v8014_v5 = vsel %vm844_vm10, %v8012_v56, -inf }
0x3712   :  { %8015 = vmax.xlane.f32.xlu1 %v8014_v5  ;;  %12827 = vmatpush3.bf16.msra.mxu0 %v15685_v8  ;;  %v15784_v8 = vadd.f32 %v8175_v11, %v15457_v55  ;;  %v13228_v11 = vld [vmem:[#allocation17 + $0x10c] ss:$12 sps:$4 sm:$0xff]  }
0x3714   :  { %v15792_v14 = vadd.f32 1e-06, %v15784_v8 }
0x3716   :  { %v8189_v29 = vadd.f32 1e-06, %v15792_v14 }
0x3723   :  { %8036 = vrot.lane.b32.xlu1 %v15548_v57, %s14277_s19  ;;  %v8176_v57 = vadd.f32 %v15779_v12, %v15705_v45  ;;  %v8193_v45 = vmul.f32 %v8189_v29, %v8189_v29  ;;  %v13234_v29 = vld [vmem:[#allocation17 + $0xdc] ss:$12 sps:$4 sm:$0xff]  }
0x3725   :  { %v15789_v43 = vadd.f32 %v8176_v57, %v15464_v51 }
0x3727   :  { %v15797_v49 = vadd.f32 1e-06, %v15789_v43 }
0x3729   :  { %v8190_v3 = vadd.f32 1e-06, %v15797_v49 }
0x372b   :  { %v8194_v51 = vmul.f32 %v8190_v3, %v8190_v3 }
0x3799   :  { %v8019_v7 = vpop.xlane.xlu0 %8018 }
0x379a   :  { %v8021_v4 = vsub.f32 %v8013_v54, %v8019_v7  ;;  %v13225_v7 = vld [vmem:[#allocation17 + $0x124] ss:$12 sps:$4 sm:$0xff]  }
0x379b   :  { %v8016_v36 = vpop.xlane.xlu1 %8015 }
0x379c   :  { %v8020_v16 = vsub.f32 %v8012_v56, %v8016_v36  ;;  %v8024_v42 = vmul.f32 1.442695, %v8021_v4  ;;  %v13220_v56 = vld [vmem:[#allocation17 + $0x138] ss:$12 sps:$4 sm:$0xff]  }
0x379e   :  { %v8022_v53 = vmul.f32 1.442695, %v8020_v16 }
0x379f   :  { %v8037_v17 = vpop.permute.xlu1 %8036 }
0x37a0   :  { %13634 = vpow2.f32 %v8022_v53  ;;  %12819 = vmatprep.subr.mxu1 %v8037_v17  ;;  %v13223_v53 = vld [vmem:[#allocation17 + $0x120] ss:$12 sps:$4 sm:$0xff]  }
0x37a1   :  { %12820 = vmatpush3.msra.mxu1 %v8037_v17  ;;  %13636 = vpow2.f32 %v8024_v42 }
0x37a2   :  { %8440 = vmatprep.subr.bf16.mxu1 %v13216_v33  ;;  %v15813_v33 = vld [vmem:[#allocation16 + $0x1] ss:$0 sm:$0xff] }
0x37ad   :  { %v13635_v22 = vpop.eup %13634 }
0x37ae   :  { %v8026_v2 = vsel %vm844_vm10, %v13635_v22, 0.0  ;;  %v13637_v41 = vpop.eup %13636 }
0x37af   :  { %8027 = vadd.xlane.f32.xlu0 %v8026_v2  ;;  %v8029_v55 = vsel %vm844_vm10, %v13637_v41, 0.0  ;;  %v13231_v2 = vld [vmem:[#allocation17 + $0xf4] ss:$12 sps:$4 sm:$0xff]  }
0x37b3   :  { %8030 = vadd.xlane.f32.xlu0 %v8029_v55  ;;  %v13232_v55 = vld [vmem:[#allocation17 + $0xd8] ss:$12 sps:$4 sm:$0xff]  }
0x37b7   :  { %8197 = vadd.xlane.f32.xlu0 %v8193_v45  ;;  %v13237_v45 = vld [vmem:[#allocation17 + $0xc4] ss:$12 sps:$4 sm:$0xff]  }
0x37bb   :  { %8199 = vadd.xlane.f32.xlu0 %v8194_v51  ;;  %v13235_v51 = vld [vmem:[#allocation17 + $0xc0] ss:$12 sps:$4 sm:$0xff]  }
0x37cd   :  { %v7916_v44 = vpop.f32.mrf.mxu0 }
0x37ce   :  { %v15803_v46 = vadd.f32 %v7916_v44, %v7677_v34 }
0x37cf   :  { %v12812_v25 = vpop.f32.mrf.mxu0 }
0x37d1   :  { %v7919_v10 = vpop.f32.mrf.mxu0 }
0x37d2   :  { %v15807_v59 = vadd.f32 %v7919_v10, %v7680_v6 }
0x37d3   :  { %v12813_v35 = vpop.f32.mrf.mxu0 }
0x3838   :  { %v8028_v32 = vpop.xlane.xlu0 %8027 }
0x3839   :  { %13638 = vrcp.f32 %v8028_v32  ;;  %v13238_v32 = vld [vmem:[#allocation17 + $0x170] ss:$12 sps:$4 sm:$0xff]  }
0x383a   :  { %12832 = vmatprep.subr.bf16.mxu0 %v13238_v32 }
0x383c   :  { %v8031_v37 = vpop.xlane.xlu0 %8030 }
0x383d   :  { %13640 = vrcp.f32 %v8031_v37 }
0x3840   :  { %v8198_v60 = vpop.xlane.xlu0 %8197 }
0x3841   :  { %13642 = vrsqrt.f32 %v8198_v60  ;;  %vm8207_vm3 = vcmp.eq.f32.partialorder %v8198_v60, inf  ;;  %v8210_v58 = vand.u32 2147483648, %v8198_v60  ;;  %vm8209_vm4 = vcmp.eq.f32.partialorder %v8198_v60, 0.0 }
0x3844   :  { %v8200_v21 = vpop.xlane.xlu0 %8199 }
0x3845   :  { %13644 = vrsqrt.f32 %v8200_v21  ;;  %v8217_v4 = vand.u32 2147483648, %v8200_v21  ;;  %vm8216_vm8 = vcmp.eq.f32.partialorder %v8200_v21, 0.0 }
0x3846   :  { %v13639_v27 = vpop.eup %13638 }
0x3847   :  { %v8034_v52 = vmul.f32 %v13639_v27, %v13635_v22  ;;  %v13226_v22 = vld [vmem:[#allocation17 + $0x108] ss:$12 sps:$4 sm:$0xff]  }
0x3848   :  { %v13241_v27 = vld [vmem:[#allocation17 + $0x128] ss:$12 sps:$4 sm:$0xff]  }
0x3849   :  { %12821 = vmatprep.mubr.msk.f32.mxu1 %vm844_vm10, %v8034_v52  ;;  %v13242_v52 = vld [vmem:[#allocation17 + $0x110] ss:$12 sps:$4 sm:$0xff]  }
0x384a   :  { %v13641_v48 = vpop.eup %13640 }
0x384b   :  { %v8035_v0 = vmul.f32 %v13641_v48, %v13637_v41  ;;  %v13229_v41 = vld [vmem:[#allocation17 + $0xf0] ss:$12 sps:$4 sm:$0xff]   ;;  %v13243_v48 = vld [vmem:[#allocation17 + $0xf8] ss:$12 sps:$4 sm:$0xff]  }
0x384d   :  { %12822 = vmatmul.mubr.msk.f32.vlgmr.msra.gmra.mxu1 %vm844_vm10, %v8035_v0  ;;  %vm8214_vm10 = vcmp.eq.f32.partialorder %v8200_v21, inf  ;;  %v15820_v0 = vld [vmem:[#allocation19 + $0x3] sm:$0x7] }
0x384e   :  { %v13643_v28 = vpop.eup %13642  ;;  %8441 = vmatpush1.bf16.msra.mxu1 %v13214_v15  ;;  %8472 = vmatprep.mubr.bf16.mxu1 %v14274_v38  ;;  %v13244_v15 = vld [vmem:[#allocation17 + $0xe0] ss:$12 sps:$4 sm:$0xff]  }
0x384f   :  { %v8206_v40 = vmul.f32 %v13643_v28, %v8198_v60  ;;  %8442 = vmatprep.subr.bf16.mxu1 %v13219_v26  ;;  %v13245_v26 = vld [vmem:[#allocation17 + $0xc8] ss:$12 sps:$4 sm:$0xff]   ;;  %v15824_v28 = vrot.slane %v15820_v0, %v14584_v50 }
0x3851   :  { %v8208_v18 = vsel %vm8207_vm3, %v8198_v60, %v8206_v40 }
0x3852   :  { %v13645_v54 = vpop.eup %13644  ;;  %v8211_v20 = vsel %vm8209_vm4, %v8210_v58, %v8208_v18  ;;  %8443 = vmatpush1.bf16.msra.mxu1 %v13217_v62 }
0x3853   :  { %v8233_v13 = vmul.f32 11.313708, %v8211_v20  ;;  %v8213_v5 = vmul.f32 %v13645_v54, %v8200_v21  ;;  %8444 = vmatprep.subr.bf16.mxu1 %v13222_v23 }
0x3855   :  { %v8237_v36 = vadd.f32 1e-06, %v8233_v13  ;;  %v8215_v16 = vsel %vm8214_vm10, %v8200_v21, %v8213_v5 }
0x3856   :  { %v8218_v42 = vsel %vm8216_vm8, %v8217_v4, %v8215_v16  ;;  %8445 = vmatpush1.bf16.msra.mxu1 %v13220_v56 }
0x3857   :  { %13646 = vrcp.f32 %v8237_v36  ;;  %v8234_v17 = vmul.f32 11.313708, %v8218_v42  ;;  %8446 = vmatprep.subr.bf16.mxu1 %v13225_v7  ;;  %v13790_v7 = vld [vmem:[#allocation5 + $0x8] sm:$0xff] }
0x3858   :  { %v15833_v36 = vld [vmem:[#allocation7 + $0x8] sm:$0xff] }
0x3859   :  { %v8238_v57 = vadd.f32 1e-06, %v8234_v17 }
0x385a   :  { %8447 = vmatpush1.bf16.msra.mxu1 %v13223_v53 }
0x385b   :  { %13648 = vrcp.f32 %v8238_v57  ;;  %8448 = vmatprep.subr.bf16.mxu1 %v13228_v11 }
0x385e   :  { %8449 = vmatpush1.bf16.msra.mxu1 %v13226_v22 }
0x385f   :  { %8450 = vmatprep.subr.bf16.mxu1 %v13231_v2 }
0x3862   :  { %8451 = vmatpush1.bf16.msra.mxu1 %v13229_v41 }
0x3863   :  { %8452 = vmatprep.subr.bf16.mxu1 %v13234_v29 }
0x3864   :  { %v13647_v3 = vpop.eup %13646 }
0x3865   :  { %v8245_v34 = vmul.f32 %v13647_v3, %v15792_v14  ;;  %v13239_v14 = vld [vmem:[#allocation17 + $0x158] ss:$12 sps:$4 sm:$0xff]  }
0x3866   :  { %8453 = vmatpush1.bf16.msra.mxu1 %v13232_v55 }
0x3867   :  { %8454 = vmatprep.subr.bf16.mxu1 %v13237_v45  ;;  %v8255_v6 = vmul.f32 %v15813_v33, %v8245_v34 }
0x3868   :  { %v13649_v44 = vpop.eup %13648 }
0x3869   :  { %v8246_v25 = vmul.f32 %v13649_v44, %v15797_v49  ;;  %v13240_v49 = vld [vmem:[#allocation17 + $0x140] ss:$12 sps:$4 sm:$0xff]  }
0x386a   :  { %8455 = vmatpush1.bf16.msra.mxu1 %v13235_v51 }
0x386b   :  { %v8256_v10 = vmul.f32 %v15813_v33, %v8246_v25 }
0x386d   :  { %v8259_v35 = vpack.c.bf16 %v8256_v10, %v8255_v6 }
0x386f   :  { %8473 = vmatmul.mubr.bf16.vlgmr.msra.gmra.mxu1 %v8259_v35 }
0x3870   :  { %8482 = vmatprep.mubr.bf16.mxu1 %v14274_v38 }
0x390d   :  { %v12823_v37 = vpop.f32.mrf.mxu1 }
0x390f   :  { %v8111_v60 = vpop.f32.mrf.mxu1 }
0x3910   :  { %v8120_v21 = vpack.c.bf16 %v12823_v37, %v8111_v60 }
0x3912   :  { %12829 = vmatmul.mubr.msk.bf16.vlgmr.msra.gmra.mxu0 %vm757_vm9, %v8120_v21  ;;  %v13792_v21 = vld [vmem:[#allocation5] sm:$0xff] }
0x3913   :  { %12848 = vmatprep.mubr.bf16.mxu0 %v8259_v35  ;;  %12833 = vmatpush3.bf16.msra.mxu0 %v13238_v32 }
0x3914   :  { %12834 = vmatprep.subr.bf16.mxu0 %v13239_v14 }
0x3917   :  { %12835 = vmatpush3.bf16.msra.mxu0 %v13239_v14 }
0x3918   :  { %12836 = vmatprep.subr.bf16.mxu0 %v13240_v49 }
0x391b   :  { %12837 = vmatpush3.bf16.msra.mxu0 %v13240_v49 }
0x391c   :  { %12838 = vmatprep.subr.bf16.mxu0 %v13241_v27 }
0x391f   :  { %12839 = vmatpush3.bf16.msra.mxu0 %v13241_v27  ;;  %v13793_v27 = vld [vmem:[#allocation7] sm:$0xff] }
0x3920   :  { %12840 = vmatprep.subr.bf16.mxu0 %v13242_v52 }
0x3923   :  { %12841 = vmatpush3.bf16.msra.mxu0 %v13242_v52 }
0x3924   :  { %12842 = vmatprep.subr.bf16.mxu0 %v13243_v48 }
0x3927   :  { %12843 = vmatpush3.bf16.msra.mxu0 %v13243_v48 }
0x3928   :  { %12844 = vmatprep.subr.bf16.mxu0 %v13244_v15 }
0x392b   :  { %12845 = vmatpush3.bf16.msra.mxu0 %v13244_v15 }
0x392c   :  { %12846 = vmatprep.subr.bf16.mxu0 %v13245_v26 }
0x392f   :  { %v8474_v62 = vpop.f32.mrf.mxu1  ;;  %12847 = vmatpush3.bf16.msra.mxu0 %v13245_v26 }
0x3931   :  { %v8476_v40 = vpop.f32.mrf.mxu1 }
0x3932   :  { %v8477_v23 = vadd.f32 %v8476_v40, %v15824_v28 }
0x3933   :  { %v8478_v58 = vpop.f32.mrf.mxu1 }
0x3934   :  { %8574 = vrot.lane.b32.xlu1 %v8477_v23, %s14278_s7  ;;  %v8594_v49 = vmul.f32 %v13792_v21, %v8477_v23 }
0x3935   :  { %v8480_v18 = vpop.f32.mrf.mxu1 }
0x3936   :  { %v8481_v54 = vadd.f32 %v8480_v18, %v15824_v28 }
0x3938   :  { %8576 = vrot.lane.b32.xlu0 %v8481_v54, %s14278_s7  ;;  %8584 = vrot.lane.b32.xlu1 %v8481_v54, %s14246_s25  ;;  %v8595_v4 = vmul.f32 %v13790_v7, %v8481_v54 }
0x39a6   :  { %v8575_v20 = vpop.permute.xlu1 %8574 }
0x39aa   :  { %v8577_v56 = vpop.permute.xlu0 %8576  ;;  %v8585_v13 = vpop.permute.xlu1 %8584 }
0x39ab   :  { %v8591_v5 = vsel %vm14895_vm15, %v8577_v56, %v8585_v13 }
0x39ac   :  { %v8599_v16 = vmul.f32 %v15833_v36, %v8591_v5 }
0x39ae   :  { %v15836_v42 = vadd.f32 %v8599_v16, %v8595_v4 }
0x39b0   :  { %12852 = vmatprep.subr.msk.mxu0 %vm757_vm9, %v15836_v42 }
0x39d2   :  { %v8158_v53 = vpop.f32.mrf.mxu0 }
0x39d3   :  { %v8165_v17 = vadd.f32 %v8158_v53, %v15803_v46 }
0x39d4   :  { %v12830_v11 = vpop.f32.mrf.mxu0 }
0x39d5   :  { %v8177_v57 = vadd.f32 %v15779_v12, %v8165_v17 }
0x39d6   :  { %v8161_v22 = vpop.f32.mrf.mxu0 }
0x39d7   :  { %v15843_v2 = vadd.f32 %v8177_v57, %v15495_v61  ;;  %v8166_v41 = vadd.f32 %v8161_v22, %v15807_v59 }
0x39d8   :  { %v12831_v29 = vpop.f32.mrf.mxu0 }
0x39d9   :  { %v8178_v55 = vadd.f32 %v15779_v12, %v8166_v41  ;;  %v15848_v45 = vadd.f32 1e-06, %v15843_v2  ;;  %v15860_v12 = vrot.slane %v15820_v0, %v14565_v31 }
0x39db   :  { %v15851_v3 = vadd.f32 %v8178_v55, %v15500_v1  ;;  %v8191_v46 = vadd.f32 1e-06, %v15848_v45  ;;  %v8475_v59 = vadd.f32 %v8474_v62, %v15860_v12  ;;  %v8479_v1 = vadd.f32 %v8478_v58, %v15860_v12 }
0x39dd   :  { %v8195_v51 = vmul.f32 %v8191_v46, %v8191_v46  ;;  %v15855_v34 = vadd.f32 1e-06, %v15851_v3  ;;  %v8562_v14 = vmul.f32 %v13792_v21, %v8475_v59  ;;  %v8563_v13 = vmul.f32 %v13790_v7, %v8479_v1 }
0x39df   :  { %8201 = vadd.xlane.f32.xlu1 %v8195_v51  ;;  %v8192_v61 = vadd.f32 1e-06, %v15855_v34 }
0x39e1   :  { %v8196_v44 = vmul.f32 %v8192_v61, %v8192_v61 }
0x39e3   :  { %8203 = vadd.xlane.f32.xlu0 %v8196_v44 }
0x39f0   :  { %8542 = vrot.lane.b32.xlu1 %v8475_v59, %s14278_s7 }
0x39f4   :  { %8550 = vrot.lane.b32.xlu1 %v8475_v59, %s14246_s25 }
0x39f8   :  { %8544 = vrot.lane.b32.xlu1 %v8479_v1, %s14278_s7 }
0x39f9   :  { %8582 = vrot.lane.b32.xlu0 %v8477_v23, %s14246_s25 }
0x39fc   :  { %8552 = vrot.lane.b32.xlu1 %v8479_v1, %s14246_s25 }
0x39fd   :  { %8817 = vrot.lane.b32.xlu0 %v15836_v42, %s14257_s0 }
0x3a68   :  { %v8202_v25 = vpop.xlane.xlu1 %8201 }
0x3a69   :  { %13650 = vrsqrt.f32 %v8202_v25  ;;  %vm8221_vm11 = vcmp.eq.f32.partialorder %v8202_v25, inf  ;;  %v8224_v18 = vand.u32 2147483648, %v8202_v25  ;;  %vm8223_vm12 = vcmp.eq.f32.partialorder %v8202_v25, 0.0 }
0x3a6c   :  { %v8543_v6 = vpop.permute.xlu1 %8542  ;;  %v8204_v10 = vpop.xlane.xlu0 %8203 }
0x3a6d   :  { %13652 = vrsqrt.f32 %v8204_v10  ;;  %vm8228_vm13 = vcmp.eq.f32.partialorder %v8204_v10, inf  ;;  %v8231_v17 = vand.u32 2147483648, %v8204_v10  ;;  %vm8230_vm14 = vcmp.eq.f32.partialorder %v8204_v10, 0.0 }
0x3a70   :  { %v8551_v35 = vpop.permute.xlu1 %8550  ;;  %v8583_v32 = vpop.permute.xlu0 %8582 }
0x3a71   :  { %v8558_v37 = vsel %vm14895_vm15, %v8543_v6, %v8551_v35  ;;  %v8590_v60 = vsel %vm14895_vm15, %v8575_v20, %v8583_v32 }
0x3a72   :  { %v8566_v52 = vmul.f32 %v13793_v27, %v8558_v37  ;;  %v8598_v48 = vmul.f32 %v13793_v27, %v8590_v60 }
0x3a74   :  { %v15875_v15 = vadd.f32 %v8566_v52, %v8562_v14  ;;  %v15877_v26 = vadd.f32 %v8598_v48, %v8594_v49  ;;  %v8545_v62 = vpop.permute.xlu1 %8544 }
0x3a76   :  { %v13651_v40 = vpop.eup %13650  ;;  %8811 = vrot.lane.b32.xlu0 %v15875_v15, %s14257_s0  ;;  %8815 = vrot.lane.b32.xlu1 %v15877_v26, %s14257_s0 }
0x3a77   :  { %v8220_v58 = vmul.f32 %v13651_v40, %v8202_v25 }
0x3a78   :  { %v8553_v54 = vpop.permute.xlu1 %8552 }
0x3a79   :  { %v8222_v23 = vsel %vm8221_vm11, %v8202_v25, %v8220_v58  ;;  %v8559_v20 = vsel %vm14895_vm15, %v8545_v62, %v8553_v54  ;;  %v8308_v25 = vrot.slane %v15820_v0, %v14617_v24 }
0x3a7a   :  { %v13653_v56 = vpop.eup %13652  ;;  %v8225_v5 = vsel %vm8223_vm12, %v8224_v18, %v8222_v23  ;;  %v8567_v4 = vmul.f32 %v15833_v36, %v8559_v20 }
0x3a7b   :  { %v8235_v16 = vmul.f32 11.313708, %v8225_v5  ;;  %v8227_v53 = vmul.f32 %v13653_v56, %v8204_v10 }
0x3a7c   :  { %v15886_v11 = vadd.f32 %v8567_v4, %v8563_v13 }
0x3a7d   :  { %v8239_v57 = vadd.f32 1e-06, %v8235_v16  ;;  %v8229_v22 = vsel %vm8228_vm13, %v8204_v10, %v8227_v53 }
0x3a7e   :  { %v8232_v41 = vsel %vm8230_vm14, %v8231_v17, %v8229_v22  ;;  %8813 = vrot.lane.b32.xlu1 %v15886_v11, %s14257_s0 }
0x3a7f   :  { %13654 = vrcp.f32 %v8239_v57  ;;  %v8236_v29 = vmul.f32 11.313708, %v8232_v41 }
0x3a81   :  { %v8240_v55 = vadd.f32 1e-06, %v8236_v29 }
0x3a83   :  { %13656 = vrcp.f32 %v8240_v55 }
0x3a8c   :  { %v13655_v7 = vpop.eup %13654 }
0x3a8d   :  { %v8247_v36 = vmul.f32 %v13655_v7, %v15848_v45  ;;  %v8818_v45 = vpop.permute.xlu0 %8817 }
0x3a8f   :  { %v8257_v61 = vmul.f32 %v15813_v33, %v8247_v36 }
0x3a90   :  { %v13657_v46 = vpop.eup %13656 }
0x3a91   :  { %v8248_v51 = vmul.f32 %v13657_v46, %v15855_v34 }
0x3a93   :  { %v8258_v44 = vmul.f32 %v15813_v33, %v8248_v51 }
0x3a95   :  { %v8260_v59 = vpack.c.bf16 %v8258_v44, %v8257_v61 }
0x3a97   :  { %8483 = vmatmul.mubr.bf16.gmra.mxu1 %v8260_v59  ;;  %12849 = vmatmul.mubr.bf16.vlgmr.msra.gmra.mxu0 %v8260_v59 }
0x3a98   :  { %12853 = vmatpush3.xpose.msk.msra.mxu0 %vm757_vm9, %v15836_v42  ;;  %12856 = vmatprep.mubr.msk.f32.mxu0 %vm757_vm9, %v15875_v15 }
0x3a99   :  { %12854 = vmatprep.subr.msk.mxu0 %vm757_vm9, %v15877_v26 }
0x3a9c   :  { %12855 = vmatpush3.xpose.msk.msra.mxu0 %vm757_vm9, %v15877_v26 }
0x3a9d   :  { %12866 = vmatprep.subr.msk.mxu0 %vm757_vm9, %v8818_v45 }
0x3a9f   :  { %12857 = vmatmul.mubr.msk.f32.vlgmr.msra.gmra.mxu0 %vm757_vm9, %v15886_v11 }
0x3aa0   :  { %12867 = vmatpush3.xpose.msk.msra.mxu0 %vm757_vm9, %v8818_v45 }
0x3ae8   :  { %v8816_v33 = vpop.permute.xlu1 %8815  ;;  %v8812_v34 = vpop.permute.xlu0 %8811 }
0x3ae9   :  { %12868 = vmatprep.subr.msk.mxu0 %vm757_vm9, %v8816_v33  ;;  %12870 = vmatprep.mubr.msk.f32.mxu0 %vm757_vm9, %v8812_v34 }
0x3aea   :  { %12869 = vmatpush3.xpose.msk.msra.mxu0 %vm757_vm9, %v8816_v33 }
0x3af0   :  { %v8814_v1 = vpop.permute.xlu1 %8813 }
0x3af1   :  { %12871 = vmatmul.mubr.msk.f32.vlgmr.msra.gmra.mxu0 %vm757_vm9, %v8814_v1 }
0x3b57   :  { %v12850_v6 = vpop.f32.mrf.mxu0 }
0x3b58   :  { %v15912_v10 = vadd.f32 %v12850_v6, %v8308_v25 }
0x3b59   :  { %v8527_v35 = vpop.f32.mrf.mxu0 }
0x3b5a   :  { %v15918_v49 = vadd.f32 %v8527_v35, %v8308_v25 }
0x3b5b   :  { %v12851_v32 = vpop.f32.mrf.mxu0 }
0x3b5c   :  { %v15914_v37 = vadd.f32 %v12851_v32, %v8308_v25 }
0x3b5d   :  { %v8530_v60 = vpop.f32.mrf.mxu0 }
0x3b5e   :  { %v15916_v21 = vadd.f32 %v8530_v60, %v8308_v25 }
0x3b5f   :  { %v12858_v14 = vpop.f32.mrf.mxu0 }
0x3b60   :  { %v8705_v27 = vmul.f32 0.17677669, %v12858_v14  ;;  %12859 = vmatprep.subr.mxu1 %v15916_v21 }
0x3b61   :  { %v8695_v52 = vpop.f32.mrf.mxu0  ;;  %12860 = vmatpush3.msra.mxu1 %v15916_v21 }
0x3b62   :  { %v8707_v0 = vsel %vm14996_vm5, %v8705_v27, -1e+30  ;;  %v8704_v48 = vmul.f32 0.17677669, %v8695_v52  ;;  %12861 = vmatprep.subr.mxu1 %v15918_v49 }
0x3b63   :  { %12862 = vmatpush3.msra.mxu1 %v15918_v49  ;;  %v8711_v62 = vsel %vm3260_vm6, %v8707_v0, -inf }
0x3b64   :  { %v8706_v40 = vsel %vm15005_vm7, %v8704_v48, -1e+30  ;;  %8712 = vmax.xlane.f32.xlu1 %v8711_v62 }
0x3b65   :  { %v8708_v58 = vsel %vm3260_vm6, %v8706_v40, -inf }
0x3b66   :  { %8709 = vmax.xlane.f32.xlu0 %v8708_v58 }
0x3bb1   :  { %v12872_v18 = vpop.f32.mrf.mxu0 }
0x3bb2   :  { %v8903_v23 = vmul.f32 0.17677669, %v12872_v18 }
0x3bb3   :  { %v8893_v54 = vpop.f32.mrf.mxu0 }
0x3bb4   :  { %v8902_v20 = vmul.f32 0.17677669, %v8893_v54  ;;  %v8905_v5 = vsel %vm14996_vm5, %v8903_v23, -1e+30 }
0x3bb5   :  { %v8909_v4 = vsel %vm3260_vm6, %v8905_v5, -inf }
0x3bb6   :  { %v8904_v56 = vsel %vm15005_vm7, %v8902_v20, -1e+30 }
0x3bb7   :  { %v8906_v13 = vsel %vm3260_vm6, %v8904_v56, -inf }
0x3bb8   :  { %8907 = vmax.xlane.f32.xlu0 %v8906_v13 }
0x3bbc   :  { %8910 = vmax.xlane.f32.xlu0 %v8909_v4 }
0x3bed   :  { %v8713_v16 = vpop.xlane.xlu1 %8712 }
0x3bee   :  { %v8715_v53 = vsub.f32 %v8707_v0, %v8713_v16 }
0x3bef   :  { %v8710_v17 = vpop.xlane.xlu0 %8709 }
0x3bf0   :  { %v8718_v57 = vmul.f32 1.442695, %v8715_v53  ;;  %v8714_v22 = vsub.f32 %v8706_v40, %v8710_v17 }
0x3bf2   :  { %13658 = vpow2.f32 %v8718_v57  ;;  %v8716_v41 = vmul.f32 1.442695, %v8714_v22 }
0x3bf4   :  { %13660 = vpow2.f32 %v8716_v41  ;;  %v15974_v41 = vld [vmem:[#allocation23 + $0x1] ss:$0 sm:$0xff] }
0x3bff   :  { %v13659_v29 = vpop.eup %13658 }
0x3c00   :  { %v8723_v55 = vsel %vm3260_vm6, %v13659_v29, 0.0 }
0x3c01   :  { %v13661_v7 = vpop.eup %13660  ;;  %8724 = vadd.xlane.f32.xlu1 %v8723_v55 }
0x3c02   :  { %v8720_v36 = vsel %vm3260_vm6, %v13661_v7, 0.0 }
0x3c03   :  { %8721 = vadd.xlane.f32.xlu0 %v8720_v36 }
0x3c41   :  { %v8908_v46 = vpop.xlane.xlu0 %8907 }
0x3c42   :  { %v8912_v51 = vsub.f32 %v8904_v56, %v8908_v46 }
0x3c44   :  { %v8914_v61 = vmul.f32 1.442695, %v8912_v51 }
0x3c45   :  { %v8911_v44 = vpop.xlane.xlu0 %8910 }
0x3c46   :  { %13662 = vpow2.f32 %v8914_v61  ;;  %v8913_v59 = vsub.f32 %v8905_v5, %v8911_v44  ;;  %v15962_v5 = vpop.f32.mrf.mxu1 }
0x3c48   :  { %v8916_v45 = vmul.f32 1.442695, %v8913_v59  ;;  %v15964_v4 = vpop.f32.mrf.mxu1 }
0x3c4a   :  { %13664 = vpow2.f32 %v8916_v45  ;;  %v15966_v16 = vpop.f32.mrf.mxu1 }
0x3c4c   :  { %v15968_v53 = vpop.f32.mrf.mxu1 }
0x3c53   :  { %v13663_v33 = vpop.eup %13662 }
0x3c54   :  { %v8918_v34 = vsel %vm3260_vm6, %v13663_v33, 0.0 }
0x3c55   :  { %8919 = vadd.xlane.f32.xlu0 %v8918_v34 }
0x3c57   :  { %v13665_v1 = vpop.eup %13664 }
0x3c58   :  { %v8921_v25 = vsel %vm3260_vm6, %v13665_v1, 0.0 }
0x3c59   :  { %8922 = vadd.xlane.f32.xlu1 %v8921_v25 }
0x3c6a   :  { %8930 = vrot.lane.b32.xlu1 %v15918_v49, %s14257_s0 }
0x3c6b   :  { %8932 = vrot.lane.b32.xlu0 %v15916_v21, %s14257_s0 }
0x3c6e   :  { %9060 = vrot.lane.b32.xlu1 %v15836_v42, %s14276_s11 }
0x3c6f   :  { %9054 = vrot.lane.b32.xlu0 %v15875_v15, %s14276_s11 }
0x3c72   :  { %9058 = vrot.lane.b32.xlu1 %v15877_v26, %s14276_s11 }
0x3c76   :  { %9056 = vrot.lane.b32.xlu1 %v15886_v11, %s14276_s11 }
0x3c8a   :  { %v8725_v6 = vpop.xlane.xlu1 %8724 }
0x3c8b   :  { %13666 = vrcp.f32 %v8725_v6 }
0x3c8c   :  { %v8722_v35 = vpop.xlane.xlu0 %8721 }
0x3c8d   :  { %13668 = vrcp.f32 %v8722_v35 }
0x3c98   :  { %v13667_v32 = vpop.eup %13666 }
0x3c99   :  { %v8729_v27 = vmul.f32 %v13667_v32, %v13659_v29 }
0x3c9a   :  { %v13669_v60 = vpop.eup %13668 }
0x3c9b   :  { %v8728_v14 = vmul.f32 %v13669_v60, %v13661_v7 }
0x3c9d   :  { %12863 = vmatprep.mubr.msk.f32.mxu1 %vm3260_vm6, %v8728_v14 }
0x3c9e   :  { %12864 = vmatmul.mubr.msk.f32.vlgmr.msra.gmra.mxu1 %vm3260_vm6, %v8729_v27 }
0x3cde   :  { %v8920_v52 = vpop.xlane.xlu0 %8919 }
0x3cdf   :  { %13670 = vrcp.f32 %v8920_v52 }
0x3ce2   :  { %v8923_v0 = vpop.xlane.xlu1 %8922  ;;  %v8933_v48 = vpop.permute.xlu0 %8932 }
0x3ce3   :  { %13672 = vrcp.f32 %v8923_v0  ;;  %12873 = vmatprep.subr.mxu1 %v8933_v48 }
0x3ce4   :  { %12874 = vmatpush3.msra.mxu1 %v8933_v48 }
0x3ce6   :  { %v8931_v62 = vpop.permute.xlu1 %8930  ;;  %v9055_v20 = vpop.permute.xlu0 %9054 }
0x3ce7   :  { %12875 = vmatprep.subr.mxu1 %v8931_v62 }
0x3ce8   :  { %12876 = vmatpush3.msra.mxu1 %v8931_v62 }
0x3cea   :  { %v9061_v40 = vpop.permute.xlu1 %9060 }
0x3ceb   :  { %12880 = vmatprep.subr.msk.mxu1 %vm757_vm9, %v9061_v40 }
0x3cec   :  { %v13671_v58 = vpop.eup %13670 }
0x3ced   :  { %v8926_v18 = vmul.f32 %v13671_v58, %v13663_v33 }
0x3cee   :  { %v9059_v56 = vpop.permute.xlu1 %9058 }
0x3cef   :  { %12877 = vmatprep.mubr.msk.f32.mxu1 %vm3260_vm6, %v8926_v18 }
0x3cf0   :  { %v13673_v54 = vpop.eup %13672 }
0x3cf1   :  { %v8927_v23 = vmul.f32 %v13673_v54, %v13665_v1 }
0x3cf2   :  { %v9057_v13 = vpop.permute.xlu1 %9056 }
0x3cf3   :  { %12878 = vmatmul.mubr.msk.f32.vlgmr.msra.gmra.mxu1 %vm3260_vm6, %v8927_v23  ;;  %v16006_v23 = vld [vmem:[#allocation20 + $0x28] sm:$0xff]  }
0x3cf4   :  { %12881 = vmatpush3.xpose.msk.msra.mxu1 %vm757_vm9, %v9061_v40  ;;  %12884 = vmatprep.mubr.msk.f32.mxu1 %vm757_vm9, %v9055_v20 }
0x3cf5   :  { %12882 = vmatprep.subr.msk.mxu1 %vm757_vm9, %v9059_v56 }
0x3cf8   :  { %12883 = vmatpush3.xpose.msk.msra.mxu1 %vm757_vm9, %v9059_v56  ;;  %v16011_v56 = vld [vmem:[#allocation20 + $0x20] sm:$0xff]  }
0x3cfb   :  { %12885 = vmatmul.mubr.msk.f32.vlgmr.msra.gmra.mxu1 %vm757_vm9, %v9057_v13 }
0x3d5e   :  { %v15970_v17 = vpop.f32.mrf.mxu1 }
0x3d60   :  { %v8802_v57 = vpop.f32.mrf.mxu1 }
0x3db3   :  { %v15972_v22 = vpop.f32.mrf.mxu1 }
0x3db4   :  { %v9024_v63 = vmul.f32 %v15972_v22, %v15974_v41 }
0x3db5   :  { %v9008_v29 = vpop.f32.mrf.mxu1 }
0x3db6   :  { %v9023_v55 = vmul.f32 %v15974_v41, %v9008_v29 }
0x3db8   :  { %v15977_v7 = vsub.f32 %v8802_v57, %v9023_v55 }
0x3dbb   :  { %v12886_v36 = vpop.f32.mrf.mxu1 }
0x3dbc   :  { %v9146_v46 = vmul.f32 0.17677669, %v12886_v36 }
0x3dbd   :  { %v9136_v51 = vpop.f32.mrf.mxu1 }
0x3dbe   :  { %v9148_v61 = vsel %vm14996_vm5, %v9146_v46, -1e+30  ;;  %v9145_v44 = vmul.f32 0.17677669, %v9136_v51 }
0x3dbf   :  { %v9152_v59 = vsel %vm3260_vm6, %v9148_v61, -inf }
0x3dc0   :  { %v9147_v45 = vsel %vm15005_vm7, %v9145_v44, -1e+30  ;;  %9153 = vmax.xlane.f32.xlu1 %v9152_v59 }
0x3dc1   :  { %v9149_v33 = vsel %vm3260_vm6, %v9147_v45, -inf }
0x3dc2   :  { %9150 = vmax.xlane.f32.xlu0 %v9149_v33 }
0x3dd1   :  { %9171 = vrot.lane.b32.xlu1 %v15918_v49, %s14276_s11 }
0x3dd5   :  { %9264 = vrot.lane.b32.xlu1 %v15836_v42, %s14277_s19 }
0x3dd9   :  { %9262 = vrot.lane.b32.xlu1 %v15877_v26, %s14277_s19 }
0x3ddd   :  { %9260 = vrot.lane.b32.xlu1 %v15886_v11, %s14277_s19 }
0x3e49   :  { %v9154_v34 = vpop.xlane.xlu1 %9153 }
0x3e4a   :  { %v9156_v1 = vsub.f32 %v9148_v61, %v9154_v34 }
0x3e4b   :  { %v9151_v25 = vpop.xlane.xlu0 %9150 }
0x3e4c   :  { %v9159_v6 = vmul.f32 1.442695, %v9156_v1  ;;  %v9155_v35 = vsub.f32 %v9147_v45, %v9151_v25 }
0x3e4d   :  { %v9172_v52 = vpop.permute.xlu1 %9171 }
0x3e4e   :  { %13674 = vpow2.f32 %v9159_v6  ;;  %v9157_v32 = vmul.f32 1.442695, %v9155_v35 }
0x3e50   :  { %13676 = vpow2.f32 %v9157_v32 }
0x3e51   :  { %v9265_v48 = vpop.permute.xlu1 %9264 }
0x3e55   :  { %v9263_v54 = vpop.permute.xlu1 %9262 }
0x3e59   :  { %v9261_v20 = vpop.permute.xlu1 %9260 }
0x3e5b   :  { %v13675_v60 = vpop.eup %13674 }
0x3e5c   :  { %v9164_v14 = vsel %vm3260_vm6, %v13675_v60, 0.0 }
0x3e5d   :  { %v13677_v27 = vpop.eup %13676  ;;  %9165 = vadd.xlane.f32.xlu0 %v9164_v14 }
0x3e5e   :  { %v9161_v42 = vsel %vm3260_vm6, %v13677_v27, 0.0 }
0x3e61   :  { %9162 = vadd.xlane.f32.xlu0 %v9161_v42 }
0x3e77   :  { %9173 = vrot.lane.b32.xlu0 %v15916_v21, %s14276_s11 }
0x3e7b   :  { %9258 = vrot.lane.b32.xlu0 %v15875_v15, %s14277_s19 }
0x3ee6   :  { %v9166_v26 = vpop.xlane.xlu0 %9165 }
0x3ee7   :  { %13678 = vrcp.f32 %v9166_v26 }
0x3eea   :  { %v9163_v11 = vpop.xlane.xlu0 %9162 }
0x3eeb   :  { %13680 = vrcp.f32 %v9163_v11 }
0x3eee   :  { %v9174_v0 = vpop.permute.xlu0 %9173 }
0x3eef   :  { %12887 = vmatprep.subr.mxu0 %v9174_v0 }
0x3ef0   :  { %12888 = vmatpush3.msra.mxu0 %v9174_v0 }
0x3ef1   :  { %12889 = vmatprep.subr.mxu0 %v9172_v52 }
0x3ef2   :  { %12890 = vmatpush3.msra.mxu0 %v9172_v52  ;;  %v9259_v15 = vpop.permute.xlu0 %9258 }
0x3ef3   :  { %12894 = vmatprep.subr.msk.mxu0 %vm757_vm9, %v9265_v48 }
0x3ef4   :  { %v13679_v62 = vpop.eup %13678 }
0x3ef5   :  { %v9170_v18 = vmul.f32 %v13679_v62, %v13675_v60 }
0x3ef8   :  { %v13681_v40 = vpop.eup %13680 }
0x3ef9   :  { %v9169_v58 = vmul.f32 %v13681_v40, %v13677_v27 }
0x3efb   :  { %12891 = vmatprep.mubr.msk.f32.mxu0 %vm3260_vm6, %v9169_v58 }
0x3efc   :  { %12892 = vmatmul.mubr.msk.f32.vlgmr.msra.gmra.mxu0 %vm3260_vm6, %v9170_v18 }
0x3efd   :  { %12895 = vmatpush3.xpose.msk.msra.mxu0 %vm757_vm9, %v9265_v48  ;;  %12898 = vmatprep.mubr.msk.f32.mxu0 %vm757_vm9, %v9259_v15 }
0x3efe   :  { %12896 = vmatprep.subr.msk.mxu0 %vm757_vm9, %v9263_v54 }
0x3f01   :  { %12897 = vmatpush3.xpose.msk.msra.mxu0 %vm757_vm9, %v9263_v54 }
0x3f02   :  { %12916 = vmatprep.subr.bf16.mxu0 %v14273_v19 }
0x3f04   :  { %12899 = vmatmul.mubr.msk.f32.vlgmr.msra.gmra.mxu0 %vm757_vm9, %v9261_v20 }
0x3f05   :  { %12917 = vmatpush3.bf16.msra.mxu0 %v16006_v23  ;;  %12920 = vmatprep.mubr.msk.bf16.mxu0 %vm14275_vm0, %v14273_v19 }
0x3f06   :  { %12918 = vmatprep.subr.bf16.mxu0 %v14273_v19 }
0x3f09   :  { %12919 = vmatpush3.bf16.msra.mxu0 %v16011_v56 }
0x3f0a   :  { %12931 = vmatprep.subr.mxu0 %v15914_v37 }
0x3fbc   :  { %v12893_v13 = vpop.f32.mrf.mxu0 }
0x3fbe   :  { %v9249_v57 = vpop.f32.mrf.mxu0 }
0x3fc4   :  { %v12900_v29 = vpop.f32.mrf.mxu0 }
0x3fc5   :  { %v9350_v55 = vmul.f32 0.17677669, %v12900_v29 }
0x3fc6   :  { %v9340_v36 = vpop.f32.mrf.mxu0 }
0x3fc7   :  { %v9352_v46 = vsel %vm14996_vm5, %v9350_v55, -1e+30  ;;  %v9349_v51 = vmul.f32 0.17677669, %v9340_v36 }
0x3fc8   :  { %v9356_v61 = vsel %vm3260_vm6, %v9352_v46, -inf }
0x3fc9   :  { %v9351_v44 = vsel %vm15005_vm7, %v9349_v51, -1e+30  ;;  %9357 = vmax.xlane.f32.xlu1 %v9356_v61  ;;  %v16043_v51 = vld [vmem:[#allocation20 + $0x38] sm:$0xff]   ;;  %v8491_v61 = vadd.f32 %v15968_v53, %v15824_v28  ;;  %v8485_v53 = vadd.f32 %v15962_v5, %v15860_v12 }
0x3fca   :  { %v9353_v59 = vsel %vm3260_vm6, %v9351_v44, -inf }
0x3fcb   :  { %9354 = vmax.xlane.f32.xlu0 %v9353_v59 }
0x3fda   :  { %9375 = vrot.lane.b32.xlu1 %v15918_v49, %s14277_s19 }
0x4052   :  { %v9358_v45 = vpop.xlane.xlu1 %9357 }
0x4053   :  { %v9360_v33 = vsub.f32 %v9352_v46, %v9358_v45 }
0x4054   :  { %v9355_v34 = vpop.xlane.xlu0 %9354 }
0x4055   :  { %v9363_v1 = vmul.f32 1.442695, %v9360_v33  ;;  %v9359_v25 = vsub.f32 %v9351_v44, %v9355_v34  ;;  %v16049_v44 = vld [vmem:[#allocation20 + $0x30] sm:$0xff]  }
0x4056   :  { %v9376_v26 = vpop.permute.xlu1 %9375 }
0x4057   :  { %13682 = vpow2.f32 %v9363_v1  ;;  %v9361_v6 = vmul.f32 1.442695, %v9359_v25 }
0x4059   :  { %13684 = vpow2.f32 %v9361_v6 }
0x4064   :  { %v13683_v35 = vpop.eup %13682 }
0x4065   :  { %v9368_v32 = vsel %vm3260_vm6, %v13683_v35, 0.0 }
0x4066   :  { %v13685_v60 = vpop.eup %13684  ;;  %9369 = vadd.xlane.f32.xlu0 %v9368_v32 }
0x4067   :  { %v9365_v14 = vsel %vm3260_vm6, %v13685_v60, 0.0 }
0x406a   :  { %9366 = vadd.xlane.f32.xlu0 %v9365_v14 }
0x4080   :  { %9377 = vrot.lane.b32.xlu0 %v15916_v21, %s14277_s19 }
0x40ef   :  { %v9370_v49 = vpop.xlane.xlu0 %9369 }
0x40f0   :  { %13686 = vrcp.f32 %v9370_v49 }
0x40f3   :  { %v9367_v27 = vpop.xlane.xlu0 %9366 }
0x40f4   :  { %13688 = vrcp.f32 %v9367_v27 }
0x40f7   :  { %v9378_v42 = vpop.permute.xlu0 %9377 }
0x40f8   :  { %12901 = vmatprep.subr.mxu1 %v9378_v42 }
0x40f9   :  { %12902 = vmatpush3.msra.mxu1 %v9378_v42 }
0x40fa   :  { %12903 = vmatprep.subr.mxu1 %v9376_v26 }
0x40fb   :  { %12904 = vmatpush3.msra.mxu1 %v9376_v26 }
0x40fc   :  { %12908 = vmatprep.subr.bf16.mxu1 %v14273_v19 }
0x40fd   :  { %v13687_v11 = vpop.eup %13686 }
0x40fe   :  { %v9374_v48 = vmul.f32 %v13687_v11, %v13683_v35 }
0x4101   :  { %v13689_v52 = vpop.eup %13688 }
0x4102   :  { %v9373_v0 = vmul.f32 %v13689_v52, %v13685_v60  ;;  %v13795_v60 = vld [vmem:[#allocation7 + $0x18] sm:$0xff] }
0x4104   :  { %12905 = vmatprep.mubr.msk.f32.mxu1 %vm3260_vm6, %v9373_v0 }
0x4105   :  { %12906 = vmatmul.mubr.msk.f32.vlgmr.msra.gmra.mxu1 %vm3260_vm6, %v9374_v48 }
0x4106   :  { %12912 = vmatprep.mubr.msk.bf16.mxu1 %vm14275_vm0, %v14273_v19  ;;  %12909 = vmatpush3.bf16.msra.mxu1 %v16043_v51 }
0x4107   :  { %12910 = vmatprep.subr.bf16.mxu1 %v14273_v19 }
0x410a   :  { %12911 = vmatpush3.bf16.msra.mxu1 %v16049_v44 }
0x41c5   :  { %v12907_v21 = vpop.f32.mrf.mxu1 }
0x41c7   :  { %v9453_v62 = vpop.f32.mrf.mxu1 }
0x41c8   :  { %9464 = vrot.lane.b32.xlu1 %v9453_v62, %s14277_s19 }
0x41cc   :  { %9466 = vrot.lane.b32.xlu1 %v12907_v21, %s14277_s19  ;;  %v13796_v21 = vld [vmem:[#allocation7 + $0x10] sm:$0xff] }
0x423a   :  { %v9465_v40 = vpop.permute.xlu1 %9464 }
0x423b   :  { %v9470_v58 = vmul.f32 %v15974_v41, %v9465_v40 }
0x423d   :  { %9474 = vrot.lane.b32.xlu0 %v9470_v58, %s14276_s11 }
0x423e   :  { %v9467_v18 = vpop.permute.xlu1 %9466 }
0x423f   :  { %v9471_v15 = vmul.f32 %v15974_v41, %v9467_v18  ;;  %v13797_v18 = vld [vmem:[#allocation5 + $0x10] sm:$0xff] }
0x4241   :  { %9476 = vrot.lane.b32.xlu1 %v9471_v15, %s14276_s11 }
0x42af   :  { %v9475_v54 = vpop.permute.xlu0 %9474 }
0x42b0   :  { %v9480_v20 = vsub.f32 %v9249_v57, %v9475_v54  ;;  %v8489_v57 = vadd.f32 %v15966_v16, %v15860_v12  ;;  %v13794_v16 = vld [vmem:[#allocation5 + $0x18] sm:$0xff] }
0x42b1   :  { %v8597_v32 = vmul.f32 %v13794_v16, %v8491_v61 }
0x42b2   :  { %v9482_v29 = vsel %vm757_vm9, %v9480_v20, 0.0 }
0x42b3   :  { %9483 = vadd.xlane.f32.xlu0 %v9482_v29  ;;  %v9477_v55 = vpop.permute.xlu1 %9476 }
0x42b4   :  { %v9481_v36 = vsub.f32 %v12893_v13, %v9477_v55  ;;  %v8487_v13 = vadd.f32 %v15964_v4, %v15824_v28 }
0x42b6   :  { %v9485_v46 = vsel %vm757_vm9, %v9481_v36, 0.0  ;;  %v8596_v15 = vmul.f32 %v13797_v18, %v8487_v13 }
0x42b7   :  { %9486 = vadd.xlane.f32.xlu1 %v9485_v46  ;;  %v8564_v46 = vmul.f32 %v13797_v18, %v8485_v53 }
0x42c8   :  { %8588 = vrot.lane.b32.xlu1 %v8491_v61, %s14246_s25 }
0x42c9   :  { %8580 = vrot.lane.b32.xlu0 %v8491_v61, %s14278_s7 }
0x42cc   :  { %8586 = vrot.lane.b32.xlu1 %v8487_v13, %s14246_s25 }
0x42cd   :  { %8578 = vrot.lane.b32.xlu0 %v8487_v13, %s14278_s7  ;;  %v9026_v13 = vsub.f32 %v15970_v17, %v9024_v63 }
0x42d0   :  { %8554 = vrot.lane.b32.xlu1 %v8485_v53, %s14246_s25 }
0x42d1   :  { %8546 = vrot.lane.b32.xlu0 %v8485_v53, %s14278_s7  ;;  %v9027_v53 = vsel %vm757_vm9, %v15977_v7, 0.0 }
0x42d4   :  { %8556 = vrot.lane.b32.xlu1 %v8489_v57, %s14246_s25 }
0x42d5   :  { %8548 = vrot.lane.b32.xlu0 %v8489_v57, %s14278_s7 }
0x433c   :  { %v9484_v59 = vpop.xlane.xlu0 %9483 }
0x433d   :  { %v9488_v28 = vmul.f32 0.03125, %v9484_v59 }
0x433f   :  { %v9490_v4 = vsub.f32 %v9480_v20, %v9488_v28 }
0x4340   :  { %v9487_v45 = vpop.xlane.xlu1 %9486  ;;  %v8581_v33 = vpop.permute.xlu0 %8580 }
0x4341   :  { %v9489_v34 = vmul.f32 0.03125, %v9487_v45  ;;  %v9492_v1 = vmul.f32 %v9490_v4, %v9490_v4 }
0x4343   :  { %v9491_v25 = vsub.f32 %v9481_v36, %v9489_v34  ;;  %v9494_v5 = vsel %vm757_vm9, %v9492_v1, 0.0  ;;  %v8565_v36 = vmul.f32 %v13794_v16, %v8489_v57  ;;  %v9030_v57 = vsel %vm757_vm9, %v9026_v13, 0.0 }
0x4344   :  { %9495 = vadd.xlane.f32.xlu0 %v9494_v5  ;;  %v8589_v6 = vpop.permute.xlu1 %8588  ;;  %v8579_v49 = vpop.permute.xlu0 %8578 }
0x4345   :  { %v8593_v35 = vsel %vm14895_vm15, %v8581_v33, %v8589_v6  ;;  %v9493_v12 = vmul.f32 %v9491_v25, %v9491_v25 }
0x4346   :  { %v8601_v14 = vmul.f32 %v13795_v60, %v8593_v35 }
0x4347   :  { %v9497_v27 = vsel %vm757_vm9, %v9493_v12, 0.0 }
0x4348   :  { %v16070_v42 = vadd.f32 %v8601_v14, %v8597_v32  ;;  %9498 = vadd.xlane.f32.xlu1 %v9497_v27  ;;  %v8587_v26 = vpop.permute.xlu1 %8586  ;;  %v8547_v52 = vpop.permute.xlu0 %8546 }
0x4349   :  { %v8592_v0 = vsel %vm14895_vm15, %v8579_v49, %v8587_v26 }
0x434a   :  { %12924 = vmatprep.subr.msk.mxu1 %vm757_vm9, %v16070_v42  ;;  %v8600_v62 = vmul.f32 %v13796_v21, %v8592_v0 }
0x434c   :  { %v8555_v11 = vpop.permute.xlu1 %8554  ;;  %v8549_v40 = vpop.permute.xlu0 %8548  ;;  %v16080_v20 = vadd.f32 %v8600_v62, %v8596_v15 }
0x434d   :  { %v8560_v54 = vsel %vm14895_vm15, %v8547_v52, %v8555_v11 }
0x434e   :  { %v8568_v55 = vmul.f32 %v13796_v21, %v8560_v54 }
0x4350   :  { %v8557_v48 = vpop.permute.xlu1 %8556  ;;  %v16088_v59 = vadd.f32 %v8568_v55, %v8564_v46 }
0x4351   :  { %v8561_v58 = vsel %vm14895_vm15, %v8549_v40, %v8557_v48 }
0x4352   :  { %v8569_v29 = vmul.f32 %v13795_v60, %v8561_v58 }
0x4354   :  { %v16086_v61 = vadd.f32 %v8569_v29, %v8565_v36 }
0x4359   :  { %9819 = vrot.lane.b32.xlu1 %v16080_v20, %s14257_s0 }
0x435a   :  { %9821 = vrot.lane.b32.xlu0 %v16070_v42, %s14257_s0 }
0x435d   :  { %9817 = vrot.lane.b32.xlu1 %v16086_v61, %s14257_s0 }
0x435e   :  { %9815 = vrot.lane.b32.xlu0 %v16088_v59, %s14257_s0 }
0x437d   :  { %9028 = vadd.xlane.f32.xlu0 %v9027_v53 }
0x4381   :  { %9031 = vadd.xlane.f32.xlu1 %v9030_v57 }
0x43cd   :  { %v9496_v28 = vpop.xlane.xlu0 %9495 }
0x43ce   :  { %v9500_v45 = vmul.f32 0.03125, %v9496_v28 }
0x43d0   :  { %v9502_v33 = vadd.f32 1e-05, %v9500_v45 }
0x43d1   :  { %v9499_v34 = vpop.xlane.xlu1 %9498  ;;  %v9822_v16 = vpop.permute.xlu0 %9821 }
0x43d2   :  { %v9501_v1 = vmul.f32 0.03125, %v9499_v34  ;;  %13690 = vrsqrt.f32 %v9502_v33 }
0x43d4   :  { %v9503_v5 = vadd.f32 1e-05, %v9501_v1 }
0x43d6   :  { %13692 = vrsqrt.f32 %v9503_v5 }
0x43df   :  { %v13691_v6 = vpop.eup %13690 }
0x43e0   :  { %v9506_v22 = vmul.f32 %v13691_v6, %v9490_v4  ;;  %v9816_v4 = vpop.permute.xlu0 %9815 }
0x43e3   :  { %v13693_v35 = vpop.eup %13692 }
0x43e4   :  { %v9507_v12 = vmul.f32 %v13693_v35, %v9491_v25  ;;  %v9820_v25 = vpop.permute.xlu1 %9819 }
0x43e6   :  { %v9508_v17 = vpack.c.bf16 %v9507_v12, %v9506_v22 }
0x43e8   :  { %12913 = vmatmul.mubr.msk.bf16.vlgmr.msra.gmra.mxu1 %vm757_vm9, %v9508_v17  ;;  %v9818_v32 = vpop.permute.xlu1 %9817 }
0x43e9   :  { %12925 = vmatpush3.xpose.msk.msra.mxu1 %vm757_vm9, %v16070_v42  ;;  %12928 = vmatprep.mubr.msk.f32.mxu1 %vm757_vm9, %v16088_v59 }
0x43ea   :  { %12926 = vmatprep.subr.msk.mxu1 %vm757_vm9, %v16080_v20 }
0x43ed   :  { %12927 = vmatpush3.xpose.msk.msra.mxu1 %vm757_vm9, %v16080_v20 }
0x43ee   :  { %12938 = vmatprep.subr.msk.mxu1 %vm757_vm9, %v9822_v16 }
0x43f0   :  { %12929 = vmatmul.mubr.msk.f32.vlgmr.msra.gmra.mxu1 %vm757_vm9, %v16086_v61 }
0x43f1   :  { %12939 = vmatpush3.xpose.msk.msra.mxu1 %vm757_vm9, %v9822_v16  ;;  %12942 = vmatprep.mubr.msk.f32.mxu1 %vm757_vm9, %v9816_v4 }
0x43f2   :  { %12940 = vmatprep.subr.msk.mxu1 %vm757_vm9, %v9820_v25 }
0x43f5   :  { %12941 = vmatpush3.xpose.msk.msra.mxu1 %vm757_vm9, %v9820_v25 }
0x43f8   :  { %12943 = vmatmul.mubr.msk.f32.vlgmr.msra.gmra.mxu1 %vm757_vm9, %v9818_v32 }
0x4406   :  { %v9029_v48 = vpop.xlane.xlu0 %9028 }
0x4407   :  { %v9033_v15 = vmul.f32 0.03125, %v9029_v48 }
0x4409   :  { %v9035_v46 = vsub.f32 %v15977_v7, %v9033_v15 }
0x440a   :  { %v9032_v11 = vpop.xlane.xlu1 %9031 }
0x440b   :  { %v9034_v40 = vmul.f32 0.03125, %v9032_v11  ;;  %v9037_v34 = vmul.f32 %v9035_v46, %v9035_v46 }
0x440d   :  { %v9036_v54 = vsub.f32 %v9026_v13, %v9034_v40  ;;  %v9039_v7 = vsel %vm757_vm9, %v9037_v34, 0.0 }
0x440f   :  { %v9038_v45 = vmul.f32 %v9036_v54, %v9036_v54 }
0x4411   :  { %v9042_v1 = vsel %vm757_vm9, %v9038_v45, 0.0 }
0x44a8   :  { %v16117_v60 = vpop.f32.mrf.mxu1 }
0x44aa   :  { %v12914_v14 = vpop.f32.mrf.mxu1 }
0x44ac   :  { %v16119_v49 = vpop.f32.mrf.mxu1 }
0x44ae   :  { %v12915_v27 = vpop.f32.mrf.mxu1 }
0x44b0   :  { %v12930_v26 = vpop.f32.mrf.mxu1 }
0x44b1   :  { %v9709_v52 = vmul.f32 0.17677669, %v12930_v26 }
0x44b2   :  { %v9699_v0 = vpop.f32.mrf.mxu1 }
0x44b3   :  { %v9711_v21 = vsel %vm14996_vm5, %v9709_v52, -1e+30  ;;  %v9708_v62 = vmul.f32 0.17677669, %v9699_v0 }
0x44b4   :  { %v9715_v58 = vsel %vm3260_vm6, %v9711_v21, -inf }
0x44b5   :  { %v9710_v18 = vsel %vm15005_vm7, %v9708_v62, -1e+30  ;;  %9716 = vmax.xlane.f32.xlu0 %v9715_v58 }
0x44b6   :  { %v9712_v55 = vsel %vm3260_vm6, %v9710_v18, -inf }
0x44b8   :  { %v12944_v29 = vpop.f32.mrf.mxu1 }
0x44b9   :  { %v9907_v36 = vmul.f32 0.17677669, %v12944_v29  ;;  %9713 = vmax.xlane.f32.xlu0 %v9712_v55 }
0x44ba   :  { %v9897_v63 = vpop.f32.mrf.mxu1 }
0x44bb   :  { %v9909_v53 = vsel %vm14996_vm5, %v9907_v36, -1e+30  ;;  %v9906_v57 = vmul.f32 0.17677669, %v9897_v63 }
0x44bc   :  { %v9913_v28 = vsel %vm3260_vm6, %v9909_v53, -inf }
0x44bd   :  { %v9908_v33 = vsel %vm15005_vm7, %v9906_v57, -1e+30  ;;  %9914 = vmax.xlane.f32.xlu1 %v9913_v28 }
0x44be   :  { %v9910_v13 = vsel %vm3260_vm6, %v9908_v33, -inf }
0x44bf   :  { %9911 = vmax.xlane.f32.xlu0 %v9910_v13 }
0x44c1   :  { %9043 = vadd.xlane.f32.xlu1 %v9042_v1 }
0x44c3   :  { %9040 = vadd.xlane.f32.xlu0 %v9039_v7 }
0x453e   :  { %v9717_v5 = vpop.xlane.xlu0 %9716 }
0x453f   :  { %v9719_v6 = vsub.f32 %v9711_v21, %v9717_v5 }
0x4541   :  { %v9722_v35 = vmul.f32 1.442695, %v9719_v6 }
0x4542   :  { %v9714_v22 = vpop.xlane.xlu0 %9713 }
0x4543   :  { %13694 = vpow2.f32 %v9722_v35  ;;  %v9718_v12 = vsub.f32 %v9710_v18, %v9714_v22 }
0x4545   :  { %v9720_v17 = vmul.f32 1.442695, %v9718_v12 }
0x4546   :  { %v9915_v16 = vpop.xlane.xlu1 %9914 }
0x4547   :  { %13696 = vpow2.f32 %v9720_v17  ;;  %v9917_v4 = vsub.f32 %v9909_v53, %v9915_v16 }
0x4548   :  { %v9912_v25 = vpop.xlane.xlu0 %9911 }
0x4549   :  { %v9920_v32 = vmul.f32 1.442695, %v9917_v4  ;;  %v9916_v14 = vsub.f32 %v9908_v33, %v9912_v25 }
0x454a   :  { %v9044_v27 = vpop.xlane.xlu1 %9043 }
0x454b   :  { %13698 = vpow2.f32 %v9920_v32  ;;  %v9918_v26 = vmul.f32 1.442695, %v9916_v14  ;;  %v9046_v11 = vmul.f32 0.03125, %v9044_v27 }
0x454c   :  { %v9041_v52 = vpop.xlane.xlu0 %9040 }
0x454d   :  { %13700 = vpow2.f32 %v9918_v26  ;;  %v9048_v0 = vadd.f32 1e-05, %v9046_v11  ;;  %v9045_v48 = vmul.f32 0.03125, %v9041_v52 }
0x454f   :  { %13702 = vrsqrt.f32 %v9048_v0  ;;  %v9047_v21 = vadd.f32 1e-05, %v9045_v48 }
0x4550   :  { %v13695_v62 = vpop.eup %13694 }
0x4551   :  { %13704 = vrsqrt.f32 %v9047_v21  ;;  %v9727_v40 = vsel %vm3260_vm6, %v13695_v62, 0.0 }
0x4552   :  { %9728 = vadd.xlane.f32.xlu1 %v9727_v40 }
0x4554   :  { %v13697_v58 = vpop.eup %13696 }
0x4555   :  { %v9724_v18 = vsel %vm3260_vm6, %v13697_v58, 0.0 }
0x4556   :  { %9725 = vadd.xlane.f32.xlu0 %v9724_v18 }
0x4558   :  { %v13699_v15 = vpop.eup %13698 }
0x4559   :  { %v9925_v29 = vsel %vm3260_vm6, %v13699_v15, 0.0 }
0x455a   :  { %v13701_v55 = vpop.eup %13700  ;;  %9926 = vadd.xlane.f32.xlu1 %v9925_v29 }
0x455b   :  { %v9922_v36 = vsel %vm3260_vm6, %v13701_v55, 0.0 }
0x455c   :  { %v13703_v63 = vpop.eup %13702  ;;  %9923 = vadd.xlane.f32.xlu0 %v9922_v36 }
0x455d   :  { %v9052_v57 = vmul.f32 %v13703_v63, %v9036_v54 }
0x455e   :  { %v13705_v53 = vpop.eup %13704 }
0x455f   :  { %v9051_v28 = vmul.f32 %v13705_v53, %v9035_v46 }
0x4561   :  { %v9053_v45 = vpack.c.bf16 %v9052_v57, %v9051_v28 }
0x4563   :  { %12921 = vmatmul.mubr.msk.bf16.vlgmr.msra.gmra.mxu0 %vm757_vm9, %v9053_v45 }
0x4564   :  { %12932 = vmatpush3.msra.mxu0 %v15914_v37 }
0x4565   :  { %12933 = vmatprep.subr.mxu0 %v15912_v10 }
0x4566   :  { %12934 = vmatpush3.msra.mxu0 %v15912_v10 }
0x456b   :  { %9934 = vrot.lane.b32.xlu1 %v15912_v10, %s14257_s0 }
0x456f   :  { %10058 = vrot.lane.b32.xlu1 %v16070_v42, %s14276_s11 }
0x4572   :  { %9936 = vrot.lane.b32.xlu0 %v15914_v37, %s14257_s0 }
0x4573   :  { %10056 = vrot.lane.b32.xlu1 %v16080_v20, %s14276_s11 }
0x4576   :  { %10052 = vrot.lane.b32.xlu0 %v16088_v59, %s14276_s11 }
0x4577   :  { %10054 = vrot.lane.b32.xlu1 %v16086_v61, %s14276_s11 }
0x45db   :  { %v9729_v54 = vpop.xlane.xlu1 %9728 }
0x45dc   :  { %13706 = vrcp.f32 %v9729_v54 }
0x45df   :  { %v9726_v46 = vpop.xlane.xlu0 %9725 }
0x45e0   :  { %13708 = vrcp.f32 %v9726_v46 }
0x45e3   :  { %v9927_v33 = vpop.xlane.xlu1 %9926 }
0x45e4   :  { %13710 = vrcp.f32 %v9927_v33 }
0x45e5   :  { %v9924_v13 = vpop.xlane.xlu0 %9923 }
0x45e6   :  { %13712 = vrcp.f32 %v9924_v13 }
0x45e7   :  { %v9935_v7 = vpop.permute.xlu1 %9934 }
0x45e9   :  { %v9937_v34 = vpop.permute.xlu0 %9936  ;;  %v13707_v1 = vpop.eup %13706 }
0x45ea   :  { %12945 = vmatprep.subr.mxu0 %v9937_v34  ;;  %v9733_v35 = vmul.f32 %v13707_v1, %v13695_v62 }
0x45eb   :  { %v10059_v12 = vpop.permute.xlu1 %10058 }
0x45ed   :  { %v13709_v5 = vpop.eup %13708  ;;  %v10053_v25 = vpop.permute.xlu0 %10052 }
0x45ee   :  { %v9732_v6 = vmul.f32 %v13709_v5, %v13697_v58 }
0x45ef   :  { %v10057_v32 = vpop.permute.xlu1 %10056 }
0x45f0   :  { %12935 = vmatprep.mubr.msk.f32.mxu0 %vm3260_vm6, %v9732_v6 }
0x45f1   :  { %12936 = vmatmul.mubr.msk.f32.vlgmr.msra.gmra.mxu0 %vm3260_vm6, %v9733_v35  ;;  %v13711_v22 = vpop.eup %13710 }
0x45f2   :  { %12946 = vmatpush3.msra.mxu0 %v9937_v34  ;;  %v9931_v4 = vmul.f32 %v13711_v22, %v13699_v15 }
0x45f3   :  { %v13713_v17 = vpop.eup %13712  ;;  %12947 = vmatprep.subr.mxu0 %v9935_v7  ;;  %v10055_v14 = vpop.permute.xlu1 %10054 }
0x45f4   :  { %12948 = vmatpush3.msra.mxu0 %v9935_v7  ;;  %v9930_v16 = vmul.f32 %v13713_v17, %v13701_v55 }
0x45f5   :  { %12952 = vmatprep.subr.msk.mxu0 %vm757_vm9, %v10059_v12 }
0x45f6   :  { %12949 = vmatprep.mubr.msk.f32.mxu0 %vm3260_vm6, %v9930_v16 }
0x45f7   :  { %12950 = vmatmul.mubr.msk.f32.vlgmr.msra.gmra.mxu0 %vm3260_vm6, %v9931_v4 }
0x45f8   :  { %12953 = vmatpush3.xpose.msk.msra.mxu0 %vm757_vm9, %v10059_v12  ;;  %12956 = vmatprep.mubr.msk.f32.mxu0 %vm757_vm9, %v10053_v25 }
0x45f9   :  { %12954 = vmatprep.subr.msk.mxu0 %vm757_vm9, %v10057_v32 }
0x45fc   :  { %12955 = vmatpush3.xpose.msk.msra.mxu0 %vm757_vm9, %v10057_v32 }
0x45ff   :  { %12957 = vmatmul.mubr.msk.f32.vlgmr.msra.gmra.mxu0 %vm757_vm9, %v10055_v14 }
0x4623   :  { %v16166_v27 = vpop.f32.mrf.mxu0 }
0x4625   :  { %v12922_v26 = vpop.f32.mrf.mxu0 }
0x4627   :  { %v16168_v11 = vpop.f32.mrf.mxu0 }
0x4629   :  { %v12923_v52 = vpop.f32.mrf.mxu0 }
0x46b1   :  { %v12937_v0 = vpop.f32.mrf.mxu0 }
0x46b3   :  { %v9806_v48 = vpop.f32.mrf.mxu0 }
0x46b7   :  { %v12951_v21 = vpop.f32.mrf.mxu0 }
0x46b8   :  { %v10022_v62 = vmul.f32 %v12951_v21, %v15974_v41 }
0x46b9   :  { %v10012_v40 = vpop.f32.mrf.mxu0 }
0x46ba   :  { %v16171_v58 = vsub.f32 %v12937_v0, %v10022_v62  ;;  %v10021_v18 = vmul.f32 %v15974_v41, %v10012_v40 }
0x46bc   :  { %v16174_v15 = vsub.f32 %v9806_v48, %v10021_v18 }
0x46bf   :  { %v12958_v29 = vpop.f32.mrf.mxu0 }
0x46c0   :  { %v10144_v55 = vmul.f32 0.17677669, %v12958_v29 }
0x46c1   :  { %v10134_v36 = vpop.f32.mrf.mxu0 }
0x46c2   :  { %v10146_v63 = vsel %vm14996_vm5, %v10144_v55, -1e+30  ;;  %v10143_v53 = vmul.f32 0.17677669, %v10134_v36 }
0x46c3   :  { %v10150_v57 = vsel %vm3260_vm6, %v10146_v63, -inf }
0x46c4   :  { %v10145_v28 = vsel %vm15005_vm7, %v10143_v53, -1e+30  ;;  %10151 = vmax.xlane.f32.xlu1 %v10150_v57 }
0x46c5   :  { %v10147_v45 = vsel %vm3260_vm6, %v10145_v28, -inf }
0x46c6   :  { %10148 = vmax.xlane.f32.xlu0 %v10147_v45 }
0x46d5   :  { %10169 = vrot.lane.b32.xlu1 %v15912_v10, %s14276_s11 }
0x46d9   :  { %10262 = vrot.lane.b32.xlu1 %v16070_v42, %s14277_s19 }
0x46dd   :  { %10260 = vrot.lane.b32.xlu1 %v16080_v20, %s14277_s19 }
0x46e1   :  { %10258 = vrot.lane.b32.xlu1 %v16086_v61, %s14277_s19 }
0x474d   :  { %v10152_v54 = vpop.xlane.xlu1 %10151 }
0x474e   :  { %v10154_v46 = vsub.f32 %v10146_v63, %v10152_v54 }
0x474f   :  { %v10149_v33 = vpop.xlane.xlu0 %10148 }
0x4750   :  { %v10157_v13 = vmul.f32 1.442695, %v10154_v46  ;;  %v10153_v34 = vsub.f32 %v10145_v28, %v10149_v33 }
0x4751   :  { %v10170_v35 = vpop.permute.xlu1 %10169 }
0x4752   :  { %13714 = vpow2.f32 %v10157_v13  ;;  %v10155_v1 = vmul.f32 1.442695, %v10153_v34 }
0x4754   :  { %13716 = vpow2.f32 %v10155_v1 }
0x4755   :  { %v10263_v12 = vpop.permute.xlu1 %10262 }
0x4759   :  { %v10261_v32 = vpop.permute.xlu1 %10260 }
0x475d   :  { %v10259_v14 = vpop.permute.xlu1 %10258 }
0x475f   :  { %v13715_v7 = vpop.eup %13714 }
0x4760   :  { %v10162_v5 = vsel %vm3260_vm6, %v13715_v7, 0.0 }
0x4761   :  { %v13717_v6 = vpop.eup %13716  ;;  %10163 = vadd.xlane.f32.xlu0 %v10162_v5 }
0x4762   :  { %v10159_v42 = vsel %vm3260_vm6, %v13717_v6, 0.0 }
0x4765   :  { %10160 = vadd.xlane.f32.xlu0 %v10159_v42 }
0x477b   :  { %10171 = vrot.lane.b32.xlu0 %v15914_v37, %s14276_s11 }
0x477f   :  { %10256 = vrot.lane.b32.xlu0 %v16088_v59, %s14277_s19 }
0x47ea   :  { %v10164_v20 = vpop.xlane.xlu0 %10163 }
0x47eb   :  { %13718 = vrcp.f32 %v10164_v20 }
0x47ee   :  { %v10161_v61 = vpop.xlane.xlu0 %10160 }
0x47ef   :  { %13720 = vrcp.f32 %v10161_v61 }
0x47f2   :  { %v10172_v22 = vpop.permute.xlu0 %10171 }
0x47f3   :  { %12959 = vmatprep.subr.mxu1 %v10172_v22 }
0x47f4   :  { %12960 = vmatpush3.msra.mxu1 %v10172_v22 }
0x47f5   :  { %12961 = vmatprep.subr.mxu1 %v10170_v35 }
0x47f6   :  { %12962 = vmatpush3.msra.mxu1 %v10170_v35  ;;  %v10257_v59 = vpop.permute.xlu0 %10256 }
0x47f7   :  { %12966 = vmatprep.subr.msk.mxu1 %vm757_vm9, %v10263_v12 }
0x47f8   :  { %v13719_v17 = vpop.eup %13718 }
0x47f9   :  { %v10168_v25 = vmul.f32 %v13719_v17, %v13715_v7 }
0x47fc   :  { %v13721_v16 = vpop.eup %13720 }
0x47fd   :  { %v10167_v4 = vmul.f32 %v13721_v16, %v13717_v6 }
0x47ff   :  { %12963 = vmatprep.mubr.msk.f32.mxu1 %vm3260_vm6, %v10167_v4 }
0x4800   :  { %12964 = vmatmul.mubr.msk.f32.vlgmr.msra.gmra.mxu1 %vm3260_vm6, %v10168_v25 }
0x4801   :  { %12967 = vmatpush3.xpose.msk.msra.mxu1 %vm757_vm9, %v10263_v12  ;;  %12970 = vmatprep.mubr.msk.f32.mxu1 %vm757_vm9, %v10257_v59 }
0x4802   :  { %12968 = vmatprep.subr.msk.mxu1 %vm757_vm9, %v10261_v32 }
0x4805   :  { %12969 = vmatpush3.xpose.msk.msra.mxu1 %vm757_vm9, %v10261_v32 }
0x4806   :  { %12988 = vmatprep.subr.bf16.mxu1 %v14273_v19 }
0x4808   :  { %12971 = vmatmul.mubr.msk.f32.vlgmr.msra.gmra.mxu1 %vm757_vm9, %v10259_v14 }
0x4809   :  { %12989 = vmatpush3.bf16.msra.mxu1 %v16006_v23  ;;  %12992 = vmatprep.mubr.msk.bf16.mxu1 %vm14275_vm0, %v14273_v19 }
0x480a   :  { %12990 = vmatprep.subr.bf16.mxu1 %v14273_v19 }
0x480d   :  { %12991 = vmatpush3.bf16.msra.mxu1 %v16011_v56 }
0x48c0   :  { %v16210_v26 = vpop.f32.mrf.mxu1 }
0x48c2   :  { %v16212_v52 = vpop.f32.mrf.mxu1 }
0x48c8   :  { %v12972_v0 = vpop.f32.mrf.mxu1 }
0x48c9   :  { %v10348_v48 = vmul.f32 0.17677669, %v12972_v0 }
0x48ca   :  { %v10338_v21 = vpop.f32.mrf.mxu1 }
0x48cb   :  { %v10350_v62 = vsel %vm14996_vm5, %v10348_v48, -1e+30  ;;  %v10347_v40 = vmul.f32 0.17677669, %v10338_v21 }
0x48cc   :  { %v10354_v23 = vsel %vm3260_vm6, %v10350_v62, -inf }
0x48cd   :  { %v10349_v18 = vsel %vm15005_vm7, %v10347_v40, -1e+30  ;;  %10355 = vmax.xlane.f32.xlu1 %v10354_v23 }
0x48ce   :  { %v10351_v29 = vsel %vm3260_vm6, %v10349_v18, -inf }
0x48cf   :  { %10352 = vmax.xlane.f32.xlu0 %v10351_v29 }
0x48de   :  { %10373 = vrot.lane.b32.xlu1 %v15912_v10, %s14277_s19 }
0x4956   :  { %v10356_v56 = vpop.xlane.xlu1 %10355 }
0x4957   :  { %v10358_v55 = vsub.f32 %v10350_v62, %v10356_v56  ;;  %v16254_v62 = vld [vmem:[#allocation22 + $0x1] ss:$0 sm:$0xff] }
0x4958   :  { %v10353_v36 = vpop.xlane.xlu0 %10352 }
0x4959   :  { %v10361_v63 = vmul.f32 1.442695, %v10358_v55  ;;  %v10357_v53 = vsub.f32 %v10349_v18, %v10353_v36 }
0x495a   :  { %v10374_v33 = vpop.permute.xlu1 %10373 }
0x495b   :  { %13722 = vpow2.f32 %v10361_v63  ;;  %v10359_v47 = vmul.f32 1.442695, %v10357_v53 }
0x495d   :  { %13724 = vpow2.f32 %v10359_v47 }
0x4968   :  { %v13723_v57 = vpop.eup %13722 }
0x4969   :  { %v10366_v28 = vsel %vm3260_vm6, %v13723_v57, 0.0 }
0x496a   :  { %v13725_v9 = vpop.eup %13724  ;;  %10367 = vadd.xlane.f32.xlu0 %v10366_v28 }
0x496b   :  { %v10363_v45 = vsel %vm3260_vm6, %v13725_v9, 0.0 }
0x496e   :  { %10364 = vadd.xlane.f32.xlu0 %v10363_v45  ;;  %v13252_v45 = vld [vmem:[#allocation26 + $0x1ec] ss:$16 sps:$4 sm:$0xff]  }
0x496f   :  { %10958 = vmatprep.subr.bf16.mxu1 %v13252_v45 }
0x4984   :  { %10375 = vrot.lane.b32.xlu0 %v15914_v37, %s14277_s19 }
0x49f3   :  { %v10368_v10 = vpop.xlane.xlu0 %10367 }
0x49f4   :  { %13726 = vrcp.f32 %v10368_v10  ;;  %v13258_v10 = vld [vmem:[#allocation26 + $0x1e4] ss:$16 sps:$4 sm:$0xff]  }
0x49f7   :  { %v10365_v54 = vpop.xlane.xlu0 %10364 }
0x49f8   :  { %13728 = vrcp.f32 %v10365_v54 }
0x49fb   :  { %v10376_v46 = vpop.permute.xlu0 %10375 }
0x49fc   :  { %12973 = vmatprep.subr.mxu0 %v10376_v46 }
0x49fd   :  { %12974 = vmatpush3.msra.mxu0 %v10376_v46 }
0x49fe   :  { %12975 = vmatprep.subr.mxu0 %v10374_v33 }
0x49ff   :  { %12976 = vmatpush3.msra.mxu0 %v10374_v33 }
0x4a00   :  { %12980 = vmatprep.subr.bf16.mxu0 %v14273_v19 }
0x4a01   :  { %v13727_v13 = vpop.eup %13726 }
0x4a02   :  { %v10372_v7 = vmul.f32 %v13727_v13, %v13723_v57 }
0x4a05   :  { %v13729_v34 = vpop.eup %13728 }
0x4a06   :  { %v10371_v1 = vmul.f32 %v13729_v34, %v13725_v9 }
0x4a08   :  { %12977 = vmatprep.mubr.msk.f32.mxu0 %vm3260_vm6, %v10371_v1 }
0x4a09   :  { %12978 = vmatmul.mubr.msk.f32.vlgmr.msra.gmra.mxu0 %vm3260_vm6, %v10372_v7 }
0x4a0a   :  { %12981 = vmatpush3.bf16.msra.mxu0 %v16043_v51  ;;  %12984 = vmatprep.mubr.msk.bf16.mxu0 %vm14275_vm0, %v14273_v19 }
0x4a0b   :  { %12982 = vmatprep.subr.bf16.mxu0 %v14273_v19  ;;  %v10025_v19 = vsel %vm757_vm9, %v16174_v15, 0.0 }
0x4a0e   :  { %12983 = vmatpush3.bf16.msra.mxu0 %v16049_v44  ;;  %v10028_v44 = vsel %vm757_vm9, %v16171_v58, 0.0 }
0x4a0f   :  { %10905 = vmatprep.subr.bf16.mxu0 %v13258_v10  ;;  %v13256_v10 = vld [vmem:[#allocation26 + $0x1e0] ss:$16 sps:$4 sm:$0xff]  }
0x4ac9   :  { %v12979_v37 = vpop.f32.mrf.mxu0 }
0x4acb   :  { %v10451_v5 = vpop.f32.mrf.mxu0 }
0x4acc   :  { %10462 = vrot.lane.b32.xlu1 %v10451_v5, %s14277_s19 }
0x4ad0   :  { %10464 = vrot.lane.b32.xlu1 %v12979_v37, %s14277_s19 }
0x4b3e   :  { %v10463_v6 = vpop.permute.xlu1 %10462 }
0x4b3f   :  { %v10468_v42 = vmul.f32 %v15974_v41, %v10463_v6 }
0x4b41   :  { %10472 = vrot.lane.b32.xlu0 %v10468_v42, %s14276_s11  ;;  %v13250_v42 = vld [vmem:[#allocation26 + $0x1e8] ss:$16 sps:$4 sm:$0xff]  }
0x4b42   :  { %v10465_v20 = vpop.permute.xlu1 %10464 }
0x4b43   :  { %v10469_v51 = vmul.f32 %v15974_v41, %v10465_v20 }
0x4b45   :  { %10474 = vrot.lane.b32.xlu1 %v10469_v51, %s14276_s11  ;;  %v13255_v51 = vld [vmem:[#allocation26 + $0x1cc] ss:$16 sps:$4 sm:$0xff]  }
0x4b60   :  { %10026 = vadd.xlane.f32.xlu0 %v10025_v19  ;;  %v13253_v19 = vld [vmem:[#allocation26 + $0x1c8] ss:$16 sps:$4 sm:$0xff]  }
0x4b69   :  { %10029 = vadd.xlane.f32.xlu1 %v10028_v44  ;;  %v13261_v44 = vld [vmem:[#allocation26 + $0x1ac] ss:$16 sps:$4 sm:$0xff]  }
0x4bb3   :  { %v10473_v61 = vpop.permute.xlu0 %10472 }
0x4bb4   :  { %v10478_v35 = vsub.f32 %v16212_v52, %v10473_v61  ;;  %v13259_v61 = vld [vmem:[#allocation26 + $0x1a8] ss:$16 sps:$4 sm:$0xff]  }
0x4bb6   :  { %v10480_v22 = vsel %vm757_vm9, %v10478_v35, 0.0 }
0x4bb7   :  { %10481 = vadd.xlane.f32.xlu0 %v10480_v22  ;;  %v10475_v12 = vpop.permute.xlu1 %10474  ;;  %v13265_v22 = vld [vmem:[#allocation26 + $0x188] ss:$16 sps:$4 sm:$0xff]  }
0x4bb8   :  { %v10479_v17 = vsub.f32 %v16210_v26, %v10475_v12  ;;  %v9615_v26 = vadd.f32 %v16166_v27, %v16117_v60  ;;  %v13273_v12 = vld [vmem:[#allocation26 + $0x16c] ss:$16 sps:$4 sm:$0xff]  }
0x4bba   :  { %v10483_v41 = vsel %vm757_vm9, %v10479_v17, 0.0  ;;  %v10603_v40 = vadd.f32 %v16254_v62, %v9615_v26 }
0x4bbb   :  { %10484 = vadd.xlane.f32.xlu0 %v10483_v41  ;;  %v13279_v41 = vld [vmem:[#allocation26 + $0x14c] ss:$16 sps:$4 sm:$0xff]  }
0x4bbc   :  { %v16260_v23 = vadd.f32 %v10603_v40, %v15784_v8 }
0x4bbe   :  { %v16267_v55 = vadd.f32 1e-06, %v16260_v23 }
0x4bc0   :  { %v10617_v8 = vadd.f32 1e-06, %v16267_v55 }
0x4bc2   :  { %v10621_v47 = vmul.f32 %v10617_v8, %v10617_v8 }
0x4be9   :  { %v10027_v16 = vpop.xlane.xlu0 %10026 }
0x4bea   :  { %v10031_v4 = vmul.f32 0.03125, %v10027_v16  ;;  %v13277_v16 = vld [vmem:[#allocation26 + $0x148] ss:$16 sps:$4 sm:$0xff]  }
0x4bec   :  { %v10033_v25 = vsub.f32 %v16174_v15, %v10031_v4  ;;  %v9618_v15 = vadd.f32 %v16168_v11, %v16119_v49  ;;  %v13285_v4 = vld [vmem:[#allocation26 + $0x12c] ss:$16 sps:$4 sm:$0xff]  }
0x4bee   :  { %v10035_v59 = vmul.f32 %v10033_v25, %v10033_v25  ;;  %v10604_v18 = vadd.f32 %v16254_v62, %v9618_v15 }
0x4bf0   :  { %v10037_v32 = vsel %vm757_vm9, %v10035_v59, 0.0  ;;  %v16264_v56 = vadd.f32 %v10604_v18, %v15789_v43  ;;  %v13291_v59 = vld [vmem:[#allocation26 + $0x10c] ss:$16 sps:$4 sm:$0xff]  }
0x4bf1   :  { %10038 = vadd.xlane.f32.xlu0 %v10037_v32  ;;  %v13289_v32 = vld [vmem:[#allocation26 + $0x108] ss:$16 sps:$4 sm:$0xff]  }
0x4bf2   :  { %v10030_v14 = vpop.xlane.xlu1 %10029  ;;  %v16275_v11 = vadd.f32 1e-06, %v16264_v56 }
0x4bf3   :  { %v10032_v0 = vmul.f32 0.03125, %v10030_v14 }
0x4bf4   :  { %v10618_v57 = vadd.f32 1e-06, %v16275_v11 }
0x4bf5   :  { %v10034_v52 = vsub.f32 %v16171_v58, %v10032_v0 }
0x4bf6   :  { %v10622_v9 = vmul.f32 %v10618_v57, %v10618_v57 }
0x4bf7   :  { %v10036_v48 = vmul.f32 %v10034_v52, %v10034_v52 }
0x4bf9   :  { %v10040_v21 = vsel %vm757_vm9, %v10036_v48, 0.0 }
0x4bfa   :  { %10041 = vadd.xlane.f32.xlu1 %v10040_v21 }
0x4c40   :  { %v10482_v58 = vpop.xlane.xlu0 %10481 }
0x4c41   :  { %v10486_v29 = vmul.f32 0.03125, %v10482_v58 }
0x4c43   :  { %v16269_v60 = vsub.f32 %v10478_v35, %v10486_v29  ;;  %v13267_v35 = vld [vmem:[#allocation26 + $0x18c] ss:$16 sps:$4 sm:$0xff]  }
0x4c44   :  { %v10485_v27 = vpop.xlane.xlu0 %10484 }
0x4c45   :  { %v10487_v36 = vmul.f32 0.03125, %v10485_v27  ;;  %v10490_v49 = vmul.f32 %v16269_v60, %v16269_v60 }
0x4c47   :  { %v16277_v63 = vsub.f32 %v10479_v17, %v10487_v36  ;;  %v10492_v43 = vsel %vm757_vm9, %v10490_v49, 0.0  ;;  %v13271_v17 = vld [vmem:[#allocation26 + $0x168] ss:$16 sps:$4 sm:$0xff]  }
0x4c48   :  { %10493 = vadd.xlane.f32.xlu0 %v10492_v43 }
0x4c49   :  { %v10491_v53 = vmul.f32 %v16277_v63, %v16277_v63 }
0x4c4b   :  { %v10495_v28 = vsel %vm757_vm9, %v10491_v53, 0.0 }
0x4c4c   :  { %10625 = vadd.xlane.f32.xlu0 %v10621_v47  ;;  %10496 = vadd.xlane.f32.xlu1 %v10495_v28 }
0x4c50   :  { %10627 = vadd.xlane.f32.xlu1 %v10622_v9 }
0x4c7a   :  { %v10039_v54 = vpop.xlane.xlu0 %10038 }
0x4c7b   :  { %v10043_v46 = vmul.f32 0.03125, %v10039_v54 }
0x4c7d   :  { %v10045_v33 = vadd.f32 1e-05, %v10043_v46 }
0x4c7f   :  { %13730 = vrsqrt.f32 %v10045_v33 }
0x4c83   :  { %v10042_v13 = vpop.xlane.xlu1 %10041 }
0x4c84   :  { %v10044_v34 = vmul.f32 0.03125, %v10042_v13  ;;  %v13264_v13 = vld [vmem:[#allocation26 + $0x1c4] ss:$16 sps:$4 sm:$0xff]  }
0x4c86   :  { %v10046_v1 = vadd.f32 1e-05, %v10044_v34 }
0x4c88   :  { %13732 = vrsqrt.f32 %v10046_v1 }
0x4c8c   :  { %v13731_v7 = vpop.eup %13730 }
0x4c8d   :  { %v10049_v5 = vmul.f32 %v13731_v7, %v10033_v25  ;;  %v13283_v25 = vld [vmem:[#allocation26 + $0x128] ss:$16 sps:$4 sm:$0xff]   ;;  %v13262_v7 = vld [vmem:[#allocation26 + $0x1c0] ss:$16 sps:$4 sm:$0xff]  }
0x4c95   :  { %v13733_v37 = vpop.eup %13732 }
0x4c96   :  { %v10050_v6 = vmul.f32 %v13733_v37, %v10034_v52  ;;  %v13276_v37 = vld [vmem:[#allocation26 + $0x184] ss:$16 sps:$4 sm:$0xff]  }
0x4c98   :  { %v10051_v20 = vpack.c.bf16 %v10050_v6, %v10049_v5  ;;  %v13274_v5 = vld [vmem:[#allocation26 + $0x180] ss:$16 sps:$4 sm:$0xff]   ;;  %v13282_v6 = vld [vmem:[#allocation26 + $0x164] ss:$16 sps:$4 sm:$0xff]  }
0x4c9a   :  { %12993 = vmatmul.mubr.msk.bf16.vlgmr.msra.gmra.mxu1 %vm757_vm9, %v10051_v20  ;;  %v13280_v20 = vld [vmem:[#allocation26 + $0x160] ss:$16 sps:$4 sm:$0xff]  }
0x4c9b   :  { %10959 = vmatpush1.bf16.msra.mxu1 %v13250_v42  ;;  %10990 = vmatprep.mubr.bf16.mxu1 %v14274_v38 }
0x4c9c   :  { %10960 = vmatprep.subr.bf16.mxu1 %v13255_v51  ;;  %v13288_v51 = vld [vmem:[#allocation26 + $0x144] ss:$16 sps:$4 sm:$0xff]  }
0x4c9f   :  { %10961 = vmatpush1.bf16.msra.mxu1 %v13253_v19 }
0x4ca0   :  { %10962 = vmatprep.subr.bf16.mxu1 %v13261_v44 }
0x4ca3   :  { %10963 = vmatpush1.bf16.msra.mxu1 %v13259_v61  ;;  %v16291_v61 = vld [vmem:[#allocation25 + $0x1] ss:$0 sm:$0xff] }
0x4ca4   :  { %10964 = vmatprep.subr.bf16.mxu1 %v13267_v35  ;;  %v13286_v35 = vld [vmem:[#allocation26 + $0x140] ss:$16 sps:$4 sm:$0xff]  }
0x4ca7   :  { %10965 = vmatpush1.bf16.msra.mxu1 %v13265_v22 }
0x4ca8   :  { %10966 = vmatprep.subr.bf16.mxu1 %v13273_v12  ;;  %v13294_v12 = vld [vmem:[#allocation26 + $0x124] ss:$16 sps:$4 sm:$0xff]  }
0x4cab   :  { %10967 = vmatpush1.bf16.msra.mxu1 %v13271_v17 }
0x4cac   :  { %10968 = vmatprep.subr.bf16.mxu1 %v13279_v41 }
0x4caf   :  { %10969 = vmatpush1.bf16.msra.mxu1 %v13277_v16  ;;  %v13292_v16 = vld [vmem:[#allocation26 + $0x120] ss:$16 sps:$4 sm:$0xff]  }
0x4cb0   :  { %10970 = vmatprep.subr.bf16.mxu1 %v13285_v4 }
0x4cb3   :  { %10971 = vmatpush1.bf16.msra.mxu1 %v13283_v25  ;;  %v13297_v25 = vld [vmem:[#allocation26 + $0x104] ss:$16 sps:$4 sm:$0xff]  }
0x4cb4   :  { %10972 = vmatprep.subr.bf16.mxu1 %v13291_v59 }
0x4cb7   :  { %10973 = vmatpush1.bf16.msra.mxu1 %v13289_v32 }
0x4cd1   :  { %v10494_v14 = vpop.xlane.xlu0 %10493 }
0x4cd2   :  { %v10498_v0 = vmul.f32 0.03125, %v10494_v14 }
0x4cd4   :  { %v10500_v52 = vadd.f32 1e-05, %v10498_v0 }
0x4cd5   :  { %v10626_v48 = vpop.xlane.xlu0 %10625  ;;  %v10497_v21 = vpop.xlane.xlu1 %10496 }
0x4cd6   :  { %13734 = vrsqrt.f32 %v10626_v48  ;;  %v10499_v26 = vmul.f32 0.03125, %v10497_v21  ;;  %vm10635_vm0 = vcmp.eq.f32.partialorder %v10626_v48, inf  ;;  %v10638_v27 = vand.u32 2147483648, %v10626_v48 }
0x4cd7   :  { %13736 = vrsqrt.f32 %v10500_v52  ;;  %vm10637_vm15 = vcmp.eq.f32.partialorder %v10626_v48, 0.0 }
0x4cd8   :  { %v10501_v40 = vadd.f32 1e-05, %v10499_v26 }
0x4cd9   :  { %v10628_v15 = vpop.xlane.xlu1 %10627 }
0x4cda   :  { %13738 = vrsqrt.f32 %v10628_v15  ;;  %vm10642_vm5 = vcmp.eq.f32.partialorder %v10628_v15, inf  ;;  %v10645_v9 = vand.u32 2147483648, %v10628_v15  ;;  %vm10644_vm6 = vcmp.eq.f32.partialorder %v10628_v15, 0.0 }
0x4cdb   :  { %13740 = vrsqrt.f32 %v10501_v40 }
0x4ce3   :  { %v13735_v18 = vpop.eup %13734 }
0x4ce4   :  { %v10634_v58 = vmul.f32 %v13735_v18, %v10626_v48  ;;  %v13737_v29 = vpop.eup %13736 }
0x4ce5   :  { %v10504_v47 = vmul.f32 %v13737_v29, %v16269_v60  ;;  %v13270_v60 = vld [vmem:[#allocation26 + $0x1a4] ss:$16 sps:$4 sm:$0xff]  }
0x4ce6   :  { %v10636_v49 = vsel %vm10635_vm0, %v10626_v48, %v10634_v58 }
0x4ce7   :  { %v13739_v36 = vpop.eup %13738  ;;  %v10639_v43 = vsel %vm10637_vm15, %v10638_v27, %v10636_v49 }
0x4ce8   :  { %v13741_v8 = vpop.eup %13740  ;;  %v10641_v53 = vmul.f32 %v13739_v36, %v10628_v15  ;;  %v10661_v57 = vmul.f32 11.313708, %v10639_v43 }
0x4ce9   :  { %v10505_v28 = vmul.f32 %v13741_v8, %v16277_v63  ;;  %v13268_v63 = vld [vmem:[#allocation26 + $0x1a0] ss:$16 sps:$4 sm:$0xff]  }
0x4cea   :  { %v10643_v45 = vsel %vm10642_vm5, %v10628_v15, %v10641_v53  ;;  %v10665_v54 = vadd.f32 1e-06, %v10661_v57  ;;  %v13298_v53 = vld [vmem:[#allocation28 + $0xf8] sm:$0xff]   ;;  %v13301_v57 = vld [vmem:[#allocation28 + $0xb0] sm:$0xff]  }
0x4ceb   :  { %v10646_v46 = vsel %vm10644_vm6, %v10645_v9, %v10643_v45  ;;  %v10506_v33 = vpack.c.bf16 %v10505_v28, %v10504_v47  ;;  %v13299_v47 = vld [vmem:[#allocation28 + $0xb8] sm:$0xff]   ;;  %v13302_v28 = vld [vmem:[#allocation28 + $0xe8] sm:$0xff]   ;;  %v13304_v9 = vld [vmem:[#allocation28 + $0xe0] sm:$0xff]  }
0x4cec   :  { %v10662_v34 = vmul.f32 11.313708, %v10646_v46  ;;  %13742 = vrcp.f32 %v10665_v54  ;;  %v13305_v45 = vld [vmem:[#allocation28 + $0xa0] sm:$0xff]   ;;  %v13307_v54 = vld [vmem:[#allocation28 + $0x98] sm:$0xff]   ;;  %v13308_v46 = vld [vmem:[#allocation28 + $0xd0] sm:$0xff]  }
0x4ced   :  { %12985 = vmatmul.mubr.msk.bf16.vlgmr.msra.gmra.mxu0 %vm757_vm9, %v10506_v33  ;;  %v13309_v33 = vld [vmem:[#allocation28 + $0x90] sm:$0xff]  }
0x4cee   :  { %v10666_v1 = vadd.f32 1e-06, %v10662_v34  ;;  %10906 = vmatpush1.bf16.msra.mxu0 %v13256_v10  ;;  %10937 = vmatprep.mubr.bf16.mxu0 %v14274_v38  ;;  %v13306_v10 = vld [vmem:[#allocation28 + $0xd8] sm:$0xff]   ;;  %v13311_v34 = vld [vmem:[#allocation28 + $0x88] sm:$0xff]  }
0x4cef   :  { %10907 = vmatprep.subr.bf16.mxu0 %v13264_v13  ;;  %v13310_v13 = vld [vmem:[#allocation28 + $0xc8] sm:$0xff]  }
0x4cf0   :  { %13744 = vrcp.f32 %v10666_v1  ;;  %v13312_v1 = vld [vmem:[#allocation28 + $0xc0] sm:$0xff]  }
0x4cf2   :  { %10908 = vmatpush1.bf16.msra.mxu0 %v13262_v7  ;;  %v13313_v7 = vld [vmem:[#allocation28 + $0x80] sm:$0xff]  }
0x4cf3   :  { %10909 = vmatprep.subr.bf16.mxu0 %v13270_v60  ;;  %v13314_v60 = vld [vmem:[#allocation31 + $0x70] ss:$8 sps:$4 sm:$0xff]  }
0x4cf6   :  { %10910 = vmatpush1.bf16.msra.mxu0 %v13268_v63  ;;  %v13316_v63 = vld [vmem:[#allocation31 + $0x74] ss:$8 sps:$4 sm:$0xff]  }
0x4cf7   :  { %10911 = vmatprep.subr.bf16.mxu0 %v13276_v37  ;;  %v13319_v37 = vld [vmem:[#allocation31 + $0x64] ss:$8 sps:$4 sm:$0xff]   ;;  %11379 = vmatprep.subr.bf16.mxu1 %v13316_v63 }
0x4cf9   :  { %v13743_v42 = vpop.eup %13742 }
0x4cfa   :  { %10912 = vmatpush1.bf16.msra.mxu0 %v13274_v5  ;;  %v10673_v19 = vmul.f32 %v13743_v42, %v16267_v55  ;;  %v13295_v55 = vld [vmem:[#allocation26 + $0x100] ss:$16 sps:$4 sm:$0xff]  }
0x4cfb   :  { %10913 = vmatprep.subr.bf16.mxu0 %v13282_v6  ;;  %v13317_v5 = vld [vmem:[#allocation31 + $0x60] ss:$8 sps:$4 sm:$0xff]   ;;  %v13322_v6 = vld [vmem:[#allocation31 + $0x54] ss:$8 sps:$4 sm:$0xff]   ;;  %v13320_v42 = vld [vmem:[#allocation31 + $0x50] ss:$8 sps:$4 sm:$0xff]  }
0x4cfc   :  { %v10683_v17 = vmul.f32 %v16291_v61, %v10673_v19 }
0x4cfd   :  { %v13745_v44 = vpop.eup %13744 }
0x4cfe   :  { %10914 = vmatpush1.bf16.msra.mxu0 %v13280_v20  ;;  %v10674_v22 = vmul.f32 %v13745_v44, %v16275_v11  ;;  %v16317_v44 = vld [vmem:[%s16401_s17 + $0x4] sm:$0xf]  ;;  %s14279_s17 = smov [#allocation34]  }
0x4cff   :  { %10915 = vmatprep.subr.bf16.mxu0 %v13288_v51  ;;  %v16340_v63 = vrot.slane %v16317_v44, %v5289_v39  ;;  %s11445_s18 = sshll.u32 %s14279_s17, 4  ;;  %s11446_s18 = int_to_ptr.vmem [resolvable:$true] %s11445_s18 }
0x4d00   :  { %v10684_v41 = vmul.f32 %v16291_v61, %v10674_v22  ;;  %v16321_v22 = vrot.slane %v16317_v44, %v14584_v50  ;;  %s14198_s1 = scalar_lea.vmem %s11446_s18, 1024  ;;  %p14203_p3 = scmp.lt.s32.totalorder %s11446_s18, %s11446_s18 }
0x4d01   :  { %p14199_p2 = scmp.ne.s32.totalorder %s11446_s18, %s14198_s1  ;;  %p14204_p4 = scmp.lt.s32.totalorder %s14198_s1, %s14198_s1 }
0x4d02   :  { %10916 = vmatpush1.bf16.msra.mxu0 %v13286_v35  ;;  %v10687_v4 = vpack.c.bf16 %v10684_v41, %v10683_v17 }
0x4d03   :  { %10917 = vmatprep.subr.bf16.mxu0 %v13294_v12  ;;  %p14205_p5 = por %p14204_p4, %p14203_p3 }
0x4d04   :  { %10991 = vmatmul.mubr.bf16.vlgmr.msra.gmra.mxu1 %v10687_v4 }
0x4d05   :  { %11000 = vmatprep.mubr.bf16.mxu1 %v14274_v38  ;;  %11380 = vmatpush1.bf16.msra.mxu1 %v13314_v60  ;;  %p14206_p6 = pnand %p14205_p5, %p14199_p2 }
0x4d06   :  { %10918 = vmatpush1.bf16.msra.mxu0 %v13292_v16  ;;  %11381 = vmatprep.subr.bf16.mxu1 %v13319_v37  ;;  %v16327_v16 = vrot.slane %v16317_v44, %v14565_v31 }
0x4d07   :  { %10919 = vmatprep.subr.bf16.mxu0 %v13297_v25 }
0x4d09   :  { %11382 = vmatpush1.bf16.msra.mxu1 %v13317_v5 }
0x4d0a   :  { %10920 = vmatpush1.bf16.msra.mxu0 %v13295_v55  ;;  %11383 = vmatprep.subr.bf16.mxu1 %v13322_v6 }
0x4d0b   :  { %12296 = vmatprep.subr.bf16.mxu0 %v13298_v53 }
0x4d0d   :  { %10938 = vmatmul.mubr.bf16.vlgmr.msra.gmra.mxu0 %v10687_v4  ;;  %11384 = vmatpush1.bf16.msra.mxu1 %v13320_v42 }
0x4d0e   :  { %10947 = vmatprep.mubr.bf16.mxu0 %v14274_v38  ;;  %12297 = vmatpush3.bf16.msra.mxu0 %v13299_v47 }
0x4d5a   :  { %v10588_v11 = vpop.f32.mrf.mxu1 }
0x4d5c   :  { %v12994_v59 = vpop.f32.mrf.mxu1 }
0x4d5e   :  { %v10591_v32 = vpop.f32.mrf.mxu1 }
0x4d60   :  { %v12995_v14 = vpop.f32.mrf.mxu1 }
0x4dad   :  { %v10544_v0 = vpop.f32.mrf.mxu0 }
0x4dae   :  { %v10589_v52 = vadd.f32 %v10588_v11, %v10544_v0 }
0x4daf   :  { %v12986_v48 = vpop.f32.mrf.mxu0 }
0x4db0   :  { %v10605_v21 = vadd.f32 %v16254_v62, %v10589_v52 }
0x4db1   :  { %v10547_v26 = vpop.f32.mrf.mxu0 }
0x4db2   :  { %v16300_v40 = vadd.f32 %v10605_v21, %v15843_v2  ;;  %v10592_v15 = vadd.f32 %v10591_v32, %v10547_v26 }
0x4db3   :  { %v12987_v18 = vpop.f32.mrf.mxu0 }
0x4db4   :  { %v10606_v58 = vadd.f32 %v16254_v62, %v10592_v15  ;;  %v16304_v29 = vadd.f32 1e-06, %v16300_v40  ;;  %v13300_v62 = vld [vmem:[#allocation28 + $0xf0] sm:$0xff]  }
0x4db5   :  { %12298 = vmatprep.subr.bf16.mxu0 %v13300_v62 }
0x4db6   :  { %v16307_v27 = vadd.f32 %v10606_v58, %v15851_v3  ;;  %v10619_v36 = vadd.f32 1e-06, %v16304_v29  ;;  %12299 = vmatpush3.bf16.msra.mxu0 %v13301_v57  ;;  %v13303_v3 = vld [vmem:[#allocation28 + $0xa8] sm:$0xff]  }
0x4db7   :  { %12300 = vmatprep.subr.bf16.mxu0 %v13302_v28 }
0x4db8   :  { %v10623_v49 = vmul.f32 %v10619_v36, %v10619_v36  ;;  %v16311_v8 = vadd.f32 1e-06, %v16307_v27 }
0x4dba   :  { %10629 = vadd.xlane.f32.xlu0 %v10623_v49  ;;  %v10620_v2 = vadd.f32 1e-06, %v16311_v8  ;;  %12301 = vmatpush3.bf16.msra.mxu0 %v13303_v3 }
0x4dbb   :  { %12302 = vmatprep.subr.bf16.mxu0 %v13304_v9 }
0x4dbc   :  { %v10624_v43 = vmul.f32 %v10620_v2, %v10620_v2 }
0x4dbe   :  { %10631 = vadd.xlane.f32.xlu1 %v10624_v43  ;;  %12303 = vmatpush3.bf16.msra.mxu0 %v13305_v45 }
0x4dbf   :  { %12304 = vmatprep.subr.bf16.mxu0 %v13306_v10 }
0x4dc2   :  { %12305 = vmatpush3.bf16.msra.mxu0 %v13307_v54 }
0x4dc3   :  { %12306 = vmatprep.subr.bf16.mxu0 %v13308_v46 }
0x4dc4   :  { %v10992_v45 = vpop.f32.mrf.mxu1 }
0x4dc6   :  { %12307 = vmatpush3.bf16.msra.mxu0 %v13309_v33  ;;  %v10994_v33 = vpop.f32.mrf.mxu1 }
0x4dc7   :  { %12308 = vmatprep.subr.bf16.mxu0 %v13310_v13 }
0x4dc8   :  { %v10996_v13 = vpop.f32.mrf.mxu1 }
0x4dca   :  { %12309 = vmatpush3.bf16.msra.mxu0 %v13311_v34  ;;  %v10998_v60 = vpop.f32.mrf.mxu1 }
0x4dcb   :  { %12310 = vmatprep.subr.bf16.mxu0 %v13312_v1  ;;  %v10999_v42 = vadd.f32 %v10998_v60, %v16340_v63 }
0x4dcd   :  { %v10939_v20 = vpop.f32.mrf.mxu0 }
0x4dce   :  { %12311 = vmatpush3.bf16.msra.mxu0 %v13313_v7  ;;  %v16333_v11 = vadd.f32 %v10939_v20, %v16327_v16 }
0x4dcf   :  { %v10941_v51 = vpop.f32.mrf.mxu0 }
0x4dd0   :  { %v10942_v17 = vadd.f32 %v10941_v51, %v16321_v22  ;;  %v11889_v14 = vmul.f32 -1.442695, %v16333_v11 }
0x4dd1   :  { %v10943_v19 = vpop.f32.mrf.mxu0 }
0x4dd2   :  { %v11890_v4 = vmul.f32 -1.442695, %v10942_v17  ;;  %v16330_v55 = vadd.f32 %v10943_v19, %v16327_v16 }
0x4dd3   :  { %v10945_v35 = vpop.f32.mrf.mxu0 }
0x4dd4   :  { %v10946_v12 = vadd.f32 %v10945_v35, %v16321_v22  ;;  %v11891_v32 = vmul.f32 -1.442695, %v16330_v55  ;;  %v10995_v35 = vadd.f32 %v10994_v33, %v16340_v63  ;;  %v16361_v33 = vld [vmem:[#allocation29 + $0x1] ss:$0 sm:$0xff] }
0x4dd6   :  { %v11892_v41 = vmul.f32 -1.442695, %v10946_v12 }
0x4e43   :  { %v10630_v25 = vpop.xlane.xlu0 %10629 }
0x4e44   :  { %13746 = vrsqrt.f32 %v10630_v25  ;;  %vm10649_vm9 = vcmp.eq.f32.partialorder %v10630_v25, inf  ;;  %v10652_v21 = vand.u32 2147483648, %v10630_v25  ;;  %vm10651_vm7 = vcmp.eq.f32.partialorder %v10630_v25, 0.0 }
0x4e45   :  { %13748 = vpow2.f32 %v11892_v41 }
0x4e46   :  { %13750 = vpow2.f32 %v11890_v4 }
0x4e47   :  { %v10632_v59 = vpop.xlane.xlu1 %10631 }
0x4e48   :  { %13752 = vrsqrt.f32 %v10632_v59  ;;  %vm10656_vm1 = vcmp.eq.f32.partialorder %v10632_v59, inf  ;;  %v10659_v53 = vand.u32 2147483648, %v10632_v59  ;;  %vm10658_vm2 = vcmp.eq.f32.partialorder %v10632_v59, 0.0 }
0x4e49   :  { %13754 = vpow2.f32 %v11891_v32 }
0x4e4a   :  { %13756 = vpow2.f32 %v11889_v14 }
0x4e51   :  { %v13747_v0 = vpop.eup %13746 }
0x4e52   :  { %v13749_v52 = vpop.eup %13748  ;;  %v10648_v48 = vmul.f32 %v13747_v0, %v10630_v25 }
0x4e53   :  { %v13751_v26 = vpop.eup %13750  ;;  %v11038_v58 = vadd.f32 1.0, %v13749_v52 }
0x4e54   :  { %v10650_v15 = vsel %vm10649_vm9, %v10630_v25, %v10648_v48  ;;  %v11036_v43 = vadd.f32 1.0, %v13751_v26  ;;  %v13326_v48 = vld [vmem:[#allocation31 + $0x30] ss:$8 sps:$4 sm:$0xff]   ;;  %v13334_v26 = vld [vmem:[#allocation31 + $0x14] ss:$8 sps:$4 sm:$0xff]  }
0x4e55   :  { %v13753_v18 = vpop.eup %13752  ;;  %v10653_v36 = vsel %vm10651_vm7, %v10652_v21, %v10650_v15  ;;  %13758 = vrcp.f32 %v11038_v58  ;;  %v13329_v21 = vld [vmem:[#allocation31 + $0x20] ss:$8 sps:$4 sm:$0xff]   ;;  %v13332_v15 = vld [vmem:[#allocation31 + $0x10] ss:$8 sps:$4 sm:$0xff]  }
0x4e56   :  { %v10663_v49 = vmul.f32 11.313708, %v10653_v36  ;;  %v10655_v2 = vmul.f32 %v13753_v18, %v10632_v59  ;;  %v13755_v57 = vpop.eup %13754  ;;  %v13337_v18 = vld [vmem:[#allocation31 + $0x4] ss:$8 sps:$4 sm:$0xff]   ;;  %v13335_v58 = vld [vmem:[#allocation31] ss:$8 sps:$4 sm:$0xff]  }
0x4e57   :  { %v13757_v9 = vpop.eup %13756  ;;  %v11037_v10 = vadd.f32 1.0, %v13755_v57 }
0x4e58   :  { %v10667_v47 = vadd.f32 1e-06, %v10663_v49  ;;  %v10657_v62 = vsel %vm10656_vm1, %v10632_v59, %v10655_v2  ;;  %v11035_v46 = vadd.f32 1.0, %v13757_v9 }
0x4e59   :  { %v10660_v28 = vsel %vm10658_vm2, %v10659_v53, %v10657_v62 }
0x4e5a   :  { %13760 = vrcp.f32 %v10667_v47  ;;  %v10664_v3 = vmul.f32 11.313708, %v10660_v28 }
0x4e5b   :  { %13762 = vrcp.f32 %v11036_v43 }
0x4e5c   :  { %v10668_v54 = vadd.f32 1e-06, %v10664_v3 }
0x4e5e   :  { %13764 = vrcp.f32 %v10668_v54 }
0x4e5f   :  { %13766 = vrcp.f32 %v11037_v10 }
0x4e60   :  { %13768 = vrcp.f32 %v11035_v46 }
0x4e62   :  { %v13759_v34 = vpop.eup %13758 }
0x4e63   :  { %v11062_v37 = vmul.f32 %v13759_v34, %v10946_v12  ;;  %v16350_v12 = vrot.slane %v16317_v44, %v14617_v24  ;;  %v13325_v24 = vld [vmem:[#allocation31 + $0x44] ss:$8 sps:$4 sm:$0xff]   ;;  %v13323_v44 = vld [vmem:[#allocation31 + $0x40] ss:$8 sps:$4 sm:$0xff]  }
0x4e64   :  { %11385 = vmatprep.subr.bf16.mxu1 %v13325_v24 }
0x4e65   :  { %v11070_v41 = vmul.f32 %v11062_v37, %v10999_v42  ;;  %11386 = vmatpush1.bf16.msra.mxu1 %v13323_v44 }
0x4e67   :  { %v13761_v1 = vpop.eup %13760 }
0x4e68   :  { %v13763_v7 = vpop.eup %13762  ;;  %v10675_v5 = vmul.f32 %v13761_v1, %v16304_v29 }
0x4e69   :  { %v11060_v20 = vmul.f32 %v13763_v7, %v10942_v17 }
0x4e6a   :  { %v10685_v4 = vmul.f32 %v16291_v61, %v10675_v5 }
0x4e6b   :  { %v13765_v6 = vpop.eup %13764  ;;  %v11068_v39 = vmul.f32 %v11060_v20, %v10995_v35 }
0x4e6c   :  { %v10676_v51 = vmul.f32 %v13765_v6, %v16311_v8  ;;  %v13767_v19 = vpop.eup %13766  ;;  %v10997_v8 = vadd.f32 %v10996_v13, %v16350_v12 }
0x4e6d   :  { %v13769_v25 = vpop.eup %13768  ;;  %v11061_v29 = vmul.f32 %v13767_v19, %v16330_v55  ;;  %v11076_v17 = vpack.c.bf16 %v11070_v41, %v11068_v39  ;;  %v13328_v55 = vld [vmem:[#allocation31 + $0x34] ss:$8 sps:$4 sm:$0xff]  }
0x4e6e   :  { %v10686_v30 = vmul.f32 %v16291_v61, %v10676_v51  ;;  %v11059_v32 = vmul.f32 %v13769_v25, %v16333_v11  ;;  %v10993_v61 = vadd.f32 %v10992_v45, %v16350_v12  ;;  %11387 = vmatprep.subr.bf16.mxu1 %v13328_v55  ;;  %v13331_v11 = vld [vmem:[#allocation31 + $0x24] ss:$8 sps:$4 sm:$0xff]  }
0x4e6f   :  { %v11069_v14 = vmul.f32 %v11061_v29, %v10997_v8  ;;  %11388 = vmatpush1.bf16.msra.mxu1 %v13326_v48 }
0x4e70   :  { %v10688_v59 = vpack.c.bf16 %v10686_v30, %v10685_v4  ;;  %v11067_v0 = vmul.f32 %v11059_v32, %v10993_v61  ;;  %11389 = vmatprep.subr.bf16.mxu1 %v13331_v11 }
0x4e72   :  { %10948 = vmatmul.mubr.bf16.gmra.mxu0 %v10688_v59  ;;  %11001 = vmatmul.mubr.bf16.gmra.mxu1 %v10688_v59  ;;  %v11075_v52 = vpack.c.bf16 %v11069_v14, %v11067_v0 }
0x4e73   :  { %11248 = vmatprep.mubr.bf16.mxu0 %v11076_v17  ;;  %11411 = vmatprep.mubr.bf16.mxu1 %v14274_v38 }
0x4e74   :  { %11390 = vmatpush1.bf16.msra.mxu1 %v13329_v21 }
0x4e75   :  { %11391 = vmatprep.subr.bf16.mxu1 %v13334_v26  ;;  %v11287_v26 = vld [vmem:[#allocation32] sm:$0x3] }
0x4e78   :  { %11392 = vmatpush1.bf16.msra.mxu1 %v13332_v15  ;;  %v11292_v15 = vrot.slane %v11287_v26, %v14565_v31 }
0x4e79   :  { %11393 = vmatprep.subr.bf16.mxu1 %v13337_v18  ;;  %v11296_v18 = vrot.slane %v11287_v26, %v14584_v50 }
0x4e7a   :  { %11249 = vmatmul.mubr.bf16.vlgmr.msra.gmra.mxu0 %v11075_v52 }
0x4e7c   :  { %11394 = vmatpush1.bf16.msra.mxu1 %v13335_v58 }
0x4f32   :  { %v10949_v36 = vpop.f32.mrf.mxu0  ;;  %v11002_v4 = vpop.f32.mrf.mxu1 }
0x4f33   :  { %v10950_v49 = vadd.f32 %v10949_v36, %v16327_v16  ;;  %v11003_v52 = vadd.f32 %v11002_v4, %v16350_v12 }
0x4f34   :  { %v10951_v2 = vpop.f32.mrf.mxu0  ;;  %v11004_v30 = vpop.f32.mrf.mxu1 }
0x4f35   :  { %v11893_v43 = vmul.f32 -1.442695, %v10950_v49  ;;  %v10952_v53 = vadd.f32 %v10951_v2, %v16321_v22  ;;  %v11005_v14 = vadd.f32 %v11004_v30, %v16340_v63 }
0x4f36   :  { %v10953_v47 = vpop.f32.mrf.mxu0 }
0x4f37   :  { %13770 = vpow2.f32 %v11893_v43  ;;  %v11894_v62 = vmul.f32 -1.442695, %v10952_v53  ;;  %v10954_v57 = vadd.f32 %v10953_v47, %v16327_v16 }
0x4f38   :  { %v10955_v28 = vpop.f32.mrf.mxu0 }
0x4f39   :  { %13772 = vpow2.f32 %v11894_v62  ;;  %v11895_v3 = vmul.f32 -1.442695, %v10954_v57  ;;  %v10956_v9 = vadd.f32 %v10955_v28, %v16321_v22 }
0x4f3a   :  { %v12312_v45 = vpop.f32.mrf.mxu0 }
0x4f3b   :  { %13774 = vpow2.f32 %v11895_v3  ;;  %v11896_v10 = vmul.f32 -1.442695, %v10956_v9 }
0x4f3c   :  { %v12313_v54 = vpop.f32.mrf.mxu0 }
0x4f3d   :  { %13776 = vpow2.f32 %v11896_v10  ;;  %v12314_v46 = vadd.f32 %v12313_v54, %v12312_v45 }
0x4f3e   :  { %v12315_v13 = vpop.f32.mrf.mxu0 }
0x4f3f   :  { %v11251_v1 = vadd.f32 %v12314_v46, %v16361_v33 }
0x4f40   :  { %v12316_v34 = vpop.f32.mrf.mxu0 }
0x4f41   :  { %v12317_v7 = vadd.f32 %v12316_v34, %v12315_v13  ;;  %v11265_v37 = vadd.f32 %v11251_v1, %v16260_v23  ;;  %v11006_v23 = vpop.f32.mrf.mxu1 }
0x4f42   :  { %v11007_v61 = vadd.f32 %v11006_v23, %v16350_v12 }
0x4f43   :  { %v11254_v16 = vadd.f32 %v12317_v7, %v16361_v33  ;;  %v11008_v29 = vpop.f32.mrf.mxu1 }
0x4f44   :  { %v13771_v60 = vpop.eup %13770 }
0x4f45   :  { %v11266_v22 = vadd.f32 %v11254_v16, %v16264_v56  ;;  %v11039_v6 = vadd.f32 1.0, %v13771_v60 }
0x4f46   :  { %v13773_v5 = vpop.eup %13772 }
0x4f47   :  { %v11040_v42 = vadd.f32 1.0, %v13773_v5  ;;  %v11269_v20 = vpack.c.bf16 %v11266_v22, %v11265_v37 }
0x4f48   :  { %v13775_v51 = vpop.eup %13774 }
0x4f49   :  { %13778 = vrcp.f32 %v11040_v42  ;;  %v11041_v19 = vadd.f32 1.0, %v13775_v51  ;;  %11412 = vmatmul.mubr.bf16.vlgmr.msra.gmra.mxu1 %v11269_v20 }
0x4f4a   :  { %v13777_v35 = vpop.eup %13776  ;;  %13780 = vrcp.f32 %v11039_v6  ;;  %11421 = vmatprep.mubr.bf16.mxu1 %v14274_v38  ;;  %v11009_v38 = vadd.f32 %v11008_v29, %v16340_v63 }
0x4f4b   :  { %13782 = vrcp.f32 %v11041_v19  ;;  %v11042_v41 = vadd.f32 1.0, %v13777_v35 }
0x4f4d   :  { %13784 = vrcp.f32 %v11042_v41 }
0x4f56   :  { %v13779_v25 = vpop.eup %13778 }
0x4f57   :  { %v13781_v56 = vpop.eup %13780  ;;  %v11064_v59 = vmul.f32 %v13779_v25, %v10952_v53 }
0x4f58   :  { %v13783_v39 = vpop.eup %13782  ;;  %v11063_v32 = vmul.f32 %v13781_v56, %v10950_v49 }
0x4f59   :  { %v11065_v17 = vmul.f32 %v13783_v39, %v10954_v57  ;;  %v11072_v44 = vmul.f32 %v11064_v59, %v11005_v14 }
0x4f5a   :  { %v13785_v8 = vpop.eup %13784  ;;  %v11071_v48 = vmul.f32 %v11063_v32, %v11003_v52 }
0x4f5b   :  { %v11066_v0 = vmul.f32 %v13785_v8, %v10956_v9  ;;  %v11073_v24 = vmul.f32 %v11065_v17, %v11007_v61 }
0x4f5d   :  { %v11074_v55 = vmul.f32 %v11066_v0, %v11009_v38  ;;  %v11077_v21 = vpack.c.bf16 %v11073_v24, %v11071_v48 }
0x4f5f   :  { %v11078_v11 = vpack.c.bf16 %v11074_v55, %v11072_v44 }
0x4f61   :  { %11256 = vmatprep.mubr.bf16.mxu0 %v11078_v11 }
0x4f62   :  { %11257 = vmatmul.mubr.bf16.gmra.mxu0 %v11077_v21 }
0x5009   :  { %v11413_v58 = vpop.f32.mrf.mxu1 }
0x500a   :  { %v11414_v36 = vadd.f32 %v11413_v58, %v11292_v15 }
0x500b   :  { %v11415_v49 = vpop.f32.mrf.mxu1 }
0x500c   :  { %11432 = vst [vmem:[#allocation34] sm:$0xff] %v11414_v36  ;;  %v11416_v63 = vadd.f32 %v11415_v49, %v11296_v18 }
0x500d   :  { %v11417_v2 = vpop.f32.mrf.mxu1 }
0x500e   :  { %11433 = vst [vmem:[#allocation34 + $0x8] sm:$0xff] %v11416_v63  ;;  %v11418_v12 = vadd.f32 %v11417_v2, %v11292_v15 }
0x500f   :  { %v11419_v43 = vpop.f32.mrf.mxu1 }
0x5010   :  { %11434 = vst [vmem:[#allocation34 + $0x10] sm:$0xff] %v11418_v12  ;;  %v11420_v53 = vadd.f32 %v11419_v43, %v11296_v18 }
0x5012   :  { %11435 = vst [vmem:[#allocation34 + $0x18] sm:$0xff] %v11420_v53 }
0x5022   :  { %v12318_v47 = vpop.f32.mrf.mxu0 }
0x5024   :  { %v12319_v62 = vpop.f32.mrf.mxu0 }
0x5025   :  { %v12320_v57 = vadd.f32 %v12319_v62, %v12318_v47 }
0x5026   :  { %v12321_v28 = vpop.f32.mrf.mxu0 }
0x5027   :  { %v11259_v31 = vadd.f32 %v12320_v57, %v16361_v33 }
0x5028   :  { %v12322_v3 = vpop.f32.mrf.mxu0 }
0x5029   :  { %v12323_v50 = vadd.f32 %v12322_v3, %v12321_v28  ;;  %v11267_v45 = vadd.f32 %v11259_v31, %v16300_v40 }
0x502b   :  { %v11262_v9 = vadd.f32 %v12323_v50, %v16361_v33 }
0x502d   :  { %v11268_v10 = vadd.f32 %v11262_v9, %v16307_v27 }
0x502f   :  { %v11270_v54 = vpack.c.bf16 %v11268_v10, %v11267_v45 }
0x5031   :  { %11422 = vmatmul.mubr.bf16.gmra.mxu1 %v11270_v54 }
0x50f1   :  { %v11423_v46 = vpop.f32.mrf.mxu1 }
0x50f2   :  { %v11424_v13 = vadd.f32 %v11423_v46, %v11292_v15 }
0x50f3   :  { %v11425_v34 = vpop.f32.mrf.mxu1 }
0x50f4   :  { %11436 = vst [vmem:[#allocation34 + $0x20] sm:$0xff] %v11424_v13  ;;  %v11426_v1 = vadd.f32 %v11425_v34, %v11296_v18 }
0x50f5   :  { %v11427_v7 = vpop.f32.mrf.mxu1 }
0x50f6   :  { %11437 = vst [vmem:[#allocation34 + $0x28] sm:$0xff] %v11426_v1  ;;  %v11428_v16 = vadd.f32 %v11427_v7, %v11292_v15 }
0x50f7   :  { %v11429_v60 = vpop.f32.mrf.mxu1 }
0x50f8   :  { %11438 = vst [vmem:[#allocation34 + $0x30] sm:$0xff] %v11428_v16  ;;  %v11430_v37 = vadd.f32 %v11429_v60, %v11296_v18 }
0x50fa   :  { %11439 = vst [vmem:[#allocation34 + $0x38] sm:$0xff] %v11430_v37 }
0x50fb   :  { %14209 = shalt.err (!%p14206_p6)
}
0x50fc   :  { %11451 = dma.vmem_to_hbm [thread:$0]  %s11446_s18, 1024, %s16406_s22, [#allocation4], %s14260_s12, %s14260_s12, %s14246_s25  }
0x50fd   :  { %14240 = dma.done.wait [#allocation4], 1024  }
0x50fe   :  { %14241 = vsyncadd [#allocation4], 4294966272 }
0x50ff   :  { %11455 = vsyncpa [#allocation3], 1 }
0x5100   :  { %11456 = vsyncpa [#allocation6], 1 }
0x5101   :  { %11457 = vsyncpa [#allocation9], 1 }
0x5102   :  { %11458 = vsyncpa [#allocation12], 1 }
0x5103   :  { %11459 = vsyncpa [#allocation15], 1 }
0x5104   :  { %11460 = vsyncpa [#allocation18], 1 }
0x5105   :  { %11461 = vsyncpa [#allocation21], 1 }
0x5106   :  { %11462 = vsyncpa [#allocation24], 1 }
0x5107   :  { %11463 = vsyncpa [#allocation27], 1 }
0x5108   :  { %11464 = vsyncpa [#allocation30], 1 }
0x5109   :  { %11465 = vsyncpa [#allocation33], 1 }
0x510a   :  { %11466 = vsyncpa [#allocation4], 1 }

</bundles_post_ra>
